<compile_context>
chip_gen: v6e
topology: v6e:2x2x1
jax: 0.10.0
libtpu: 0.0.40
codegen_flags: <defaults>
</compile_context>

<pallas_src>
import functools

import numpy as np
import jax
import jax.numpy as jnp
from jax import lax
from jax.experimental import pallas as pl
from jax.experimental.pallas import tpu as pltpu


def _round_up(x, m):
    return (x + m - 1) // m * m


def _vmem_capacity_bytes():
    try:
        return int(pltpu.get_tpu_info().vmem_capacity_bytes)
    except Exception:
        return 64 * 2 ** 20          # conservative fallback (v7x per-TC physical VMEM)


def _estimate_vmem_bytes(tc, Bp, D, Hp, O, cdt):
    """Lane/sublane-padded VMEM footprint of the kernel for a given time chunk."""
    it = int(jnp.dtype(cdt).itemsize)
    lanes = lambda n: _round_up(max(int(n), 1), 128)
    rows = lambda n: _round_up(max(int(n), 1), 8)
    M = tc * Bp
    b = 2 * M * lanes(D) * it                         # streamed x chunk, double-buffered
    b += rows(D) * 3 * Hp * it                        # wih0  (single-buffered scratch)
    b += 3 * Hp * 3 * Hp * it                         # whh0, wih1, whh1
    b += Hp * lanes(O) * it                           # fcw
    b += 2 * M * 3 * Hp * 4                           # gi0 + gi1 (f32)
    b += M * Hp * 4                                   # h1 sequence of the chunk (f32)
    b += 2 * Bp * Hp * 4                              # h1 / h2 carries
    b += 2 * Bp * lanes(O) * 4                        # resident output
    b += 2 * (2 * 8 * 3 * Hp + 2 * 8 * Hp + 8 * lanes(O)) * 4   # small bias blocks
    return int(b)


def _choose_t_chunk(T, Bp, D, Hp, O, cdt, budget, target=64):
    """Largest chunk <= target (and <= T) whose padded footprint fits the VMEM budget."""
    tc = max(1, min(T, target))
    while tc > 1 and 1.2 * _estimate_vmem_bytes(tc, Bp, D, Hp, O, cdt) > budget:
        tc = max(1, tc // 2)
    return tc


# ---------------------------------------------------------------------------
# Kernel
# ---------------------------------------------------------------------------
def gru_kernel(x_ref,                                  # (Tc*Bp, D) time-major chunk
               wih0_hbm, whh0_hbm, wih1_hbm, whh1_hbm, fcw_hbm,   # HBM weight refs
               bi0_ref, bhn0_ref, bi1_ref, bhn1_ref, fcb_ref,     # small bias blocks
               out_ref,                                # (Bp, O)
               wih0_v, whh0_v, wih1_v, whh1_v, fcw_v,  # VMEM weight scratch (resident)
               gi0_ref, gi1_ref, h1seq_ref, h1_ref, h2_ref,       # VMEM scratch
               *, t_chunk, batch_pad, hidden_pad, last_valid, unroll):
    Tc, Bp, Hp = t_chunk, batch_pad, hidden_pad
    c = pl.program_id(0)
    nc = pl.num_programs(0)
    cdt = whh0_v.dtype                                 # MXU operand dtype (f32 or bf16)

    @pl.when(c == 0)
    def _init():
        # One-time weight residency: single-buffered VMEM copies of the big matrices
        # (the auto-pipeline would double-buffer constant-index weight blocks).
        pltpu.sync_copy(wih0_hbm, wih0_v)
        pltpu.sync_copy(whh0_hbm, whh0_v)
        pltpu.sync_copy(wih1_hbm, wih1_v)
        pltpu.sync_copy(whh1_hbm, whh1_v)
        pltpu.sync_copy(fcw_hbm, fcw_v)
        h1_ref[...] = jnp.zeros_like(h1_ref)
        h2_ref[...] = jnp.zeros_like(h2_ref)
        # Deterministic (masked) layer-1 pass on the first grid step.
        gi1_ref[...] = jnp.zeros_like(gi1_ref)

    # Layer-0 input projection for the WHOLE chunk: one dense GEMM with M = Tc*Bp.
    gi0_ref[...] = (jnp.dot(x_ref[...], wih0_v[...],
                            preferred_element_type=jnp.float32) + bi0_ref[...])

    # Hoist bias broadcasts out of the time loop (no CSE of broadcast_in_dim).
    bhn0_b = jnp.broadcast_to(bhn0_ref[...], (Bp, Hp))
    bhn1_b = jnp.broadcast_to(bhn1_ref[...], (Bp, Hp))

    def cell(gi, h_prev, whh_ref, bhn_b):
        # One fused hh-GEMM for all three gates; gate slices are 128-aligned (Hp%128==0).
        gh = jnp.dot(h_prev.astype(cdt), whh_ref[...],
                     preferred_element_type=jnp.float32)
        r = jax.nn.sigmoid(gi[:, :Hp] + gh[:, :Hp])
        z = jax.nn.sigmoid(gi[:, Hp:2 * Hp] + gh[:, Hp:2 * Hp])
        n = jnp.tanh(gi[:, 2 * Hp:] + r * (gh[:, 2 * Hp:] + bhn_b))
        return n + z * (h_prev - n)                    # == (1 - z) * n + z * h_prev

    # Wavefront-skewed recurrences: layer-0 step t of chunk c and layer-1 step t of
    # chunk c-1 are data-independent, so their small hh-GEMMs can overlap on the MXU.
    h2_carry = h2_ref[...]

    def step(t, carry):
        h1, h2 = carry
        off = pl.multiple_of(t * Bp, Bp)
        gi0_t = gi0_ref[pl.ds(off, Bp), :]             # chunk c, layer-0
        h1 = cell(gi0_t, h1, whh0_v, bhn0_b)
        h1seq_ref[pl.ds(off, Bp), :] = h1              # feeds the chunk-level ih1 GEMM
        gi1_t = gi1_ref[pl.ds(off, Bp), :]             # chunk c-1, layer-1
        h2 = cell(gi1_t, h2, whh1_v, bhn1_b)
        return h1, h2

    h1, h2 = lax.fori_loop(0, Tc, step, (h1_ref[...], h2_carry), unroll=unroll)
    h1_ref[...] = h1
    # Chunk "-1" does not exist: keep h2 at its zero carry on the first grid step.
    h2 = jnp.where(c > 0, h2, h2_carry)
    h2_ref[...] = h2

    # Layer-1 input projection for chunk c as ONE dense GEMM (M = Tc*Bp); consumed by
    # the next grid step (or the epilogue below).  Removes the per-step ih1 matmul
    # from the serial critical path.
    gi1_ref[...] = (jnp.dot(h1seq_ref[...].astype(cdt), wih1_v[...],
                            preferred_element_type=jnp.float32) + bi1_ref[...])

    @pl.when(c == nc - 1)
    def _finalize():
        # Epilogue: layer-1 over the final chunk -- only its valid (un-padded) steps.
        def l1_step(t, h2f):
            off = pl.multiple_of(t * Bp, Bp)
            return cell(gi1_ref[pl.ds(off, Bp), :], h2f, whh1_v, bhn1_b)

        h2f = lax.fori_loop(0, last_valid, l1_step, h2, unroll=unroll)
        out_ref[...] = (jnp.dot(h2f.astype(cdt), fcw_v[...],
                                preferred_element_type=jnp.float32) + fcb_ref[...])


# ---------------------------------------------------------------------------
# Wrapper
# ---------------------------------------------------------------------------
def advanced_gru_forward(x_btd, packed, *, t_chunk=None):
    """x_btd: (B, T, D) float32 (PyTorch batch_first). Returns (B, output_size) f32."""
    B, T, D = x_btd.shape
    Hp = packed["whh0"].shape[0]
    O = packed["fcw"].shape[1]
    cdt = packed["whh0"].dtype
    Bp = _round_up(B, 8)

    capacity = _vmem_capacity_bytes()
    budget = capacity - 8 * 2 ** 20                    # headroom for compiler scratch
    if t_chunk is None:
        t_chunk = _choose_t_chunk(T, Bp, D, Hp, O, cdt, budget)
    nc = -(-T // t_chunk)                              # ceil-div: arbitrary T supported
    T_pad = nc * t_chunk
    last_valid = T - (nc - 1) * t_chunk                # valid steps in the last chunk

    # (B,T,D) -> time-major, batch padded to a sublane multiple, T padded to a chunk
    # multiple, flattened to 2D so each chunk-level projection is one dense GEMM.
    x_tbd = jnp.transpose(x_btd, (1, 0, 2))
    x_tbd = jnp.pad(x_tbd, ((0, T_pad - T), (0, Bp - B), (0, 0)))
    x2d = x_tbd.reshape(T_pad * Bp, D).astype(cdt)

    weights = (packed["wih0"], packed["whh0"], packed["wih1"], packed["whh1"],
               packed["fcw"])
    biases = (packed["bi0"], packed["bhn0"], packed["bi1"], packed["bhn1"],
              packed["fcb"])

    in_specs = ([pl.BlockSpec((t_chunk * Bp, D), lambda c: (c, 0))]        # streamed x
                + [pl.BlockSpec(memory_space=pl.ANY)] * len(weights)       # weights->HBM
                + [pl.BlockSpec(b.shape, lambda c, _nd=b.ndim: (0,) * _nd)
                   for b in biases])                                       # tiny biases
    out_spec = pl.BlockSpec((Bp, O), lambda c: (0, 0))                     # resident out

    scratch_shapes = [pltpu.VMEM(w.shape, w.dtype) for w in weights] + [
        pltpu.VMEM((t_chunk * Bp, 3 * Hp), jnp.float32),   # gi0 (layer-0 projections)
        pltpu.VMEM((t_chunk * Bp, 3 * Hp), jnp.float32),   # gi1 (chunk c-1 -> c handoff)
        pltpu.VMEM((t_chunk * Bp, Hp), jnp.float32),       # h1 sequence of the chunk
        pltpu.VMEM((Bp, Hp), jnp.float32),                 # h1 carry across chunks
        pltpu.VMEM((Bp, Hp), jnp.float32),                 # h2 carry across chunks
    ]

    # Full unroll for small live sets; partial unroll for large Hp to bound vreg spills.
    full_unroll = (max(Bp // 8, 1) * max(Hp // 128, 1)) <= 4
    unroll = t_chunk if full_unroll else 2

    vmem_limit = int(min(max(budget, 32 * 2 ** 20), 128 * 2 ** 20))

    kernel = functools.partial(gru_kernel, t_chunk=t_chunk, batch_pad=Bp,
                               hidden_pad=Hp, last_valid=last_valid, unroll=unroll)

    out = pl.pallas_call(
        kernel,
        out_shape=jax.ShapeDtypeStruct((Bp, O), jnp.float32),
        grid_spec=pltpu.PrefetchScalarGridSpec(
            num_scalar_prefetch=0,
            grid=(nc,),
            in_specs=in_specs,
            out_specs=out_spec,
            scratch_shapes=scratch_shapes),
        compiler_params=pltpu.CompilerParams(
            dimension_semantics=("arbitrary",),        # T-chunk axis is a recurrence
            vmem_limit_bytes=vmem_limit),
    )(x2d, *weights, *biases)
    return out[:B]


# ---------------------------------------------------------------------------
# Parameters (PyTorch layout) + packing into the fused/padded kernel layout
# ---------------------------------------------------------------------------
def init_params(key, input_size, hidden_size, output_size=1):
    """PyTorch-layout parameters with the module's init (xavier weights, zero biases)."""
    H, D, O = hidden_size, input_size, output_size
    ks = jax.random.split(key, 5)

    def xavier(k, shape):                  # nn.init.xavier_uniform_ on (fan_out, fan_in)
        fan_out, fan_in = shape
        a = float(np.sqrt(6.0 / (fan_in + fan_out)))
        return jax.random.uniform(k, shape, jnp.float32, -a, a)

    zeros = lambda n: jnp.zeros((n,), jnp.float32)
    return {
        "w_ih_l0": xavier(ks[0], (3 * H, D)), "w_hh_l0": xavier(ks[1], (3 * H, H)),
        "w_ih_l1": xavier(ks[2], (3 * H, H)), "w_hh_l1": xavier(ks[3], (3 * H, H)),
        "b_ih_l0": zeros(3 * H), "b_hh_l0": zeros(3 * H),
        "b_ih_l1": zeros(3 * H), "b_hh_l1": zeros(3 * H),
        "fc_w": xavier(ks[4], (O, H)), "fc_b": zeros(O),
    }


def pack_params(p, compute_dtype=jnp.bfloat16):
    """PyTorch layout -> kernel layout: fused [r|z|n] gate columns, H zero-padded to a
    multiple of 128, b_i* + b_h{r,z} pre-combined (b_hn separate), MXU operands cast.
    Default MXU operand dtype is bf16 (f32 accumulation + f32 gate math)."""
    H = p["w_hh_l0"].shape[1]
    D = p["w_ih_l0"].shape[1]
    O = p["fc_w"].shape[0]
    Hp = _round_up(H, 128)
    # NOTE: for H in 129..256 on v6e/v7x one could round Hp to 256 for full MXU tiles;
    # intentionally not applied for small H (padding waste dominates).

    def pack_w(w, k_pad):                  # (3H, K) rows [r;z;n] -> (k_pad, 3*Hp)
        K = w.shape[1]
        g = jnp.transpose(w).reshape(K, 3, H)
        g = jnp.pad(g, ((0, k_pad - K), (0, 0), (0, Hp - H)))
        return g.reshape(k_pad, 3 * Hp).astype(compute_dtype)

    def pack_b(b_ih, b_hh):
        bih, bhh = b_ih.reshape(3, H), b_hh.reshape(3, H)
        bi = jnp.stack([bih[0] + bhh[0], bih[1] + bhh[1], bih[2]])   # b_hn stays out
        bi = jnp.pad(bi, ((0, 0), (0, Hp - H))).reshape(1, 3 * Hp)
        bhn = jnp.pad(bhh[2], (0, Hp - H)).reshape(1, Hp)
        return bi.astype(jnp.float32), bhn.astype(jnp.float32)

    bi0, bhn0 = pack_b(p["b_ih_l0"], p["b_hh_l0"])
    bi1, bhn1 = pack_b(p["b_ih_l1"], p["b_hh_l1"])
    return {
        "wih0": pack_w(p["w_ih_l0"], D), "whh0": pack_w(p["w_hh_l0"], Hp),
        "wih1": pack_w(p["w_ih_l1"], Hp), "whh1": pack_w(p["w_hh_l1"], Hp),
        "bi0": bi0, "bhn0": bhn0, "bi1": bi1, "bhn1": bhn1,
        "fcw": jnp.pad(jnp.transpose(p["fc_w"]),
                       ((0, Hp - H), (0, 0))).astype(compute_dtype),
        "fcb": p["fc_b"].reshape(1, O).astype(jnp.float32),
    }


# ---------------------------------------------------------------------------
# Pure-JAX reference (PyTorch eval-mode GRU -> fc), for validation
# ---------------------------------------------------------------------------
def reference_forward(x_btd, p):
    hi = jax.lax.Precision.HIGHEST

    def cell(x_t, h, w_ih, w_hh, b_ih, b_hh):
        H = h.shape[1]
        gi = jnp.dot(x_t, w_ih.T, precision=hi) + b_ih
        gh = jnp.dot(h, w_hh.T, precision=hi) + b_hh
        r = jax.nn.sigmoid(gi[:, :H] + gh[:, :H])
        z = jax.nn.sigmoid(gi[:, H:2 * H] + gh[:, H:2 * H])
        n = jnp.tanh(gi[:, 2 * H:] + r * gh[:, 2 * H:])
        return (1.0 - z) * n + z * h

    B, T, _ = x_btd.shape
    H = p["w_hh_l0"].shape[1]
    h1 = jnp.zeros((B, H), jnp.float32)
    h2 = jnp.zeros((B, H), jnp.float32)
    for t in range(T):
        x_t = x_btd[:, t, :]
        h1 = cell(x_t, h1, p["w_ih_l0"], p["w_hh_l0"], p["b_ih_l0"], p["b_hh_l0"])
        h2 = cell(h1, h2, p["w_ih_l1"], p["w_hh_l1"], p["b_ih_l1"], p["b_hh_l1"])
    return jnp.dot(h2, p["fc_w"].T, precision=hi) + p["fc_b"]


if __name__ == "__main__":
    key = jax.random.PRNGKey(0)

    # --- Test 1: module-default small shapes (single chunk), f32 + bf16 operands ---
    B, T, D, H, O = 2, 8, 16, 32, 1
    k_x, k_p, key = jax.random.split(key, 3)
    x = jax.random.normal(k_x, (B, T, D), jnp.float32)
    params = init_params(k_p, input_size=D, hidden_size=H, output_size=O)
    ref = np.asarray(reference_forward(x, params))

    out_f32 = jax.block_until_ready(
        advanced_gru_forward(x, pack_params(params, jnp.float32)))
    assert out_f32.shape == (B, O)
    assert np.allclose(np.asarray(out_f32), ref, rtol=1e-4, atol=1e-4), "f32 mismatch (t1)"

    out_bf16 = jax.block_until_ready(
        advanced_gru_forward(x, pack_params(params)))          # bf16 MXU operands (default)
    assert out_bf16.shape == (B, O)
    assert np.allclose(np.asarray(out_bf16), ref, rtol=5e-2, atol=1e-1), "bf16 mismatch (t1)"

    # --- Test 2: multi-chunk path, skewed layer-1 recurrence, partial last chunk,
    #             batch/hidden/time padding, non-zero GRU biases ------------------
    B2, T2, D2, H2, O2 = 3, 20, 16, 32, 3
    k_x2, k_p2, key = jax.random.split(key, 3)
    x2 = jax.random.normal(k_x2, (B2, T2, D2), jnp.float32)
    params2 = dict(init_params(k_p2, input_size=D2, hidden_size=H2, output_size=O2))
    kb = jax.random.split(k_p2, 4)
    params2["b_ih_l0"] = 0.1 * jax.random.normal(kb[0], (3 * H2,), jnp.float32)
    params2["b_hh_l0"] = 0.1 * jax.random.normal(kb[1], (3 * H2,), jnp.float32)
    params2["b_ih_l1"] = 0.1 * jax.random.normal(kb[2], (3 * H2,), jnp.float32)
    params2["b_hh_l1"] = 0.1 * jax.random.normal(kb[3], (3 * H2,), jnp.float32)
    ref2 = np.asarray(reference_forward(x2, params2))

    out2 = jax.block_until_ready(
        advanced_gru_forward(x2, pack_params(params2, jnp.float32), t_chunk=8))
    assert out2.shape == (B2, O2)
    assert np.allclose(np.asarray(out2), ref2, rtol=1e-4, atol=1e-4), "f32 mismatch (t2)"

    print("KERNEL_OK")
</pallas_src>

<mosaic_0001>
module attributes {stable_mosaic.version = 11 : i64} {
  func.func @gru_kernel(%arg0: i32, %arg1: memref<64x16xf32, #tpu.memory_space<vmem>>, %arg2: memref<16x384xf32, #tpu.memory_space<any>>, %arg3: memref<128x384xf32, #tpu.memory_space<any>>, %arg4: memref<128x384xf32, #tpu.memory_space<any>>, %arg5: memref<128x384xf32, #tpu.memory_space<any>>, %arg6: memref<128x1xf32, #tpu.memory_space<any>>, %arg7: memref<1x384xf32, #tpu.memory_space<vmem>>, %arg8: memref<1x128xf32, #tpu.memory_space<vmem>>, %arg9: memref<1x384xf32, #tpu.memory_space<vmem>>, %arg10: memref<1x128xf32, #tpu.memory_space<vmem>>, %arg11: memref<1x1xf32, #tpu.memory_space<vmem>>, %arg12: memref<8x1xf32, #tpu.memory_space<vmem>>, %arg13: memref<16x384xf32, #tpu.memory_space<vmem>>, %arg14: memref<128x384xf32, #tpu.memory_space<vmem>>, %arg15: memref<128x384xf32, #tpu.memory_space<vmem>>, %arg16: memref<128x384xf32, #tpu.memory_space<vmem>>, %arg17: memref<128x1xf32, #tpu.memory_space<vmem>>, %arg18: memref<64x384xf32, #tpu.memory_space<vmem>>, %arg19: memref<64x384xf32, #tpu.memory_space<vmem>>, %arg20: memref<64x128xf32, #tpu.memory_space<vmem>>, %arg21: memref<8x128xf32, #tpu.memory_space<vmem>>, %arg22: memref<8x128xf32, #tpu.memory_space<vmem>>) attributes {dimension_semantics = [#tpu.dimension_semantics<arbitrary>], iteration_bounds = array<i64: 1>, scalar_prefetch = 0 : i64, scratch_operands = 10 : i64, tpu.core_type = #tpu.core_type<tc>, window_params = [{transform_indices = @transform_0, window_bounds = array<i64: 64, 16>}, {}, {}, {}, {}, {}, {pipeline_mode = #tpu.pipeline_mode<synchronous>, transform_indices = @transform_6, window_bounds = array<i64: 1, 384>}, {pipeline_mode = #tpu.pipeline_mode<synchronous>, transform_indices = @transform_7, window_bounds = array<i64: 1, 128>}, {pipeline_mode = #tpu.pipeline_mode<synchronous>, transform_indices = @transform_8, window_bounds = array<i64: 1, 384>}, {pipeline_mode = #tpu.pipeline_mode<synchronous>, transform_indices = @transform_9, window_bounds = array<i64: 1, 128>}, {pipeline_mode = #tpu.pipeline_mode<synchronous>, transform_indices = @transform_10, window_bounds = array<i64: 1, 1>}, {pipeline_mode = #tpu.pipeline_mode<synchronous>, transform_indices = @transform_11, window_bounds = array<i64: 8, 1>}]} {
    %c0_i32 = arith.constant 0 : i32
    %0 = arith.cmpi eq, %arg0, %c0_i32 : i32
    %1 = arith.extui %0 : i1 to i32
    %c0_i32_0 = arith.constant 0 : i32
    %2 = arith.cmpi ne, %1, %c0_i32_0 : i32
    scf.if %2 {
      "tpu.region"() ({
        %534 = tpu.sem_alloc : memref<!tpu.dma_semaphore, #tpu.memory_space<semaphore_mem>>
        tpu.enqueue_dma source(%arg2 : memref<16x384xf32, #tpu.memory_space<any>>) target(%arg13 : memref<16x384xf32, #tpu.memory_space<vmem>>) target_semaphore(%534 : memref<!tpu.dma_semaphore, #tpu.memory_space<semaphore_mem>>)
        tpu.wait_dma2 semaphore(%534 : memref<!tpu.dma_semaphore, #tpu.memory_space<semaphore_mem>>) src(%arg2 : memref<16x384xf32, #tpu.memory_space<any>>) dst(%arg13 : memref<16x384xf32, #tpu.memory_space<vmem>>)
        tpu.yield
      }) : () -> ()
      "tpu.region"() ({
        %534 = tpu.sem_alloc : memref<!tpu.dma_semaphore, #tpu.memory_space<semaphore_mem>>
        tpu.enqueue_dma source(%arg3 : memref<128x384xf32, #tpu.memory_space<any>>) target(%arg14 : memref<128x384xf32, #tpu.memory_space<vmem>>) target_semaphore(%534 : memref<!tpu.dma_semaphore, #tpu.memory_space<semaphore_mem>>)
        tpu.wait_dma2 semaphore(%534 : memref<!tpu.dma_semaphore, #tpu.memory_space<semaphore_mem>>) src(%arg3 : memref<128x384xf32, #tpu.memory_space<any>>) dst(%arg14 : memref<128x384xf32, #tpu.memory_space<vmem>>)
        tpu.yield
      }) : () -> ()
      "tpu.region"() ({
        %534 = tpu.sem_alloc : memref<!tpu.dma_semaphore, #tpu.memory_space<semaphore_mem>>
        tpu.enqueue_dma source(%arg4 : memref<128x384xf32, #tpu.memory_space<any>>) target(%arg15 : memref<128x384xf32, #tpu.memory_space<vmem>>) target_semaphore(%534 : memref<!tpu.dma_semaphore, #tpu.memory_space<semaphore_mem>>)
        tpu.wait_dma2 semaphore(%534 : memref<!tpu.dma_semaphore, #tpu.memory_space<semaphore_mem>>) src(%arg4 : memref<128x384xf32, #tpu.memory_space<any>>) dst(%arg15 : memref<128x384xf32, #tpu.memory_space<vmem>>)
        tpu.yield
      }) : () -> ()
      "tpu.region"() ({
        %534 = tpu.sem_alloc : memref<!tpu.dma_semaphore, #tpu.memory_space<semaphore_mem>>
        tpu.enqueue_dma source(%arg5 : memref<128x384xf32, #tpu.memory_space<any>>) target(%arg16 : memref<128x384xf32, #tpu.memory_space<vmem>>) target_semaphore(%534 : memref<!tpu.dma_semaphore, #tpu.memory_space<semaphore_mem>>)
        tpu.wait_dma2 semaphore(%534 : memref<!tpu.dma_semaphore, #tpu.memory_space<semaphore_mem>>) src(%arg5 : memref<128x384xf32, #tpu.memory_space<any>>) dst(%arg16 : memref<128x384xf32, #tpu.memory_space<vmem>>)
        tpu.yield
      }) : () -> ()
      "tpu.region"() ({
        %534 = tpu.sem_alloc : memref<!tpu.dma_semaphore, #tpu.memory_space<semaphore_mem>>
        tpu.enqueue_dma source(%arg6 : memref<128x1xf32, #tpu.memory_space<any>>) target(%arg17 : memref<128x1xf32, #tpu.memory_space<vmem>>) target_semaphore(%534 : memref<!tpu.dma_semaphore, #tpu.memory_space<semaphore_mem>>)
        tpu.wait_dma2 semaphore(%534 : memref<!tpu.dma_semaphore, #tpu.memory_space<semaphore_mem>>) src(%arg6 : memref<128x1xf32, #tpu.memory_space<any>>) dst(%arg17 : memref<128x1xf32, #tpu.memory_space<vmem>>)
        tpu.yield
      }) : () -> ()
      %cst_145 = arith.constant 0.000000e+00 : f32
      %528 = vector.broadcast %cst_145 : f32 to vector<8x128xf32>
      %c0_146 = arith.constant 0 : index
      %c0_147 = arith.constant 0 : index
      %529 = vector.load %arg21[%c0_146, %c0_147] : memref<8x128xf32, #tpu.memory_space<vmem>>, vector<8x128xf32>
      tpu.vector_store %arg21[%c0_146, %c0_147], %528 {strides = array<i32>} : memref<8x128xf32, #tpu.memory_space<vmem>>, vector<8x128xf32>,
      %cst_148 = arith.constant 0.000000e+00 : f32
      %530 = vector.broadcast %cst_148 : f32 to vector<8x128xf32>
      %c0_149 = arith.constant 0 : index
      %c0_150 = arith.constant 0 : index
      %531 = vector.load %arg22[%c0_149, %c0_150] : memref<8x128xf32, #tpu.memory_space<vmem>>, vector<8x128xf32>
      tpu.vector_store %arg22[%c0_149, %c0_150], %530 {strides = array<i32>} : memref<8x128xf32, #tpu.memory_space<vmem>>, vector<8x128xf32>,
      %cst_151 = arith.constant 0.000000e+00 : f32
      %532 = vector.broadcast %cst_151 : f32 to vector<64x384xf32>
      %c0_152 = arith.constant 0 : index
      %c0_153 = arith.constant 0 : index
      %533 = vector.load %arg19[%c0_152, %c0_153] : memref<64x384xf32, #tpu.memory_space<vmem>>, vector<64x384xf32>
      tpu.vector_store %arg19[%c0_152, %c0_153], %532 {strides = array<i32>} : memref<64x384xf32, #tpu.memory_space<vmem>>, vector<64x384xf32>,
    } else {
    }
    %c0 = arith.constant 0 : index
    %c0_1 = arith.constant 0 : index
    %3 = vector.load %arg1[%c0, %c0_1] : memref<64x16xf32, #tpu.memory_space<vmem>>, vector<64x16xf32>
    %c0_2 = arith.constant 0 : index
    %c0_3 = arith.constant 0 : index
    %4 = vector.load %arg13[%c0_2, %c0_3] : memref<16x384xf32, #tpu.memory_space<vmem>>, vector<16x384xf32>
    %cst = arith.constant dense<0.000000e+00> : vector<64x384xf32>
    %5 = tpu.matmul %3, %4, %cst {dimension_numbers = #tpu.dot_dimension_numbers<[1], [0], [0], [1], [0, 0, 1, 1], [], []>} : vector<64x16xf32>, vector<16x384xf32>, vector<64x384xf32> -> vector<64x384xf32>
    %c0_4 = arith.constant 0 : index
    %c0_5 = arith.constant 0 : index
    %6 = vector.load %arg7[%c0_4, %c0_5] : memref<1x384xf32, #tpu.memory_space<vmem>>, vector<1x384xf32>
    %7 = vector.broadcast %6 : vector<1x384xf32> to vector<64x384xf32>
    %8 = arith.addf %5, %7 : vector<64x384xf32>
    %c0_6 = arith.constant 0 : index
    %c0_7 = arith.constant 0 : index
    %9 = vector.load %arg18[%c0_6, %c0_7] : memref<64x384xf32, #tpu.memory_space<vmem>>, vector<64x384xf32>
    tpu.vector_store %arg18[%c0_6, %c0_7], %8 {strides = array<i32>} : memref<64x384xf32, #tpu.memory_space<vmem>>, vector<64x384xf32>,
    %c0_8 = arith.constant 0 : index
    %c0_9 = arith.constant 0 : index
    %10 = vector.load %arg8[%c0_8, %c0_9] : memref<1x128xf32, #tpu.memory_space<vmem>>, vector<1x128xf32>
    %11 = vector.shape_cast %10 : vector<1x128xf32> to vector<1x128xf32>
    %12 = vector.broadcast %11 : vector<1x128xf32> to vector<8x128xf32>
    %c0_10 = arith.constant 0 : index
    %c0_11 = arith.constant 0 : index
    %13 = vector.load %arg10[%c0_10, %c0_11] : memref<1x128xf32, #tpu.memory_space<vmem>>, vector<1x128xf32>
    %14 = vector.shape_cast %13 : vector<1x128xf32> to vector<1x128xf32>
    %15 = vector.broadcast %14 : vector<1x128xf32> to vector<8x128xf32>
    %c0_12 = arith.constant 0 : index
    %c0_13 = arith.constant 0 : index
    %16 = vector.load %arg22[%c0_12, %c0_13] : memref<8x128xf32, #tpu.memory_space<vmem>>, vector<8x128xf32>
    %c0_14 = arith.constant 0 : index
    %c0_15 = arith.constant 0 : index
    %17 = vector.load %arg21[%c0_14, %c0_15] : memref<8x128xf32, #tpu.memory_space<vmem>>, vector<8x128xf32>
    %c0_i32_16 = arith.constant 0 : i32
    %c8_i32 = arith.constant 8 : i32
    %18 = arith.muli %c0_i32_16, %c8_i32 : i32
    %19 = tpu.assume_multiple %18, 8 : i32
    %20 = arith.index_cast %19 : i32 to index
    %c0_17 = arith.constant 0 : index
    %21 = vector.load %arg18[%20, %c0_17] : memref<64x384xf32, #tpu.memory_space<vmem>>, vector<8x384xf32>
    %c0_18 = arith.constant 0 : index
    %c0_19 = arith.constant 0 : index
    %22 = vector.load %arg14[%c0_18, %c0_19] : memref<128x384xf32, #tpu.memory_space<vmem>>, vector<128x384xf32>
    %cst_20 = arith.constant dense<0.000000e+00> : vector<8x384xf32>
    %23 = tpu.matmul %17, %22, %cst_20 {dimension_numbers = #tpu.dot_dimension_numbers<[1], [0], [0], [1], [0, 0, 1, 1], [], []>} : vector<8x128xf32>, vector<128x384xf32>, vector<8x384xf32> -> vector<8x384xf32>
    %24 = vector.extract_strided_slice %21 {offsets = [0, 0], sizes = [8, 128], strides = [1, 1]} : vector<8x384xf32> to vector<8x128xf32>
    %25 = vector.extract_strided_slice %23 {offsets = [0, 0], sizes = [8, 128], strides = [1, 1]} : vector<8x384xf32> to vector<8x128xf32>
    %26 = arith.addf %24, %25 : vector<8x128xf32>
    %27 = arith.negf %26 : vector<8x128xf32>
    %28 = math.exp %27 : vector<8x128xf32>
    %cst_21 = arith.constant 1.000000e+00 : f32
    %29 = vector.broadcast %cst_21 : f32 to vector<8x128xf32>
    %30 = arith.addf %29, %28 : vector<8x128xf32>
    %31 = arith.divf %29, %30 : vector<8x128xf32>
    %32 = vector.extract_strided_slice %21 {offsets = [0, 128], sizes = [8, 128], strides = [1, 1]} : vector<8x384xf32> to vector<8x128xf32>
    %33 = vector.extract_strided_slice %23 {offsets = [0, 128], sizes = [8, 128], strides = [1, 1]} : vector<8x384xf32> to vector<8x128xf32>
    %34 = arith.addf %32, %33 : vector<8x128xf32>
    %35 = arith.negf %34 : vector<8x128xf32>
    %36 = math.exp %35 : vector<8x128xf32>
    %cst_22 = arith.constant 1.000000e+00 : f32
    %37 = vector.broadcast %cst_22 : f32 to vector<8x128xf32>
    %38 = arith.addf %37, %36 : vector<8x128xf32>
    %39 = arith.divf %37, %38 : vector<8x128xf32>
    %40 = vector.extract_strided_slice %21 {offsets = [0, 256], sizes = [8, 128], strides = [1, 1]} : vector<8x384xf32> to vector<8x128xf32>
    %41 = vector.extract_strided_slice %23 {offsets = [0, 256], sizes = [8, 128], strides = [1, 1]} : vector<8x384xf32> to vector<8x128xf32>
    %42 = arith.addf %41, %12 : vector<8x128xf32>
    %43 = arith.mulf %31, %42 : vector<8x128xf32>
    %44 = arith.addf %40, %43 : vector<8x128xf32>
    %45 = math.tanh %44 : vector<8x128xf32>
    %46 = arith.subf %17, %45 : vector<8x128xf32>
    %47 = arith.mulf %39, %46 : vector<8x128xf32>
    %48 = arith.addf %45, %47 : vector<8x128xf32>
    %49 = arith.index_cast %19 : i32 to index
    %c0_23 = arith.constant 0 : index
    %50 = vector.load %arg20[%49, %c0_23] : memref<64x128xf32, #tpu.memory_space<vmem>>, vector<8x128xf32>
    tpu.vector_store %arg20[%49, %c0_23], %48 {strides = array<i32>} : memref<64x128xf32, #tpu.memory_space<vmem>>, vector<8x128xf32>,
    %51 = arith.index_cast %19 : i32 to index
    %c0_24 = arith.constant 0 : index
    %52 = vector.load %arg19[%51, %c0_24] : memref<64x384xf32, #tpu.memory_space<vmem>>, vector<8x384xf32>
    %c0_25 = arith.constant 0 : index
    %c0_26 = arith.constant 0 : index
    %53 = vector.load %arg16[%c0_25, %c0_26] : memref<128x384xf32, #tpu.memory_space<vmem>>, vector<128x384xf32>
    %cst_27 = arith.constant dense<0.000000e+00> : vector<8x384xf32>
    %54 = tpu.matmul %16, %53, %cst_27 {dimension_numbers = #tpu.dot_dimension_numbers<[1], [0], [0], [1], [0, 0, 1, 1], [], []>} : vector<8x128xf32>, vector<128x384xf32>, vector<8x384xf32> -> vector<8x384xf32>
    %55 = vector.extract_strided_slice %52 {offsets = [0, 0], sizes = [8, 128], strides = [1, 1]} : vector<8x384xf32> to vector<8x128xf32>
    %56 = vector.extract_strided_slice %54 {offsets = [0, 0], sizes = [8, 128], strides = [1, 1]} : vector<8x384xf32> to vector<8x128xf32>
    %57 = arith.addf %55, %56 : vector<8x128xf32>
    %58 = arith.negf %57 : vector<8x128xf32>
    %59 = math.exp %58 : vector<8x128xf32>
    %cst_28 = arith.constant 1.000000e+00 : f32
    %60 = vector.broadcast %cst_28 : f32 to vector<8x128xf32>
    %61 = arith.addf %60, %59 : vector<8x128xf32>
    %62 = arith.divf %60, %61 : vector<8x128xf32>
    %63 = vector.extract_strided_slice %52 {offsets = [0, 128], sizes = [8, 128], strides = [1, 1]} : vector<8x384xf32> to vector<8x128xf32>
    %64 = vector.extract_strided_slice %54 {offsets = [0, 128], sizes = [8, 128], strides = [1, 1]} : vector<8x384xf32> to vector<8x128xf32>
    %65 = arith.addf %63, %64 : vector<8x128xf32>
    %66 = arith.negf %65 : vector<8x128xf32>
    %67 = math.exp %66 : vector<8x128xf32>
    %cst_29 = arith.constant 1.000000e+00 : f32
    %68 = vector.broadcast %cst_29 : f32 to vector<8x128xf32>
    %69 = arith.addf %68, %67 : vector<8x128xf32>
    %70 = arith.divf %68, %69 : vector<8x128xf32>
    %71 = vector.extract_strided_slice %52 {offsets = [0, 256], sizes = [8, 128], strides = [1, 1]} : vector<8x384xf32> to vector<8x128xf32>
    %72 = vector.extract_strided_slice %54 {offsets = [0, 256], sizes = [8, 128], strides = [1, 1]} : vector<8x384xf32> to vector<8x128xf32>
    %73 = arith.addf %72, %15 : vector<8x128xf32>
    %74 = arith.mulf %62, %73 : vector<8x128xf32>
    %75 = arith.addf %71, %74 : vector<8x128xf32>
    %76 = math.tanh %75 : vector<8x128xf32>
    %77 = arith.subf %16, %76 : vector<8x128xf32>
    %78 = arith.mulf %70, %77 : vector<8x128xf32>
    %79 = arith.addf %76, %78 : vector<8x128xf32>
    %c1_i32 = arith.constant 1 : i32
    %c8_i32_30 = arith.constant 8 : i32
    %80 = arith.muli %c1_i32, %c8_i32_30 : i32
    %81 = tpu.assume_multiple %80, 8 : i32
    %82 = arith.index_cast %81 : i32 to index
    %c0_31 = arith.constant 0 : index
    %83 = vector.load %arg18[%82, %c0_31] : memref<64x384xf32, #tpu.memory_space<vmem>>, vector<8x384xf32>
    %c0_32 = arith.constant 0 : index
    %c0_33 = arith.constant 0 : index
    %84 = vector.load %arg14[%c0_32, %c0_33] : memref<128x384xf32, #tpu.memory_space<vmem>>, vector<128x384xf32>
    %cst_34 = arith.constant dense<0.000000e+00> : vector<8x384xf32>
    %85 = tpu.matmul %48, %84, %cst_34 {dimension_numbers = #tpu.dot_dimension_numbers<[1], [0], [0], [1], [0, 0, 1, 1], [], []>} : vector<8x128xf32>, vector<128x384xf32>, vector<8x384xf32> -> vector<8x384xf32>
    %86 = vector.extract_strided_slice %83 {offsets = [0, 0], sizes = [8, 128], strides = [1, 1]} : vector<8x384xf32> to vector<8x128xf32>
    %87 = vector.extract_strided_slice %85 {offsets = [0, 0], sizes = [8, 128], strides = [1, 1]} : vector<8x384xf32> to vector<8x128xf32>
    %88 = arith.addf %86, %87 : vector<8x128xf32>
    %89 = arith.negf %88 : vector<8x128xf32>
    %90 = math.exp %89 : vector<8x128xf32>
    %cst_35 = arith.constant 1.000000e+00 : f32
    %91 = vector.broadcast %cst_35 : f32 to vector<8x128xf32>
    %92 = arith.addf %91, %90 : vector<8x128xf32>
    %93 = arith.divf %91, %92 : vector<8x128xf32>
    %94 = vector.extract_strided_slice %83 {offsets = [0, 128], sizes = [8, 128], strides = [1, 1]} : vector<8x384xf32> to vector<8x128xf32>
    %95 = vector.extract_strided_slice %85 {offsets = [0, 128], sizes = [8, 128], strides = [1, 1]} : vector<8x384xf32> to vector<8x128xf32>
    %96 = arith.addf %94, %95 : vector<8x128xf32>
    %97 = arith.negf %96 : vector<8x128xf32>
    %98 = math.exp %97 : vector<8x128xf32>
    %cst_36 = arith.constant 1.000000e+00 : f32
    %99 = vector.broadcast %cst_36 : f32 to vector<8x128xf32>
    %100 = arith.addf %99, %98 : vector<8x128xf32>
    %101 = arith.divf %99, %100 : vector<8x128xf32>
    %102 = vector.extract_strided_slice %83 {offsets = [0, 256], sizes = [8, 128], strides = [1, 1]} : vector<8x384xf32> to vector<8x128xf32>
    %103 = vector.extract_strided_slice %85 {offsets = [0, 256], sizes = [8, 128], strides = [1, 1]} : vector<8x384xf32> to vector<8x128xf32>
    %104 = arith.addf %103, %12 : vector<8x128xf32>
    %105 = arith.mulf %93, %104 : vector<8x128xf32>
    %106 = arith.addf %102, %105 : vector<8x128xf32>
    %107 = math.tanh %106 : vector<8x128xf32>
    %108 = arith.subf %48, %107 : vector<8x128xf32>
    %109 = arith.mulf %101, %108 : vector<8x128xf32>
    %110 = arith.addf %107, %109 : vector<8x128xf32>
    %111 = arith.index_cast %81 : i32 to index
    %c0_37 = arith.constant 0 : index
    %112 = vector.load %arg20[%111, %c0_37] : memref<64x128xf32, #tpu.memory_space<vmem>>, vector<8x128xf32>
    tpu.vector_store %arg20[%111, %c0_37], %110 {strides = array<i32>} : memref<64x128xf32, #tpu.memory_space<vmem>>, vector<8x128xf32>,
    %113 = arith.index_cast %81 : i32 to index
    %c0_38 = arith.constant 0 : index
    %114 = vector.load %arg19[%113, %c0_38] : memref<64x384xf32, #tpu.memory_space<vmem>>, vector<8x384xf32>
    %c0_39 = arith.constant 0 : index
    %c0_40 = arith.constant 0 : index
    %115 = vector.load %arg16[%c0_39, %c0_40] : memref<128x384xf32, #tpu.memory_space<vmem>>, vector<128x384xf32>
    %cst_41 = arith.constant dense<0.000000e+00> : vector<8x384xf32>
    %116 = tpu.matmul %79, %115, %cst_41 {dimension_numbers = #tpu.dot_dimension_numbers<[1], [0], [0], [1], [0, 0, 1, 1], [], []>} : vector<8x128xf32>, vector<128x384xf32>, vector<8x384xf32> -> vector<8x384xf32>
    %117 = vector.extract_strided_slice %114 {offsets = [0, 0], sizes = [8, 128], strides = [1, 1]} : vector<8x384xf32> to vector<8x128xf32>
    %118 = vector.extract_strided_slice %116 {offsets = [0, 0], sizes = [8, 128], strides = [1, 1]} : vector<8x384xf32> to vector<8x128xf32>
    %119 = arith.addf %117, %118 : vector<8x128xf32>
    %120 = arith.negf %119 : vector<8x128xf32>
    %121 = math.exp %120 : vector<8x128xf32>
    %cst_42 = arith.constant 1.000000e+00 : f32
    %122 = vector.broadcast %cst_42 : f32 to vector<8x128xf32>
    %123 = arith.addf %122, %121 : vector<8x128xf32>
    %124 = arith.divf %122, %123 : vector<8x128xf32>
    %125 = vector.extract_strided_slice %114 {offsets = [0, 128], sizes = [8, 128], strides = [1, 1]} : vector<8x384xf32> to vector<8x128xf32>
    %126 = vector.extract_strided_slice %116 {offsets = [0, 128], sizes = [8, 128], strides = [1, 1]} : vector<8x384xf32> to vector<8x128xf32>
    %127 = arith.addf %125, %126 : vector<8x128xf32>
    %128 = arith.negf %127 : vector<8x128xf32>
    %129 = math.exp %128 : vector<8x128xf32>
    %cst_43 = arith.constant 1.000000e+00 : f32
    %130 = vector.broadcast %cst_43 : f32 to vector<8x128xf32>
    %131 = arith.addf %130, %129 : vector<8x128xf32>
    %132 = arith.divf %130, %131 : vector<8x128xf32>
    %133 = vector.extract_strided_slice %114 {offsets = [0, 256], sizes = [8, 128], strides = [1, 1]} : vector<8x384xf32> to vector<8x128xf32>
    %134 = vector.extract_strided_slice %116 {offsets = [0, 256], sizes = [8, 128], strides = [1, 1]} : vector<8x384xf32> to vector<8x128xf32>
    %135 = arith.addf %134, %15 : vector<8x128xf32>
    %136 = arith.mulf %124, %135 : vector<8x128xf32>
    %137 = arith.addf %133, %136 : vector<8x128xf32>
    %138 = math.tanh %137 : vector<8x128xf32>
    %139 = arith.subf %79, %138 : vector<8x128xf32>
    %140 = arith.mulf %132, %139 : vector<8x128xf32>
    %141 = arith.addf %138, %140 : vector<8x128xf32>
    %c2_i32 = arith.constant 2 : i32
    %c8_i32_44 = arith.constant 8 : i32
    %142 = arith.muli %c2_i32, %c8_i32_44 : i32
    %143 = tpu.assume_multiple %142, 8 : i32
    %144 = arith.index_cast %143 : i32 to index
    %c0_45 = arith.constant 0 : index
    %145 = vector.load %arg18[%144, %c0_45] : memref<64x384xf32, #tpu.memory_space<vmem>>, vector<8x384xf32>
    %c0_46 = arith.constant 0 : index
    %c0_47 = arith.constant 0 : index
    %146 = vector.load %arg14[%c0_46, %c0_47] : memref<128x384xf32, #tpu.memory_space<vmem>>, vector<128x384xf32>
    %cst_48 = arith.constant dense<0.000000e+00> : vector<8x384xf32>
    %147 = tpu.matmul %110, %146, %cst_48 {dimension_numbers = #tpu.dot_dimension_numbers<[1], [0], [0], [1], [0, 0, 1, 1], [], []>} : vector<8x128xf32>, vector<128x384xf32>, vector<8x384xf32> -> vector<8x384xf32>
    %148 = vector.extract_strided_slice %145 {offsets = [0, 0], sizes = [8, 128], strides = [1, 1]} : vector<8x384xf32> to vector<8x128xf32>
    %149 = vector.extract_strided_slice %147 {offsets = [0, 0], sizes = [8, 128], strides = [1, 1]} : vector<8x384xf32> to vector<8x128xf32>
    %150 = arith.addf %148, %149 : vector<8x128xf32>
    %151 = arith.negf %150 : vector<8x128xf32>
    %152 = math.exp %151 : vector<8x128xf32>
    %cst_49 = arith.constant 1.000000e+00 : f32
    %153 = vector.broadcast %cst_49 : f32 to vector<8x128xf32>
    %154 = arith.addf %153, %152 : vector<8x128xf32>
    %155 = arith.divf %153, %154 : vector<8x128xf32>
    %156 = vector.extract_strided_slice %145 {offsets = [0, 128], sizes = [8, 128], strides = [1, 1]} : vector<8x384xf32> to vector<8x128xf32>
    %157 = vector.extract_strided_slice %147 {offsets = [0, 128], sizes = [8, 128], strides = [1, 1]} : vector<8x384xf32> to vector<8x128xf32>
    %158 = arith.addf %156, %157 : vector<8x128xf32>
    %159 = arith.negf %158 : vector<8x128xf32>
    %160 = math.exp %159 : vector<8x128xf32>
    %cst_50 = arith.constant 1.000000e+00 : f32
    %161 = vector.broadcast %cst_50 : f32 to vector<8x128xf32>
    %162 = arith.addf %161, %160 : vector<8x128xf32>
    %163 = arith.divf %161, %162 : vector<8x128xf32>
    %164 = vector.extract_strided_slice %145 {offsets = [0, 256], sizes = [8, 128], strides = [1, 1]} : vector<8x384xf32> to vector<8x128xf32>
    %165 = vector.extract_strided_slice %147 {offsets = [0, 256], sizes = [8, 128], strides = [1, 1]} : vector<8x384xf32> to vector<8x128xf32>
    %166 = arith.addf %165, %12 : vector<8x128xf32>
    %167 = arith.mulf %155, %166 : vector<8x128xf32>
    %168 = arith.addf %164, %167 : vector<8x128xf32>
    %169 = math.tanh %168 : vector<8x128xf32>
    %170 = arith.subf %110, %169 : vector<8x128xf32>
    %171 = arith.mulf %163, %170 : vector<8x128xf32>
    %172 = arith.addf %169, %171 : vector<8x128xf32>
    %173 = arith.index_cast %143 : i32 to index
    %c0_51 = arith.constant 0 : index
    %174 = vector.load %arg20[%173, %c0_51] : memref<64x128xf32, #tpu.memory_space<vmem>>, vector<8x128xf32>
    tpu.vector_store %arg20[%173, %c0_51], %172 {strides = array<i32>} : memref<64x128xf32, #tpu.memory_space<vmem>>, vector<8x128xf32>,
    %175 = arith.index_cast %143 : i32 to index
    %c0_52 = arith.constant 0 : index
    %176 = vector.load %arg19[%175, %c0_52] : memref<64x384xf32, #tpu.memory_space<vmem>>, vector<8x384xf32>
    %c0_53 = arith.constant 0 : index
    %c0_54 = arith.constant 0 : index
    %177 = vector.load %arg16[%c0_53, %c0_54] : memref<128x384xf32, #tpu.memory_space<vmem>>, vector<128x384xf32>
    %cst_55 = arith.constant dense<0.000000e+00> : vector<8x384xf32>
    %178 = tpu.matmul %141, %177, %cst_55 {dimension_numbers = #tpu.dot_dimension_numbers<[1], [0], [0], [1], [0, 0, 1, 1], [], []>} : vector<8x128xf32>, vector<128x384xf32>, vector<8x384xf32> -> vector<8x384xf32>
    %179 = vector.extract_strided_slice %176 {offsets = [0, 0], sizes = [8, 128], strides = [1, 1]} : vector<8x384xf32> to vector<8x128xf32>
    %180 = vector.extract_strided_slice %178 {offsets = [0, 0], sizes = [8, 128], strides = [1, 1]} : vector<8x384xf32> to vector<8x128xf32>
    %181 = arith.addf %179, %180 : vector<8x128xf32>
    %182 = arith.negf %181 : vector<8x128xf32>
    %183 = math.exp %182 : vector<8x128xf32>
    %cst_56 = arith.constant 1.000000e+00 : f32
    %184 = vector.broadcast %cst_56 : f32 to vector<8x128xf32>
    %185 = arith.addf %184, %183 : vector<8x128xf32>
    %186 = arith.divf %184, %185 : vector<8x128xf32>
    %187 = vector.extract_strided_slice %176 {offsets = [0, 128], sizes = [8, 128], strides = [1, 1]} : vector<8x384xf32> to vector<8x128xf32>
    %188 = vector.extract_strided_slice %178 {offsets = [0, 128], sizes = [8, 128], strides = [1, 1]} : vector<8x384xf32> to vector<8x128xf32>
    %189 = arith.addf %187, %188 : vector<8x128xf32>
    %190 = arith.negf %189 : vector<8x128xf32>
    %191 = math.exp %190 : vector<8x128xf32>
    %cst_57 = arith.constant 1.000000e+00 : f32
    %192 = vector.broadcast %cst_57 : f32 to vector<8x128xf32>
    %193 = arith.addf %192, %191 : vector<8x128xf32>
    %194 = arith.divf %192, %193 : vector<8x128xf32>
    %195 = vector.extract_strided_slice %176 {offsets = [0, 256], sizes = [8, 128], strides = [1, 1]} : vector<8x384xf32> to vector<8x128xf32>
    %196 = vector.extract_strided_slice %178 {offsets = [0, 256], sizes = [8, 128], strides = [1, 1]} : vector<8x384xf32> to vector<8x128xf32>
    %197 = arith.addf %196, %15 : vector<8x128xf32>
    %198 = arith.mulf %186, %197 : vector<8x128xf32>
    %199 = arith.addf %195, %198 : vector<8x128xf32>
    %200 = math.tanh %199 : vector<8x128xf32>
    %201 = arith.subf %141, %200 : vector<8x128xf32>
    %202 = arith.mulf %194, %201 : vector<8x128xf32>
    %203 = arith.addf %200, %202 : vector<8x128xf32>
    %c3_i32 = arith.constant 3 : i32
    %c8_i32_58 = arith.constant 8 : i32
    %204 = arith.muli %c3_i32, %c8_i32_58 : i32
    %205 = tpu.assume_multiple %204, 8 : i32
    %206 = arith.index_cast %205 : i32 to index
    %c0_59 = arith.constant 0 : index
    %207 = vector.load %arg18[%206, %c0_59] : memref<64x384xf32, #tpu.memory_space<vmem>>, vector<8x384xf32>
    %c0_60 = arith.constant 0 : index
    %c0_61 = arith.constant 0 : index
    %208 = vector.load %arg14[%c0_60, %c0_61] : memref<128x384xf32, #tpu.memory_space<vmem>>, vector<128x384xf32>
    %cst_62 = arith.constant dense<0.000000e+00> : vector<8x384xf32>
    %209 = tpu.matmul %172, %208, %cst_62 {dimension_numbers = #tpu.dot_dimension_numbers<[1], [0], [0], [1], [0, 0, 1, 1], [], []>} : vector<8x128xf32>, vector<128x384xf32>, vector<8x384xf32> -> vector<8x384xf32>
    %210 = vector.extract_strided_slice %207 {offsets = [0, 0], sizes = [8, 128], strides = [1, 1]} : vector<8x384xf32> to vector<8x128xf32>
    %211 = vector.extract_strided_slice %209 {offsets = [0, 0], sizes = [8, 128], strides = [1, 1]} : vector<8x384xf32> to vector<8x128xf32>
    %212 = arith.addf %210, %211 : vector<8x128xf32>
    %213 = arith.negf %212 : vector<8x128xf32>
    %214 = math.exp %213 : vector<8x128xf32>
    %cst_63 = arith.constant 1.000000e+00 : f32
    %215 = vector.broadcast %cst_63 : f32 to vector<8x128xf32>
    %216 = arith.addf %215, %214 : vector<8x128xf32>
    %217 = arith.divf %215, %216 : vector<8x128xf32>
    %218 = vector.extract_strided_slice %207 {offsets = [0, 128], sizes = [8, 128], strides = [1, 1]} : vector<8x384xf32> to vector<8x128xf32>
    %219 = vector.extract_strided_slice %209 {offsets = [0, 128], sizes = [8, 128], strides = [1, 1]} : vector<8x384xf32> to vector<8x128xf32>
    %220 = arith.addf %218, %219 : vector<8x128xf32>
    %221 = arith.negf %220 : vector<8x128xf32>
    %222 = math.exp %221 : vector<8x128xf32>
    %cst_64 = arith.constant 1.000000e+00 : f32
    %223 = vector.broadcast %cst_64 : f32 to vector<8x128xf32>
    %224 = arith.addf %223, %222 : vector<8x128xf32>
    %225 = arith.divf %223, %224 : vector<8x128xf32>
    %226 = vector.extract_strided_slice %207 {offsets = [0, 256], sizes = [8, 128], strides = [1, 1]} : vector<8x384xf32> to vector<8x128xf32>
    %227 = vector.extract_strided_slice %209 {offsets = [0, 256], sizes = [8, 128], strides = [1, 1]} : vector<8x384xf32> to vector<8x128xf32>
    %228 = arith.addf %227, %12 : vector<8x128xf32>
    %229 = arith.mulf %217, %228 : vector<8x128xf32>
    %230 = arith.addf %226, %229 : vector<8x128xf32>
    %231 = math.tanh %230 : vector<8x128xf32>
    %232 = arith.subf %172, %231 : vector<8x128xf32>
    %233 = arith.mulf %225, %232 : vector<8x128xf32>
    %234 = arith.addf %231, %233 : vector<8x128xf32>
    %235 = arith.index_cast %205 : i32 to index
    %c0_65 = arith.constant 0 : index
    %236 = vector.load %arg20[%235, %c0_65] : memref<64x128xf32, #tpu.memory_space<vmem>>, vector<8x128xf32>
    tpu.vector_store %arg20[%235, %c0_65], %234 {strides = array<i32>} : memref<64x128xf32, #tpu.memory_space<vmem>>, vector<8x128xf32>,
    %237 = arith.index_cast %205 : i32 to index
    %c0_66 = arith.constant 0 : index
    %238 = vector.load %arg19[%237, %c0_66] : memref<64x384xf32, #tpu.memory_space<vmem>>, vector<8x384xf32>
    %c0_67 = arith.constant 0 : index
    %c0_68 = arith.constant 0 : index
    %239 = vector.load %arg16[%c0_67, %c0_68] : memref<128x384xf32, #tpu.memory_space<vmem>>, vector<128x384xf32>
    %cst_69 = arith.constant dense<0.000000e+00> : vector<8x384xf32>
    %240 = tpu.matmul %203, %239, %cst_69 {dimension_numbers = #tpu.dot_dimension_numbers<[1], [0], [0], [1], [0, 0, 1, 1], [], []>} : vector<8x128xf32>, vector<128x384xf32>, vector<8x384xf32> -> vector<8x384xf32>
    %241 = vector.extract_strided_slice %238 {offsets = [0, 0], sizes = [8, 128], strides = [1, 1]} : vector<8x384xf32> to vector<8x128xf32>
    %242 = vector.extract_strided_slice %240 {offsets = [0, 0], sizes = [8, 128], strides = [1, 1]} : vector<8x384xf32> to vector<8x128xf32>
    %243 = arith.addf %241, %242 : vector<8x128xf32>
    %244 = arith.negf %243 : vector<8x128xf32>
    %245 = math.exp %244 : vector<8x128xf32>
    %cst_70 = arith.constant 1.000000e+00 : f32
    %246 = vector.broadcast %cst_70 : f32 to vector<8x128xf32>
    %247 = arith.addf %246, %245 : vector<8x128xf32>
    %248 = arith.divf %246, %247 : vector<8x128xf32>
    %249 = vector.extract_strided_slice %238 {offsets = [0, 128], sizes = [8, 128], strides = [1, 1]} : vector<8x384xf32> to vector<8x128xf32>
    %250 = vector.extract_strided_slice %240 {offsets = [0, 128], sizes = [8, 128], strides = [1, 1]} : vector<8x384xf32> to vector<8x128xf32>
    %251 = arith.addf %249, %250 : vector<8x128xf32>
    %252 = arith.negf %251 : vector<8x128xf32>
    %253 = math.exp %252 : vector<8x128xf32>
    %cst_71 = arith.constant 1.000000e+00 : f32
    %254 = vector.broadcast %cst_71 : f32 to vector<8x128xf32>
    %255 = arith.addf %254, %253 : vector<8x128xf32>
    %256 = arith.divf %254, %255 : vector<8x128xf32>
    %257 = vector.extract_strided_slice %238 {offsets = [0, 256], sizes = [8, 128], strides = [1, 1]} : vector<8x384xf32> to vector<8x128xf32>
    %258 = vector.extract_strided_slice %240 {offsets = [0, 256], sizes = [8, 128], strides = [1, 1]} : vector<8x384xf32> to vector<8x128xf32>
    %259 = arith.addf %258, %15 : vector<8x128xf32>
    %260 = arith.mulf %248, %259 : vector<8x128xf32>
    %261 = arith.addf %257, %260 : vector<8x128xf32>
    %262 = math.tanh %261 : vector<8x128xf32>
    %263 = arith.subf %203, %262 : vector<8x128xf32>
    %264 = arith.mulf %256, %263 : vector<8x128xf32>
    %265 = arith.addf %262, %264 : vector<8x128xf32>
    %c4_i32 = arith.constant 4 : i32
    %c8_i32_72 = arith.constant 8 : i32
    %266 = arith.muli %c4_i32, %c8_i32_72 : i32
    %267 = tpu.assume_multiple %266, 8 : i32
    %268 = arith.index_cast %267 : i32 to index
    %c0_73 = arith.constant 0 : index
    %269 = vector.load %arg18[%268, %c0_73] : memref<64x384xf32, #tpu.memory_space<vmem>>, vector<8x384xf32>
    %c0_74 = arith.constant 0 : index
    %c0_75 = arith.constant 0 : index
    %270 = vector.load %arg14[%c0_74, %c0_75] : memref<128x384xf32, #tpu.memory_space<vmem>>, vector<128x384xf32>
    %cst_76 = arith.constant dense<0.000000e+00> : vector<8x384xf32>
    %271 = tpu.matmul %234, %270, %cst_76 {dimension_numbers = #tpu.dot_dimension_numbers<[1], [0], [0], [1], [0, 0, 1, 1], [], []>} : vector<8x128xf32>, vector<128x384xf32>, vector<8x384xf32> -> vector<8x384xf32>
    %272 = vector.extract_strided_slice %269 {offsets = [0, 0], sizes = [8, 128], strides = [1, 1]} : vector<8x384xf32> to vector<8x128xf32>
    %273 = vector.extract_strided_slice %271 {offsets = [0, 0], sizes = [8, 128], strides = [1, 1]} : vector<8x384xf32> to vector<8x128xf32>
    %274 = arith.addf %272, %273 : vector<8x128xf32>
    %275 = arith.negf %274 : vector<8x128xf32>
    %276 = math.exp %275 : vector<8x128xf32>
    %cst_77 = arith.constant 1.000000e+00 : f32
    %277 = vector.broadcast %cst_77 : f32 to vector<8x128xf32>
    %278 = arith.addf %277, %276 : vector<8x128xf32>
    %279 = arith.divf %277, %278 : vector<8x128xf32>
    %280 = vector.extract_strided_slice %269 {offsets = [0, 128], sizes = [8, 128], strides = [1, 1]} : vector<8x384xf32> to vector<8x128xf32>
    %281 = vector.extract_strided_slice %271 {offsets = [0, 128], sizes = [8, 128], strides = [1, 1]} : vector<8x384xf32> to vector<8x128xf32>
    %282 = arith.addf %280, %281 : vector<8x128xf32>
    %283 = arith.negf %282 : vector<8x128xf32>
    %284 = math.exp %283 : vector<8x128xf32>
    %cst_78 = arith.constant 1.000000e+00 : f32
    %285 = vector.broadcast %cst_78 : f32 to vector<8x128xf32>
    %286 = arith.addf %285, %284 : vector<8x128xf32>
    %287 = arith.divf %285, %286 : vector<8x128xf32>
    %288 = vector.extract_strided_slice %269 {offsets = [0, 256], sizes = [8, 128], strides = [1, 1]} : vector<8x384xf32> to vector<8x128xf32>
    %289 = vector.extract_strided_slice %271 {offsets = [0, 256], sizes = [8, 128], strides = [1, 1]} : vector<8x384xf32> to vector<8x128xf32>
    %290 = arith.addf %289, %12 : vector<8x128xf32>
    %291 = arith.mulf %279, %290 : vector<8x128xf32>
    %292 = arith.addf %288, %291 : vector<8x128xf32>
    %293 = math.tanh %292 : vector<8x128xf32>
    %294 = arith.subf %234, %293 : vector<8x128xf32>
    %295 = arith.mulf %287, %294 : vector<8x128xf32>
    %296 = arith.addf %293, %295 : vector<8x128xf32>
    %297 = arith.index_cast %267 : i32 to index
    %c0_79 = arith.constant 0 : index
    %298 = vector.load %arg20[%297, %c0_79] : memref<64x128xf32, #tpu.memory_space<vmem>>, vector<8x128xf32>
    tpu.vector_store %arg20[%297, %c0_79], %296 {strides = array<i32>} : memref<64x128xf32, #tpu.memory_space<vmem>>, vector<8x128xf32>,
    %299 = arith.index_cast %267 : i32 to index
    %c0_80 = arith.constant 0 : index
    %300 = vector.load %arg19[%299, %c0_80] : memref<64x384xf32, #tpu.memory_space<vmem>>, vector<8x384xf32>
    %c0_81 = arith.constant 0 : index
    %c0_82 = arith.constant 0 : index
    %301 = vector.load %arg16[%c0_81, %c0_82] : memref<128x384xf32, #tpu.memory_space<vmem>>, vector<128x384xf32>
    %cst_83 = arith.constant dense<0.000000e+00> : vector<8x384xf32>
    %302 = tpu.matmul %265, %301, %cst_83 {dimension_numbers = #tpu.dot_dimension_numbers<[1], [0], [0], [1], [0, 0, 1, 1], [], []>} : vector<8x128xf32>, vector<128x384xf32>, vector<8x384xf32> -> vector<8x384xf32>
    %303 = vector.extract_strided_slice %300 {offsets = [0, 0], sizes = [8, 128], strides = [1, 1]} : vector<8x384xf32> to vector<8x128xf32>
    %304 = vector.extract_strided_slice %302 {offsets = [0, 0], sizes = [8, 128], strides = [1, 1]} : vector<8x384xf32> to vector<8x128xf32>
    %305 = arith.addf %303, %304 : vector<8x128xf32>
    %306 = arith.negf %305 : vector<8x128xf32>
    %307 = math.exp %306 : vector<8x128xf32>
    %cst_84 = arith.constant 1.000000e+00 : f32
    %308 = vector.broadcast %cst_84 : f32 to vector<8x128xf32>
    %309 = arith.addf %308, %307 : vector<8x128xf32>
    %310 = arith.divf %308, %309 : vector<8x128xf32>
    %311 = vector.extract_strided_slice %300 {offsets = [0, 128], sizes = [8, 128], strides = [1, 1]} : vector<8x384xf32> to vector<8x128xf32>
    %312 = vector.extract_strided_slice %302 {offsets = [0, 128], sizes = [8, 128], strides = [1, 1]} : vector<8x384xf32> to vector<8x128xf32>
    %313 = arith.addf %311, %312 : vector<8x128xf32>
    %314 = arith.negf %313 : vector<8x128xf32>
    %315 = math.exp %314 : vector<8x128xf32>
    %cst_85 = arith.constant 1.000000e+00 : f32
    %316 = vector.broadcast %cst_85 : f32 to vector<8x128xf32>
    %317 = arith.addf %316, %315 : vector<8x128xf32>
    %318 = arith.divf %316, %317 : vector<8x128xf32>
    %319 = vector.extract_strided_slice %300 {offsets = [0, 256], sizes = [8, 128], strides = [1, 1]} : vector<8x384xf32> to vector<8x128xf32>
    %320 = vector.extract_strided_slice %302 {offsets = [0, 256], sizes = [8, 128], strides = [1, 1]} : vector<8x384xf32> to vector<8x128xf32>
    %321 = arith.addf %320, %15 : vector<8x128xf32>
    %322 = arith.mulf %310, %321 : vector<8x128xf32>
    %323 = arith.addf %319, %322 : vector<8x128xf32>
    %324 = math.tanh %323 : vector<8x128xf32>
    %325 = arith.subf %265, %324 : vector<8x128xf32>
    %326 = arith.mulf %318, %325 : vector<8x128xf32>
    %327 = arith.addf %324, %326 : vector<8x128xf32>
    %c5_i32 = arith.constant 5 : i32
    %c8_i32_86 = arith.constant 8 : i32
    %328 = arith.muli %c5_i32, %c8_i32_86 : i32
    %329 = tpu.assume_multiple %328, 8 : i32
    %330 = arith.index_cast %329 : i32 to index
    %c0_87 = arith.constant 0 : index
    %331 = vector.load %arg18[%330, %c0_87] : memref<64x384xf32, #tpu.memory_space<vmem>>, vector<8x384xf32>
    %c0_88 = arith.constant 0 : index
    %c0_89 = arith.constant 0 : index
    %332 = vector.load %arg14[%c0_88, %c0_89] : memref<128x384xf32, #tpu.memory_space<vmem>>, vector<128x384xf32>
    %cst_90 = arith.constant dense<0.000000e+00> : vector<8x384xf32>
    %333 = tpu.matmul %296, %332, %cst_90 {dimension_numbers = #tpu.dot_dimension_numbers<[1], [0], [0], [1], [0, 0, 1, 1], [], []>} : vector<8x128xf32>, vector<128x384xf32>, vector<8x384xf32> -> vector<8x384xf32>
    %334 = vector.extract_strided_slice %331 {offsets = [0, 0], sizes = [8, 128], strides = [1, 1]} : vector<8x384xf32> to vector<8x128xf32>
    %335 = vector.extract_strided_slice %333 {offsets = [0, 0], sizes = [8, 128], strides = [1, 1]} : vector<8x384xf32> to vector<8x128xf32>
    %336 = arith.addf %334, %335 : vector<8x128xf32>
    %337 = arith.negf %336 : vector<8x128xf32>
    %338 = math.exp %337 : vector<8x128xf32>
    %cst_91 = arith.constant 1.000000e+00 : f32
    %339 = vector.broadcast %cst_91 : f32 to vector<8x128xf32>
    %340 = arith.addf %339, %338 : vector<8x128xf32>
    %341 = arith.divf %339, %340 : vector<8x128xf32>
    %342 = vector.extract_strided_slice %331 {offsets = [0, 128], sizes = [8, 128], strides = [1, 1]} : vector<8x384xf32> to vector<8x128xf32>
    %343 = vector.extract_strided_slice %333 {offsets = [0, 128], sizes = [8, 128], strides = [1, 1]} : vector<8x384xf32> to vector<8x128xf32>
    %344 = arith.addf %342, %343 : vector<8x128xf32>
    %345 = arith.negf %344 : vector<8x128xf32>
    %346 = math.exp %345 : vector<8x128xf32>
    %cst_92 = arith.constant 1.000000e+00 : f32
    %347 = vector.broadcast %cst_92 : f32 to vector<8x128xf32>
    %348 = arith.addf %347, %346 : vector<8x128xf32>
    %349 = arith.divf %347, %348 : vector<8x128xf32>
    %350 = vector.extract_strided_slice %331 {offsets = [0, 256], sizes = [8, 128], strides = [1, 1]} : vector<8x384xf32> to vector<8x128xf32>
    %351 = vector.extract_strided_slice %333 {offsets = [0, 256], sizes = [8, 128], strides = [1, 1]} : vector<8x384xf32> to vector<8x128xf32>
    %352 = arith.addf %351, %12 : vector<8x128xf32>
    %353 = arith.mulf %341, %352 : vector<8x128xf32>
    %354 = arith.addf %350, %353 : vector<8x128xf32>
    %355 = math.tanh %354 : vector<8x128xf32>
    %356 = arith.subf %296, %355 : vector<8x128xf32>
    %357 = arith.mulf %349, %356 : vector<8x128xf32>
    %358 = arith.addf %355, %357 : vector<8x128xf32>
    %359 = arith.index_cast %329 : i32 to index
    %c0_93 = arith.constant 0 : index
    %360 = vector.load %arg20[%359, %c0_93] : memref<64x128xf32, #tpu.memory_space<vmem>>, vector<8x128xf32>
    tpu.vector_store %arg20[%359, %c0_93], %358 {strides = array<i32>} : memref<64x128xf32, #tpu.memory_space<vmem>>, vector<8x128xf32>,
    %361 = arith.index_cast %329 : i32 to index
    %c0_94 = arith.constant 0 : index
    %362 = vector.load %arg19[%361, %c0_94] : memref<64x384xf32, #tpu.memory_space<vmem>>, vector<8x384xf32>
    %c0_95 = arith.constant 0 : index
    %c0_96 = arith.constant 0 : index
    %363 = vector.load %arg16[%c0_95, %c0_96] : memref<128x384xf32, #tpu.memory_space<vmem>>, vector<128x384xf32>
    %cst_97 = arith.constant dense<0.000000e+00> : vector<8x384xf32>
    %364 = tpu.matmul %327, %363, %cst_97 {dimension_numbers = #tpu.dot_dimension_numbers<[1], [0], [0], [1], [0, 0, 1, 1], [], []>} : vector<8x128xf32>, vector<128x384xf32>, vector<8x384xf32> -> vector<8x384xf32>
    %365 = vector.extract_strided_slice %362 {offsets = [0, 0], sizes = [8, 128], strides = [1, 1]} : vector<8x384xf32> to vector<8x128xf32>
    %366 = vector.extract_strided_slice %364 {offsets = [0, 0], sizes = [8, 128], strides = [1, 1]} : vector<8x384xf32> to vector<8x128xf32>
    %367 = arith.addf %365, %366 : vector<8x128xf32>
    %368 = arith.negf %367 : vector<8x128xf32>
    %369 = math.exp %368 : vector<8x128xf32>
    %cst_98 = arith.constant 1.000000e+00 : f32
    %370 = vector.broadcast %cst_98 : f32 to vector<8x128xf32>
    %371 = arith.addf %370, %369 : vector<8x128xf32>
    %372 = arith.divf %370, %371 : vector<8x128xf32>
    %373 = vector.extract_strided_slice %362 {offsets = [0, 128], sizes = [8, 128], strides = [1, 1]} : vector<8x384xf32> to vector<8x128xf32>
    %374 = vector.extract_strided_slice %364 {offsets = [0, 128], sizes = [8, 128], strides = [1, 1]} : vector<8x384xf32> to vector<8x128xf32>
    %375 = arith.addf %373, %374 : vector<8x128xf32>
    %376 = arith.negf %375 : vector<8x128xf32>
    %377 = math.exp %376 : vector<8x128xf32>
    %cst_99 = arith.constant 1.000000e+00 : f32
    %378 = vector.broadcast %cst_99 : f32 to vector<8x128xf32>
    %379 = arith.addf %378, %377 : vector<8x128xf32>
    %380 = arith.divf %378, %379 : vector<8x128xf32>
    %381 = vector.extract_strided_slice %362 {offsets = [0, 256], sizes = [8, 128], strides = [1, 1]} : vector<8x384xf32> to vector<8x128xf32>
    %382 = vector.extract_strided_slice %364 {offsets = [0, 256], sizes = [8, 128], strides = [1, 1]} : vector<8x384xf32> to vector<8x128xf32>
    %383 = arith.addf %382, %15 : vector<8x128xf32>
    %384 = arith.mulf %372, %383 : vector<8x128xf32>
    %385 = arith.addf %381, %384 : vector<8x128xf32>
    %386 = math.tanh %385 : vector<8x128xf32>
    %387 = arith.subf %327, %386 : vector<8x128xf32>
    %388 = arith.mulf %380, %387 : vector<8x128xf32>
    %389 = arith.addf %386, %388 : vector<8x128xf32>
    %c6_i32 = arith.constant 6 : i32
    %c8_i32_100 = arith.constant 8 : i32
    %390 = arith.muli %c6_i32, %c8_i32_100 : i32
    %391 = tpu.assume_multiple %390, 8 : i32
    %392 = arith.index_cast %391 : i32 to index
    %c0_101 = arith.constant 0 : index
    %393 = vector.load %arg18[%392, %c0_101] : memref<64x384xf32, #tpu.memory_space<vmem>>, vector<8x384xf32>
    %c0_102 = arith.constant 0 : index
    %c0_103 = arith.constant 0 : index
    %394 = vector.load %arg14[%c0_102, %c0_103] : memref<128x384xf32, #tpu.memory_space<vmem>>, vector<128x384xf32>
    %cst_104 = arith.constant dense<0.000000e+00> : vector<8x384xf32>
    %395 = tpu.matmul %358, %394, %cst_104 {dimension_numbers = #tpu.dot_dimension_numbers<[1], [0], [0], [1], [0, 0, 1, 1], [], []>} : vector<8x128xf32>, vector<128x384xf32>, vector<8x384xf32> -> vector<8x384xf32>
    %396 = vector.extract_strided_slice %393 {offsets = [0, 0], sizes = [8, 128], strides = [1, 1]} : vector<8x384xf32> to vector<8x128xf32>
    %397 = vector.extract_strided_slice %395 {offsets = [0, 0], sizes = [8, 128], strides = [1, 1]} : vector<8x384xf32> to vector<8x128xf32>
    %398 = arith.addf %396, %397 : vector<8x128xf32>
    %399 = arith.negf %398 : vector<8x128xf32>
    %400 = math.exp %399 : vector<8x128xf32>
    %cst_105 = arith.constant 1.000000e+00 : f32
    %401 = vector.broadcast %cst_105 : f32 to vector<8x128xf32>
    %402 = arith.addf %401, %400 : vector<8x128xf32>
    %403 = arith.divf %401, %402 : vector<8x128xf32>
    %404 = vector.extract_strided_slice %393 {offsets = [0, 128], sizes = [8, 128], strides = [1, 1]} : vector<8x384xf32> to vector<8x128xf32>
    %405 = vector.extract_strided_slice %395 {offsets = [0, 128], sizes = [8, 128], strides = [1, 1]} : vector<8x384xf32> to vector<8x128xf32>
    %406 = arith.addf %404, %405 : vector<8x128xf32>
    %407 = arith.negf %406 : vector<8x128xf32>
    %408 = math.exp %407 : vector<8x128xf32>
    %cst_106 = arith.constant 1.000000e+00 : f32
    %409 = vector.broadcast %cst_106 : f32 to vector<8x128xf32>
    %410 = arith.addf %409, %408 : vector<8x128xf32>
    %411 = arith.divf %409, %410 : vector<8x128xf32>
    %412 = vector.extract_strided_slice %393 {offsets = [0, 256], sizes = [8, 128], strides = [1, 1]} : vector<8x384xf32> to vector<8x128xf32>
    %413 = vector.extract_strided_slice %395 {offsets = [0, 256], sizes = [8, 128], strides = [1, 1]} : vector<8x384xf32> to vector<8x128xf32>
    %414 = arith.addf %413, %12 : vector<8x128xf32>
    %415 = arith.mulf %403, %414 : vector<8x128xf32>
    %416 = arith.addf %412, %415 : vector<8x128xf32>
    %417 = math.tanh %416 : vector<8x128xf32>
    %418 = arith.subf %358, %417 : vector<8x128xf32>
    %419 = arith.mulf %411, %418 : vector<8x128xf32>
    %420 = arith.addf %417, %419 : vector<8x128xf32>
    %421 = arith.index_cast %391 : i32 to index
    %c0_107 = arith.constant 0 : index
    %422 = vector.load %arg20[%421, %c0_107] : memref<64x128xf32, #tpu.memory_space<vmem>>, vector<8x128xf32>
    tpu.vector_store %arg20[%421, %c0_107], %420 {strides = array<i32>} : memref<64x128xf32, #tpu.memory_space<vmem>>, vector<8x128xf32>,
    %423 = arith.index_cast %391 : i32 to index
    %c0_108 = arith.constant 0 : index
    %424 = vector.load %arg19[%423, %c0_108] : memref<64x384xf32, #tpu.memory_space<vmem>>, vector<8x384xf32>
    %c0_109 = arith.constant 0 : index
    %c0_110 = arith.constant 0 : index
    %425 = vector.load %arg16[%c0_109, %c0_110] : memref<128x384xf32, #tpu.memory_space<vmem>>, vector<128x384xf32>
    %cst_111 = arith.constant dense<0.000000e+00> : vector<8x384xf32>
    %426 = tpu.matmul %389, %425, %cst_111 {dimension_numbers = #tpu.dot_dimension_numbers<[1], [0], [0], [1], [0, 0, 1, 1], [], []>} : vector<8x128xf32>, vector<128x384xf32>, vector<8x384xf32> -> vector<8x384xf32>
    %427 = vector.extract_strided_slice %424 {offsets = [0, 0], sizes = [8, 128], strides = [1, 1]} : vector<8x384xf32> to vector<8x128xf32>
    %428 = vector.extract_strided_slice %426 {offsets = [0, 0], sizes = [8, 128], strides = [1, 1]} : vector<8x384xf32> to vector<8x128xf32>
    %429 = arith.addf %427, %428 : vector<8x128xf32>
    %430 = arith.negf %429 : vector<8x128xf32>
    %431 = math.exp %430 : vector<8x128xf32>
    %cst_112 = arith.constant 1.000000e+00 : f32
    %432 = vector.broadcast %cst_112 : f32 to vector<8x128xf32>
    %433 = arith.addf %432, %431 : vector<8x128xf32>
    %434 = arith.divf %432, %433 : vector<8x128xf32>
    %435 = vector.extract_strided_slice %424 {offsets = [0, 128], sizes = [8, 128], strides = [1, 1]} : vector<8x384xf32> to vector<8x128xf32>
    %436 = vector.extract_strided_slice %426 {offsets = [0, 128], sizes = [8, 128], strides = [1, 1]} : vector<8x384xf32> to vector<8x128xf32>
    %437 = arith.addf %435, %436 : vector<8x128xf32>
    %438 = arith.negf %437 : vector<8x128xf32>
    %439 = math.exp %438 : vector<8x128xf32>
    %cst_113 = arith.constant 1.000000e+00 : f32
    %440 = vector.broadcast %cst_113 : f32 to vector<8x128xf32>
    %441 = arith.addf %440, %439 : vector<8x128xf32>
    %442 = arith.divf %440, %441 : vector<8x128xf32>
    %443 = vector.extract_strided_slice %424 {offsets = [0, 256], sizes = [8, 128], strides = [1, 1]} : vector<8x384xf32> to vector<8x128xf32>
    %444 = vector.extract_strided_slice %426 {offsets = [0, 256], sizes = [8, 128], strides = [1, 1]} : vector<8x384xf32> to vector<8x128xf32>
    %445 = arith.addf %444, %15 : vector<8x128xf32>
    %446 = arith.mulf %434, %445 : vector<8x128xf32>
    %447 = arith.addf %443, %446 : vector<8x128xf32>
    %448 = math.tanh %447 : vector<8x128xf32>
    %449 = arith.subf %389, %448 : vector<8x128xf32>
    %450 = arith.mulf %442, %449 : vector<8x128xf32>
    %451 = arith.addf %448, %450 : vector<8x128xf32>
    %c7_i32 = arith.constant 7 : i32
    %c8_i32_114 = arith.constant 8 : i32
    %452 = arith.muli %c7_i32, %c8_i32_114 : i32
    %453 = tpu.assume_multiple %452, 8 : i32
    %454 = arith.index_cast %453 : i32 to index
    %c0_115 = arith.constant 0 : index
    %455 = vector.load %arg18[%454, %c0_115] : memref<64x384xf32, #tpu.memory_space<vmem>>, vector<8x384xf32>
    %c0_116 = arith.constant 0 : index
    %c0_117 = arith.constant 0 : index
    %456 = vector.load %arg14[%c0_116, %c0_117] : memref<128x384xf32, #tpu.memory_space<vmem>>, vector<128x384xf32>
    %cst_118 = arith.constant dense<0.000000e+00> : vector<8x384xf32>
    %457 = tpu.matmul %420, %456, %cst_118 {dimension_numbers = #tpu.dot_dimension_numbers<[1], [0], [0], [1], [0, 0, 1, 1], [], []>} : vector<8x128xf32>, vector<128x384xf32>, vector<8x384xf32> -> vector<8x384xf32>
    %458 = vector.extract_strided_slice %455 {offsets = [0, 0], sizes = [8, 128], strides = [1, 1]} : vector<8x384xf32> to vector<8x128xf32>
    %459 = vector.extract_strided_slice %457 {offsets = [0, 0], sizes = [8, 128], strides = [1, 1]} : vector<8x384xf32> to vector<8x128xf32>
    %460 = arith.addf %458, %459 : vector<8x128xf32>
    %461 = arith.negf %460 : vector<8x128xf32>
    %462 = math.exp %461 : vector<8x128xf32>
    %cst_119 = arith.constant 1.000000e+00 : f32
    %463 = vector.broadcast %cst_119 : f32 to vector<8x128xf32>
    %464 = arith.addf %463, %462 : vector<8x128xf32>
    %465 = arith.divf %463, %464 : vector<8x128xf32>
    %466 = vector.extract_strided_slice %455 {offsets = [0, 128], sizes = [8, 128], strides = [1, 1]} : vector<8x384xf32> to vector<8x128xf32>
    %467 = vector.extract_strided_slice %457 {offsets = [0, 128], sizes = [8, 128], strides = [1, 1]} : vector<8x384xf32> to vector<8x128xf32>
    %468 = arith.addf %466, %467 : vector<8x128xf32>
    %469 = arith.negf %468 : vector<8x128xf32>
    %470 = math.exp %469 : vector<8x128xf32>
    %cst_120 = arith.constant 1.000000e+00 : f32
    %471 = vector.broadcast %cst_120 : f32 to vector<8x128xf32>
    %472 = arith.addf %471, %470 : vector<8x128xf32>
    %473 = arith.divf %471, %472 : vector<8x128xf32>
    %474 = vector.extract_strided_slice %455 {offsets = [0, 256], sizes = [8, 128], strides = [1, 1]} : vector<8x384xf32> to vector<8x128xf32>
    %475 = vector.extract_strided_slice %457 {offsets = [0, 256], sizes = [8, 128], strides = [1, 1]} : vector<8x384xf32> to vector<8x128xf32>
    %476 = arith.addf %475, %12 : vector<8x128xf32>
    %477 = arith.mulf %465, %476 : vector<8x128xf32>
    %478 = arith.addf %474, %477 : vector<8x128xf32>
    %479 = math.tanh %478 : vector<8x128xf32>
    %480 = arith.subf %420, %479 : vector<8x128xf32>
    %481 = arith.mulf %473, %480 : vector<8x128xf32>
    %482 = arith.addf %479, %481 : vector<8x128xf32>
    %483 = arith.index_cast %453 : i32 to index
    %c0_121 = arith.constant 0 : index
    %484 = vector.load %arg20[%483, %c0_121] : memref<64x128xf32, #tpu.memory_space<vmem>>, vector<8x128xf32>
    tpu.vector_store %arg20[%483, %c0_121], %482 {strides = array<i32>} : memref<64x128xf32, #tpu.memory_space<vmem>>, vector<8x128xf32>,
    %485 = arith.index_cast %453 : i32 to index
    %c0_122 = arith.constant 0 : index
    %486 = vector.load %arg19[%485, %c0_122] : memref<64x384xf32, #tpu.memory_space<vmem>>, vector<8x384xf32>
    %c0_123 = arith.constant 0 : index
    %c0_124 = arith.constant 0 : index
    %487 = vector.load %arg16[%c0_123, %c0_124] : memref<128x384xf32, #tpu.memory_space<vmem>>, vector<128x384xf32>
    %cst_125 = arith.constant dense<0.000000e+00> : vector<8x384xf32>
    %488 = tpu.matmul %451, %487, %cst_125 {dimension_numbers = #tpu.dot_dimension_numbers<[1], [0], [0], [1], [0, 0, 1, 1], [], []>} : vector<8x128xf32>, vector<128x384xf32>, vector<8x384xf32> -> vector<8x384xf32>
    %489 = vector.extract_strided_slice %486 {offsets = [0, 0], sizes = [8, 128], strides = [1, 1]} : vector<8x384xf32> to vector<8x128xf32>
    %490 = vector.extract_strided_slice %488 {offsets = [0, 0], sizes = [8, 128], strides = [1, 1]} : vector<8x384xf32> to vector<8x128xf32>
    %491 = arith.addf %489, %490 : vector<8x128xf32>
    %492 = arith.negf %491 : vector<8x128xf32>
    %493 = math.exp %492 : vector<8x128xf32>
    %cst_126 = arith.constant 1.000000e+00 : f32
    %494 = vector.broadcast %cst_126 : f32 to vector<8x128xf32>
    %495 = arith.addf %494, %493 : vector<8x128xf32>
    %496 = arith.divf %494, %495 : vector<8x128xf32>
    %497 = vector.extract_strided_slice %486 {offsets = [0, 128], sizes = [8, 128], strides = [1, 1]} : vector<8x384xf32> to vector<8x128xf32>
    %498 = vector.extract_strided_slice %488 {offsets = [0, 128], sizes = [8, 128], strides = [1, 1]} : vector<8x384xf32> to vector<8x128xf32>
    %499 = arith.addf %497, %498 : vector<8x128xf32>
    %500 = arith.negf %499 : vector<8x128xf32>
    %501 = math.exp %500 : vector<8x128xf32>
    %cst_127 = arith.constant 1.000000e+00 : f32
    %502 = vector.broadcast %cst_127 : f32 to vector<8x128xf32>
    %503 = arith.addf %502, %501 : vector<8x128xf32>
    %504 = arith.divf %502, %503 : vector<8x128xf32>
    %505 = vector.extract_strided_slice %486 {offsets = [0, 256], sizes = [8, 128], strides = [1, 1]} : vector<8x384xf32> to vector<8x128xf32>
    %506 = vector.extract_strided_slice %488 {offsets = [0, 256], sizes = [8, 128], strides = [1, 1]} : vector<8x384xf32> to vector<8x128xf32>
    %507 = arith.addf %506, %15 : vector<8x128xf32>
    %508 = arith.mulf %496, %507 : vector<8x128xf32>
    %509 = arith.addf %505, %508 : vector<8x128xf32>
    %510 = math.tanh %509 : vector<8x128xf32>
    %511 = arith.subf %451, %510 : vector<8x128xf32>
    %512 = arith.mulf %504, %511 : vector<8x128xf32>
    %513 = arith.addf %510, %512 : vector<8x128xf32>
    %c8_i32_128 = arith.constant 8 : i32
    %c0_129 = arith.constant 0 : index
    %c0_130 = arith.constant 0 : index
    %514 = vector.load %arg21[%c0_129, %c0_130] : memref<8x128xf32, #tpu.memory_space<vmem>>, vector<8x128xf32>
    tpu.vector_store %arg21[%c0_129, %c0_130], %482 {strides = array<i32>} : memref<8x128xf32, #tpu.memory_space<vmem>>, vector<8x128xf32>,
    %c0_i32_131 = arith.constant 0 : i32
    %515 = arith.cmpi sgt, %arg0, %c0_i32_131 : i32
    %516 = arith.select %515, %513, %16 : vector<8x128xf32>
    %c0_132 = arith.constant 0 : index
    %c0_133 = arith.constant 0 : index
    %517 = vector.load %arg22[%c0_132, %c0_133] : memref<8x128xf32, #tpu.memory_space<vmem>>, vector<8x128xf32>
    tpu.vector_store %arg22[%c0_132, %c0_133], %516 {strides = array<i32>} : memref<8x128xf32, #tpu.memory_space<vmem>>, vector<8x128xf32>,
    %c0_134 = arith.constant 0 : index
    %c0_135 = arith.constant 0 : index
    %518 = vector.load %arg20[%c0_134, %c0_135] : memref<64x128xf32, #tpu.memory_space<vmem>>, vector<64x128xf32>
    %c0_136 = arith.constant 0 : index
    %c0_137 = arith.constant 0 : index
    %519 = vector.load %arg15[%c0_136, %c0_137] : memref<128x384xf32, #tpu.memory_space<vmem>>, vector<128x384xf32>
    %cst_138 = arith.constant dense<0.000000e+00> : vector<64x384xf32>
    %520 = tpu.matmul %518, %519, %cst_138 {dimension_numbers = #tpu.dot_dimension_numbers<[1], [0], [0], [1], [0, 0, 1, 1], [], []>} : vector<64x128xf32>, vector<128x384xf32>, vector<64x384xf32> -> vector<64x384xf32>
    %c0_139 = arith.constant 0 : index
    %c0_140 = arith.constant 0 : index
    %521 = vector.load %arg9[%c0_139, %c0_140] : memref<1x384xf32, #tpu.memory_space<vmem>>, vector<1x384xf32>
    %522 = vector.broadcast %521 : vector<1x384xf32> to vector<64x384xf32>
    %523 = arith.addf %520, %522 : vector<64x384xf32>
    %c0_141 = arith.constant 0 : index
    %c0_142 = arith.constant 0 : index
    %524 = vector.load %arg19[%c0_141, %c0_142] : memref<64x384xf32, #tpu.memory_space<vmem>>, vector<64x384xf32>
    tpu.vector_store %arg19[%c0_141, %c0_142], %523 {strides = array<i32>} : memref<64x384xf32, #tpu.memory_space<vmem>>, vector<64x384xf32>,
    %c0_i32_143 = arith.constant 0 : i32
    %525 = arith.cmpi eq, %arg0, %c0_i32_143 : i32
    %526 = arith.extui %525 : i1 to i32
    %c0_i32_144 = arith.constant 0 : i32
    %527 = arith.cmpi ne, %526, %c0_i32_144 : i32
    scf.if %527 {
      %c0_i32_145 = arith.constant 0 : i32
      %c8_i32_146 = arith.constant 8 : i32
      %528 = arith.muli %c0_i32_145, %c8_i32_146 : i32
      %529 = tpu.assume_multiple %528, 8 : i32
      %530 = arith.index_cast %529 : i32 to index
      %c0_147 = arith.constant 0 : index
      %531 = vector.load %arg19[%530, %c0_147] : memref<64x384xf32, #tpu.memory_space<vmem>>, vector<8x384xf32>
      %c0_148 = arith.constant 0 : index
      %c0_149 = arith.constant 0 : index
      %532 = vector.load %arg16[%c0_148, %c0_149] : memref<128x384xf32, #tpu.memory_space<vmem>>, vector<128x384xf32>
      %cst_150 = arith.constant dense<0.000000e+00> : vector<8x384xf32>
      %533 = tpu.matmul %516, %532, %cst_150 {dimension_numbers = #tpu.dot_dimension_numbers<[1], [0], [0], [1], [0, 0, 1, 1], [], []>} : vector<8x128xf32>, vector<128x384xf32>, vector<8x384xf32> -> vector<8x384xf32>
      %534 = vector.extract_strided_slice %531 {offsets = [0, 0], sizes = [8, 128], strides = [1, 1]} : vector<8x384xf32> to vector<8x128xf32>
      %535 = vector.extract_strided_slice %533 {offsets = [0, 0], sizes = [8, 128], strides = [1, 1]} : vector<8x384xf32> to vector<8x128xf32>
      %536 = arith.addf %534, %535 : vector<8x128xf32>
      %537 = arith.negf %536 : vector<8x128xf32>
      %538 = math.exp %537 : vector<8x128xf32>
      %cst_151 = arith.constant 1.000000e+00 : f32
      %539 = vector.broadcast %cst_151 : f32 to vector<8x128xf32>
      %540 = arith.addf %539, %538 : vector<8x128xf32>
      %541 = arith.divf %539, %540 : vector<8x128xf32>
      %542 = vector.extract_strided_slice %531 {offsets = [0, 128], sizes = [8, 128], strides = [1, 1]} : vector<8x384xf32> to vector<8x128xf32>
      %543 = vector.extract_strided_slice %533 {offsets = [0, 128], sizes = [8, 128], strides = [1, 1]} : vector<8x384xf32> to vector<8x128xf32>
      %544 = arith.addf %542, %543 : vector<8x128xf32>
      %545 = arith.negf %544 : vector<8x128xf32>
      %546 = math.exp %545 : vector<8x128xf32>
      %cst_152 = arith.constant 1.000000e+00 : f32
      %547 = vector.broadcast %cst_152 : f32 to vector<8x128xf32>
      %548 = arith.addf %547, %546 : vector<8x128xf32>
      %549 = arith.divf %547, %548 : vector<8x128xf32>
      %550 = vector.extract_strided_slice %531 {offsets = [0, 256], sizes = [8, 128], strides = [1, 1]} : vector<8x384xf32> to vector<8x128xf32>
      %551 = vector.extract_strided_slice %533 {offsets = [0, 256], sizes = [8, 128], strides = [1, 1]} : vector<8x384xf32> to vector<8x128xf32>
      %552 = arith.addf %551, %15 : vector<8x128xf32>
      %553 = arith.mulf %541, %552 : vector<8x128xf32>
      %554 = arith.addf %550, %553 : vector<8x128xf32>
      %555 = math.tanh %554 : vector<8x128xf32>
      %556 = arith.subf %516, %555 : vector<8x128xf32>
      %557 = arith.mulf %549, %556 : vector<8x128xf32>
      %558 = arith.addf %555, %557 : vector<8x128xf32>
      %c1_i32_153 = arith.constant 1 : i32
      %c8_i32_154 = arith.constant 8 : i32
      %559 = arith.muli %c1_i32_153, %c8_i32_154 : i32
      %560 = tpu.assume_multiple %559, 8 : i32
      %561 = arith.index_cast %560 : i32 to index
      %c0_155 = arith.constant 0 : index
      %562 = vector.load %arg19[%561, %c0_155] : memref<64x384xf32, #tpu.memory_space<vmem>>, vector<8x384xf32>
      %c0_156 = arith.constant 0 : index
      %c0_157 = arith.constant 0 : index
      %563 = vector.load %arg16[%c0_156, %c0_157] : memref<128x384xf32, #tpu.memory_space<vmem>>, vector<128x384xf32>
      %cst_158 = arith.constant dense<0.000000e+00> : vector<8x384xf32>
      %564 = tpu.matmul %558, %563, %cst_158 {dimension_numbers = #tpu.dot_dimension_numbers<[1], [0], [0], [1], [0, 0, 1, 1], [], []>} : vector<8x128xf32>, vector<128x384xf32>, vector<8x384xf32> -> vector<8x384xf32>
      %565 = vector.extract_strided_slice %562 {offsets = [0, 0], sizes = [8, 128], strides = [1, 1]} : vector<8x384xf32> to vector<8x128xf32>
      %566 = vector.extract_strided_slice %564 {offsets = [0, 0], sizes = [8, 128], strides = [1, 1]} : vector<8x384xf32> to vector<8x128xf32>
      %567 = arith.addf %565, %566 : vector<8x128xf32>
      %568 = arith.negf %567 : vector<8x128xf32>
      %569 = math.exp %568 : vector<8x128xf32>
      %cst_159 = arith.constant 1.000000e+00 : f32
      %570 = vector.broadcast %cst_159 : f32 to vector<8x128xf32>
      %571 = arith.addf %570, %569 : vector<8x128xf32>
      %572 = arith.divf %570, %571 : vector<8x128xf32>
      %573 = vector.extract_strided_slice %562 {offsets = [0, 128], sizes = [8, 128], strides = [1, 1]} : vector<8x384xf32> to vector<8x128xf32>
      %574 = vector.extract_strided_slice %564 {offsets = [0, 128], sizes = [8, 128], strides = [1, 1]} : vector<8x384xf32> to vector<8x128xf32>
      %575 = arith.addf %573, %574 : vector<8x128xf32>
      %576 = arith.negf %575 : vector<8x128xf32>
      %577 = math.exp %576 : vector<8x128xf32>
      %cst_160 = arith.constant 1.000000e+00 : f32
      %578 = vector.broadcast %cst_160 : f32 to vector<8x128xf32>
      %579 = arith.addf %578, %577 : vector<8x128xf32>
      %580 = arith.divf %578, %579 : vector<8x128xf32>
      %581 = vector.extract_strided_slice %562 {offsets = [0, 256], sizes = [8, 128], strides = [1, 1]} : vector<8x384xf32> to vector<8x128xf32>
      %582 = vector.extract_strided_slice %564 {offsets = [0, 256], sizes = [8, 128], strides = [1, 1]} : vector<8x384xf32> to vector<8x128xf32>
      %583 = arith.addf %582, %15 : vector<8x128xf32>
      %584 = arith.mulf %572, %583 : vector<8x128xf32>
      %585 = arith.addf %581, %584 : vector<8x128xf32>
      %586 = math.tanh %585 : vector<8x128xf32>
      %587 = arith.subf %558, %586 : vector<8x128xf32>
      %588 = arith.mulf %580, %587 : vector<8x128xf32>
      %589 = arith.addf %586, %588 : vector<8x128xf32>
      %c2_i32_161 = arith.constant 2 : i32
      %c8_i32_162 = arith.constant 8 : i32
      %590 = arith.muli %c2_i32_161, %c8_i32_162 : i32
      %591 = tpu.assume_multiple %590, 8 : i32
      %592 = arith.index_cast %591 : i32 to index
      %c0_163 = arith.constant 0 : index
      %593 = vector.load %arg19[%592, %c0_163] : memref<64x384xf32, #tpu.memory_space<vmem>>, vector<8x384xf32>
      %c0_164 = arith.constant 0 : index
      %c0_165 = arith.constant 0 : index
      %594 = vector.load %arg16[%c0_164, %c0_165] : memref<128x384xf32, #tpu.memory_space<vmem>>, vector<128x384xf32>
      %cst_166 = arith.constant dense<0.000000e+00> : vector<8x384xf32>
      %595 = tpu.matmul %589, %594, %cst_166 {dimension_numbers = #tpu.dot_dimension_numbers<[1], [0], [0], [1], [0, 0, 1, 1], [], []>} : vector<8x128xf32>, vector<128x384xf32>, vector<8x384xf32> -> vector<8x384xf32>
      %596 = vector.extract_strided_slice %593 {offsets = [0, 0], sizes = [8, 128], strides = [1, 1]} : vector<8x384xf32> to vector<8x128xf32>
      %597 = vector.extract_strided_slice %595 {offsets = [0, 0], sizes = [8, 128], strides = [1, 1]} : vector<8x384xf32> to vector<8x128xf32>
      %598 = arith.addf %596, %597 : vector<8x128xf32>
      %599 = arith.negf %598 : vector<8x128xf32>
      %600 = math.exp %599 : vector<8x128xf32>
      %cst_167 = arith.constant 1.000000e+00 : f32
      %601 = vector.broadcast %cst_167 : f32 to vector<8x128xf32>
      %602 = arith.addf %601, %600 : vector<8x128xf32>
      %603 = arith.divf %601, %602 : vector<8x128xf32>
      %604 = vector.extract_strided_slice %593 {offsets = [0, 128], sizes = [8, 128], strides = [1, 1]} : vector<8x384xf32> to vector<8x128xf32>
      %605 = vector.extract_strided_slice %595 {offsets = [0, 128], sizes = [8, 128], strides = [1, 1]} : vector<8x384xf32> to vector<8x128xf32>
      %606 = arith.addf %604, %605 : vector<8x128xf32>
      %607 = arith.negf %606 : vector<8x128xf32>
      %608 = math.exp %607 : vector<8x128xf32>
      %cst_168 = arith.constant 1.000000e+00 : f32
      %609 = vector.broadcast %cst_168 : f32 to vector<8x128xf32>
      %610 = arith.addf %609, %608 : vector<8x128xf32>
      %611 = arith.divf %609, %610 : vector<8x128xf32>
      %612 = vector.extract_strided_slice %593 {offsets = [0, 256], sizes = [8, 128], strides = [1, 1]} : vector<8x384xf32> to vector<8x128xf32>
      %613 = vector.extract_strided_slice %595 {offsets = [0, 256], sizes = [8, 128], strides = [1, 1]} : vector<8x384xf32> to vector<8x128xf32>
      %614 = arith.addf %613, %15 : vector<8x128xf32>
      %615 = arith.mulf %603, %614 : vector<8x128xf32>
      %616 = arith.addf %612, %615 : vector<8x128xf32>
      %617 = math.tanh %616 : vector<8x128xf32>
      %618 = arith.subf %589, %617 : vector<8x128xf32>
      %619 = arith.mulf %611, %618 : vector<8x128xf32>
      %620 = arith.addf %617, %619 : vector<8x128xf32>
      %c3_i32_169 = arith.constant 3 : i32
      %c8_i32_170 = arith.constant 8 : i32
      %621 = arith.muli %c3_i32_169, %c8_i32_170 : i32
      %622 = tpu.assume_multiple %621, 8 : i32
      %623 = arith.index_cast %622 : i32 to index
      %c0_171 = arith.constant 0 : index
      %624 = vector.load %arg19[%623, %c0_171] : memref<64x384xf32, #tpu.memory_space<vmem>>, vector<8x384xf32>
      %c0_172 = arith.constant 0 : index
      %c0_173 = arith.constant 0 : index
      %625 = vector.load %arg16[%c0_172, %c0_173] : memref<128x384xf32, #tpu.memory_space<vmem>>, vector<128x384xf32>
      %cst_174 = arith.constant dense<0.000000e+00> : vector<8x384xf32>
      %626 = tpu.matmul %620, %625, %cst_174 {dimension_numbers = #tpu.dot_dimension_numbers<[1], [0], [0], [1], [0, 0, 1, 1], [], []>} : vector<8x128xf32>, vector<128x384xf32>, vector<8x384xf32> -> vector<8x384xf32>
      %627 = vector.extract_strided_slice %624 {offsets = [0, 0], sizes = [8, 128], strides = [1, 1]} : vector<8x384xf32> to vector<8x128xf32>
      %628 = vector.extract_strided_slice %626 {offsets = [0, 0], sizes = [8, 128], strides = [1, 1]} : vector<8x384xf32> to vector<8x128xf32>
      %629 = arith.addf %627, %628 : vector<8x128xf32>
      %630 = arith.negf %629 : vector<8x128xf32>
      %631 = math.exp %630 : vector<8x128xf32>
      %cst_175 = arith.constant 1.000000e+00 : f32
      %632 = vector.broadcast %cst_175 : f32 to vector<8x128xf32>
      %633 = arith.addf %632, %631 : vector<8x128xf32>
      %634 = arith.divf %632, %633 : vector<8x128xf32>
      %635 = vector.extract_strided_slice %624 {offsets = [0, 128], sizes = [8, 128], strides = [1, 1]} : vector<8x384xf32> to vector<8x128xf32>
      %636 = vector.extract_strided_slice %626 {offsets = [0, 128], sizes = [8, 128], strides = [1, 1]} : vector<8x384xf32> to vector<8x128xf32>
      %637 = arith.addf %635, %636 : vector<8x128xf32>
      %638 = arith.negf %637 : vector<8x128xf32>
      %639 = math.exp %638 : vector<8x128xf32>
      %cst_176 = arith.constant 1.000000e+00 : f32
      %640 = vector.broadcast %cst_176 : f32 to vector<8x128xf32>
      %641 = arith.addf %640, %639 : vector<8x128xf32>
      %642 = arith.divf %640, %641 : vector<8x128xf32>
      %643 = vector.extract_strided_slice %624 {offsets = [0, 256], sizes = [8, 128], strides = [1, 1]} : vector<8x384xf32> to vector<8x128xf32>
      %644 = vector.extract_strided_slice %626 {offsets = [0, 256], sizes = [8, 128], strides = [1, 1]} : vector<8x384xf32> to vector<8x128xf32>
      %645 = arith.addf %644, %15 : vector<8x128xf32>
      %646 = arith.mulf %634, %645 : vector<8x128xf32>
      %647 = arith.addf %643, %646 : vector<8x128xf32>
      %648 = math.tanh %647 : vector<8x128xf32>
      %649 = arith.subf %620, %648 : vector<8x128xf32>
      %650 = arith.mulf %642, %649 : vector<8x128xf32>
      %651 = arith.addf %648, %650 : vector<8x128xf32>
      %c4_i32_177 = arith.constant 4 : i32
      %c8_i32_178 = arith.constant 8 : i32
      %652 = arith.muli %c4_i32_177, %c8_i32_178 : i32
      %653 = tpu.assume_multiple %652, 8 : i32
      %654 = arith.index_cast %653 : i32 to index
      %c0_179 = arith.constant 0 : index
      %655 = vector.load %arg19[%654, %c0_179] : memref<64x384xf32, #tpu.memory_space<vmem>>, vector<8x384xf32>
      %c0_180 = arith.constant 0 : index
      %c0_181 = arith.constant 0 : index
      %656 = vector.load %arg16[%c0_180, %c0_181] : memref<128x384xf32, #tpu.memory_space<vmem>>, vector<128x384xf32>
      %cst_182 = arith.constant dense<0.000000e+00> : vector<8x384xf32>
      %657 = tpu.matmul %651, %656, %cst_182 {dimension_numbers = #tpu.dot_dimension_numbers<[1], [0], [0], [1], [0, 0, 1, 1], [], []>} : vector<8x128xf32>, vector<128x384xf32>, vector<8x384xf32> -> vector<8x384xf32>
      %658 = vector.extract_strided_slice %655 {offsets = [0, 0], sizes = [8, 128], strides = [1, 1]} : vector<8x384xf32> to vector<8x128xf32>
      %659 = vector.extract_strided_slice %657 {offsets = [0, 0], sizes = [8, 128], strides = [1, 1]} : vector<8x384xf32> to vector<8x128xf32>
      %660 = arith.addf %658, %659 : vector<8x128xf32>
      %661 = arith.negf %660 : vector<8x128xf32>
      %662 = math.exp %661 : vector<8x128xf32>
      %cst_183 = arith.constant 1.000000e+00 : f32
      %663 = vector.broadcast %cst_183 : f32 to vector<8x128xf32>
      %664 = arith.addf %663, %662 : vector<8x128xf32>
      %665 = arith.divf %663, %664 : vector<8x128xf32>
      %666 = vector.extract_strided_slice %655 {offsets = [0, 128], sizes = [8, 128], strides = [1, 1]} : vector<8x384xf32> to vector<8x128xf32>
      %667 = vector.extract_strided_slice %657 {offsets = [0, 128], sizes = [8, 128], strides = [1, 1]} : vector<8x384xf32> to vector<8x128xf32>
      %668 = arith.addf %666, %667 : vector<8x128xf32>
      %669 = arith.negf %668 : vector<8x128xf32>
      %670 = math.exp %669 : vector<8x128xf32>
      %cst_184 = arith.constant 1.000000e+00 : f32
      %671 = vector.broadcast %cst_184 : f32 to vector<8x128xf32>
      %672 = arith.addf %671, %670 : vector<8x128xf32>
      %673 = arith.divf %671, %672 : vector<8x128xf32>
      %674 = vector.extract_strided_slice %655 {offsets = [0, 256], sizes = [8, 128], strides = [1, 1]} : vector<8x384xf32> to vector<8x128xf32>
      %675 = vector.extract_strided_slice %657 {offsets = [0, 256], sizes = [8, 128], strides = [1, 1]} : vector<8x384xf32> to vector<8x128xf32>
      %676 = arith.addf %675, %15 : vector<8x128xf32>
      %677 = arith.mulf %665, %676 : vector<8x128xf32>
      %678 = arith.addf %674, %677 : vector<8x128xf32>
      %679 = math.tanh %678 : vector<8x128xf32>
      %680 = arith.subf %651, %679 : vector<8x128xf32>
      %681 = arith.mulf %673, %680 : vector<8x128xf32>
      %682 = arith.addf %679, %681 : vector<8x128xf32>
      %c5_i32_185 = arith.constant 5 : i32
      %c8_i32_186 = arith.constant 8 : i32
      %683 = arith.muli %c5_i32_185, %c8_i32_186 : i32
      %684 = tpu.assume_multiple %683, 8 : i32
      %685 = arith.index_cast %684 : i32 to index
      %c0_187 = arith.constant 0 : index
      %686 = vector.load %arg19[%685, %c0_187] : memref<64x384xf32, #tpu.memory_space<vmem>>, vector<8x384xf32>
      %c0_188 = arith.constant 0 : index
      %c0_189 = arith.constant 0 : index
      %687 = vector.load %arg16[%c0_188, %c0_189] : memref<128x384xf32, #tpu.memory_space<vmem>>, vector<128x384xf32>
      %cst_190 = arith.constant dense<0.000000e+00> : vector<8x384xf32>
      %688 = tpu.matmul %682, %687, %cst_190 {dimension_numbers = #tpu.dot_dimension_numbers<[1], [0], [0], [1], [0, 0, 1, 1], [], []>} : vector<8x128xf32>, vector<128x384xf32>, vector<8x384xf32> -> vector<8x384xf32>
      %689 = vector.extract_strided_slice %686 {offsets = [0, 0], sizes = [8, 128], strides = [1, 1]} : vector<8x384xf32> to vector<8x128xf32>
      %690 = vector.extract_strided_slice %688 {offsets = [0, 0], sizes = [8, 128], strides = [1, 1]} : vector<8x384xf32> to vector<8x128xf32>
      %691 = arith.addf %689, %690 : vector<8x128xf32>
      %692 = arith.negf %691 : vector<8x128xf32>
      %693 = math.exp %692 : vector<8x128xf32>
      %cst_191 = arith.constant 1.000000e+00 : f32
      %694 = vector.broadcast %cst_191 : f32 to vector<8x128xf32>
      %695 = arith.addf %694, %693 : vector<8x128xf32>
      %696 = arith.divf %694, %695 : vector<8x128xf32>
      %697 = vector.extract_strided_slice %686 {offsets = [0, 128], sizes = [8, 128], strides = [1, 1]} : vector<8x384xf32> to vector<8x128xf32>
      %698 = vector.extract_strided_slice %688 {offsets = [0, 128], sizes = [8, 128], strides = [1, 1]} : vector<8x384xf32> to vector<8x128xf32>
      %699 = arith.addf %697, %698 : vector<8x128xf32>
      %700 = arith.negf %699 : vector<8x128xf32>
      %701 = math.exp %700 : vector<8x128xf32>
      %cst_192 = arith.constant 1.000000e+00 : f32
      %702 = vector.broadcast %cst_192 : f32 to vector<8x128xf32>
      %703 = arith.addf %702, %701 : vector<8x128xf32>
      %704 = arith.divf %702, %703 : vector<8x128xf32>
      %705 = vector.extract_strided_slice %686 {offsets = [0, 256], sizes = [8, 128], strides = [1, 1]} : vector<8x384xf32> to vector<8x128xf32>
      %706 = vector.extract_strided_slice %688 {offsets = [0, 256], sizes = [8, 128], strides = [1, 1]} : vector<8x384xf32> to vector<8x128xf32>
      %707 = arith.addf %706, %15 : vector<8x128xf32>
      %708 = arith.mulf %696, %707 : vector<8x128xf32>
      %709 = arith.addf %705, %708 : vector<8x128xf32>
      %710 = math.tanh %709 : vector<8x128xf32>
      %711 = arith.subf %682, %710 : vector<8x128xf32>
      %712 = arith.mulf %704, %711 : vector<8x128xf32>
      %713 = arith.addf %710, %712 : vector<8x128xf32>
      %c6_i32_193 = arith.constant 6 : i32
      %c8_i32_194 = arith.constant 8 : i32
      %714 = arith.muli %c6_i32_193, %c8_i32_194 : i32
      %715 = tpu.assume_multiple %714, 8 : i32
      %716 = arith.index_cast %715 : i32 to index
      %c0_195 = arith.constant 0 : index
      %717 = vector.load %arg19[%716, %c0_195] : memref<64x384xf32, #tpu.memory_space<vmem>>, vector<8x384xf32>
      %c0_196 = arith.constant 0 : index
      %c0_197 = arith.constant 0 : index
      %718 = vector.load %arg16[%c0_196, %c0_197] : memref<128x384xf32, #tpu.memory_space<vmem>>, vector<128x384xf32>
      %cst_198 = arith.constant dense<0.000000e+00> : vector<8x384xf32>
      %719 = tpu.matmul %713, %718, %cst_198 {dimension_numbers = #tpu.dot_dimension_numbers<[1], [0], [0], [1], [0, 0, 1, 1], [], []>} : vector<8x128xf32>, vector<128x384xf32>, vector<8x384xf32> -> vector<8x384xf32>
      %720 = vector.extract_strided_slice %717 {offsets = [0, 0], sizes = [8, 128], strides = [1, 1]} : vector<8x384xf32> to vector<8x128xf32>
      %721 = vector.extract_strided_slice %719 {offsets = [0, 0], sizes = [8, 128], strides = [1, 1]} : vector<8x384xf32> to vector<8x128xf32>
      %722 = arith.addf %720, %721 : vector<8x128xf32>
      %723 = arith.negf %722 : vector<8x128xf32>
      %724 = math.exp %723 : vector<8x128xf32>
      %cst_199 = arith.constant 1.000000e+00 : f32
      %725 = vector.broadcast %cst_199 : f32 to vector<8x128xf32>
      %726 = arith.addf %725, %724 : vector<8x128xf32>
      %727 = arith.divf %725, %726 : vector<8x128xf32>
      %728 = vector.extract_strided_slice %717 {offsets = [0, 128], sizes = [8, 128], strides = [1, 1]} : vector<8x384xf32> to vector<8x128xf32>
      %729 = vector.extract_strided_slice %719 {offsets = [0, 128], sizes = [8, 128], strides = [1, 1]} : vector<8x384xf32> to vector<8x128xf32>
      %730 = arith.addf %728, %729 : vector<8x128xf32>
      %731 = arith.negf %730 : vector<8x128xf32>
      %732 = math.exp %731 : vector<8x128xf32>
      %cst_200 = arith.constant 1.000000e+00 : f32
      %733 = vector.broadcast %cst_200 : f32 to vector<8x128xf32>
      %734 = arith.addf %733, %732 : vector<8x128xf32>
      %735 = arith.divf %733, %734 : vector<8x128xf32>
      %736 = vector.extract_strided_slice %717 {offsets = [0, 256], sizes = [8, 128], strides = [1, 1]} : vector<8x384xf32> to vector<8x128xf32>
      %737 = vector.extract_strided_slice %719 {offsets = [0, 256], sizes = [8, 128], strides = [1, 1]} : vector<8x384xf32> to vector<8x128xf32>
      %738 = arith.addf %737, %15 : vector<8x128xf32>
      %739 = arith.mulf %727, %738 : vector<8x128xf32>
      %740 = arith.addf %736, %739 : vector<8x128xf32>
      %741 = math.tanh %740 : vector<8x128xf32>
      %742 = arith.subf %713, %741 : vector<8x128xf32>
      %743 = arith.mulf %735, %742 : vector<8x128xf32>
      %744 = arith.addf %741, %743 : vector<8x128xf32>
      %c7_i32_201 = arith.constant 7 : i32
      %c8_i32_202 = arith.constant 8 : i32
      %745 = arith.muli %c7_i32_201, %c8_i32_202 : i32
      %746 = tpu.assume_multiple %745, 8 : i32
      %747 = arith.index_cast %746 : i32 to index
      %c0_203 = arith.constant 0 : index
      %748 = vector.load %arg19[%747, %c0_203] : memref<64x384xf32, #tpu.memory_space<vmem>>, vector<8x384xf32>
      %c0_204 = arith.constant 0 : index
      %c0_205 = arith.constant 0 : index
      %749 = vector.load %arg16[%c0_204, %c0_205] : memref<128x384xf32, #tpu.memory_space<vmem>>, vector<128x384xf32>
      %cst_206 = arith.constant dense<0.000000e+00> : vector<8x384xf32>
      %750 = tpu.matmul %744, %749, %cst_206 {dimension_numbers = #tpu.dot_dimension_numbers<[1], [0], [0], [1], [0, 0, 1, 1], [], []>} : vector<8x128xf32>, vector<128x384xf32>, vector<8x384xf32> -> vector<8x384xf32>
      %751 = vector.extract_strided_slice %748 {offsets = [0, 0], sizes = [8, 128], strides = [1, 1]} : vector<8x384xf32> to vector<8x128xf32>
      %752 = vector.extract_strided_slice %750 {offsets = [0, 0], sizes = [8, 128], strides = [1, 1]} : vector<8x384xf32> to vector<8x128xf32>
      %753 = arith.addf %751, %752 : vector<8x128xf32>
      %754 = arith.negf %753 : vector<8x128xf32>
      %755 = math.exp %754 : vector<8x128xf32>
      %cst_207 = arith.constant 1.000000e+00 : f32
      %756 = vector.broadcast %cst_207 : f32 to vector<8x128xf32>
      %757 = arith.addf %756, %755 : vector<8x128xf32>
      %758 = arith.divf %756, %757 : vector<8x128xf32>
      %759 = vector.extract_strided_slice %748 {offsets = [0, 128], sizes = [8, 128], strides = [1, 1]} : vector<8x384xf32> to vector<8x128xf32>
      %760 = vector.extract_strided_slice %750 {offsets = [0, 128], sizes = [8, 128], strides = [1, 1]} : vector<8x384xf32> to vector<8x128xf32>
      %761 = arith.addf %759, %760 : vector<8x128xf32>
      %762 = arith.negf %761 : vector<8x128xf32>
      %763 = math.exp %762 : vector<8x128xf32>
      %cst_208 = arith.constant 1.000000e+00 : f32
      %764 = vector.broadcast %cst_208 : f32 to vector<8x128xf32>
      %765 = arith.addf %764, %763 : vector<8x128xf32>
      %766 = arith.divf %764, %765 : vector<8x128xf32>
      %767 = vector.extract_strided_slice %748 {offsets = [0, 256], sizes = [8, 128], strides = [1, 1]} : vector<8x384xf32> to vector<8x128xf32>
      %768 = vector.extract_strided_slice %750 {offsets = [0, 256], sizes = [8, 128], strides = [1, 1]} : vector<8x384xf32> to vector<8x128xf32>
      %769 = arith.addf %768, %15 : vector<8x128xf32>
      %770 = arith.mulf %758, %769 : vector<8x128xf32>
      %771 = arith.addf %767, %770 : vector<8x128xf32>
      %772 = math.tanh %771 : vector<8x128xf32>
      %773 = arith.subf %744, %772 : vector<8x128xf32>
      %774 = arith.mulf %766, %773 : vector<8x128xf32>
      %775 = arith.addf %772, %774 : vector<8x128xf32>
      %c8_i32_209 = arith.constant 8 : i32
      %c0_210 = arith.constant 0 : index
      %c0_211 = arith.constant 0 : index
      %776 = vector.load %arg17[%c0_210, %c0_211] : memref<128x1xf32, #tpu.memory_space<vmem>>, vector<128x1xf32>
      %cst_212 = arith.constant dense<0.000000e+00> : vector<8x1xf32>
      %777 = tpu.matmul %775, %776, %cst_212 {dimension_numbers = #tpu.dot_dimension_numbers<[1], [0], [0], [1], [0, 0, 1, 1], [], []>} : vector<8x128xf32>, vector<128x1xf32>, vector<8x1xf32> -> vector<8x1xf32>
      %c0_213 = arith.constant 0 : index
      %c0_214 = arith.constant 0 : index
      %778 = vector.load %arg11[%c0_213, %c0_214] : memref<1x1xf32, #tpu.memory_space<vmem>>, vector<1x1xf32>
      %779 = vector.broadcast %778 : vector<1x1xf32> to vector<8x1xf32>
      %780 = arith.addf %777, %779 : vector<8x1xf32>
      %c0_215 = arith.constant 0 : index
      %c0_216 = arith.constant 0 : index
      %781 = vector.load %arg12[%c0_215, %c0_216] : memref<8x1xf32, #tpu.memory_space<vmem>>, vector<8x1xf32>
      tpu.vector_store %arg12[%c0_215, %c0_216], %780 {strides = array<i32>} : memref<8x1xf32, #tpu.memory_space<vmem>>, vector<8x1xf32>,
    } else {
    }
    return
  }
  func.func @transform_0(%arg0: i32) -> (i32, i32) {
    %c0_i32 = arith.constant 0 : i32
    %c0_i32_0 = arith.constant 0 : i32
    return %arg0, %c0_i32 : i32, i32
  }
  func.func @transform_6(%arg0: i32) -> (i32, i32) {
    %c0_i32 = arith.constant 0 : i32
    %c0_i32_0 = arith.constant 0 : i32
    %c0_i32_1 = arith.constant 0 : i32
    return %c0_i32, %c0_i32_0 : i32, i32
  }
  func.func @transform_7(%arg0: i32) -> (i32, i32) {
    %c0_i32 = arith.constant 0 : i32
    %c0_i32_0 = arith.constant 0 : i32
    %c0_i32_1 = arith.constant 0 : i32
    return %c0_i32, %c0_i32_0 : i32, i32
  }
  func.func @transform_8(%arg0: i32) -> (i32, i32) {
    %c0_i32 = arith.constant 0 : i32
    %c0_i32_0 = arith.constant 0 : i32
    %c0_i32_1 = arith.constant 0 : i32
    return %c0_i32, %c0_i32_0 : i32, i32
  }
  func.func @transform_9(%arg0: i32) -> (i32, i32) {
    %c0_i32 = arith.constant 0 : i32
    %c0_i32_0 = arith.constant 0 : i32
    %c0_i32_1 = arith.constant 0 : i32
    return %c0_i32, %c0_i32_0 : i32, i32
  }
  func.func @transform_10(%arg0: i32) -> (i32, i32) {
    %c0_i32 = arith.constant 0 : i32
    %c0_i32_0 = arith.constant 0 : i32
    %c0_i32_1 = arith.constant 0 : i32
    return %c0_i32, %c0_i32_0 : i32, i32
  }
  func.func @transform_11(%arg0: i32) -> (i32, i32) {
    %c0_i32 = arith.constant 0 : i32
    %c0_i32_0 = arith.constant 0 : i32
    %c0_i32_1 = arith.constant 0 : i32
    return %c0_i32, %c0_i32_0 : i32, i32
  }
}

</mosaic_0001>

<bundles_post_ra>
// kernel: tpu_custom_call.1
= control target key start
LH: loop header
LB: loop body
LE: loop exit
PB: predicated region body
PF: predicated region fallthrough
CT: control target
= control target key end

     0   :  { %s10913_s0 = inlined_call_operand.vmem [shape: f32[64,16], index: 0, kind: input, shape index: {}]   ;;  %s10914_s1 = inlined_call_operand.vmem [shape: f32[16,384], index: 1, kind: input, shape index: {}]   ;;  %s10915_s2 = inlined_call_operand.hbm [shape: f32[128,384], index: 2, kind: input, shape index: {}]   ;;  %s10916_s3 = inlined_call_operand.hbm [shape: f32[128,384], index: 3, kind: input, shape index: {}]   ;;  %s10917_s4 = inlined_call_operand.hbm [shape: f32[128,384], index: 4, kind: input, shape index: {}]   ;;  %s10918_s5 = inlined_call_operand.vmem [shape: f32[128,1], index: 5, kind: input, shape index: {}]   ;;  %s10919_s6 = inlined_call_operand.vmem [shape: f32[1,384], index: 6, kind: input, shape index: {}]   ;;  %s10920_s7 = inlined_call_operand.vmem [shape: f32[1,128], index: 7, kind: input, shape index: {}]   ;;  %s10921_s8 = inlined_call_operand.vmem [shape: f32[1,384], index: 8, kind: input, shape index: {}]   ;;  %s10922_s9 = inlined_call_operand.vmem [shape: f32[1,128], index: 9, kind: input, shape index: {}]   ;;  %s10923_s10 = inlined_call_operand.<no memory space> [shape: f32[1,1], index: 10, kind: input, shape index: {}]   ;;  %s10924_s11 = inlined_call_operand.vmem [shape: f32[8,1], index: 11, kind: output, shape index: {}]  }
   0x1   :  { %v16_v0 = vstv %s10923_s10 }
   0x2   :  { %17 = vst [vmem:[#allocation12] sm:$0x1] %v16_v0 }
   0x3   :  { %v7738_v1 = vld [vmem:[%s10914_s1] sm:$0xff]  ;;  %v7743_v2 = vld [vmem:[%s10914_s1 + $0x8] sm:$0xff]  ;;  %v7748_v3 = vld [vmem:[%s10914_s1 + $0x10] sm:$0xff] }
   0x4   :  { %v7753_v4 = vld [vmem:[%s10914_s1 + $0x18] sm:$0xff]  ;;  %v75_v5 = vld [vmem:[%s10914_s1 + $0x20] sm:$0xff]  ;;  %v7761_v6 = vld [vmem:[%s10914_s1 + $0x28] sm:$0xff] }
   0x5   :  { %86 = vsyncadd [#allocation13], 768 }
   0x6   :  { %7657 = dma.done.wait [#allocation13], 768 }
   0x7   :  { %7658 = vsyncadd [#allocation13], 4294966528 }
   0x8   :  { %s7667_s30 = smov [#allocation3]  }
   0x9   :  { %s98_s12 = sshll.u32 %s7667_s30, 4  ;;  %s99_s12 = int_to_ptr.vmem [resolvable:$true] %s98_s12 }
   0xa   :  { %s7605_s13 = scalar_lea.vmem %s99_s12, 6144  ;;  %p7610_p1 = scmp.lt.s32.totalorder %s99_s12, %s99_s12 }
   0xb   :  { %p7606_p0 = scmp.ne.s32.totalorder %s99_s12, %s7605_s13  ;;  %p7611_p2 = scmp.lt.s32.totalorder %s7605_s13, %s7605_s13 }
   0xd   :  { %p7612_p3 = por %p7611_p2, %p7610_p1 }
   0xf   :  { %p7613_p4 = pnand %p7612_p3, %p7606_p0 }
  0x11   :  { %7616 = shalt.err (!%p7613_p4)  }
  0x12   :  { %101 = dma.hbm_to_vmem [thread:$0]  %s10915_s2, 6144, %s99_s12, [#allocation15] }
  0x13   :  { %7659 = dma.done.wait [#allocation15], 6144 }
  0x14   :  { %7660 = vsyncadd [#allocation15], 4294961152 }
  0x15   :  { %s7668_s1 = smov [#allocation4]  }
  0x16   :  { %s113_s16 = sshll.u32 %s7668_s1, 4  ;;  %s114_s16 = int_to_ptr.vmem [resolvable:$true] %s113_s16 }
  0x17   :  { %s7625_s17 = scalar_lea.vmem %s114_s16, 6144  ;;  %p7630_p6 = scmp.lt.s32.totalorder %s114_s16, %s114_s16 }
  0x18   :  { %p7626_p5 = scmp.ne.s32.totalorder %s114_s16, %s7625_s17  ;;  %p7631_p7 = scmp.lt.s32.totalorder %s7625_s17, %s7625_s17 }
  0x1a   :  { %p7632_p8 = por %p7631_p7, %p7630_p6 }
  0x1c   :  { %p7633_p9 = pnand %p7632_p8, %p7626_p5 }
  0x1e   :  { %7636 = shalt.err (!%p7633_p9)  }
  0x1f   :  { %116 = dma.hbm_to_vmem [thread:$0]  %s10916_s3, 6144, %s114_s16, [#allocation20] }
  0x20   :  { %7661 = dma.done.wait [#allocation20], 6144 }
  0x21   :  { %7662 = vsyncadd [#allocation20], 4294961152 }
  0x22   :  { %s7669_s20 = smov [#allocation5]  }
  0x23   :  { %s128_s2 = sshll.u32 %s7669_s20, 4  ;;  %s129_s2 = int_to_ptr.vmem [resolvable:$true] %s128_s2 }
  0x24   :  { %s7645_s21 = scalar_lea.vmem %s129_s2, 6144  ;;  %p7650_p11 = scmp.lt.s32.totalorder %s129_s2, %s129_s2 }
  0x25   :  { %p7646_p10 = scmp.ne.s32.totalorder %s129_s2, %s7645_s21  ;;  %p7651_p12 = scmp.lt.s32.totalorder %s7645_s21, %s7645_s21 }
  0x27   :  { %p7652_p13 = por %p7651_p12, %p7650_p11 }
  0x29   :  { %p7653_p0 = pnand %p7652_p13, %p7646_p10 }
  0x2b   :  { %7656 = shalt.err (!%p7653_p0)  }
  0x2c   :  { %131 = dma.hbm_to_vmem [thread:$0]  %s10917_s4, 6144, %s129_s2, [#allocation23] }
  0x2d   :  { %7663 = dma.done.wait [#allocation23], 6144 }
  0x2e   :  { %7664 = vsyncadd [#allocation23], 4294961152 }
  0x2f   :  { %v7775_v7 = vld [vmem:[%s10918_s5] sm:$0xff]  ;;  %v7780_v8 = vld [vmem:[%s10918_s5 + $0x8] sm:$0xff]  ;;  %v7785_v9 = vld [vmem:[%s10918_s5 + $0x10] sm:$0xff] }
  0x30   :  { %11114 = vst [vmem:[#allocation33_spill] sm:$0xff] %v7775_v7  ;;  %11115 = vst [vmem:[#allocation34_spill] sm:$0xff] %v7780_v8  ;;  %v7790_v10 = vld [vmem:[%s10918_s5 + $0x18] sm:$0xff]  ;;  %v7795_v11 = vld [vmem:[%s10918_s5 + $0x20] sm:$0xff] }
  0x31   :  { %11116 = vst [vmem:[#allocation35_spill] sm:$0xff] %v7785_v9  ;;  %11117 = vst [vmem:[#allocation36_spill] sm:$0xff] %v7790_v10  ;;  %v7800_v12 = vld [vmem:[%s10918_s5 + $0x28] sm:$0xff]  ;;  %v7805_v13 = vld [vmem:[%s10918_s5 + $0x30] sm:$0xff] }
  0x32   :  { %11118 = vst [vmem:[#allocation37_spill] sm:$0xff] %v7795_v11  ;;  %11119 = vst [vmem:[#allocation38_spill] sm:$0xff] %v7800_v12  ;;  %v7810_v14 = vld [vmem:[%s10918_s5 + $0x38] sm:$0xff]  ;;  %v7815_v15 = vld [vmem:[%s10918_s5 + $0x40] sm:$0xff] }
  0x33   :  { %11120 = vst [vmem:[#allocation39_spill] sm:$0xff] %v7805_v13  ;;  %11121 = vst [vmem:[#allocation40_spill] sm:$0xff] %v7810_v14  ;;  %v7820_v16 = vld [vmem:[%s10918_s5 + $0x48] sm:$0xff]  ;;  %v7825_v17 = vld [vmem:[%s10918_s5 + $0x50] sm:$0xff] }
  0x34   :  { %11122 = vst [vmem:[#allocation41_spill] sm:$0xff] %v7815_v15  ;;  %11123 = vst [vmem:[#allocation42_spill] sm:$0xff] %v7820_v16  ;;  %v7830_v18 = vld [vmem:[%s10918_s5 + $0x58] sm:$0xff]  ;;  %v7835_v19 = vld [vmem:[%s10918_s5 + $0x60] sm:$0xff] }
  0x35   :  { %11124 = vst [vmem:[#allocation43_spill] sm:$0xff] %v7825_v17  ;;  %11125 = vst [vmem:[#allocation44_spill] sm:$0xff] %v7830_v18  ;;  %v7840_v20 = vld [vmem:[%s10918_s5 + $0x68] sm:$0xff]  ;;  %v7845_v21 = vld [vmem:[%s10918_s5 + $0x70] sm:$0xff] }
  0x36   :  { %11126 = vst [vmem:[#allocation45_spill] sm:$0xff] %v7835_v19  ;;  %11127 = vst [vmem:[#allocation46_spill] sm:$0xff] %v7840_v20  ;;  %v7850_v22 = vld [vmem:[%s10918_s5 + $0x78] sm:$0xff] }
  0x37   :  { %11128 = vst [vmem:[#allocation47_spill] sm:$0xff] %v7845_v21  ;;  %11129 = vst [vmem:[#allocation48_spill] sm:$0xff] %v7850_v22 }
  0x38   :  { %208 = vsyncadd [#allocation26], 2048 }
  0x39   :  { %7665 = dma.done.wait [#allocation26], 2048 }
  0x3a   :  { %7666 = vsyncadd [#allocation26], 4294965248  ;;  %322 = vmatprep.subr.mxu0 %v75_v5  ;;  %6363 = vmatprep.subr.mxu1 %v7761_v6  ;;  %v10925_v23 = vmov 0.0   ;;  %v238_v24 = vld [vmem:[%s10913_s0] sm:$0xff]  ;;  %vm269_vm0 = vcmask 130048   ;;  %v7858_v25 = vld [vmem:[#allocation3 + $0x170] sm:$0xff] }
  0x3b   :  { %323 = vmatpush1.msra.mxu0 %v7753_v4  ;;  %358 = vmatprep.mubr.f32.mxu0 %v10925_v23  ;;  %v7861_v26 = vld [vmem:[#allocation3 + $0x168] sm:$0xff]  ;;  %v7865_v27 = vld [vmem:[#allocation3 + $0x158] sm:$0xff]  ;;  %v7870_v28 = vld [vmem:[#allocation3 + $0x150] sm:$0xff]  ;;  %vm7671_vm1 = vmmov 0   ;;  %vm5801_vm2 = vcmask 7168  }
  0x3c   :  { %324 = vmatprep.subr.mxu0 %v7743_v2  ;;  %6364 = vmatpush3.msra.mxu1 %v7761_v6  ;;  %v239_v29 = vld [vmem:[%s10913_s0 + $0x8] sm:$0xff]  ;;  %v7877_v30 = vld [vmem:[#allocation3 + $0x140] sm:$0xff]  ;;  %v7880_v31 = vld [vmem:[#allocation3 + $0x138] sm:$0xff] }
  0x3d   :  { %325 = vmatpush1.msra.mxu0 %v7738_v1  ;;  %6365 = vmatprep.subr.mxu1 %v7748_v3  ;;  %v7884_v32 = vld [vmem:[#allocation3 + $0x128] sm:$0xff]  ;;  %v7889_v33 = vld [vmem:[#allocation3 + $0x120] sm:$0xff]  ;;  %v7896_v34 = vld [vmem:[%s10913_s0 + $0x10] sm:$0xff] }
  0x3e   :  { %5837 = vmatmul.mubr.msk.f32.vlgmr.msra.gmra.mxu0 %vm269_vm0, %v238_v24  ;;  %606 = vmatprep.subr.mxu0 %v7858_v25  ;;  %v7898_v35 = vld [vmem:[#allocation3 + $0x110] sm:$0xff]  ;;  %v7901_v36 = vld [vmem:[#allocation3 + $0x108] sm:$0xff]  ;;  %v7905_v37 = vld [vmem:[#allocation3 + $0xf8] sm:$0xff] }
  0x3f   :  { %607 = vmatpush1.msra.mxu0 %v7861_v26  ;;  %364 = vmatprep.mubr.f32.mxu0 %v10925_v23  ;;  %v7911_v38 = vld [vmem:[#allocation3 + $0xf0] sm:$0xff]  ;;  %v7918_v39 = vld [vmem:[%s10913_s0 + $0x18] sm:$0xff]  ;;  %v7920_v40 = vld [vmem:[#allocation3 + $0xe0] sm:$0xff] }
  0x40   :  { %608 = vmatprep.subr.mxu0 %v7865_v27  ;;  %6366 = vmatpush3.msra.mxu1 %v7748_v3  ;;  %v7922_v41 = vld [vmem:[#allocation3 + $0x178] sm:$0xff]  ;;  %v7929_v43 = vld [vmem:[#allocation3 + $0xc8] sm:$0xff]  ;;  %v7932_v44 = vld [vmem:[#allocation3 + $0x160] sm:$0xff] }
  0x41   :  { %609 = vmatpush1.msra.mxu0 %v7870_v28  ;;  %6367 = vmatprep.mubr.msk.f32.mxu1 %vm269_vm0, %v238_v24  ;;  %v7925_v42 = vld [vmem:[#allocation3 + $0xd8] sm:$0xff]  ;;  %v7937_v45 = vld [vmem:[#allocation3 + $0xc0] sm:$0xff]  ;;  %v7946_v47 = vld [vmem:[#allocation3 + $0xb0] sm:$0xff] }
  0x42   :  { %5838 = vmatmul.mubr.msk.f32.gmra.mxu0 %vm269_vm0, %v239_v29  ;;  %610 = vmatprep.subr.mxu0 %v7877_v30  ;;  %v7944_v46 = vld [vmem:[%s10913_s0 + $0x20] sm:$0xff]  ;;  %v7949_v48 = vld [vmem:[#allocation3 + $0xa8] sm:$0xff]  ;;  %v7953_v49 = vld [vmem:[#allocation3 + $0x98] sm:$0xff] }
  0x43   :  { %611 = vmatpush1.msra.mxu0 %v7880_v31  ;;  %370 = vmatprep.mubr.f32.mxu0 %v10925_v23  ;;  %v7956_v50 = vld [vmem:[#allocation3 + $0x148] sm:$0xff]  ;;  %v7961_v51 = vld [vmem:[#allocation3 + $0x90] sm:$0xff]  ;;  %v7970_v53 = vld [vmem:[#allocation3 + $0x80] sm:$0xff] }
  0x44   :  { %612 = vmatprep.subr.mxu0 %v7884_v32  ;;  %6379 = vmatprep.subr.mxu1 %v10925_v23  ;;  %v7968_v52 = vld [vmem:[%s10913_s0 + $0x28] sm:$0xff]  ;;  %v7973_v54 = vld [vmem:[#allocation3 + $0x78] sm:$0xff]  ;;  %v7980_v56 = vld [vmem:[#allocation3 + $0x130] sm:$0xff] }
  0x45   :  { %613 = vmatpush1.msra.mxu0 %v7889_v33  ;;  %6368 = vmatmul.mubr.msk.f32.vlgmr.msra.gmra.mxu1 %vm269_vm0, %v239_v29  ;;  %v7977_v55 = vld [vmem:[#allocation3 + $0x68] sm:$0xff]  ;;  %v7985_v57 = vld [vmem:[#allocation3 + $0x60] sm:$0xff]  ;;  %v7992_v58 = vld [vmem:[%s10913_s0 + $0x30] sm:$0xff] }
  0x46   :  { %5839 = vmatmul.mubr.msk.f32.gmra.mxu0 %vm269_vm0, %v7896_v34  ;;  %614 = vmatprep.subr.mxu0 %v7898_v35  ;;  %v7994_v59 = vld [vmem:[#allocation3 + $0x50] sm:$0xff]  ;;  %v7997_v60 = vld [vmem:[#allocation3 + $0x48] sm:$0xff]  ;;  %v8001_v61 = vld [vmem:[#allocation3 + $0x38] sm:$0xff] }
  0x47   :  { %615 = vmatpush1.msra.mxu0 %v7901_v36  ;;  %376 = vmatprep.mubr.f32.mxu0 %v10925_v23  ;;  %v8004_v62 = vld [vmem:[#allocation3 + $0x118] sm:$0xff]  ;;  %v8009_v63 = vld [vmem:[#allocation3 + $0x30] sm:$0xff]  ;;  %v8018_v1 = vld [vmem:[#allocation3 + $0x20] sm:$0xff] }
  0x48   :  { %616 = vmatprep.subr.mxu0 %v7905_v37  ;;  %6380 = vmatpush3.msra.mxu1 %v7922_v41  ;;  %v8016_v0 = vld [vmem:[%s10913_s0 + $0x38] sm:$0xff]  ;;  %v8025_v3 = vld [vmem:[#allocation3 + $0x8] sm:$0xff]  ;;  %v8028_v4 = vld [vmem:[#allocation3 + $0x100] sm:$0xff] }
  0x49   :  { %617 = vmatpush1.msra.mxu0 %v7911_v38  ;;  %6381 = vmatprep.subr.mxu1 %v10925_v23  ;;  %v8021_v2 = vld [vmem:[#allocation3 + $0x18] sm:$0xff]  ;;  %v8033_v5 = vld [vmem:[#allocation3] sm:$0xff]  ;;  %v8037_v6 = vld [vmem:[#allocation5 + $0x170] sm:$0xff] }
  0x4a   :  { %5840 = vmatmul.mubr.msk.f32.gmra.mxu0 %vm269_vm0, %v7918_v39  ;;  %618 = vmatprep.subr.mxu0 %v7920_v40  ;;  %v8040_v24 = vld [vmem:[#allocation5 + $0x168] sm:$0xff]  ;;  %v8046_v7 = vld [vmem:[#allocation5 + $0x158] sm:$0xff]  ;;  %v8051_v8 = vld [vmem:[#allocation5 + $0x150] sm:$0xff] }
  0x4b   :  { %619 = vmatpush1.msra.mxu0 %v7925_v42  ;;  %382 = vmatprep.mubr.f32.mxu0 %v10925_v23  ;;  %v8043_v29 = vld [vmem:[#allocation3 + $0xe8] sm:$0xff]  ;;  %v8053_v9 = vld [vmem:[#allocation3 + $0xd0] sm:$0xff]  ;;  %v8056_v10 = vld [vmem:[#allocation5 + $0x140] sm:$0xff] }
  0x4c   :  { %620 = vmatprep.subr.mxu0 %v7929_v43  ;;  %6382 = vmatpush3.msra.mxu1 %v7932_v44  ;;  %v8060_v11 = vld [vmem:[#allocation5 + $0x138] sm:$0xff]  ;;  %v8066_v13 = vld [vmem:[#allocation5 + $0x128] sm:$0xff]  ;;  %v8070_v14 = vld [vmem:[#allocation5 + $0x120] sm:$0xff] }
  0x4d   :  { %621 = vmatpush1.msra.mxu0 %v7937_v45  ;;  %6383 = vmatprep.subr.mxu1 %v10925_v23  ;;  %v8063_v12 = vld [vmem:[#allocation3 + $0xb8] sm:$0xff]  ;;  %v8074_v15 = vld [vmem:[#allocation5 + $0x110] sm:$0xff]  ;;  %v8077_v16 = vld [vmem:[#allocation3 + $0xa0] sm:$0xff] }
  0x4e   :  { %5841 = vmatmul.mubr.msk.f32.gmra.mxu0 %vm269_vm0, %v7944_v46  ;;  %622 = vmatprep.subr.mxu0 %v7946_v47  ;;  %11130 = vst [vmem:[#allocation49_spill] sm:$0xff] %v8074_v15  ;;  %v8080_v17 = vld [vmem:[#allocation5 + $0x108] sm:$0xff]  ;;  %v8084_v18 = vld [vmem:[#allocation5 + $0xf8] sm:$0xff]  ;;  %v8089_v19 = vld [vmem:[#allocation5 + $0xf0] sm:$0xff] }
  0x4f   :  { %623 = vmatpush1.msra.mxu0 %v7949_v48  ;;  %388 = vmatprep.mubr.f32.mxu0 %v10925_v23  ;;  %11131 = vst [vmem:[#allocation50_spill] sm:$0xff] %v8080_v17  ;;  %11132 = vst [vmem:[#allocation51_spill] sm:$0xff] %v8084_v18  ;;  %v8092_v20 = vld [vmem:[#allocation3 + $0x88] sm:$0xff]  ;;  %v8095_v21 = vld [vmem:[#allocation5 + $0xe0] sm:$0xff] }
  0x50   :  { %624 = vmatprep.subr.mxu0 %v7953_v49  ;;  %6384 = vmatpush3.msra.mxu1 %v7956_v50  ;;  %11133 = vst [vmem:[#allocation52_spill] sm:$0xff] %v8089_v19  ;;  %11134 = vst [vmem:[#allocation53_spill] sm:$0xff] %v8095_v21  ;;  %v8104_v22 = vld [vmem:[#allocation5 + $0xc8] sm:$0xff] }
  0x51   :  { %625 = vmatpush1.msra.mxu0 %v7961_v51  ;;  %6385 = vmatprep.subr.mxu1 %v10925_v23  ;;  %11137 = vst [vmem:[#allocation55_spill] sm:$0xff] %v8104_v22 }
  0x52   :  { %5842 = vmatmul.mubr.msk.f32.gmra.mxu0 %vm269_vm0, %v7968_v52  ;;  %626 = vmatprep.subr.mxu0 %v7970_v53 }
  0x53   :  { %627 = vmatpush1.msra.mxu0 %v7973_v54  ;;  %394 = vmatprep.mubr.f32.mxu0 %v10925_v23 }
  0x54   :  { %628 = vmatprep.subr.mxu0 %v7977_v55  ;;  %6386 = vmatpush3.msra.mxu1 %v7980_v56 }
  0x55   :  { %629 = vmatpush1.msra.mxu0 %v7985_v57  ;;  %6387 = vmatprep.subr.mxu1 %v10925_v23 }
  0x56   :  { %5843 = vmatmul.mubr.msk.f32.gmra.mxu0 %vm269_vm0, %v7992_v58  ;;  %630 = vmatprep.subr.mxu0 %v7994_v59 }
  0x57   :  { %631 = vmatpush1.msra.mxu0 %v7997_v60  ;;  %400 = vmatprep.mubr.f32.mxu0 %v10925_v23 }
  0x58   :  { %632 = vmatprep.subr.mxu0 %v8001_v61  ;;  %6388 = vmatpush3.msra.mxu1 %v8004_v62 }
  0x59   :  { %633 = vmatpush1.msra.mxu0 %v8009_v63  ;;  %6389 = vmatprep.subr.mxu1 %v10925_v23 }
  0x5a   :  { %5844 = vmatmul.mubr.msk.f32.gmra.mxu0 %vm269_vm0, %v8016_v0  ;;  %634 = vmatprep.subr.mxu0 %v8018_v1 }
  0x5b   :  { %635 = vmatpush1.msra.mxu0 %v8021_v2  ;;  %670 = vmatprep.mubr.f32.mxu0 %v10925_v23 }
  0x5c   :  { %636 = vmatprep.subr.mxu0 %v8025_v3  ;;  %6390 = vmatpush3.msra.mxu1 %v8028_v4 }
  0x5d   :  { %637 = vmatpush1.msra.mxu0 %v8033_v5  ;;  %6391 = vmatprep.subr.mxu1 %v10925_v23 }
  0x5e   :  { %671 = vmatmul.mubr.f32.vlgmr.msra.gmra.mxu0 %v10925_v23  ;;  %822 = vmatprep.subr.mxu0 %v8037_v6 }
  0x5f   :  { %823 = vmatpush1.msra.mxu0 %v8040_v24  ;;  %6392 = vmatpush3.msra.mxu1 %v8043_v29 }
  0x60   :  { %824 = vmatprep.subr.mxu0 %v8046_v7  ;;  %6393 = vmatprep.subr.mxu1 %v10925_v23 }
  0x61   :  { %825 = vmatpush1.msra.mxu0 %v8051_v8  ;;  %6394 = vmatpush3.msra.mxu1 %v8053_v9 }
  0x62   :  { %826 = vmatprep.subr.mxu0 %v8056_v10  ;;  %6395 = vmatprep.subr.mxu1 %v10925_v23 }
  0x63   :  { %827 = vmatpush1.msra.mxu0 %v8060_v11  ;;  %6396 = vmatpush3.msra.mxu1 %v8063_v12 }
  0x64   :  { %828 = vmatprep.subr.mxu0 %v8066_v13  ;;  %6397 = vmatprep.subr.mxu1 %v10925_v23  ;;  %v8100_v23 = vld [vmem:[#allocation5 + $0xd8] sm:$0xff] }
  0x65   :  { %829 = vmatpush1.msra.mxu0 %v8070_v14  ;;  %6370 = vmatprep.mubr.msk.f32.mxu1 %vm269_vm0, %v7896_v34  ;;  %11135 = vst [vmem:[#allocation54_spill] sm:$0xff] %v8100_v23  ;;  %v11136_v34 = vmov 0.0  }
  0x66   :  { %830 = vmatprep.subr.mxu0 %v8074_v15  ;;  %6398 = vmatpush3.msra.mxu1 %v8077_v16  ;;  %v8107_v15 = vld [vmem:[#allocation3 + $0x70] sm:$0xff] }
  0x67   :  { %831 = vmatpush1.msra.mxu0 %v8080_v17  ;;  %6371 = vmatmul.mubr.msk.f32.gmra.mxu1 %vm269_vm0, %v7918_v39  ;;  %v8110_v17 = vld [vmem:[#allocation5 + $0xc0] sm:$0xff]  ;;  %v8114_v39 = vld [vmem:[#allocation5 + $0xb0] sm:$0xff] }
  0x68   :  { %832 = vmatprep.subr.mxu0 %v8084_v18  ;;  %6399 = vmatprep.subr.mxu1 %v11136_v34  ;;  %11138 = vst [vmem:[#allocation56_spill] sm:$0xff] %v8110_v17  ;;  %11139 = vst [vmem:[#allocation57_spill] sm:$0xff] %v8114_v39  ;;  %v8122_v18 = vld [vmem:[#allocation3 + $0x58] sm:$0xff] }
  0x69   :  { %833 = vmatpush1.msra.mxu0 %v8089_v19  ;;  %6400 = vmatpush3.msra.mxu1 %v8092_v20  ;;  %v8119_v19 = vld [vmem:[#allocation5 + $0xa8] sm:$0xff] }
  0x6a   :  { %834 = vmatprep.subr.mxu0 %v8095_v21  ;;  %6401 = vmatprep.subr.mxu1 %v11136_v34  ;;  %11140 = vst [vmem:[#allocation58_spill] sm:$0xff] %v8119_v19  ;;  %v8125_v21 = vld [vmem:[#allocation5 + $0x98] sm:$0xff] }
  0x6b   :  { %835 = vmatpush1.msra.mxu0 %v8100_v23  ;;  %6373 = vmatprep.mubr.msk.f32.mxu1 %vm269_vm0, %v7944_v46  ;;  %11141 = vst [vmem:[#allocation59_spill] sm:$0xff] %v8125_v21  ;;  %v8130_v23 = vld [vmem:[#allocation5 + $0x90] sm:$0xff]  ;;  %v8134_v46 = vld [vmem:[#allocation5 + $0x80] sm:$0xff] }
  0x6c   :  { %836 = vmatprep.subr.mxu0 %v8104_v22  ;;  %6402 = vmatpush3.msra.mxu1 %v8107_v15  ;;  %11142 = vst [vmem:[#allocation60_spill] sm:$0xff] %v8130_v23  ;;  %11143 = vst [vmem:[#allocation61_spill] sm:$0xff] %v8134_v46  ;;  %v8137_v22 = vld [vmem:[#allocation3 + $0x40] sm:$0xff] }
  0x6d   :  { %837 = vmatpush1.msra.mxu0 %v8110_v17  ;;  %6374 = vmatmul.mubr.msk.f32.gmra.mxu1 %vm269_vm0, %v7968_v52  ;;  %v8140_v17 = vld [vmem:[#allocation5 + $0x78] sm:$0xff]  ;;  %v8144_v52 = vld [vmem:[#allocation5 + $0x68] sm:$0xff] }
  0x6e   :  { %838 = vmatprep.subr.mxu0 %v8114_v39  ;;  %6403 = vmatprep.subr.mxu1 %v11136_v34  ;;  %11144 = vst [vmem:[#allocation62_spill] sm:$0xff] %v8140_v17  ;;  %11145 = vst [vmem:[#allocation63_spill] sm:$0xff] %v8144_v52  ;;  %v8152_v39 = vld [vmem:[#allocation3 + $0x28] sm:$0xff] }
  0x6f   :  { %839 = vmatpush1.msra.mxu0 %v8119_v19  ;;  %6404 = vmatpush3.msra.mxu1 %v8122_v18  ;;  %v8150_v19 = vld [vmem:[#allocation5 + $0x60] sm:$0xff] }
  0x70   :  { %840 = vmatprep.subr.mxu0 %v8125_v21  ;;  %6405 = vmatprep.subr.mxu1 %v11136_v34  ;;  %11146 = vst [vmem:[#allocation64_spill] sm:$0xff] %v8150_v19  ;;  %v8157_v21 = vld [vmem:[#allocation5 + $0x50] sm:$0xff] }
  0x71   :  { %841 = vmatpush1.msra.mxu0 %v8130_v23  ;;  %6376 = vmatprep.mubr.msk.f32.mxu1 %vm269_vm0, %v7992_v58  ;;  %11147 = vst [vmem:[#allocation65_spill] sm:$0xff] %v8157_v21  ;;  %v8161_v58 = vld [vmem:[#allocation5 + $0x48] sm:$0xff]  ;;  %v8167_v23 = vld [vmem:[#allocation5 + $0x38] sm:$0xff] }
  0x72   :  { %842 = vmatprep.subr.mxu0 %v8134_v46  ;;  %6406 = vmatpush3.msra.mxu1 %v8137_v22  ;;  %11148 = vst [vmem:[#allocation66_spill] sm:$0xff] %v8161_v58  ;;  %v8163_v46 = vld [vmem:[#allocation3 + $0x10] sm:$0xff]  ;;  %11149 = vst [vmem:[#allocation67_spill] sm:$0xff] %v8167_v23 }
  0x73   :  { %843 = vmatpush1.msra.mxu0 %v8140_v17  ;;  %6377 = vmatmul.mubr.msk.f32.gmra.mxu1 %vm269_vm0, %v8016_v0  ;;  %v8171_v0 = vld [vmem:[#allocation5 + $0x30] sm:$0xff]  ;;  %v8186_v17 = vld [vmem:[#allocation5 + $0x178] sm:$0xff] }
  0x74   :  { %844 = vmatprep.subr.mxu0 %v8144_v52  ;;  %6407 = vmatprep.subr.mxu1 %v11136_v34  ;;  %11150 = vst [vmem:[#allocation68_spill] sm:$0xff] %v8171_v0  ;;  %v8175_v52 = vld [vmem:[#allocation5 + $0x20] sm:$0xff] }
  0x75   :  { %845 = vmatpush1.msra.mxu0 %v8150_v19  ;;  %6408 = vmatpush3.msra.mxu1 %v8152_v39  ;;  %v8180_v19 = vld [vmem:[#allocation5 + $0x18] sm:$0xff] }
  0x76   :  { %846 = vmatprep.subr.mxu0 %v8157_v21  ;;  %6409 = vmatprep.subr.mxu1 %v11136_v34  ;;  %11151 = vst [vmem:[#allocation69_spill] sm:$0xff] %v8180_v19  ;;  %v8184_v21 = vld [vmem:[#allocation5 + $0x8] sm:$0xff] }
  0x77   :  { %847 = vmatpush1.msra.mxu0 %v8161_v58  ;;  %6410 = vmatpush3.msra.mxu1 %v8163_v46  ;;  %11152 = vst [vmem:[#allocation70_spill] sm:$0xff] %v8184_v21  ;;  %v8190_v58 = vld [vmem:[#allocation5] sm:$0xff] }
  0x78   :  { %848 = vmatprep.subr.mxu0 %v8167_v23  ;;  %6411 = vmatprep.mubr.msk.f32.mxu1 %vm7671_vm1, %v11136_v34  ;;  %11153 = vst [vmem:[#allocation71_spill] sm:$0xff] %v8190_v58  ;;  %v8194_v23 = vld [vmem:[#allocation5 + $0x160] sm:$0xff] }
  0x79   :  { %849 = vmatpush1.msra.mxu0 %v8171_v0  ;;  %6412 = vmatmul.mubr.f32.vlgmr.msra.gmra.mxu1 %v11136_v34  ;;  %v8200_v0 = vld [vmem:[#allocation5 + $0x148] sm:$0xff] }
  0x7a   :  { %850 = vmatprep.subr.mxu0 %v8175_v52  ;;  %6414 = vmatprep.subr.mxu1 %v11136_v34 }
  0x7b   :  { %851 = vmatpush1.msra.mxu0 %v8180_v19  ;;  %886 = vmatprep.mubr.f32.mxu0 %v11136_v34  ;;  %v8205_v19 = vld [vmem:[#allocation5 + $0x130] sm:$0xff] }
  0x7c   :  { %852 = vmatprep.subr.mxu0 %v8184_v21  ;;  %6415 = vmatpush3.msra.mxu1 %v8186_v17  ;;  %v8218_v21 = vld [vmem:[#allocation5 + $0x100] sm:$0xff] }
  0x7d   :  { %853 = vmatpush1.msra.mxu0 %v8190_v58  ;;  %6416 = vmatprep.subr.mxu1 %v11136_v34  ;;  %v8212_v58 = vld [vmem:[#allocation5 + $0x118] sm:$0xff] }
  0x7e   :  { %887 = vmatmul.mubr.f32.vlgmr.msra.gmra.mxu0 %v11136_v34  ;;  %6417 = vmatpush3.msra.mxu1 %v8194_v23 }
  0x7f   :  { %6418 = vmatprep.subr.mxu1 %v11136_v34  ;;  %6446 = vmatprep.mubr.msk.f32.mxu1 %vm7671_vm1, %v11136_v34 }
  0x80   :  { %6419 = vmatpush3.msra.mxu1 %v8200_v0  ;;  %1038 = vmatprep.subr.mxu0 %v7858_v25  ;;  %v8224_v25 = vld [vmem:[#allocation5 + $0xe8] sm:$0xff] }
  0x81   :  { %6420 = vmatprep.subr.mxu1 %v11136_v34  ;;  %1039 = vmatpush1.msra.mxu0 %v7861_v26  ;;  %v8230_v26 = vld [vmem:[#allocation5 + $0xd0] sm:$0xff] }
  0x82   :  { %6421 = vmatpush3.msra.mxu1 %v8205_v19  ;;  %1040 = vmatprep.subr.mxu0 %v7865_v27  ;;  %v8236_v27 = vld [vmem:[#allocation5 + $0xb8] sm:$0xff] }
  0x83   :  { %6422 = vmatprep.subr.mxu1 %v11136_v34  ;;  %1041 = vmatpush1.msra.mxu0 %v7870_v28  ;;  %v8242_v28 = vld [vmem:[#allocation5 + $0xa0] sm:$0xff] }
  0x84   :  { %6423 = vmatpush3.msra.mxu1 %v8212_v58  ;;  %1042 = vmatprep.subr.mxu0 %v7877_v30  ;;  %v8248_v30 = vld [vmem:[#allocation5 + $0x88] sm:$0xff] }
  0x85   :  { %6424 = vmatprep.subr.mxu1 %v11136_v34  ;;  %1043 = vmatpush1.msra.mxu0 %v7880_v31  ;;  %v8254_v31 = vld [vmem:[#allocation5 + $0x70] sm:$0xff] }
  0x86   :  { %6425 = vmatpush3.msra.mxu1 %v8218_v21  ;;  %1044 = vmatprep.subr.mxu0 %v7884_v32  ;;  %v8260_v32 = vld [vmem:[#allocation5 + $0x58] sm:$0xff] }
  0x87   :  { %6426 = vmatprep.subr.mxu1 %v11136_v34  ;;  %1045 = vmatpush1.msra.mxu0 %v7889_v33  ;;  %v8266_v33 = vld [vmem:[#allocation5 + $0x40] sm:$0xff] }
  0x88   :  { %6427 = vmatpush3.msra.mxu1 %v8224_v25  ;;  %1046 = vmatprep.subr.mxu0 %v7898_v35  ;;  %v8272_v35 = vld [vmem:[#allocation5 + $0x28] sm:$0xff] }
  0x89   :  { %6428 = vmatprep.subr.mxu1 %v11136_v34  ;;  %1047 = vmatpush1.msra.mxu0 %v7901_v36  ;;  %v8278_v36 = vld [vmem:[#allocation5 + $0x10] sm:$0xff] }
  0x8a   :  { %6429 = vmatpush3.msra.mxu1 %v8230_v26  ;;  %1048 = vmatprep.subr.mxu0 %v7905_v37 }
  0x8b   :  { %6430 = vmatprep.subr.mxu1 %v11136_v34  ;;  %1049 = vmatpush1.msra.mxu0 %v7911_v38 }
  0x8c   :  { %6431 = vmatpush3.msra.mxu1 %v8236_v27  ;;  %1050 = vmatprep.subr.mxu0 %v7920_v40 }
  0x8d   :  { %6432 = vmatprep.subr.mxu1 %v11136_v34  ;;  %1051 = vmatpush1.msra.mxu0 %v7925_v42 }
  0x8e   :  { %6433 = vmatpush3.msra.mxu1 %v8242_v28  ;;  %1052 = vmatprep.subr.mxu0 %v7929_v43 }
  0x8f   :  { %6434 = vmatprep.subr.mxu1 %v11136_v34  ;;  %1053 = vmatpush1.msra.mxu0 %v7937_v45 }
  0x90   :  { %6435 = vmatpush3.msra.mxu1 %v8248_v30  ;;  %1054 = vmatprep.subr.mxu0 %v7946_v47 }
  0x91   :  { %6436 = vmatprep.subr.mxu1 %v11136_v34  ;;  %1055 = vmatpush1.msra.mxu0 %v7949_v48 }
  0x92   :  { %6437 = vmatpush3.msra.mxu1 %v8254_v31  ;;  %1056 = vmatprep.subr.mxu0 %v7953_v49 }
  0x93   :  { %6438 = vmatprep.subr.mxu1 %v11136_v34  ;;  %1057 = vmatpush1.msra.mxu0 %v7961_v51 }
  0x94   :  { %6439 = vmatpush3.msra.mxu1 %v8260_v32  ;;  %1058 = vmatprep.subr.mxu0 %v7970_v53 }
  0x95   :  { %6440 = vmatprep.subr.mxu1 %v11136_v34  ;;  %1059 = vmatpush1.msra.mxu0 %v7973_v54 }
  0x96   :  { %6441 = vmatpush3.msra.mxu1 %v8266_v33  ;;  %1060 = vmatprep.subr.mxu0 %v7977_v55 }
  0x97   :  { %6442 = vmatprep.subr.mxu1 %v11136_v34  ;;  %1061 = vmatpush1.msra.mxu0 %v7985_v57 }
  0x98   :  { %6443 = vmatpush3.msra.mxu1 %v8272_v35  ;;  %1062 = vmatprep.subr.mxu0 %v7994_v59 }
  0x99   :  { %6444 = vmatprep.subr.mxu1 %v11136_v34  ;;  %1063 = vmatpush1.msra.mxu0 %v7997_v60 }
  0x9a   :  { %6445 = vmatpush3.msra.mxu1 %v8278_v36  ;;  %1064 = vmatprep.subr.mxu0 %v8001_v61 }
  0x9b   :  { %6447 = vmatmul.mubr.f32.vlgmr.msra.gmra.mxu1 %v11136_v34  ;;  %6449 = vmatprep.subr.mxu1 %v11136_v34 }
  0x9c   :  { %6450 = vmatpush3.msra.mxu1 %v7922_v41  ;;  %1065 = vmatpush1.msra.mxu0 %v8009_v63 }
  0x9d   :  { %6451 = vmatprep.subr.mxu1 %v11136_v34  ;;  %1066 = vmatprep.subr.mxu0 %v8018_v1 }
  0x9e   :  { %6452 = vmatpush3.msra.mxu1 %v7932_v44  ;;  %1067 = vmatpush1.msra.mxu0 %v8021_v2 }
  0x9f   :  { %6453 = vmatprep.subr.mxu1 %v11136_v34  ;;  %1068 = vmatprep.subr.mxu0 %v8025_v3 }
  0xa0   :  { %6454 = vmatpush3.msra.mxu1 %v7956_v50  ;;  %1069 = vmatpush1.msra.mxu0 %v8033_v5 }
  0xa1   :  { %6455 = vmatprep.subr.mxu1 %v11136_v34  ;;  %1102 = vmatprep.mubr.f32.mxu0 %v11136_v34 }
  0xa2   :  { %6456 = vmatpush3.msra.mxu1 %v7980_v56  ;;  %6481 = vmatprep.mubr.msk.f32.mxu1 %vm7671_vm1, %v11136_v34 }
  0xa3   :  { %6457 = vmatprep.subr.mxu1 %v11136_v34  ;;  %1255 = vmatprep.subr.mxu0 %v8037_v6 }
  0xa4   :  { %6458 = vmatpush3.msra.mxu1 %v8004_v62 }
  0xa5   :  { %6459 = vmatprep.subr.mxu1 %v11136_v34 }
  0xa6   :  { %6460 = vmatpush3.msra.mxu1 %v8028_v4 }
  0xa7   :  { %6461 = vmatprep.subr.mxu1 %v11136_v34 }
  0xa8   :  { %6462 = vmatpush3.msra.mxu1 %v8043_v29 }
  0xa9   :  { %6463 = vmatprep.subr.mxu1 %v11136_v34 }
  0xaa   :  { %6464 = vmatpush3.msra.mxu1 %v8053_v9  ;;  %v254_v9 = vlaneseq }
  0xab   :  { %6465 = vmatprep.subr.mxu1 %v11136_v34 }
  0xac   :  { %6466 = vmatpush3.msra.mxu1 %v8063_v12  ;;  %v8330_v12 = vshrl.u32 %v254_v9, 7 }
  0xad   :  { %6467 = vmatprep.subr.mxu1 %v11136_v34 }
  0xae   :  { %6468 = vmatpush3.msra.mxu1 %v8077_v16  ;;  %11154 = vst [vmem:[#allocation72_spill] sm:$0xff] %v8330_v12  ;;  %v252_v16 = vld [vmem:[%s10919_s6] sm:$0x7] }
  0xaf   :  { %6469 = vmatprep.subr.mxu1 %v11136_v34 }
  0xb0   :  { %6470 = vmatpush3.msra.mxu1 %v8092_v20  ;;  %v10950_v20 = vsub.s32 2, %v8330_v12 }
  0xb1   :  { %6471 = vmatprep.subr.mxu1 %v11136_v34 }
  0xb2   :  { %6472 = vmatpush3.msra.mxu1 %v8107_v15  ;;  %v10952_v15 = vsub.s32 0, %v8330_v12  ;;  %v8342_v41 = vrot.slane %v252_v16, %v10950_v20 }
  0xb3   :  { %6473 = vmatprep.subr.mxu1 %v11136_v34 }
  0xb4   :  { %6474 = vmatpush3.msra.mxu1 %v8122_v18  ;;  %v257_v38 = vrot.slane %v252_v16, %v10952_v15 }
  0xb5   :  { %6475 = vmatprep.subr.mxu1 %v11136_v34 }
  0xb6   :  { %6476 = vmatpush3.msra.mxu1 %v8137_v22  ;;  %v10951_v22 = vsub.s32 1, %v8330_v12 }
  0xb7   :  { %6477 = vmatprep.subr.mxu1 %v11136_v34 }
  0xb8   :  { %6478 = vmatpush3.msra.mxu1 %v8152_v39  ;;  %v261_v42 = vrot.slane %v252_v16, %v10951_v22 }
  0xb9   :  { %6479 = vmatprep.subr.mxu1 %v11136_v34 }
  0xba   :  { %6480 = vmatpush3.msra.mxu1 %v8163_v46 }
  0xbb   :  { %6484 = vmatprep.subr.mxu1 %v11136_v34 }
  0xfe   :  { %v360_v18 = vpop.f32.mrf.mxu0 }
  0xff   :  { %v361_v16 = vadd.f32 %v360_v18, %v257_v38 }
 0x100   :  { %v362_v37 = vpop.f32.mrf.mxu0 }
 0x102   :  { %v366_v40 = vpop.f32.mrf.mxu0 }
 0x103   :  { %v8346_v43 = vadd.f32 %v366_v40, %v257_v38 }
 0x104   :  { %v368_v44 = vpop.f32.mrf.mxu0 }
 0x105   :  { %v8348_v45 = vadd.f32 %v368_v44, %v261_v42  ;;  %v6369_v47 = vpop.f32.mrf.mxu1 }
 0x106   :  { %v372_v48 = vpop.f32.mrf.mxu0  ;;  %v8351_v49 = vadd.f32 %v6369_v47, %v8342_v41 }
 0x107   :  { %v8353_v50 = vadd.f32 %v372_v48, %v257_v38 }
 0x108   :  { %v374_v51 = vpop.f32.mrf.mxu0 }
 0x109   :  { %11155 = vst [vmem:[#allocation73_spill] sm:$0xff] %v8353_v50  ;;  %v8355_v53 = vadd.f32 %v374_v51, %v261_v42  ;;  %v473_v51 = vpop.f32.mrf.mxu1 }
 0x10a   :  { %v378_v54 = vpop.f32.mrf.mxu0 }
 0x10b   :  { %11156 = vst [vmem:[#allocation74_spill] sm:$0xff] %v8355_v53  ;;  %v8357_v55 = vadd.f32 %v378_v54, %v257_v38 }
 0x10c   :  { %v380_v56 = vpop.f32.mrf.mxu0 }
 0x10d   :  { %11157 = vst [vmem:[#allocation75_spill] sm:$0xff] %v8357_v55  ;;  %v8359_v57 = vadd.f32 %v380_v56, %v261_v42 }
 0x10e   :  { %v384_v59 = vpop.f32.mrf.mxu0 }
 0x10f   :  { %11158 = vst [vmem:[#allocation76_spill] sm:$0xff] %v8359_v57  ;;  %v8361_v60 = vadd.f32 %v384_v59, %v257_v38  ;;  %v363_v59 = vadd.f32 %v362_v37, %v261_v42 }
 0x110   :  { %v386_v61 = vpop.f32.mrf.mxu0 }
 0x111   :  { %11159 = vst [vmem:[#allocation77_spill] sm:$0xff] %v8361_v60  ;;  %v8363_v62 = vadd.f32 %v386_v61, %v261_v42 }
 0x112   :  { %v390_v63 = vpop.f32.mrf.mxu0 }
 0x113   :  { %11160 = vst [vmem:[#allocation78_spill] sm:$0xff] %v8363_v62  ;;  %v8365_v1 = vadd.f32 %v390_v63, %v257_v38  ;;  %v8640_v62 = vld [vmem:[#allocation5 + $0x170] sm:$0xff] }
 0x114   :  { %v392_v2 = vpop.f32.mrf.mxu0 }
 0x115   :  { %11161 = vst [vmem:[#allocation79_spill] sm:$0xff] %v8365_v1  ;;  %v8367_v3 = vadd.f32 %v392_v2, %v261_v42  ;;  %v8634_v1 = vld [vmem:[#allocation3] sm:$0xff] }
 0x116   :  { %v396_v4 = vpop.f32.mrf.mxu0 }
 0x117   :  { %11162 = vst [vmem:[#allocation80_spill] sm:$0xff] %v8367_v3  ;;  %v8369_v5 = vadd.f32 %v396_v4, %v257_v38  ;;  %v8630_v3 = vld [vmem:[#allocation3 + $0x8] sm:$0xff] }
 0x118   :  { %v398_v6 = vpop.f32.mrf.mxu0 }
 0x119   :  { %11163 = vst [vmem:[#allocation81_spill] sm:$0xff] %v8369_v5  ;;  %v8371_v29 = vadd.f32 %v398_v6, %v261_v42  ;;  %v8626_v5 = vld [vmem:[#allocation3 + $0x18] sm:$0xff] }
 0x11a   :  { %v402_v39 = vpop.f32.mrf.mxu0 }
 0x11b   :  { %11164 = vst [vmem:[#allocation82_spill] sm:$0xff] %v8371_v29  ;;  %v8373_v46 = vadd.f32 %v402_v39, %v257_v38  ;;  %v8622_v29 = vld [vmem:[#allocation3 + $0x20] sm:$0xff] }
 0x11c   :  { %v404_v9 = vpop.f32.mrf.mxu0 }
 0x11d   :  { %11165 = vst [vmem:[#allocation83_spill] sm:$0xff] %v8373_v46  ;;  %v8375_v40 = vadd.f32 %v404_v9, %v261_v42 }
 0x11e   :  { %v672_v44 = vpop.f32.mrf.mxu0 }
 0x11f   :  { %11166 = vst [vmem:[#allocation84_spill] sm:$0xff] %v8375_v40  ;;  %v747_v47 = vadd.f32 %v672_v44, %v361_v16 }
 0x120   :  { %v674_v54 = vpop.f32.mrf.mxu0 }
 0x121   :  { %v5855_v48 = vmul.f32 -1.442695, %v747_v47  ;;  %v754_v2 = vadd.f32 %v674_v54, %v363_v59 }
 0x123   :  { %7303 = vpow2.f32 %v5855_v48  ;;  %v5856_v18 = vmul.f32 -1.442695, %v754_v2 }
 0x125   :  { %7305 = vpow2.f32 %v5856_v18 }
 0x127   :  { %v6372_v56 = vpop.f32.mrf.mxu1 }
 0x128   :  { %v8378_v61 = vadd.f32 %v6372_v56, %v8342_v41  ;;  %v8398_v56 = vld [vmem:[%s10920_s7] ss:$0 sm:$0xff] }
 0x129   :  { %v483_v63 = vpop.f32.mrf.mxu1 }
 0x12a   :  { %11167 = vst [vmem:[#allocation85_spill] sm:$0xff] %v8378_v61  ;;  %v8381_v4 = vadd.f32 %v483_v63, %v8342_v41 }
 0x12c   :  { %11168 = vst [vmem:[#allocation86_spill] sm:$0xff] %v8381_v4 }
 0x12d   :  { %v6375_v6 = vpop.f32.mrf.mxu1 }
 0x12e   :  { %v8384_v38 = vadd.f32 %v6375_v6, %v8342_v41 }
 0x12f   :  { %v493_v39 = vpop.f32.mrf.mxu1 }
 0x130   :  { %11169 = vst [vmem:[#allocation87_spill] sm:$0xff] %v8384_v38  ;;  %v7304_v9 = vpop.eup %7303  ;;  %v8387_v16 = vadd.f32 %v493_v39, %v8342_v41  ;;  %v8628_v38 = vld [vmem:[#allocation3 + $0x28] sm:$0xff] }
 0x131   :  { %v751_v44 = vadd.f32 1.0, %v7304_v9  ;;  %v474_v9 = vadd.f32 %v473_v51, %v8342_v41 }
 0x132   :  { %11170 = vst [vmem:[#allocation88_spill] sm:$0xff] %v8387_v16  ;;  %v7306_v6 = vpop.eup %7305  ;;  %v8636_v16 = vld [vmem:[#allocation3 + $0x10] sm:$0xff] }
 0x133   :  { %7307 = vrcp.f32 %v751_v44  ;;  %v6378_v37 = vpop.f32.mrf.mxu1 }
 0x134   :  { %v8390_v42 = vadd.f32 %v6378_v37, %v8342_v41  ;;  %v758_v37 = vadd.f32 1.0, %v7306_v6  ;;  %v11190_v6 = vld [vmem:[#allocation65_spill] sm:$0xff] }
 0x135   :  { %v503_v47 = vpop.f32.mrf.mxu1 }
 0x136   :  { %11171 = vst [vmem:[#allocation89_spill] sm:$0xff] %v8390_v42  ;;  %v8393_v48 = vadd.f32 %v503_v47, %v8342_v41  ;;  %v8409_v41 = vld [vmem:[%s10922_s9] ss:$0 sm:$0xff] }
 0x138   :  { %11172 = vst [vmem:[#allocation90_spill] sm:$0xff] %v8393_v48  ;;  %v8620_v48 = vld [vmem:[#allocation3 + $0x40] sm:$0xff] }
 0x139   :  { %v743_v54 = vpop.f32.mrf.mxu1 }
 0x13a   :  { %v761_v63 = vadd.f32 %v8398_v56, %v743_v54 }
 0x13b   :  { %v6413_v59 = vpop.f32.mrf.mxu1 }
 0x13e   :  { %v888_v2 = vpop.f32.mrf.mxu0 }
 0x13f   :  { %v5857_v18 = vmul.f32 -1.442695, %v888_v2 }
 0x140   :  { %v7308_v39 = vpop.eup %7307  ;;  %v890_v20 = vpop.f32.mrf.mxu0 }
 0x141   :  { %v762_v44 = vmul.f32 %v7308_v39, %v761_v63  ;;  %7309 = vpow2.f32 %v5857_v18  ;;  %v5858_v22 = vmul.f32 -1.442695, %v890_v20  ;;  %v11192_v39 = vld [vmem:[#allocation67_spill] sm:$0xff] }
 0x143   :  { %v763_v47 = vadd.f32 %v762_v44, %v474_v9  ;;  %v11193_v9 = vld [vmem:[#allocation68_spill] sm:$0xff]  ;;  %v11194_v44 = vld [vmem:[#allocation69_spill] sm:$0xff] }
 0x145   :  { %7311 = vtanh.f32 %v763_v47  ;;  %v8500_v47 = vld [vmem:[#allocation3 + $0x160] sm:$0xff] }
 0x146   :  { %7313 = vrcp.f32 %v758_v37  ;;  %v11196_v37 = vld [vmem:[#allocation71_spill] sm:$0xff] }
 0x147   :  { %7315 = vpow2.f32 %v5858_v22 }
 0x14e   :  { %v7310_v15 = vpop.eup %7309 }
 0x14f   :  { %v967_v12 = vadd.f32 1.0, %v7310_v15 }
 0x151   :  { %7317 = vrcp.f32 %v967_v12 }
 0x152   :  { %v7312_v59 = vpop.eup %7311 }
 0x153   :  { %v765_v54 = vsub.f32 0.0, %v7312_v59  ;;  %v7314_v42 = vpop.eup %7313 }
 0x154   :  { %v7316_v46 = vpop.eup %7315 }
 0x155   :  { %v766_v40 = vmul.f32 %v7314_v42, %v765_v54  ;;  %v974_v15 = vadd.f32 1.0, %v7316_v46  ;;  %v11185_v46 = vld [vmem:[#allocation60_spill] sm:$0xff]  ;;  %v11187_v42 = vld [vmem:[#allocation62_spill] sm:$0xff] }
 0x156   :  { %v8508_v54 = vld [vmem:[#allocation3 + $0x138] sm:$0xff] }
 0x157   :  { %v8402_v2 = vadd.f32 %v7312_v59, %v766_v40  ;;  %7319 = vrcp.f32 %v974_v15  ;;  %v11186_v40 = vld [vmem:[#allocation61_spill] sm:$0xff] }
 0x158   :  { %v8504_v59 = vld [vmem:[#allocation3 + $0x140] sm:$0xff]  ;;  %v8514_v15 = vld [vmem:[#allocation3 + $0x128] sm:$0xff] }
 0x159   :  { %11173 = vst [vmem:[#allocation91_spill] sm:$0xff] %v8402_v2  ;;  %1103 = vmatmul.mubr.f32.vlgmr.msra.gmra.mxu0 %v8402_v2  ;;  %6482 = vmatmul.mubr.f32.vlgmr.msra.gmra.mxu1 %v8402_v2 }
 0x15a   :  { %1256 = vmatpush1.msra.mxu0 %v8040_v24  ;;  %1319 = vmatprep.mubr.f32.mxu0 %v11136_v34 }
 0x15b   :  { %1257 = vmatprep.subr.mxu0 %v8046_v7  ;;  %v959_v12 = vpop.f32.mrf.mxu1  ;;  %6485 = vmatpush3.msra.mxu1 %v8186_v17  ;;  %v11179_v17 = vld [vmem:[#allocation54_spill] sm:$0xff] }
 0x15c   :  { %1258 = vmatpush1.msra.mxu0 %v8051_v8  ;;  %v977_v20 = vadd.f32 %v8409_v41, %v959_v12  ;;  %6486 = vmatprep.subr.mxu1 %v11136_v34  ;;  %v11174_v8 = vld [vmem:[#allocation49_spill] sm:$0xff]  ;;  %11202 = vst [vmem:[#allocation54_spill] sm:$0xff] %v8628_v38 }
 0x15d   :  { %1259 = vmatprep.subr.mxu0 %v8056_v10  ;;  %6487 = vmatpush3.msra.mxu1 %v8194_v23  ;;  %v6448_v22 = vpop.f32.mrf.mxu1  ;;  %v11175_v10 = vld [vmem:[#allocation50_spill] sm:$0xff]  ;;  %v11181_v23 = vld [vmem:[#allocation56_spill] sm:$0xff] }
 0x15e   :  { %v7318_v24 = vpop.eup %7317  ;;  %1260 = vmatpush1.msra.mxu0 %v8060_v11  ;;  %6488 = vmatprep.subr.mxu1 %v11136_v34  ;;  %v11176_v11 = vld [vmem:[#allocation51_spill] sm:$0xff]  ;;  %v8510_v12 = vld [vmem:[#allocation3 + $0x148] sm:$0xff]  ;;  %11204 = vst [vmem:[#allocation56_spill] sm:$0xff] %v8634_v1 }
 0x15f   :  { %1261 = vmatprep.subr.mxu0 %v8066_v13  ;;  %v978_v7 = vmul.f32 %v7318_v24, %v977_v20  ;;  %6489 = vmatpush3.msra.mxu1 %v8200_v0  ;;  %v11177_v13 = vld [vmem:[#allocation52_spill] sm:$0xff]  ;;  %v11183_v0 = vld [vmem:[#allocation58_spill] sm:$0xff]  ;;  %11199 = vst [vmem:[#allocation51_spill] sm:$0xff] %v8620_v48 }
 0x160   :  { %1262 = vmatpush1.msra.mxu0 %v8070_v14  ;;  %6490 = vmatprep.subr.mxu1 %v11136_v34  ;;  %v11178_v14 = vld [vmem:[#allocation53_spill] sm:$0xff]  ;;  %v8520_v22 = vld [vmem:[#allocation3 + $0x130] sm:$0xff]  ;;  %11200 = vst [vmem:[#allocation52_spill] sm:$0xff] %v8622_v29  ;;  %11206 = vst [vmem:[#allocation58_spill] sm:$0xff] %v8640_v62 }
 0x161   :  { %7321 = vtanh.f32 %v978_v7  ;;  %1263 = vmatprep.subr.mxu0 %v11174_v8  ;;  %6491 = vmatpush3.msra.mxu1 %v8205_v19  ;;  %v11180_v19 = vld [vmem:[#allocation55_spill] sm:$0xff]  ;;  %v8518_v20 = vld [vmem:[#allocation3 + $0x120] sm:$0xff]  ;;  %v8528_v7 = vld [vmem:[#allocation3 + $0x108] sm:$0xff]  ;;  %11201 = vst [vmem:[#allocation53_spill] sm:$0xff] %v8626_v5 }
 0x162   :  { %1264 = vmatpush1.msra.mxu0 %v11175_v10  ;;  %6492 = vmatprep.subr.mxu1 %v11136_v34  ;;  %v8524_v24 = vld [vmem:[#allocation3 + $0x110] sm:$0xff]  ;;  %v8530_v8 = vld [vmem:[#allocation3 + $0x118] sm:$0xff]  ;;  %11203 = vst [vmem:[#allocation55_spill] sm:$0xff] %v8630_v3 }
 0x163   :  { %1265 = vmatprep.subr.mxu0 %v11176_v11  ;;  %6493 = vmatpush3.msra.mxu1 %v8212_v58  ;;  %v11182_v58 = vld [vmem:[#allocation57_spill] sm:$0xff]  ;;  %v8534_v10 = vld [vmem:[#allocation3 + $0xf8] sm:$0xff]  ;;  %v8538_v11 = vld [vmem:[#allocation3 + $0xf0] sm:$0xff] }
 0x164   :  { %1266 = vmatpush1.msra.mxu0 %v11177_v13  ;;  %6494 = vmatprep.subr.mxu1 %v11136_v34  ;;  %v8540_v13 = vld [vmem:[#allocation3 + $0x100] sm:$0xff]  ;;  %11205 = vst [vmem:[#allocation57_spill] sm:$0xff] %v8636_v16 }
 0x165   :  { %1267 = vmatprep.subr.mxu0 %v11178_v14  ;;  %6495 = vmatpush3.msra.mxu1 %v8218_v21  ;;  %v11184_v21 = vld [vmem:[#allocation59_spill] sm:$0xff]  ;;  %v8544_v14 = vld [vmem:[#allocation3 + $0xe0] sm:$0xff] }
 0x166   :  { %1268 = vmatpush1.msra.mxu0 %v11179_v17  ;;  %6496 = vmatprep.subr.mxu1 %v11136_v34  ;;  %v8548_v17 = vld [vmem:[#allocation3 + $0xd8] sm:$0xff] }
 0x167   :  { %1269 = vmatprep.subr.mxu0 %v11180_v19  ;;  %6497 = vmatpush3.msra.mxu1 %v8224_v25  ;;  %v7320_v25 = vpop.eup %7319  ;;  %v8550_v19 = vld [vmem:[#allocation3 + $0xe8] sm:$0xff] }
 0x168   :  { %1270 = vmatpush1.msra.mxu0 %v11181_v23  ;;  %6498 = vmatprep.subr.mxu1 %v11136_v34  ;;  %v8554_v23 = vld [vmem:[#allocation3 + $0xc8] sm:$0xff] }
 0x169   :  { %1271 = vmatprep.subr.mxu0 %v11182_v58  ;;  %6499 = vmatpush3.msra.mxu1 %v8230_v26  ;;  %v11188_v26 = vld [vmem:[#allocation63_spill] sm:$0xff]  ;;  %v8558_v58 = vld [vmem:[#allocation3 + $0xc0] sm:$0xff] }
 0x16a   :  { %1272 = vmatpush1.msra.mxu0 %v11183_v0  ;;  %6500 = vmatprep.subr.mxu1 %v11136_v34  ;;  %v8560_v0 = vld [vmem:[#allocation3 + $0xd0] sm:$0xff] }
 0x16b   :  { %1273 = vmatprep.subr.mxu0 %v11184_v21  ;;  %6501 = vmatpush3.msra.mxu1 %v8236_v27  ;;  %v11189_v27 = vld [vmem:[#allocation64_spill] sm:$0xff]  ;;  %v8564_v21 = vld [vmem:[#allocation3 + $0xb0] sm:$0xff] }
 0x16c   :  { %1274 = vmatpush1.msra.mxu0 %v11185_v46  ;;  %6502 = vmatprep.subr.mxu1 %v11136_v34  ;;  %v8568_v46 = vld [vmem:[#allocation3 + $0xa8] sm:$0xff] }
 0x16d   :  { %1275 = vmatprep.subr.mxu0 %v11186_v40  ;;  %6503 = vmatpush3.msra.mxu1 %v8242_v28  ;;  %v11191_v28 = vld [vmem:[#allocation66_spill] sm:$0xff]  ;;  %v8574_v40 = vld [vmem:[#allocation3 + $0x98] sm:$0xff] }
 0x16e   :  { %v7322_v51 = vpop.eup %7321  ;;  %1276 = vmatpush1.msra.mxu0 %v11187_v42  ;;  %6504 = vmatprep.subr.mxu1 %v11136_v34  ;;  %v8580_v42 = vld [vmem:[#allocation3 + $0xa0] sm:$0xff] }
 0x16f   :  { %1277 = vmatprep.subr.mxu0 %v11188_v26  ;;  %v981_v63 = vsub.f32 0.0, %v7322_v51  ;;  %6505 = vmatpush3.msra.mxu1 %v8248_v30  ;;  %v8584_v26 = vld [vmem:[#allocation3 + $0x80] sm:$0xff] }
 0x170   :  { %1278 = vmatpush1.msra.mxu0 %v11189_v27  ;;  %6506 = vmatprep.subr.mxu1 %v11136_v34  ;;  %v8590_v27 = vld [vmem:[#allocation3 + $0x88] sm:$0xff] }
 0x171   :  { %1279 = vmatprep.subr.mxu0 %v11190_v6  ;;  %v982_v18 = vmul.f32 %v7320_v25, %v981_v63  ;;  %6507 = vmatpush3.msra.mxu1 %v8254_v31  ;;  %v11195_v31 = vld [vmem:[#allocation70_spill] sm:$0xff]  ;;  %v8570_v25 = vld [vmem:[#allocation3 + $0xb8] sm:$0xff] }
 0x172   :  { %1280 = vmatpush1.msra.mxu0 %v11191_v28  ;;  %6508 = vmatprep.subr.mxu1 %v11136_v34  ;;  %v8588_v63 = vld [vmem:[#allocation3 + $0x78] sm:$0xff]  ;;  %v8594_v6 = vld [vmem:[#allocation3 + $0x68] sm:$0xff]  ;;  %v8600_v28 = vld [vmem:[#allocation3 + $0x70] sm:$0xff] }
 0x173   :  { %1281 = vmatprep.subr.mxu0 %v11192_v39  ;;  %6509 = vmatpush3.msra.mxu1 %v8260_v32  ;;  %v8467_v30 = vadd.f32 %v7322_v51, %v982_v18  ;;  %v8488_v32 = vld [vmem:[#allocation3 + $0x168] sm:$0xff]  ;;  %v8578_v51 = vld [vmem:[#allocation3 + $0x90] sm:$0xff]  ;;  %v8598_v18 = vld [vmem:[#allocation3 + $0x60] sm:$0xff] }
 0x174   :  { %1282 = vmatpush1.msra.mxu0 %v11193_v9  ;;  %6510 = vmatprep.subr.mxu1 %v11136_v34  ;;  %v8604_v39 = vld [vmem:[#allocation3 + $0x50] sm:$0xff]  ;;  %v8608_v9 = vld [vmem:[#allocation3 + $0x48] sm:$0xff] }
 0x175   :  { %1283 = vmatprep.subr.mxu0 %v8175_v52  ;;  %6511 = vmatpush3.msra.mxu1 %v8266_v33  ;;  %v8485_v52 = vld [vmem:[#allocation3 + $0x170] sm:$0xff]  ;;  %v8490_v33 = vld [vmem:[#allocation3 + $0x178] sm:$0xff] }
 0x176   :  { %1284 = vmatpush1.msra.mxu0 %v11194_v44  ;;  %6512 = vmatprep.subr.mxu1 %v11136_v34  ;;  %v8610_v44 = vld [vmem:[#allocation3 + $0x58] sm:$0xff] }
 0x177   :  { %1285 = vmatprep.subr.mxu0 %v11195_v31  ;;  %6513 = vmatpush3.msra.mxu1 %v8272_v35  ;;  %v8494_v35 = vld [vmem:[#allocation3 + $0x158] sm:$0xff] }
 0x178   :  { %1286 = vmatpush1.msra.mxu0 %v11196_v37  ;;  %6514 = vmatprep.subr.mxu1 %v11136_v34  ;;  %v8614_v31 = vld [vmem:[#allocation3 + $0x38] sm:$0xff]  ;;  %v8618_v37 = vld [vmem:[#allocation3 + $0x30] sm:$0xff] }
 0x179   :  { %1320 = vmatmul.mubr.f32.vlgmr.msra.gmra.mxu0 %v8467_v30  ;;  %6515 = vmatpush3.msra.mxu1 %v8278_v36  ;;  %v8498_v36 = vld [vmem:[#allocation3 + $0x150] sm:$0xff]  ;;  %11197 = vst [vmem:[#allocation49_spill] sm:$0xff] %v8614_v31  ;;  %11198 = vst [vmem:[#allocation50_spill] sm:$0xff] %v8618_v37 }
 0x17a   :  { %6516 = vmatprep.mubr.msk.f32.mxu1 %vm7671_vm1, %v11136_v34  ;;  %6519 = vmatprep.subr.mxu1 %v11136_v34 }
 0x17b   :  { %6517 = vmatmul.mubr.f32.vlgmr.msra.gmra.mxu1 %v8467_v30  ;;  %1535 = vmatprep.mubr.f32.mxu0 %v11136_v34 }
 0x17c   :  { %6551 = vmatprep.mubr.msk.f32.mxu1 %vm7671_vm1, %v11136_v34  ;;  %1471 = vmatprep.subr.mxu0 %v8485_v52 }
 0x17d   :  { %1472 = vmatpush1.msra.mxu0 %v8488_v32  ;;  %6520 = vmatpush3.msra.mxu1 %v8490_v33 }
 0x17e   :  { %1473 = vmatprep.subr.mxu0 %v8494_v35  ;;  %6521 = vmatprep.subr.mxu1 %v11136_v34 }
 0x17f   :  { %1474 = vmatpush1.msra.mxu0 %v8498_v36  ;;  %6522 = vmatpush3.msra.mxu1 %v8500_v47 }
 0x180   :  { %1475 = vmatprep.subr.mxu0 %v8504_v59  ;;  %6523 = vmatprep.subr.mxu1 %v11136_v34 }
 0x181   :  { %1476 = vmatpush1.msra.mxu0 %v8508_v54  ;;  %6524 = vmatpush3.msra.mxu1 %v8510_v12 }
 0x182   :  { %1477 = vmatprep.subr.mxu0 %v8514_v15  ;;  %6525 = vmatprep.subr.mxu1 %v11136_v34 }
 0x183   :  { %1478 = vmatpush1.msra.mxu0 %v8518_v20  ;;  %6526 = vmatpush3.msra.mxu1 %v8520_v22 }
 0x184   :  { %1479 = vmatprep.subr.mxu0 %v8524_v24  ;;  %6527 = vmatprep.subr.mxu1 %v11136_v34 }
 0x185   :  { %1480 = vmatpush1.msra.mxu0 %v8528_v7  ;;  %6528 = vmatpush3.msra.mxu1 %v8530_v8 }
 0x186   :  { %1481 = vmatprep.subr.mxu0 %v8534_v10  ;;  %6529 = vmatprep.subr.mxu1 %v11136_v34 }
 0x187   :  { %1482 = vmatpush1.msra.mxu0 %v8538_v11  ;;  %6530 = vmatpush3.msra.mxu1 %v8540_v13 }
 0x188   :  { %1483 = vmatprep.subr.mxu0 %v8544_v14  ;;  %6531 = vmatprep.subr.mxu1 %v11136_v34 }
 0x189   :  { %1484 = vmatpush1.msra.mxu0 %v8548_v17  ;;  %6532 = vmatpush3.msra.mxu1 %v8550_v19 }
 0x18a   :  { %1485 = vmatprep.subr.mxu0 %v8554_v23  ;;  %6533 = vmatprep.subr.mxu1 %v11136_v34 }
 0x18b   :  { %1486 = vmatpush1.msra.mxu0 %v8558_v58  ;;  %6534 = vmatpush3.msra.mxu1 %v8560_v0 }
 0x18c   :  { %1487 = vmatprep.subr.mxu0 %v8564_v21  ;;  %6535 = vmatprep.subr.mxu1 %v11136_v34 }
 0x18d   :  { %1488 = vmatpush1.msra.mxu0 %v8568_v46  ;;  %6536 = vmatpush3.msra.mxu1 %v8570_v25 }
 0x18e   :  { %1489 = vmatprep.subr.mxu0 %v8574_v40  ;;  %6537 = vmatprep.subr.mxu1 %v11136_v34 }
 0x18f   :  { %1490 = vmatpush1.msra.mxu0 %v8578_v51  ;;  %6538 = vmatpush3.msra.mxu1 %v8580_v42 }
 0x190   :  { %1491 = vmatprep.subr.mxu0 %v8584_v26  ;;  %6539 = vmatprep.subr.mxu1 %v11136_v34 }
 0x191   :  { %1492 = vmatpush1.msra.mxu0 %v8588_v63  ;;  %6540 = vmatpush3.msra.mxu1 %v8590_v27 }
 0x192   :  { %1493 = vmatprep.subr.mxu0 %v8594_v6  ;;  %6541 = vmatprep.subr.mxu1 %v11136_v34 }
 0x193   :  { %1494 = vmatpush1.msra.mxu0 %v8598_v18  ;;  %6542 = vmatpush3.msra.mxu1 %v8600_v28 }
 0x194   :  { %1495 = vmatprep.subr.mxu0 %v8604_v39  ;;  %6543 = vmatprep.subr.mxu1 %v11136_v34 }
 0x195   :  { %1496 = vmatpush1.msra.mxu0 %v8608_v9  ;;  %6544 = vmatpush3.msra.mxu1 %v8610_v44 }
 0x196   :  { %1497 = vmatprep.subr.mxu0 %v8614_v31  ;;  %6545 = vmatprep.subr.mxu1 %v11136_v34 }
 0x197   :  { %1498 = vmatpush1.msra.mxu0 %v8618_v37  ;;  %6546 = vmatpush3.msra.mxu1 %v8620_v48 }
 0x198   :  { %1499 = vmatprep.subr.mxu0 %v8622_v29  ;;  %6547 = vmatprep.subr.mxu1 %v11136_v34 }
 0x199   :  { %1500 = vmatpush1.msra.mxu0 %v8626_v5  ;;  %6548 = vmatpush3.msra.mxu1 %v8628_v38 }
 0x19a   :  { %1501 = vmatprep.subr.mxu0 %v8630_v3  ;;  %6549 = vmatprep.subr.mxu1 %v11136_v34 }
 0x19b   :  { %1502 = vmatpush1.msra.mxu0 %v8634_v1  ;;  %6550 = vmatpush3.msra.mxu1 %v8636_v16 }
 0x19c   :  { %1688 = vmatprep.subr.mxu0 %v8640_v62  ;;  %6554 = vmatprep.subr.mxu1 %v11136_v34 }
 0x219   :  { %v1104_v60 = vpop.f32.mrf.mxu0  ;;  %v1175_v61 = vpop.f32.mrf.mxu1 }
 0x21a   :  { %v1179_v57 = vadd.f32 %v1104_v60, %v8346_v43  ;;  %v1193_v62 = vadd.f32 %v8398_v56, %v1175_v61 }
 0x21b   :  { %v6483_v55 = vpop.f32.mrf.mxu1  ;;  %v1106_v53 = vpop.f32.mrf.mxu0 }
 0x21c   :  { %v5859_v4 = vmul.f32 -1.442695, %v1179_v57  ;;  %v1186_v50 = vadd.f32 %v1106_v53, %v8348_v45 }
 0x21e   :  { %7323 = vpow2.f32 %v5859_v4  ;;  %v5860_v3 = vmul.f32 -1.442695, %v1186_v50 }
 0x220   :  { %7325 = vpow2.f32 %v5860_v3 }
 0x22b   :  { %v7324_v38 = vpop.eup %7323 }
 0x22c   :  { %v1183_v5 = vadd.f32 1.0, %v7324_v38 }
 0x22d   :  { %v7326_v1 = vpop.eup %7325 }
 0x22e   :  { %7327 = vrcp.f32 %v1183_v5  ;;  %v1190_v57 = vadd.f32 1.0, %v7326_v1  ;;  %v8663_v1 = vld [vmem:[#allocation5 + $0x150] sm:$0xff] }
 0x239   :  { %v1321_v16 = vpop.f32.mrf.mxu0 }
 0x23a   :  { %v5861_v29 = vmul.f32 -1.442695, %v1321_v16  ;;  %v8665_v16 = vld [vmem:[#allocation5 + $0x160] sm:$0xff] }
 0x23b   :  { %v7328_v48 = vpop.eup %7327  ;;  %v1392_v37 = vpop.f32.mrf.mxu1 }
 0x23c   :  { %v1194_v31 = vmul.f32 %v7328_v48, %v1193_v62  ;;  %7329 = vpow2.f32 %v5861_v29  ;;  %v1323_v45 = vpop.f32.mrf.mxu0  ;;  %v8655_v62 = vld [vmem:[#allocation5 + $0x168] sm:$0xff]  ;;  %v8657_v29 = vld [vmem:[#allocation5 + $0x178] sm:$0xff]  ;;  %v8669_v48 = vld [vmem:[#allocation5 + $0x140] sm:$0xff] }
 0x23d   :  { %v6518_v43 = vpop.f32.mrf.mxu1  ;;  %v5862_v50 = vmul.f32 -1.442695, %v1323_v45 }
 0x23e   :  { %v1195_v55 = vadd.f32 %v1194_v31, %v8351_v49  ;;  %v8659_v49 = vld [vmem:[#allocation5 + $0x158] sm:$0xff]  ;;  %v1410_v31 = vadd.f32 %v8409_v41, %v1392_v37 }
 0x23f   :  { %v8674_v43 = vld [vmem:[#allocation5 + $0x138] sm:$0xff] }
 0x240   :  { %7331 = vtanh.f32 %v1195_v55  ;;  %v8676_v55 = vld [vmem:[#allocation5 + $0x148] sm:$0xff] }
 0x241   :  { %7333 = vrcp.f32 %v1190_v57  ;;  %v8680_v57 = vld [vmem:[#allocation5 + $0x128] sm:$0xff] }
 0x242   :  { %7335 = vpow2.f32 %v5862_v50  ;;  %11208 = vst [vmem:[#allocation60_spill] sm:$0xff] %v8680_v57  ;;  %v8684_v50 = vld [vmem:[#allocation5 + $0x120] sm:$0xff] }
 0x243   :  { %11209 = vst [vmem:[#allocation61_spill] sm:$0xff] %v8684_v50 }
 0x249   :  { %v7330_v53 = vpop.eup %7329 }
 0x24a   :  { %v1400_v60 = vadd.f32 1.0, %v7330_v53  ;;  %v8686_v53 = vld [vmem:[#allocation5 + $0x130] sm:$0xff] }
 0x24b   :  { %11210 = vst [vmem:[#allocation62_spill] sm:$0xff] %v8686_v53 }
 0x24c   :  { %7337 = vrcp.f32 %v1400_v60  ;;  %v8690_v60 = vld [vmem:[#allocation5 + $0x110] sm:$0xff] }
 0x24d   :  { %v7332_v3 = vpop.eup %7331  ;;  %11211 = vst [vmem:[#allocation63_spill] sm:$0xff] %v8690_v60 }
 0x24e   :  { %v1197_v5 = vsub.f32 %v8402_v2, %v7332_v3  ;;  %v7334_v61 = vpop.eup %7333  ;;  %v8700_v2 = vld [vmem:[#allocation5 + $0xf8] sm:$0xff] }
 0x24f   :  { %v7336_v45 = vpop.eup %7335  ;;  %11214 = vst [vmem:[#allocation66_spill] sm:$0xff] %v8700_v2 }
 0x250   :  { %v1198_v4 = vmul.f32 %v7334_v61, %v1197_v5  ;;  %v8694_v5 = vld [vmem:[#allocation5 + $0x108] sm:$0xff]  ;;  %v8696_v61 = vld [vmem:[#allocation5 + $0x118] sm:$0xff] }
 0x251   :  { %11212 = vst [vmem:[#allocation64_spill] sm:$0xff] %v8694_v5  ;;  %11213 = vst [vmem:[#allocation65_spill] sm:$0xff] %v8696_v61 }
 0x252   :  { %v8653_v38 = vadd.f32 %v7332_v3, %v1198_v4  ;;  %v1407_v4 = vadd.f32 1.0, %v7336_v45  ;;  %v8710_v45 = vld [vmem:[#allocation5 + $0xe0] sm:$0xff] }
 0x253   :  { %11217 = vst [vmem:[#allocation69_spill] sm:$0xff] %v8710_v45 }
 0x254   :  { %11207 = vst [vmem:[#allocation59_spill] sm:$0xff] %v8653_v38  ;;  %1536 = vmatmul.mubr.f32.vlgmr.msra.gmra.mxu0 %v8653_v38  ;;  %6552 = vmatmul.mubr.f32.vlgmr.msra.gmra.mxu1 %v8653_v38 }
 0x255   :  { %1689 = vmatpush1.msra.mxu0 %v8655_v62  ;;  %6555 = vmatpush3.msra.mxu1 %v8657_v29 }
 0x256   :  { %1690 = vmatprep.subr.mxu0 %v8659_v49  ;;  %6556 = vmatprep.subr.mxu1 %v11136_v34 }
 0x257   :  { %1691 = vmatpush1.msra.mxu0 %v8663_v1  ;;  %6557 = vmatpush3.msra.mxu1 %v8665_v16 }
 0x258   :  { %1692 = vmatprep.subr.mxu0 %v8669_v48  ;;  %6558 = vmatprep.subr.mxu1 %v11136_v34 }
 0x259   :  { %v7338_v37 = vpop.eup %7337  ;;  %1693 = vmatpush1.msra.mxu0 %v8674_v43  ;;  %6559 = vmatpush3.msra.mxu1 %v8676_v55 }
 0x25a   :  { %v1411_v3 = vmul.f32 %v7338_v37, %v1410_v31  ;;  %1694 = vmatprep.subr.mxu0 %v8680_v57  ;;  %6560 = vmatprep.subr.mxu1 %v11136_v34  ;;  %v8704_v31 = vld [vmem:[#allocation5 + $0xf0] sm:$0xff]  ;;  %v8706_v37 = vld [vmem:[#allocation5 + $0x100] sm:$0xff] }
 0x25b   :  { %1695 = vmatpush1.msra.mxu0 %v8684_v50  ;;  %6561 = vmatpush3.msra.mxu1 %v8686_v53  ;;  %11215 = vst [vmem:[#allocation67_spill] sm:$0xff] %v8704_v31  ;;  %11216 = vst [vmem:[#allocation68_spill] sm:$0xff] %v8706_v37  ;;  %v8714_v53 = vld [vmem:[#allocation5 + $0xd8] sm:$0xff] }
 0x25c   :  { %7339 = vtanh.f32 %v1411_v3  ;;  %1696 = vmatprep.subr.mxu0 %v8690_v60  ;;  %6562 = vmatprep.subr.mxu1 %v11136_v34  ;;  %11218 = vst [vmem:[#allocation70_spill] sm:$0xff] %v8714_v53  ;;  %v8716_v3 = vld [vmem:[#allocation5 + $0xe8] sm:$0xff] }
 0x25d   :  { %1697 = vmatpush1.msra.mxu0 %v8694_v5  ;;  %6563 = vmatpush3.msra.mxu1 %v8696_v61  ;;  %11219 = vst [vmem:[#allocation71_spill] sm:$0xff] %v8716_v3  ;;  %7341 = vrcp.f32 %v1407_v4  ;;  %v8720_v60 = vld [vmem:[#allocation5 + $0xc8] sm:$0xff]  ;;  %v8724_v61 = vld [vmem:[#allocation5 + $0xc0] sm:$0xff]  ;;  %v8730_v5 = vld [vmem:[#allocation5 + $0xb0] sm:$0xff] }
 0x25e   :  { %1698 = vmatprep.subr.mxu0 %v8700_v2  ;;  %6564 = vmatprep.subr.mxu1 %v11136_v34  ;;  %11220 = vst [vmem:[#allocation92_spill] sm:$0xff] %v8720_v60  ;;  %11221 = vst [vmem:[#allocation93_spill] sm:$0xff] %v8724_v61  ;;  %v8726_v2 = vld [vmem:[#allocation5 + $0xd0] sm:$0xff]  ;;  %v8734_v4 = vld [vmem:[#allocation5 + $0xa8] sm:$0xff] }
 0x25f   :  { %1699 = vmatpush1.msra.mxu0 %v8704_v31  ;;  %6565 = vmatpush3.msra.mxu1 %v8706_v37  ;;  %11222 = vst [vmem:[#allocation94_spill] sm:$0xff] %v8726_v2  ;;  %11223 = vst [vmem:[#allocation95_spill] sm:$0xff] %v8730_v5  ;;  %v8736_v37 = vld [vmem:[#allocation5 + $0xb8] sm:$0xff]  ;;  %v8770_v31 = vld [vmem:[#allocation5 + $0x50] sm:$0xff] }
 0x260   :  { %1700 = vmatprep.subr.mxu0 %v8710_v45  ;;  %6566 = vmatprep.subr.mxu1 %v11136_v34  ;;  %11224 = vst [vmem:[#allocation96_spill] sm:$0xff] %v8734_v4  ;;  %11225 = vst [vmem:[#allocation97_spill] sm:$0xff] %v8736_v37  ;;  %v8740_v45 = vld [vmem:[#allocation5 + $0x98] sm:$0xff] }
 0x261   :  { %1701 = vmatpush1.msra.mxu0 %v8714_v53  ;;  %6567 = vmatpush3.msra.mxu1 %v8716_v3  ;;  %11226 = vst [vmem:[#allocation98_spill] sm:$0xff] %v8740_v45  ;;  %v8744_v3 = vld [vmem:[#allocation5 + $0x90] sm:$0xff]  ;;  %v8746_v53 = vld [vmem:[#allocation5 + $0xa0] sm:$0xff]  ;;  %11235 = vst [vmem:[#allocation107_spill] sm:$0xff] %v8770_v31 }
 0x262   :  { %1702 = vmatprep.subr.mxu0 %v8720_v60  ;;  %6568 = vmatprep.subr.mxu1 %v11136_v34  ;;  %11227 = vst [vmem:[#allocation99_spill] sm:$0xff] %v8744_v3  ;;  %11228 = vst [vmem:[#allocation100_spill] sm:$0xff] %v8746_v53  ;;  %v8750_v60 = vld [vmem:[#allocation5 + $0x80] sm:$0xff] }
 0x263   :  { %1703 = vmatpush1.msra.mxu0 %v8724_v61  ;;  %6569 = vmatpush3.msra.mxu1 %v8726_v2  ;;  %11229 = vst [vmem:[#allocation101_spill] sm:$0xff] %v8750_v60  ;;  %v8754_v2 = vld [vmem:[#allocation5 + $0x78] sm:$0xff]  ;;  %v8756_v61 = vld [vmem:[#allocation5 + $0x88] sm:$0xff] }
 0x264   :  { %1704 = vmatprep.subr.mxu0 %v8730_v5  ;;  %6570 = vmatprep.subr.mxu1 %v11136_v34  ;;  %11230 = vst [vmem:[#allocation102_spill] sm:$0xff] %v8754_v2  ;;  %11231 = vst [vmem:[#allocation103_spill] sm:$0xff] %v8756_v61  ;;  %v8760_v5 = vld [vmem:[#allocation5 + $0x68] sm:$0xff] }
 0x265   :  { %1705 = vmatpush1.msra.mxu0 %v8734_v4  ;;  %6571 = vmatpush3.msra.mxu1 %v8736_v37  ;;  %11232 = vst [vmem:[#allocation104_spill] sm:$0xff] %v8760_v5  ;;  %v8764_v37 = vld [vmem:[#allocation5 + $0x60] sm:$0xff]  ;;  %v8766_v4 = vld [vmem:[#allocation5 + $0x70] sm:$0xff] }
 0x266   :  { %1706 = vmatprep.subr.mxu0 %v8740_v45  ;;  %6572 = vmatprep.subr.mxu1 %v11136_v34  ;;  %11233 = vst [vmem:[#allocation105_spill] sm:$0xff] %v8764_v37  ;;  %11234 = vst [vmem:[#allocation106_spill] sm:$0xff] %v8766_v4 }
 0x267   :  { %1707 = vmatpush1.msra.mxu0 %v8744_v3  ;;  %6573 = vmatpush3.msra.mxu1 %v8746_v53  ;;  %v8774_v53 = vld [vmem:[#allocation5 + $0x48] sm:$0xff]  ;;  %v8780_v3 = vld [vmem:[#allocation5 + $0x38] sm:$0xff] }
 0x268   :  { %1708 = vmatprep.subr.mxu0 %v8750_v60  ;;  %6574 = vmatprep.subr.mxu1 %v11136_v34  ;;  %v8776_v60 = vld [vmem:[#allocation5 + $0x58] sm:$0xff]  ;;  %11237 = vst [vmem:[#allocation109_spill] sm:$0xff] %v8780_v3 }
 0x269   :  { %v7340_v45 = vpop.eup %7339  ;;  %1709 = vmatpush1.msra.mxu0 %v8754_v2  ;;  %6575 = vmatpush3.msra.mxu1 %v8756_v61  ;;  %11236 = vst [vmem:[#allocation108_spill] sm:$0xff] %v8776_v60  ;;  %v8787_v61 = vld [vmem:[#allocation5 + $0x40] sm:$0xff] }
 0x26a   :  { %1710 = vmatprep.subr.mxu0 %v8760_v5  ;;  %6576 = vmatprep.subr.mxu1 %v11136_v34  ;;  %v1414_v2 = vsub.f32 %v8467_v30, %v7340_v45  ;;  %v7342_v50 = vpop.eup %7341  ;;  %v8785_v5 = vld [vmem:[#allocation5 + $0x30] sm:$0xff]  ;;  %v8795_v30 = vld [vmem:[#allocation5 + $0x18] sm:$0xff] }
 0x26b   :  { %1711 = vmatpush1.msra.mxu0 %v8764_v37  ;;  %6577 = vmatpush3.msra.mxu1 %v8766_v4  ;;  %v8791_v37 = vld [vmem:[#allocation5 + $0x20] sm:$0xff]  ;;  %v8797_v4 = vld [vmem:[#allocation5 + $0x28] sm:$0xff] }
 0x26c   :  { %1712 = vmatprep.subr.mxu0 %v8770_v31  ;;  %6578 = vmatprep.subr.mxu1 %v11136_v34  ;;  %v8801_v31 = vld [vmem:[#allocation5 + $0x8] sm:$0xff]  ;;  %v1415_v57 = vmul.f32 %v7342_v50, %v1414_v2 }
 0x26d   :  { %1713 = vmatpush1.msra.mxu0 %v8774_v53  ;;  %6579 = vmatpush3.msra.mxu1 %v8776_v60  ;;  %v8805_v60 = vld [vmem:[#allocation5] sm:$0xff] }
 0x26e   :  { %1714 = vmatprep.subr.mxu0 %v8780_v3  ;;  %6580 = vmatprep.subr.mxu1 %v11136_v34  ;;  %v8809_v3 = vld [vmem:[#allocation5 + $0x10] sm:$0xff]  ;;  %v8815_v2 = vadd.f32 %v7340_v45, %v1415_v57 }
 0x26f   :  { %1715 = vmatpush1.msra.mxu0 %v8785_v5  ;;  %6581 = vmatpush3.msra.mxu1 %v8787_v61 }
 0x270   :  { %1716 = vmatprep.subr.mxu0 %v8791_v37  ;;  %6582 = vmatprep.subr.mxu1 %v11136_v34 }
 0x271   :  { %1717 = vmatpush1.msra.mxu0 %v8795_v30  ;;  %6583 = vmatpush3.msra.mxu1 %v8797_v4 }
 0x272   :  { %1718 = vmatprep.subr.mxu0 %v8801_v31  ;;  %6584 = vmatprep.subr.mxu1 %v11136_v34 }
 0x273   :  { %1719 = vmatpush1.msra.mxu0 %v8805_v60  ;;  %1752 = vmatprep.mubr.f32.mxu0 %v11136_v34 }
 0x274   :  { %6585 = vmatpush3.msra.mxu1 %v8809_v3  ;;  %6586 = vmatprep.mubr.msk.f32.mxu1 %vm7671_vm1, %v11136_v34 }
 0x275   :  { %1753 = vmatmul.mubr.f32.vlgmr.msra.gmra.mxu0 %v8815_v2  ;;  %6587 = vmatmul.mubr.f32.vlgmr.msra.gmra.mxu1 %v8815_v2 }
 0x276   :  { %1904 = vmatprep.subr.mxu0 %v8485_v52  ;;  %6589 = vmatprep.subr.mxu1 %v11136_v34  ;;  %v11238_v52 = vld [vmem:[#allocation49_spill] sm:$0xff] }
 0x277   :  { %1905 = vmatpush1.msra.mxu0 %v8488_v32  ;;  %6590 = vmatpush3.msra.mxu1 %v8490_v33  ;;  %v11239_v32 = vld [vmem:[#allocation50_spill] sm:$0xff]  ;;  %v11240_v33 = vld [vmem:[#allocation51_spill] sm:$0xff] }
 0x278   :  { %1906 = vmatprep.subr.mxu0 %v8494_v35  ;;  %6591 = vmatprep.subr.mxu1 %v11136_v34  ;;  %v11241_v35 = vld [vmem:[#allocation52_spill] sm:$0xff] }
 0x279   :  { %1907 = vmatpush1.msra.mxu0 %v8498_v36  ;;  %6592 = vmatpush3.msra.mxu1 %v8500_v47  ;;  %v11242_v36 = vld [vmem:[#allocation53_spill] sm:$0xff]  ;;  %v11243_v47 = vld [vmem:[#allocation54_spill] sm:$0xff] }
 0x27a   :  { %1908 = vmatprep.subr.mxu0 %v8504_v59  ;;  %6593 = vmatprep.subr.mxu1 %v11136_v34  ;;  %v11244_v59 = vld [vmem:[#allocation55_spill] sm:$0xff] }
 0x27b   :  { %1909 = vmatpush1.msra.mxu0 %v8508_v54  ;;  %6594 = vmatpush3.msra.mxu1 %v8510_v12  ;;  %v11245_v54 = vld [vmem:[#allocation56_spill] sm:$0xff]  ;;  %v11246_v12 = vld [vmem:[#allocation57_spill] sm:$0xff] }
 0x27c   :  { %1910 = vmatprep.subr.mxu0 %v8514_v15  ;;  %6595 = vmatprep.subr.mxu1 %v11136_v34  ;;  %v11247_v15 = vld [vmem:[#allocation58_spill] sm:$0xff] }
 0x27d   :  { %1911 = vmatpush1.msra.mxu0 %v8518_v20  ;;  %6596 = vmatpush3.msra.mxu1 %v8520_v22 }
 0x27e   :  { %1912 = vmatprep.subr.mxu0 %v8524_v24  ;;  %6597 = vmatprep.subr.mxu1 %v11136_v34  ;;  %v11248_v24 = vld [vmem:[#allocation73_spill] sm:$0xff] }
 0x27f   :  { %1913 = vmatpush1.msra.mxu0 %v8528_v7  ;;  %6598 = vmatpush3.msra.mxu1 %v8530_v8 }
 0x280   :  { %1914 = vmatprep.subr.mxu0 %v8534_v10  ;;  %6599 = vmatprep.subr.mxu1 %v11136_v34 }
 0x281   :  { %1915 = vmatpush1.msra.mxu0 %v8538_v11  ;;  %6600 = vmatpush3.msra.mxu1 %v8540_v13  ;;  %v11249_v13 = vld [vmem:[#allocation74_spill] sm:$0xff] }
 0x282   :  { %1916 = vmatprep.subr.mxu0 %v8544_v14  ;;  %6601 = vmatprep.subr.mxu1 %v11136_v34 }
 0x283   :  { %1917 = vmatpush1.msra.mxu0 %v8548_v17  ;;  %6602 = vmatpush3.msra.mxu1 %v8550_v19 }
 0x284   :  { %1918 = vmatprep.subr.mxu0 %v8554_v23  ;;  %6603 = vmatprep.subr.mxu1 %v11136_v34 }
 0x285   :  { %1919 = vmatpush1.msra.mxu0 %v8558_v58  ;;  %6604 = vmatpush3.msra.mxu1 %v8560_v0 }
 0x286   :  { %1920 = vmatprep.subr.mxu0 %v8564_v21  ;;  %6605 = vmatprep.subr.mxu1 %v11136_v34 }
 0x287   :  { %1921 = vmatpush1.msra.mxu0 %v8568_v46  ;;  %6606 = vmatpush3.msra.mxu1 %v8570_v25 }
 0x288   :  { %1922 = vmatprep.subr.mxu0 %v8574_v40  ;;  %6607 = vmatprep.subr.mxu1 %v11136_v34 }
 0x289   :  { %1923 = vmatpush1.msra.mxu0 %v8578_v51  ;;  %6608 = vmatpush3.msra.mxu1 %v8580_v42 }
 0x28a   :  { %1924 = vmatprep.subr.mxu0 %v8584_v26  ;;  %6609 = vmatprep.subr.mxu1 %v11136_v34  ;;  %v11250_v26 = vld [vmem:[#allocation86_spill] sm:$0xff] }
 0x28b   :  { %1925 = vmatpush1.msra.mxu0 %v8588_v63  ;;  %6610 = vmatpush3.msra.mxu1 %v8590_v27 }
 0x28c   :  { %1926 = vmatprep.subr.mxu0 %v8594_v6  ;;  %6611 = vmatprep.subr.mxu1 %v11136_v34 }
 0x28d   :  { %1927 = vmatpush1.msra.mxu0 %v8598_v18  ;;  %6612 = vmatpush3.msra.mxu1 %v8600_v28 }
 0x28e   :  { %1928 = vmatprep.subr.mxu0 %v8604_v39  ;;  %6613 = vmatprep.subr.mxu1 %v11136_v34 }
 0x28f   :  { %1929 = vmatpush1.msra.mxu0 %v8608_v9  ;;  %6614 = vmatpush3.msra.mxu1 %v8610_v44 }
 0x290   :  { %1930 = vmatprep.subr.mxu0 %v11238_v52  ;;  %6615 = vmatprep.subr.mxu1 %v11136_v34 }
 0x291   :  { %1931 = vmatpush1.msra.mxu0 %v11239_v32  ;;  %6616 = vmatpush3.msra.mxu1 %v11240_v33  ;;  %v11256_v32 = vld [vmem:[#allocation64_spill] sm:$0xff]  ;;  %v11259_v33 = vld [vmem:[#allocation67_spill] sm:$0xff] }
 0x292   :  { %1932 = vmatprep.subr.mxu0 %v11241_v35  ;;  %6617 = vmatprep.subr.mxu1 %v11136_v34  ;;  %v11260_v35 = vld [vmem:[#allocation68_spill] sm:$0xff] }
 0x293   :  { %1933 = vmatpush1.msra.mxu0 %v11242_v36  ;;  %6618 = vmatpush3.msra.mxu1 %v11243_v47  ;;  %v11261_v36 = vld [vmem:[#allocation69_spill] sm:$0xff]  ;;  %v11262_v47 = vld [vmem:[#allocation70_spill] sm:$0xff] }
 0x294   :  { %1934 = vmatprep.subr.mxu0 %v11244_v59  ;;  %6619 = vmatprep.subr.mxu1 %v11136_v34  ;;  %v11263_v59 = vld [vmem:[#allocation71_spill] sm:$0xff] }
 0x295   :  { %1935 = vmatpush1.msra.mxu0 %v11245_v54  ;;  %6620 = vmatpush3.msra.mxu1 %v11246_v12  ;;  %v11264_v54 = vld [vmem:[#allocation92_spill] sm:$0xff]  ;;  %v11265_v12 = vld [vmem:[#allocation93_spill] sm:$0xff] }
 0x296   :  { %1968 = vmatprep.mubr.f32.mxu0 %v11136_v34  ;;  %6621 = vmatprep.mubr.msk.f32.mxu1 %vm7671_vm1, %v11136_v34 }
 0x297   :  { %2121 = vmatprep.subr.mxu0 %v11247_v15  ;;  %6624 = vmatprep.subr.mxu1 %v11136_v34  ;;  %v11266_v15 = vld [vmem:[#allocation94_spill] sm:$0xff] }
 0x314   :  { %v1537_v20 = vpop.f32.mrf.mxu0  ;;  %v1608_v22 = vpop.f32.mrf.mxu1 }
 0x315   :  { %v1612_v7 = vadd.f32 %v1537_v20, %v11248_v24  ;;  %v1626_v0 = vadd.f32 %v8398_v56, %v1608_v22  ;;  %v11267_v20 = vld [vmem:[#allocation95_spill] sm:$0xff]  ;;  %v11268_v22 = vld [vmem:[#allocation96_spill] sm:$0xff]  ;;  %v11269_v24 = vld [vmem:[#allocation97_spill] sm:$0xff] }
 0x316   :  { %v6553_v8 = vpop.f32.mrf.mxu1  ;;  %v1539_v11 = vpop.f32.mrf.mxu0 }
 0x317   :  { %v5863_v10 = vmul.f32 -1.442695, %v1612_v7  ;;  %v1619_v14 = vadd.f32 %v1539_v11, %v11249_v13  ;;  %v11270_v7 = vld [vmem:[#allocation98_spill] sm:$0xff]  ;;  %v11271_v8 = vld [vmem:[#allocation99_spill] sm:$0xff]  ;;  %v11273_v11 = vld [vmem:[#allocation101_spill] sm:$0xff] }
 0x318   :  { %v11274_v13 = vld [vmem:[#allocation102_spill] sm:$0xff] }
 0x319   :  { %7343 = vpow2.f32 %v5863_v10  ;;  %v5864_v17 = vmul.f32 -1.442695, %v1619_v14  ;;  %v11272_v10 = vld [vmem:[#allocation100_spill] sm:$0xff]  ;;  %v11275_v14 = vld [vmem:[#allocation103_spill] sm:$0xff] }
 0x31b   :  { %7345 = vpow2.f32 %v5864_v17 }
 0x326   :  { %v7344_v19 = vpop.eup %7343 }
 0x327   :  { %v1616_v23 = vadd.f32 1.0, %v7344_v19  ;;  %v11276_v19 = vld [vmem:[#allocation104_spill] sm:$0xff] }
 0x328   :  { %v7346_v58 = vpop.eup %7345 }
 0x329   :  { %7347 = vrcp.f32 %v1616_v23  ;;  %v1623_v27 = vadd.f32 1.0, %v7346_v58  ;;  %v11277_v23 = vld [vmem:[#allocation105_spill] sm:$0xff]  ;;  %v11278_v58 = vld [vmem:[#allocation106_spill] sm:$0xff] }
 0x335   :  { %v1754_v21 = vpop.f32.mrf.mxu0  ;;  %v1825_v46 = vpop.f32.mrf.mxu1 }
 0x336   :  { %v7348_v25 = vpop.eup %7347  ;;  %v5865_v40 = vmul.f32 -1.442695, %v1754_v21  ;;  %v1843_v52 = vadd.f32 %v8409_v41, %v1825_v46  ;;  %v11279_v21 = vld [vmem:[#allocation107_spill] sm:$0xff]  ;;  %v11280_v46 = vld [vmem:[#allocation108_spill] sm:$0xff] }
 0x337   :  { %v1627_v51 = vmul.f32 %v7348_v25, %v1626_v0  ;;  %v6588_v42 = vpop.f32.mrf.mxu1  ;;  %v1756_v6 = vpop.f32.mrf.mxu0 }
 0x338   :  { %7349 = vpow2.f32 %v5865_v40  ;;  %v5866_v18 = vmul.f32 -1.442695, %v1756_v6  ;;  %v11281_v40 = vld [vmem:[#allocation109_spill] sm:$0xff] }
 0x339   :  { %v1628_v63 = vadd.f32 %v1627_v51, %v11250_v26  ;;  %v9004_v42 = vld [vmem:[#allocation3 + $0x128] sm:$0xff]  ;;  %v9008_v26 = vld [vmem:[#allocation3 + $0x120] sm:$0xff] }
 0x33a   :  { %v9018_v6 = vld [vmem:[#allocation3 + $0x108] sm:$0xff] }
 0x33b   :  { %7351 = vtanh.f32 %v1628_v63  ;;  %v9010_v63 = vld [vmem:[#allocation3 + $0x130] sm:$0xff] }
 0x33c   :  { %7353 = vrcp.f32 %v1623_v27  ;;  %v9014_v27 = vld [vmem:[#allocation3 + $0x110] sm:$0xff] }
 0x33d   :  { %7355 = vpow2.f32 %v5866_v18  ;;  %v9020_v18 = vld [vmem:[#allocation3 + $0x118] sm:$0xff] }
 0x345   :  { %v7350_v28 = vpop.eup %7349 }
 0x346   :  { %v1833_v39 = vadd.f32 1.0, %v7350_v28  ;;  %v9024_v28 = vld [vmem:[#allocation3 + $0xf8] sm:$0xff] }
 0x348   :  { %v7352_v9 = vpop.eup %7351  ;;  %7357 = vrcp.f32 %v1833_v39  ;;  %v9028_v39 = vld [vmem:[#allocation3 + $0xf0] sm:$0xff] }
 0x349   :  { %v1630_v56 = vsub.f32 %v8653_v38, %v7352_v9  ;;  %v7354_v44 = vpop.eup %7353 }
 0x34a   :  { %v7356_v45 = vpop.eup %7355 }
 0x34b   :  { %v1631_v57 = vmul.f32 %v7354_v44, %v1630_v56  ;;  %v1840_v41 = vadd.f32 1.0, %v7356_v45  ;;  %v9034_v56 = vld [vmem:[#allocation3 + $0xe0] sm:$0xff]  ;;  %v9038_v44 = vld [vmem:[#allocation3 + $0xd8] sm:$0xff]  ;;  %v9044_v45 = vld [vmem:[#allocation3 + $0xc8] sm:$0xff] }
 0x34d   :  { %v8896_v50 = vadd.f32 %v7352_v9, %v1631_v57  ;;  %v9030_v9 = vld [vmem:[#allocation3 + $0x100] sm:$0xff]  ;;  %v9040_v57 = vld [vmem:[#allocation3 + $0xe8] sm:$0xff] }
 0x34f   :  { %11251 = vst [vmem:[#allocation49_spill] sm:$0xff] %v8896_v50  ;;  %1969 = vmatmul.mubr.f32.vlgmr.msra.gmra.mxu0 %v8896_v50  ;;  %6622 = vmatmul.mubr.f32.vlgmr.msra.gmra.mxu1 %v8896_v50 }
 0x350   :  { %2122 = vmatpush1.msra.mxu0 %v8655_v62  ;;  %6625 = vmatpush3.msra.mxu1 %v8657_v29  ;;  %v11252_v29 = vld [vmem:[#allocation60_spill] sm:$0xff] }
 0x351   :  { %2123 = vmatprep.subr.mxu0 %v8659_v49  ;;  %6626 = vmatprep.subr.mxu1 %v11136_v34 }
 0x352   :  { %2124 = vmatpush1.msra.mxu0 %v8663_v1  ;;  %6627 = vmatpush3.msra.mxu1 %v8665_v16  ;;  %v11253_v1 = vld [vmem:[#allocation61_spill] sm:$0xff]  ;;  %v11254_v16 = vld [vmem:[#allocation62_spill] sm:$0xff] }
 0x353   :  { %2125 = vmatprep.subr.mxu0 %v8669_v48  ;;  %6628 = vmatprep.subr.mxu1 %v11136_v34  ;;  %v11255_v48 = vld [vmem:[#allocation63_spill] sm:$0xff] }
 0x354   :  { %2126 = vmatpush1.msra.mxu0 %v8674_v43  ;;  %6629 = vmatpush3.msra.mxu1 %v8676_v55  ;;  %v11257_v43 = vld [vmem:[#allocation65_spill] sm:$0xff]  ;;  %v11258_v55 = vld [vmem:[#allocation66_spill] sm:$0xff] }
 0x355   :  { %v7358_v62 = vpop.eup %7357  ;;  %2127 = vmatprep.subr.mxu0 %v11252_v29  ;;  %6630 = vmatprep.subr.mxu1 %v11136_v34  ;;  %v9054_v29 = vld [vmem:[#allocation3 + $0xb0] sm:$0xff] }
 0x356   :  { %v1844_v49 = vmul.f32 %v7358_v62, %v1843_v52  ;;  %2128 = vmatpush1.msra.mxu0 %v11253_v1  ;;  %6631 = vmatpush3.msra.mxu1 %v11254_v16  ;;  %v9048_v52 = vld [vmem:[#allocation3 + $0xc0] sm:$0xff]  ;;  %v9050_v62 = vld [vmem:[#allocation3 + $0xd0] sm:$0xff]  ;;  %v9060_v1 = vld [vmem:[#allocation3 + $0xb8] sm:$0xff] }
 0x357   :  { %2129 = vmatprep.subr.mxu0 %v11255_v48  ;;  %6632 = vmatprep.subr.mxu1 %v11136_v34  ;;  %v9064_v16 = vld [vmem:[#allocation3 + $0x98] sm:$0xff]  ;;  %v9068_v48 = vld [vmem:[#allocation3 + $0x90] sm:$0xff] }
 0x358   :  { %7359 = vtanh.f32 %v1844_v49  ;;  %2130 = vmatpush1.msra.mxu0 %v11256_v32  ;;  %6633 = vmatpush3.msra.mxu1 %v11257_v43  ;;  %v9058_v49 = vld [vmem:[#allocation3 + $0xa8] sm:$0xff]  ;;  %v9074_v32 = vld [vmem:[#allocation3 + $0x80] sm:$0xff]  ;;  %v9078_v43 = vld [vmem:[#allocation3 + $0x78] sm:$0xff] }
 0x359   :  { %2131 = vmatprep.subr.mxu0 %v11258_v55  ;;  %6634 = vmatprep.subr.mxu1 %v11136_v34  ;;  %7361 = vrcp.f32 %v1840_v41  ;;  %v9070_v41 = vld [vmem:[#allocation3 + $0xa0] sm:$0xff]  ;;  %v9080_v55 = vld [vmem:[#allocation3 + $0x88] sm:$0xff] }
 0x35a   :  { %2132 = vmatpush1.msra.mxu0 %v11259_v33  ;;  %6635 = vmatpush3.msra.mxu1 %v11260_v35  ;;  %v9084_v33 = vld [vmem:[#allocation3 + $0x68] sm:$0xff]  ;;  %v9088_v35 = vld [vmem:[#allocation3 + $0x60] sm:$0xff] }
 0x35b   :  { %2133 = vmatprep.subr.mxu0 %v11261_v36  ;;  %6636 = vmatprep.subr.mxu1 %v11136_v34  ;;  %v9090_v36 = vld [vmem:[#allocation3 + $0x70] sm:$0xff] }
 0x35c   :  { %2134 = vmatpush1.msra.mxu0 %v11262_v47  ;;  %6637 = vmatpush3.msra.mxu1 %v11263_v59  ;;  %v9094_v47 = vld [vmem:[#allocation3 + $0x50] sm:$0xff]  ;;  %v9098_v59 = vld [vmem:[#allocation3 + $0x48] sm:$0xff] }
 0x35d   :  { %2135 = vmatprep.subr.mxu0 %v11264_v54  ;;  %6638 = vmatprep.subr.mxu1 %v11136_v34  ;;  %v9100_v54 = vld [vmem:[#allocation3 + $0x58] sm:$0xff] }
 0x35e   :  { %2136 = vmatpush1.msra.mxu0 %v11265_v12  ;;  %6639 = vmatpush3.msra.mxu1 %v11266_v15  ;;  %v9104_v12 = vld [vmem:[#allocation3 + $0x38] sm:$0xff]  ;;  %v9108_v15 = vld [vmem:[#allocation3 + $0x30] sm:$0xff] }
 0x35f   :  { %2137 = vmatprep.subr.mxu0 %v11267_v20  ;;  %6640 = vmatprep.subr.mxu1 %v11136_v34  ;;  %v9110_v20 = vld [vmem:[#allocation3 + $0x40] sm:$0xff] }
 0x360   :  { %2138 = vmatpush1.msra.mxu0 %v11268_v22  ;;  %6641 = vmatpush3.msra.mxu1 %v11269_v24  ;;  %v9114_v22 = vld [vmem:[#allocation3 + $0x20] sm:$0xff]  ;;  %v9118_v24 = vld [vmem:[#allocation3 + $0x18] sm:$0xff] }
 0x361   :  { %2139 = vmatprep.subr.mxu0 %v11270_v7  ;;  %6642 = vmatprep.subr.mxu1 %v11136_v34  ;;  %11282 = vst [vmem:[#allocation50_spill] sm:$0xff] %v9114_v22  ;;  %11283 = vst [vmem:[#allocation51_spill] sm:$0xff] %v9118_v24  ;;  %v9120_v7 = vld [vmem:[#allocation3 + $0x28] sm:$0xff] }
 0x362   :  { %2140 = vmatpush1.msra.mxu0 %v11271_v8  ;;  %6643 = vmatpush3.msra.mxu1 %v11272_v10  ;;  %11284 = vst [vmem:[#allocation52_spill] sm:$0xff] %v9120_v7  ;;  %v9124_v8 = vld [vmem:[#allocation3 + $0x8] sm:$0xff]  ;;  %v9128_v10 = vld [vmem:[#allocation3] sm:$0xff] }
 0x363   :  { %2141 = vmatprep.subr.mxu0 %v11273_v11  ;;  %6644 = vmatprep.subr.mxu1 %v11136_v34  ;;  %11285 = vst [vmem:[#allocation53_spill] sm:$0xff] %v9124_v8  ;;  %11286 = vst [vmem:[#allocation54_spill] sm:$0xff] %v9128_v10  ;;  %v9130_v11 = vld [vmem:[#allocation3 + $0x10] sm:$0xff] }
 0x364   :  { %2142 = vmatpush1.msra.mxu0 %v11274_v13  ;;  %6645 = vmatpush3.msra.mxu1 %v11275_v14  ;;  %11287 = vst [vmem:[#allocation55_spill] sm:$0xff] %v9130_v11  ;;  %v9134_v13 = vld [vmem:[#allocation5 + $0x170] sm:$0xff] }
 0x365   :  { %v7360_v17 = vpop.eup %7359  ;;  %2143 = vmatprep.subr.mxu0 %v11276_v19  ;;  %6646 = vmatprep.subr.mxu1 %v11136_v34  ;;  %11288 = vst [vmem:[#allocation56_spill] sm:$0xff] %v9134_v13  ;;  %v11289_v19 = vld [vmem:[#allocation75_spill] sm:$0xff] }
 0x366   :  { %2144 = vmatpush1.msra.mxu0 %v11277_v23  ;;  %6647 = vmatpush3.msra.mxu1 %v11278_v58  ;;  %v1847_v0 = vsub.f32 %v8815_v2, %v7360_v17  ;;  %v7362_v25 = vpop.eup %7361  ;;  %v9000_v2 = vld [vmem:[#allocation3 + $0x148] sm:$0xff] }
 0x367   :  { %2145 = vmatprep.subr.mxu0 %v11279_v21  ;;  %6648 = vmatprep.subr.mxu1 %v11136_v34 }
 0x368   :  { %2146 = vmatpush1.msra.mxu0 %v8774_v53  ;;  %6649 = vmatpush3.msra.mxu1 %v11280_v46  ;;  %v1848_v51 = vmul.f32 %v7362_v25, %v1847_v0  ;;  %v11290_v46 = vld [vmem:[#allocation76_spill] sm:$0xff] }
 0x369   :  { %2147 = vmatprep.subr.mxu0 %v11281_v40  ;;  %6650 = vmatprep.subr.mxu1 %v11136_v34 }
 0x36a   :  { %2148 = vmatpush1.msra.mxu0 %v8785_v5  ;;  %6651 = vmatpush3.msra.mxu1 %v8787_v61  ;;  %v8964_v53 = vadd.f32 %v7360_v17, %v1848_v51  ;;  %v8978_v5 = vld [vmem:[#allocation3 + $0x168] sm:$0xff]  ;;  %v8980_v61 = vld [vmem:[#allocation3 + $0x178] sm:$0xff] }
 0x36b   :  { %2149 = vmatprep.subr.mxu0 %v8791_v37  ;;  %6652 = vmatprep.subr.mxu1 %v11136_v34  ;;  %v8988_v37 = vld [vmem:[#allocation3 + $0x150] sm:$0xff] }
 0x36c   :  { %2150 = vmatpush1.msra.mxu0 %v8795_v30  ;;  %6653 = vmatpush3.msra.mxu1 %v8797_v4  ;;  %v8994_v4 = vld [vmem:[#allocation3 + $0x140] sm:$0xff]  ;;  %v8998_v30 = vld [vmem:[#allocation3 + $0x138] sm:$0xff] }
 0x36d   :  { %2151 = vmatprep.subr.mxu0 %v8801_v31  ;;  %6654 = vmatprep.subr.mxu1 %v11136_v34  ;;  %v8984_v31 = vld [vmem:[#allocation3 + $0x158] sm:$0xff] }
 0x36e   :  { %2152 = vmatpush1.msra.mxu0 %v8805_v60  ;;  %2185 = vmatprep.mubr.f32.mxu0 %v11136_v34  ;;  %v8975_v60 = vld [vmem:[#allocation3 + $0x170] sm:$0xff] }
 0x36f   :  { %6655 = vmatpush3.msra.mxu1 %v8809_v3  ;;  %6656 = vmatprep.mubr.msk.f32.mxu1 %vm7671_vm1, %v11136_v34  ;;  %v8990_v3 = vld [vmem:[#allocation3 + $0x160] sm:$0xff] }
 0x370   :  { %2186 = vmatmul.mubr.f32.vlgmr.msra.gmra.mxu0 %v8964_v53  ;;  %6657 = vmatmul.mubr.f32.vlgmr.msra.gmra.mxu1 %v8964_v53 }
 0x371   :  { %6659 = vmatprep.subr.mxu1 %v11136_v34  ;;  %2401 = vmatprep.mubr.f32.mxu0 %v11136_v34 }
 0x372   :  { %6691 = vmatprep.mubr.msk.f32.mxu1 %vm7671_vm1, %v11136_v34  ;;  %2337 = vmatprep.subr.mxu0 %v8975_v60 }
 0x373   :  { %2338 = vmatpush1.msra.mxu0 %v8978_v5  ;;  %6660 = vmatpush3.msra.mxu1 %v8980_v61 }
 0x374   :  { %2339 = vmatprep.subr.mxu0 %v8984_v31  ;;  %6661 = vmatprep.subr.mxu1 %v11136_v34 }
 0x375   :  { %2340 = vmatpush1.msra.mxu0 %v8988_v37  ;;  %6662 = vmatpush3.msra.mxu1 %v8990_v3 }
 0x376   :  { %2341 = vmatprep.subr.mxu0 %v8994_v4  ;;  %6663 = vmatprep.subr.mxu1 %v11136_v34 }
 0x377   :  { %2342 = vmatpush1.msra.mxu0 %v8998_v30  ;;  %6664 = vmatpush3.msra.mxu1 %v9000_v2 }
 0x378   :  { %2343 = vmatprep.subr.mxu0 %v9004_v42  ;;  %6665 = vmatprep.subr.mxu1 %v11136_v34 }
 0x379   :  { %2344 = vmatpush1.msra.mxu0 %v9008_v26  ;;  %6666 = vmatpush3.msra.mxu1 %v9010_v63 }
 0x37a   :  { %2345 = vmatprep.subr.mxu0 %v9014_v27  ;;  %6667 = vmatprep.subr.mxu1 %v11136_v34 }
 0x37b   :  { %2346 = vmatpush1.msra.mxu0 %v9018_v6  ;;  %6668 = vmatpush3.msra.mxu1 %v9020_v18 }
 0x37c   :  { %2347 = vmatprep.subr.mxu0 %v9024_v28  ;;  %6669 = vmatprep.subr.mxu1 %v11136_v34 }
 0x37d   :  { %2348 = vmatpush1.msra.mxu0 %v9028_v39  ;;  %6670 = vmatpush3.msra.mxu1 %v9030_v9 }
 0x37e   :  { %2349 = vmatprep.subr.mxu0 %v9034_v56  ;;  %6671 = vmatprep.subr.mxu1 %v11136_v34 }
 0x37f   :  { %2350 = vmatpush1.msra.mxu0 %v9038_v44  ;;  %6672 = vmatpush3.msra.mxu1 %v9040_v57 }
 0x380   :  { %2351 = vmatprep.subr.mxu0 %v9044_v45  ;;  %6673 = vmatprep.subr.mxu1 %v11136_v34 }
 0x381   :  { %2352 = vmatpush1.msra.mxu0 %v9048_v52  ;;  %6674 = vmatpush3.msra.mxu1 %v9050_v62 }
 0x382   :  { %2353 = vmatprep.subr.mxu0 %v9054_v29  ;;  %6675 = vmatprep.subr.mxu1 %v11136_v34 }
 0x383   :  { %2354 = vmatpush1.msra.mxu0 %v9058_v49  ;;  %6676 = vmatpush3.msra.mxu1 %v9060_v1 }
 0x384   :  { %2355 = vmatprep.subr.mxu0 %v9064_v16  ;;  %6677 = vmatprep.subr.mxu1 %v11136_v34 }
 0x385   :  { %2356 = vmatpush1.msra.mxu0 %v9068_v48  ;;  %6678 = vmatpush3.msra.mxu1 %v9070_v41 }
 0x386   :  { %2357 = vmatprep.subr.mxu0 %v9074_v32  ;;  %6679 = vmatprep.subr.mxu1 %v11136_v34 }
 0x387   :  { %2358 = vmatpush1.msra.mxu0 %v9078_v43  ;;  %6680 = vmatpush3.msra.mxu1 %v9080_v55 }
 0x388   :  { %2359 = vmatprep.subr.mxu0 %v9084_v33  ;;  %6681 = vmatprep.subr.mxu1 %v11136_v34 }
 0x389   :  { %2360 = vmatpush1.msra.mxu0 %v9088_v35  ;;  %6682 = vmatpush3.msra.mxu1 %v9090_v36 }
 0x38a   :  { %2361 = vmatprep.subr.mxu0 %v9094_v47  ;;  %6683 = vmatprep.subr.mxu1 %v11136_v34 }
 0x38b   :  { %2362 = vmatpush1.msra.mxu0 %v9098_v59  ;;  %6684 = vmatpush3.msra.mxu1 %v9100_v54 }
 0x38c   :  { %2363 = vmatprep.subr.mxu0 %v9104_v12  ;;  %6685 = vmatprep.subr.mxu1 %v11136_v34 }
 0x38d   :  { %2364 = vmatpush1.msra.mxu0 %v9108_v15  ;;  %6686 = vmatpush3.msra.mxu1 %v9110_v20 }
 0x38e   :  { %2365 = vmatprep.subr.mxu0 %v9114_v22  ;;  %6687 = vmatprep.subr.mxu1 %v11136_v34 }
 0x38f   :  { %2366 = vmatpush1.msra.mxu0 %v9118_v24  ;;  %6688 = vmatpush3.msra.mxu1 %v9120_v7 }
 0x390   :  { %2367 = vmatprep.subr.mxu0 %v9124_v8  ;;  %6689 = vmatprep.subr.mxu1 %v11136_v34 }
 0x391   :  { %2368 = vmatpush1.msra.mxu0 %v9128_v10  ;;  %6690 = vmatpush3.msra.mxu1 %v9130_v11 }
 0x392   :  { %2554 = vmatprep.subr.mxu0 %v9134_v13  ;;  %6694 = vmatprep.subr.mxu1 %v11136_v34  ;;  %v9143_v13 = vld [vmem:[%s10920_s7] ss:$0 sm:$0xff] }
 0x393   :  { %11291 = vst [vmem:[#allocation57_spill] sm:$0xff] %v9143_v13 }
 0x40f   :  { %v1970_v14 = vpop.f32.mrf.mxu0  ;;  %v2041_v17 = vpop.f32.mrf.mxu1 }
 0x410   :  { %v2045_v23 = vadd.f32 %v1970_v14, %v11289_v19  ;;  %v2059_v10 = vadd.f32 %v9143_v13, %v2041_v17 }
 0x411   :  { %v6623_v58 = vpop.f32.mrf.mxu1  ;;  %v1972_v21 = vpop.f32.mrf.mxu0 }
 0x412   :  { %v5867_v0 = vmul.f32 -1.442695, %v2045_v23  ;;  %v2052_v25 = vadd.f32 %v1972_v21, %v11290_v46  ;;  %v11292_v21 = vld [vmem:[#allocation85_spill] sm:$0xff] }
 0x414   :  { %7363 = vpow2.f32 %v5867_v0  ;;  %v5868_v40 = vmul.f32 -1.442695, %v2052_v25 }
 0x416   :  { %7365 = vpow2.f32 %v5868_v40 }
 0x421   :  { %v7364_v51 = vpop.eup %7363 }
 0x422   :  { %v2049_v38 = vadd.f32 1.0, %v7364_v51 }
 0x423   :  { %v7366_v11 = vpop.eup %7365 }
 0x424   :  { %7367 = vrcp.f32 %v2049_v38  ;;  %v2056_v25 = vadd.f32 1.0, %v7366_v11  ;;  %v9154_v11 = vld [vmem:[#allocation5 + $0x158] sm:$0xff] }
 0x430   :  { %v2187_v14 = vpop.f32.mrf.mxu0  ;;  %v2258_v19 = vpop.f32.mrf.mxu1 }
 0x431   :  { %v7368_v23 = vpop.eup %7367  ;;  %v5869_v58 = vmul.f32 -1.442695, %v2187_v14 }
 0x432   :  { %v2060_v0 = vmul.f32 %v7368_v23, %v2059_v10  ;;  %v6658_v8 = vpop.f32.mrf.mxu1  ;;  %v2189_v38 = vpop.f32.mrf.mxu0  ;;  %v9152_v10 = vld [vmem:[#allocation5 + $0x178] sm:$0xff]  ;;  %v9158_v23 = vld [vmem:[#allocation5 + $0x150] sm:$0xff] }
 0x433   :  { %7369 = vpow2.f32 %v5869_v58  ;;  %v5870_v40 = vmul.f32 -1.442695, %v2189_v38  ;;  %v9150_v8 = vld [vmem:[#allocation5 + $0x168] sm:$0xff]  ;;  %v9160_v58 = vld [vmem:[#allocation5 + $0x160] sm:$0xff] }
 0x434   :  { %v2061_v46 = vadd.f32 %v2060_v0, %v11292_v21  ;;  %v9178_v0 = vld [vmem:[#allocation5 + $0x120] sm:$0xff]  ;;  %v9180_v21 = vld [vmem:[#allocation5 + $0x130] sm:$0xff] }
 0x436   :  { %7371 = vtanh.f32 %v2061_v46 }
 0x437   :  { %7373 = vrcp.f32 %v2056_v25  ;;  %v9185_v25 = vld [vmem:[%s10922_s9] ss:$0 sm:$0xff] }
 0x438   :  { %7375 = vpow2.f32 %v5870_v40  ;;  %v2276_v38 = vadd.f32 %v9185_v25, %v2258_v19  ;;  %v9190_v40 = vld [vmem:[#allocation5 + $0x110] sm:$0xff]  ;;  %v9200_v19 = vld [vmem:[#allocation5 + $0xf8] sm:$0xff] }
 0x439   :  { %11298 = vst [vmem:[#allocation61_spill] sm:$0xff] %v9190_v40  ;;  %11301 = vst [vmem:[#allocation64_spill] sm:$0xff] %v9200_v19 }
 0x440   :  { %v7370_v51 = vpop.eup %7369 }
 0x441   :  { %v2266_v7 = vadd.f32 1.0, %v7370_v51 }
 0x443   :  { %v7372_v24 = vpop.eup %7371  ;;  %7377 = vrcp.f32 %v2266_v7  ;;  %v9170_v7 = vld [vmem:[#allocation5 + $0x148] sm:$0xff] }
 0x444   :  { %v2063_v17 = vsub.f32 %v8896_v50, %v7372_v24  ;;  %v7374_v13 = vpop.eup %7373  ;;  %11296 = vst [vmem:[#allocation86_spill] sm:$0xff] %v9170_v7  ;;  %v9196_v50 = vld [vmem:[#allocation5 + $0x118] sm:$0xff] }
 0x445   :  { %v7376_v46 = vpop.eup %7375  ;;  %11300 = vst [vmem:[#allocation63_spill] sm:$0xff] %v9196_v50 }
 0x446   :  { %v2064_v22 = vmul.f32 %v7374_v13, %v2063_v17  ;;  %v9174_v13 = vld [vmem:[#allocation5 + $0x128] sm:$0xff] }
 0x447   :  { %11297 = vst [vmem:[#allocation60_spill] sm:$0xff] %v9174_v13  ;;  %v9194_v17 = vld [vmem:[#allocation5 + $0x108] sm:$0xff] }
 0x448   :  { %v9148_v14 = vadd.f32 %v7372_v24, %v2064_v22  ;;  %v9164_v22 = vld [vmem:[#allocation5 + $0x140] sm:$0xff]  ;;  %v9168_v24 = vld [vmem:[#allocation5 + $0x138] sm:$0xff]  ;;  %11299 = vst [vmem:[#allocation62_spill] sm:$0xff] %v9194_v17 }
 0x449   :  { %11294 = vst [vmem:[#allocation73_spill] sm:$0xff] %v9164_v22  ;;  %11295 = vst [vmem:[#allocation74_spill] sm:$0xff] %v9168_v24 }
 0x44a   :  { %11293 = vst [vmem:[#allocation58_spill] sm:$0xff] %v9148_v14  ;;  %2402 = vmatmul.mubr.f32.vlgmr.msra.gmra.mxu0 %v9148_v14  ;;  %6692 = vmatmul.mubr.f32.vlgmr.msra.gmra.mxu1 %v9148_v14 }
 0x44b   :  { %2555 = vmatpush1.msra.mxu0 %v9150_v8  ;;  %6695 = vmatpush3.msra.mxu1 %v9152_v10 }
 0x44c   :  { %2556 = vmatprep.subr.mxu0 %v9154_v11  ;;  %6696 = vmatprep.subr.mxu1 %v11136_v34 }
 0x44d   :  { %2557 = vmatpush1.msra.mxu0 %v9158_v23  ;;  %6697 = vmatpush3.msra.mxu1 %v9160_v58 }
 0x44e   :  { %2558 = vmatprep.subr.mxu0 %v9164_v22  ;;  %6698 = vmatprep.subr.mxu1 %v11136_v34 }
 0x44f   :  { %2559 = vmatpush1.msra.mxu0 %v9168_v24  ;;  %6699 = vmatpush3.msra.mxu1 %v9170_v7  ;;  %v9204_v7 = vld [vmem:[#allocation5 + $0xf0] sm:$0xff]  ;;  %v2273_v24 = vadd.f32 1.0, %v7376_v46  ;;  %v9224_v46 = vld [vmem:[#allocation5 + $0xc0] sm:$0xff] }
 0x450   :  { %v7378_v51 = vpop.eup %7377  ;;  %2560 = vmatprep.subr.mxu0 %v9174_v13  ;;  %6700 = vmatprep.subr.mxu1 %v11136_v34  ;;  %11302 = vst [vmem:[#allocation65_spill] sm:$0xff] %v9204_v7  ;;  %v9206_v13 = vld [vmem:[#allocation5 + $0x100] sm:$0xff]  ;;  %11308 = vst [vmem:[#allocation71_spill] sm:$0xff] %v9224_v46 }
 0x451   :  { %v2277_v22 = vmul.f32 %v7378_v51, %v2276_v38  ;;  %2561 = vmatpush1.msra.mxu0 %v9178_v0  ;;  %6701 = vmatpush3.msra.mxu1 %v9180_v21  ;;  %11303 = vst [vmem:[#allocation66_spill] sm:$0xff] %v9206_v13  ;;  %v9210_v38 = vld [vmem:[#allocation5 + $0xe0] sm:$0xff]  ;;  %v9214_v51 = vld [vmem:[#allocation5 + $0xd8] sm:$0xff] }
 0x452   :  { %2562 = vmatprep.subr.mxu0 %v9190_v40  ;;  %6702 = vmatprep.subr.mxu1 %v11136_v34  ;;  %11304 = vst [vmem:[#allocation67_spill] sm:$0xff] %v9210_v38  ;;  %11305 = vst [vmem:[#allocation68_spill] sm:$0xff] %v9214_v51  ;;  %v9216_v40 = vld [vmem:[#allocation5 + $0xe8] sm:$0xff] }
 0x453   :  { %7379 = vtanh.f32 %v2277_v22  ;;  %2563 = vmatpush1.msra.mxu0 %v9194_v17  ;;  %6703 = vmatpush3.msra.mxu1 %v9196_v50  ;;  %11306 = vst [vmem:[#allocation69_spill] sm:$0xff] %v9216_v40  ;;  %v9220_v22 = vld [vmem:[#allocation5 + $0xc8] sm:$0xff]  ;;  %v9226_v50 = vld [vmem:[#allocation5 + $0xd0] sm:$0xff]  ;;  %v9291_v17 = vld [vmem:[#allocation5 + $0x20] sm:$0xff] }
 0x454   :  { %2564 = vmatprep.subr.mxu0 %v9200_v19  ;;  %6704 = vmatprep.subr.mxu1 %v11136_v34  ;;  %11307 = vst [vmem:[#allocation70_spill] sm:$0xff] %v9220_v22  ;;  %11309 = vst [vmem:[#allocation92_spill] sm:$0xff] %v9226_v50  ;;  %7381 = vrcp.f32 %v2273_v24  ;;  %v9230_v19 = vld [vmem:[#allocation5 + $0xb0] sm:$0xff] }
 0x455   :  { %2565 = vmatpush1.msra.mxu0 %v9204_v7  ;;  %6705 = vmatpush3.msra.mxu1 %v9206_v13  ;;  %11310 = vst [vmem:[#allocation93_spill] sm:$0xff] %v9230_v19  ;;  %v9234_v13 = vld [vmem:[#allocation5 + $0xa8] sm:$0xff]  ;;  %v9240_v7 = vld [vmem:[#allocation5 + $0x98] sm:$0xff]  ;;  %v9244_v24 = vld [vmem:[#allocation5 + $0x90] sm:$0xff] }
 0x456   :  { %2566 = vmatprep.subr.mxu0 %v9210_v38  ;;  %6706 = vmatprep.subr.mxu1 %v11136_v34  ;;  %11311 = vst [vmem:[#allocation94_spill] sm:$0xff] %v9234_v13  ;;  %v9236_v38 = vld [vmem:[#allocation5 + $0xb8] sm:$0xff]  ;;  %11313 = vst [vmem:[#allocation96_spill] sm:$0xff] %v9240_v7 }
 0x457   :  { %2567 = vmatpush1.msra.mxu0 %v9214_v51  ;;  %6707 = vmatpush3.msra.mxu1 %v9216_v40  ;;  %11312 = vst [vmem:[#allocation95_spill] sm:$0xff] %v9236_v38  ;;  %11314 = vst [vmem:[#allocation97_spill] sm:$0xff] %v9244_v24  ;;  %v9246_v40 = vld [vmem:[#allocation5 + $0xa0] sm:$0xff] }
 0x458   :  { %2568 = vmatprep.subr.mxu0 %v9220_v22  ;;  %6708 = vmatprep.subr.mxu1 %v11136_v34  ;;  %11315 = vst [vmem:[#allocation98_spill] sm:$0xff] %v9246_v40  ;;  %v9250_v22 = vld [vmem:[#allocation5 + $0x80] sm:$0xff] }
 0x459   :  { %2569 = vmatpush1.msra.mxu0 %v9224_v46  ;;  %6709 = vmatpush3.msra.mxu1 %v9226_v50  ;;  %11316 = vst [vmem:[#allocation99_spill] sm:$0xff] %v9250_v22  ;;  %v9254_v50 = vld [vmem:[#allocation5 + $0x78] sm:$0xff]  ;;  %v9256_v46 = vld [vmem:[#allocation5 + $0x88] sm:$0xff] }
 0x45a   :  { %2570 = vmatprep.subr.mxu0 %v9230_v19  ;;  %6710 = vmatprep.subr.mxu1 %v11136_v34  ;;  %11317 = vst [vmem:[#allocation100_spill] sm:$0xff] %v9254_v50  ;;  %11318 = vst [vmem:[#allocation101_spill] sm:$0xff] %v9256_v46  ;;  %v9260_v19 = vld [vmem:[#allocation5 + $0x68] sm:$0xff] }
 0x45b   :  { %2571 = vmatpush1.msra.mxu0 %v9234_v13  ;;  %6711 = vmatpush3.msra.mxu1 %v9236_v38  ;;  %11319 = vst [vmem:[#allocation102_spill] sm:$0xff] %v9260_v19  ;;  %v9264_v38 = vld [vmem:[#allocation5 + $0x60] sm:$0xff]  ;;  %v9266_v13 = vld [vmem:[#allocation5 + $0x70] sm:$0xff] }
 0x45c   :  { %2572 = vmatprep.subr.mxu0 %v9240_v7  ;;  %6712 = vmatprep.subr.mxu1 %v11136_v34  ;;  %11320 = vst [vmem:[#allocation103_spill] sm:$0xff] %v9264_v38  ;;  %11321 = vst [vmem:[#allocation104_spill] sm:$0xff] %v9266_v13  ;;  %v9270_v7 = vld [vmem:[#allocation5 + $0x50] sm:$0xff] }
 0x45d   :  { %2573 = vmatpush1.msra.mxu0 %v9244_v24  ;;  %6713 = vmatpush3.msra.mxu1 %v9246_v40  ;;  %11322 = vst [vmem:[#allocation105_spill] sm:$0xff] %v9270_v7  ;;  %v9274_v40 = vld [vmem:[#allocation5 + $0x48] sm:$0xff]  ;;  %v9280_v24 = vld [vmem:[#allocation5 + $0x38] sm:$0xff] }
 0x45e   :  { %2574 = vmatprep.subr.mxu0 %v9250_v22  ;;  %6714 = vmatprep.subr.mxu1 %v11136_v34  ;;  %11323 = vst [vmem:[#allocation106_spill] sm:$0xff] %v9274_v40  ;;  %v9276_v22 = vld [vmem:[#allocation5 + $0x58] sm:$0xff]  ;;  %11325 = vst [vmem:[#allocation108_spill] sm:$0xff] %v9280_v24 }
 0x45f   :  { %2575 = vmatpush1.msra.mxu0 %v9254_v50  ;;  %6715 = vmatpush3.msra.mxu1 %v9256_v46  ;;  %11324 = vst [vmem:[#allocation107_spill] sm:$0xff] %v9276_v22  ;;  %v9285_v46 = vld [vmem:[#allocation5 + $0x30] sm:$0xff] }
 0x460   :  { %v7380_v51 = vpop.eup %7379  ;;  %2576 = vmatprep.subr.mxu0 %v9260_v19  ;;  %6716 = vmatprep.subr.mxu1 %v11136_v34  ;;  %v9287_v19 = vld [vmem:[#allocation5 + $0x40] sm:$0xff] }
 0x461   :  { %2577 = vmatpush1.msra.mxu0 %v9264_v38  ;;  %6717 = vmatpush3.msra.mxu1 %v9266_v13  ;;  %v2280_v50 = vsub.f32 %v8964_v53, %v7380_v51  ;;  %v7382_v38 = vpop.eup %7381  ;;  %v9295_v53 = vld [vmem:[#allocation5 + $0x18] sm:$0xff]  ;;  %v9301_v13 = vld [vmem:[#allocation5 + $0x8] sm:$0xff] }
 0x462   :  { %2578 = vmatprep.subr.mxu0 %v9270_v7  ;;  %6718 = vmatprep.subr.mxu1 %v11136_v34  ;;  %v9297_v7 = vld [vmem:[#allocation5 + $0x28] sm:$0xff] }
 0x463   :  { %2579 = vmatpush1.msra.mxu0 %v9274_v40  ;;  %6719 = vmatpush3.msra.mxu1 %v9276_v22  ;;  %v2281_v40 = vmul.f32 %v7382_v38, %v2280_v50  ;;  %v9305_v22 = vld [vmem:[#allocation5] sm:$0xff]  ;;  %v11339_v38 = vld [vmem:[#allocation74_spill] sm:$0xff] }
 0x464   :  { %2580 = vmatprep.subr.mxu0 %v9280_v24  ;;  %6720 = vmatprep.subr.mxu1 %v11136_v34  ;;  %v9309_v24 = vld [vmem:[#allocation5 + $0x10] sm:$0xff] }
 0x465   :  { %2581 = vmatpush1.msra.mxu0 %v9285_v46  ;;  %6721 = vmatpush3.msra.mxu1 %v9287_v19  ;;  %v9315_v50 = vadd.f32 %v7380_v51, %v2281_v40  ;;  %v11341_v51 = vld [vmem:[#allocation60_spill] sm:$0xff] }
 0x466   :  { %2582 = vmatprep.subr.mxu0 %v9291_v17  ;;  %6722 = vmatprep.subr.mxu1 %v11136_v34 }
 0x467   :  { %2583 = vmatpush1.msra.mxu0 %v9295_v53  ;;  %6723 = vmatpush3.msra.mxu1 %v9297_v7 }
 0x468   :  { %2584 = vmatprep.subr.mxu0 %v9301_v13  ;;  %6724 = vmatprep.subr.mxu1 %v11136_v34 }
 0x469   :  { %2585 = vmatpush1.msra.mxu0 %v9305_v22  ;;  %2618 = vmatprep.mubr.f32.mxu0 %v11136_v34 }
 0x46a   :  { %6725 = vmatpush3.msra.mxu1 %v9309_v24  ;;  %6726 = vmatprep.mubr.msk.f32.mxu1 %vm7671_vm1, %v11136_v34 }
 0x46b   :  { %2619 = vmatmul.mubr.f32.vlgmr.msra.gmra.mxu0 %v9315_v50  ;;  %6727 = vmatmul.mubr.f32.vlgmr.msra.gmra.mxu1 %v9315_v50 }
 0x46c   :  { %2770 = vmatprep.subr.mxu0 %v8975_v60  ;;  %6729 = vmatprep.subr.mxu1 %v11136_v34  ;;  %v11326_v60 = vld [vmem:[#allocation50_spill] sm:$0xff] }
 0x46d   :  { %2771 = vmatpush1.msra.mxu0 %v8978_v5  ;;  %6730 = vmatpush3.msra.mxu1 %v8980_v61  ;;  %v11327_v5 = vld [vmem:[#allocation51_spill] sm:$0xff]  ;;  %v11328_v61 = vld [vmem:[#allocation52_spill] sm:$0xff] }
 0x46e   :  { %2772 = vmatprep.subr.mxu0 %v8984_v31  ;;  %6731 = vmatprep.subr.mxu1 %v11136_v34  ;;  %v11329_v31 = vld [vmem:[#allocation53_spill] sm:$0xff] }
 0x46f   :  { %2773 = vmatpush1.msra.mxu0 %v8988_v37  ;;  %6732 = vmatpush3.msra.mxu1 %v8990_v3  ;;  %v11330_v37 = vld [vmem:[#allocation54_spill] sm:$0xff]  ;;  %v11331_v3 = vld [vmem:[#allocation55_spill] sm:$0xff] }
 0x470   :  { %2774 = vmatprep.subr.mxu0 %v8994_v4  ;;  %6733 = vmatprep.subr.mxu1 %v11136_v34  ;;  %v11332_v4 = vld [vmem:[#allocation56_spill] sm:$0xff] }
 0x471   :  { %2775 = vmatpush1.msra.mxu0 %v8998_v30  ;;  %6734 = vmatpush3.msra.mxu1 %v9000_v2 }
 0x472   :  { %2776 = vmatprep.subr.mxu0 %v9004_v42  ;;  %6735 = vmatprep.subr.mxu1 %v11136_v34  ;;  %v11333_v42 = vld [vmem:[#allocation77_spill] sm:$0xff] }
 0x473   :  { %2777 = vmatpush1.msra.mxu0 %v9008_v26  ;;  %6736 = vmatpush3.msra.mxu1 %v9010_v63 }
 0x474   :  { %2778 = vmatprep.subr.mxu0 %v9014_v27  ;;  %6737 = vmatprep.subr.mxu1 %v11136_v34 }
 0x475   :  { %2779 = vmatpush1.msra.mxu0 %v9018_v6  ;;  %6738 = vmatpush3.msra.mxu1 %v9020_v18  ;;  %v11334_v18 = vld [vmem:[#allocation78_spill] sm:$0xff] }
 0x476   :  { %2780 = vmatprep.subr.mxu0 %v9024_v28  ;;  %6739 = vmatprep.subr.mxu1 %v11136_v34 }
 0x477   :  { %2781 = vmatpush1.msra.mxu0 %v9028_v39  ;;  %6740 = vmatpush3.msra.mxu1 %v9030_v9 }
 0x478   :  { %2782 = vmatprep.subr.mxu0 %v9034_v56  ;;  %6741 = vmatprep.subr.mxu1 %v11136_v34 }
 0x479   :  { %2783 = vmatpush1.msra.mxu0 %v9038_v44  ;;  %6742 = vmatpush3.msra.mxu1 %v9040_v57  ;;  %v11335_v57 = vld [vmem:[#allocation57_spill] sm:$0xff] }
 0x47a   :  { %2784 = vmatprep.subr.mxu0 %v9044_v45  ;;  %6743 = vmatprep.subr.mxu1 %v11136_v34 }
 0x47b   :  { %2785 = vmatpush1.msra.mxu0 %v9048_v52  ;;  %6744 = vmatpush3.msra.mxu1 %v9050_v62 }
 0x47c   :  { %2786 = vmatprep.subr.mxu0 %v9054_v29  ;;  %6745 = vmatprep.subr.mxu1 %v11136_v34 }
 0x47d   :  { %2787 = vmatpush1.msra.mxu0 %v9058_v49  ;;  %6746 = vmatpush3.msra.mxu1 %v9060_v1 }
 0x47e   :  { %2788 = vmatprep.subr.mxu0 %v9064_v16  ;;  %6747 = vmatprep.subr.mxu1 %v11136_v34 }
 0x47f   :  { %2789 = vmatpush1.msra.mxu0 %v9068_v48  ;;  %6748 = vmatpush3.msra.mxu1 %v9070_v41  ;;  %v11336_v48 = vld [vmem:[#allocation88_spill] sm:$0xff] }
 0x480   :  { %2790 = vmatprep.subr.mxu0 %v9074_v32  ;;  %6749 = vmatprep.subr.mxu1 %v11136_v34 }
 0x481   :  { %2791 = vmatpush1.msra.mxu0 %v9078_v43  ;;  %6750 = vmatpush3.msra.mxu1 %v9080_v55 }
 0x482   :  { %2792 = vmatprep.subr.mxu0 %v9084_v33  ;;  %6751 = vmatprep.subr.mxu1 %v11136_v34 }
 0x483   :  { %2793 = vmatpush1.msra.mxu0 %v9088_v35  ;;  %6752 = vmatpush3.msra.mxu1 %v9090_v36 }
 0x484   :  { %2794 = vmatprep.subr.mxu0 %v9094_v47  ;;  %6753 = vmatprep.subr.mxu1 %v11136_v34 }
 0x485   :  { %2795 = vmatpush1.msra.mxu0 %v9098_v59  ;;  %6754 = vmatpush3.msra.mxu1 %v9100_v54 }
 0x486   :  { %2796 = vmatprep.subr.mxu0 %v9104_v12  ;;  %6755 = vmatprep.subr.mxu1 %v11136_v34 }
 0x487   :  { %2797 = vmatpush1.msra.mxu0 %v9108_v15  ;;  %6756 = vmatpush3.msra.mxu1 %v9110_v20  ;;  %v11338_v15 = vld [vmem:[#allocation73_spill] sm:$0xff] }
 0x488   :  { %2798 = vmatprep.subr.mxu0 %v11326_v60  ;;  %6757 = vmatprep.subr.mxu1 %v11136_v34  ;;  %v11343_v60 = vld [vmem:[#allocation62_spill] sm:$0xff] }
 0x489   :  { %2799 = vmatpush1.msra.mxu0 %v11327_v5  ;;  %6758 = vmatpush3.msra.mxu1 %v11328_v61  ;;  %v11344_v5 = vld [vmem:[#allocation63_spill] sm:$0xff]  ;;  %v11345_v61 = vld [vmem:[#allocation64_spill] sm:$0xff] }
 0x48a   :  { %2800 = vmatprep.subr.mxu0 %v11329_v31  ;;  %6759 = vmatprep.subr.mxu1 %v11136_v34  ;;  %v11346_v31 = vld [vmem:[#allocation65_spill] sm:$0xff] }
 0x48b   :  { %2801 = vmatpush1.msra.mxu0 %v11330_v37  ;;  %6760 = vmatpush3.msra.mxu1 %v11331_v3  ;;  %v11347_v37 = vld [vmem:[#allocation66_spill] sm:$0xff]  ;;  %v11350_v3 = vld [vmem:[#allocation69_spill] sm:$0xff] }
 0x48c   :  { %2834 = vmatprep.mubr.f32.mxu0 %v11136_v34  ;;  %6761 = vmatprep.mubr.msk.f32.mxu1 %vm7671_vm1, %v11136_v34 }
 0x48d   :  { %2987 = vmatprep.subr.mxu0 %v11332_v4  ;;  %6764 = vmatprep.subr.mxu1 %v11136_v34  ;;  %v11351_v4 = vld [vmem:[#allocation70_spill] sm:$0xff] }
 0x50a   :  { %v2403_v30 = vpop.f32.mrf.mxu0  ;;  %v2474_v2 = vpop.f32.mrf.mxu1 }
 0x50b   :  { %v2478_v26 = vadd.f32 %v2403_v30, %v11333_v42  ;;  %v2492_v45 = vadd.f32 %v11335_v57, %v2474_v2  ;;  %v11352_v30 = vld [vmem:[#allocation71_spill] sm:$0xff]  ;;  %v11353_v2 = vld [vmem:[#allocation92_spill] sm:$0xff]  ;;  %v11354_v42 = vld [vmem:[#allocation93_spill] sm:$0xff] }
 0x50c   :  { %v6693_v63 = vpop.f32.mrf.mxu1  ;;  %v2405_v6 = vpop.f32.mrf.mxu0 }
 0x50d   :  { %v5871_v27 = vmul.f32 -1.442695, %v2478_v26  ;;  %v2485_v28 = vadd.f32 %v2405_v6, %v11334_v18  ;;  %v11355_v26 = vld [vmem:[#allocation94_spill] sm:$0xff]  ;;  %v11356_v63 = vld [vmem:[#allocation95_spill] sm:$0xff]  ;;  %v11358_v6 = vld [vmem:[#allocation97_spill] sm:$0xff] }
 0x50e   :  { %v11359_v18 = vld [vmem:[#allocation98_spill] sm:$0xff] }
 0x50f   :  { %7383 = vpow2.f32 %v5871_v27  ;;  %v5872_v39 = vmul.f32 -1.442695, %v2485_v28  ;;  %v11357_v27 = vld [vmem:[#allocation96_spill] sm:$0xff]  ;;  %v11360_v28 = vld [vmem:[#allocation99_spill] sm:$0xff] }
 0x511   :  { %7385 = vpow2.f32 %v5872_v39  ;;  %v11361_v39 = vld [vmem:[#allocation100_spill] sm:$0xff] }
 0x51c   :  { %v7384_v9 = vpop.eup %7383 }
 0x51d   :  { %v2482_v56 = vadd.f32 1.0, %v7384_v9  ;;  %v11362_v9 = vld [vmem:[#allocation101_spill] sm:$0xff] }
 0x51e   :  { %v7386_v44 = vpop.eup %7385 }
 0x51f   :  { %7387 = vrcp.f32 %v2482_v56  ;;  %v2489_v32 = vadd.f32 1.0, %v7386_v44  ;;  %v11363_v44 = vld [vmem:[#allocation102_spill] sm:$0xff] }
 0x52b   :  { %v2620_v52 = vpop.f32.mrf.mxu0  ;;  %v2691_v62 = vpop.f32.mrf.mxu1 }
 0x52c   :  { %v7388_v29 = vpop.eup %7387  ;;  %v5873_v49 = vmul.f32 -1.442695, %v2620_v52  ;;  %v2709_v40 = vadd.f32 %v9185_v25, %v2691_v62  ;;  %v11365_v52 = vld [vmem:[#allocation104_spill] sm:$0xff] }
 0x52d   :  { %v2493_v1 = vmul.f32 %v7388_v29, %v2492_v45  ;;  %v6728_v16 = vpop.f32.mrf.mxu1  ;;  %v2622_v43 = vpop.f32.mrf.mxu0  ;;  %v11364_v45 = vld [vmem:[#allocation103_spill] sm:$0xff]  ;;  %v11366_v29 = vld [vmem:[#allocation105_spill] sm:$0xff] }
 0x52e   :  { %7389 = vpow2.f32 %v5873_v49  ;;  %v5874_v55 = vmul.f32 -1.442695, %v2622_v43  ;;  %v11367_v49 = vld [vmem:[#allocation106_spill] sm:$0xff] }
 0x52f   :  { %v2494_v41 = vadd.f32 %v2493_v1, %v11336_v48  ;;  %v11368_v1 = vld [vmem:[#allocation107_spill] sm:$0xff]  ;;  %v11369_v48 = vld [vmem:[#allocation108_spill] sm:$0xff]  ;;  %v9504_v43 = vld [vmem:[#allocation3 + $0x128] sm:$0xff] }
 0x531   :  { %7391 = vtanh.f32 %v2494_v41 }
 0x532   :  { %7393 = vrcp.f32 %v2489_v32  ;;  %v9500_v32 = vld [vmem:[#allocation3 + $0x148] sm:$0xff] }
 0x533   :  { %7395 = vpow2.f32 %v5874_v55  ;;  %v9508_v55 = vld [vmem:[#allocation3 + $0x120] sm:$0xff] }
 0x53b   :  { %v7390_v33 = vpop.eup %7389 }
 0x53c   :  { %v2699_v35 = vadd.f32 1.0, %v7390_v33  ;;  %v9510_v33 = vld [vmem:[#allocation3 + $0x130] sm:$0xff] }
 0x53e   :  { %v7392_v36 = vpop.eup %7391  ;;  %7397 = vrcp.f32 %v2699_v35  ;;  %v9514_v35 = vld [vmem:[#allocation3 + $0x110] sm:$0xff] }
 0x53f   :  { %v2496_v47 = vsub.f32 %v9148_v14, %v7392_v36  ;;  %v7394_v59 = vpop.eup %7393 }
 0x540   :  { %v7396_v20 = vpop.eup %7395 }
 0x541   :  { %v2497_v54 = vmul.f32 %v7394_v59, %v2496_v47  ;;  %v9520_v47 = vld [vmem:[#allocation3 + $0x118] sm:$0xff] }
 0x542   :  { %v9524_v59 = vld [vmem:[#allocation3 + $0xf8] sm:$0xff] }
 0x543   :  { %v9396_v12 = vadd.f32 %v7392_v36, %v2497_v54  ;;  %v9518_v36 = vld [vmem:[#allocation3 + $0x108] sm:$0xff]  ;;  %v9528_v54 = vld [vmem:[#allocation3 + $0xf0] sm:$0xff] }
 0x545   :  { %11337 = vst [vmem:[#allocation109_spill] sm:$0xff] %v9396_v12  ;;  %2835 = vmatmul.mubr.f32.vlgmr.msra.gmra.mxu0 %v9396_v12  ;;  %6762 = vmatmul.mubr.f32.vlgmr.msra.gmra.mxu1 %v9396_v12 }
 0x546   :  { %2988 = vmatpush1.msra.mxu0 %v9150_v8  ;;  %6765 = vmatpush3.msra.mxu1 %v9152_v10  ;;  %v11340_v8 = vld [vmem:[#allocation86_spill] sm:$0xff] }
 0x547   :  { %2989 = vmatprep.subr.mxu0 %v9154_v11  ;;  %6766 = vmatprep.subr.mxu1 %v11136_v34 }
 0x548   :  { %2990 = vmatpush1.msra.mxu0 %v9158_v23  ;;  %6767 = vmatpush3.msra.mxu1 %v9160_v58  ;;  %v11342_v23 = vld [vmem:[#allocation61_spill] sm:$0xff]  ;;  %v2706_v58 = vadd.f32 1.0, %v7396_v20 }
 0x549   :  { %2991 = vmatprep.subr.mxu0 %v11338_v15  ;;  %6768 = vmatprep.subr.mxu1 %v11136_v34  ;;  %v9530_v15 = vld [vmem:[#allocation3 + $0x100] sm:$0xff] }
 0x54a   :  { %2992 = vmatpush1.msra.mxu0 %v11339_v38  ;;  %6769 = vmatpush3.msra.mxu1 %v11340_v8  ;;  %v9534_v20 = vld [vmem:[#allocation3 + $0xe0] sm:$0xff]  ;;  %v9540_v38 = vld [vmem:[#allocation3 + $0xe8] sm:$0xff] }
 0x54b   :  { %v7398_v10 = vpop.eup %7397  ;;  %2993 = vmatprep.subr.mxu0 %v11341_v51  ;;  %6770 = vmatprep.subr.mxu1 %v11136_v34  ;;  %v9544_v8 = vld [vmem:[#allocation3 + $0xc8] sm:$0xff]  ;;  %v9550_v51 = vld [vmem:[#allocation3 + $0xd0] sm:$0xff] }
 0x54c   :  { %v2710_v11 = vmul.f32 %v7398_v10, %v2709_v40  ;;  %2994 = vmatpush1.msra.mxu0 %v9178_v0  ;;  %6771 = vmatpush3.msra.mxu1 %v9180_v21  ;;  %v11348_v0 = vld [vmem:[#allocation67_spill] sm:$0xff]  ;;  %v11349_v21 = vld [vmem:[#allocation68_spill] sm:$0xff] }
 0x54d   :  { %2995 = vmatprep.subr.mxu0 %v11342_v23  ;;  %6772 = vmatprep.subr.mxu1 %v11136_v34  ;;  %v9538_v40 = vld [vmem:[#allocation3 + $0xd8] sm:$0xff]  ;;  %v9548_v10 = vld [vmem:[#allocation3 + $0xc0] sm:$0xff]  ;;  %v9558_v23 = vld [vmem:[#allocation3 + $0xa8] sm:$0xff] }
 0x54e   :  { %7399 = vtanh.f32 %v2710_v11  ;;  %2996 = vmatpush1.msra.mxu0 %v11343_v60  ;;  %6773 = vmatpush3.msra.mxu1 %v11344_v5  ;;  %v9554_v11 = vld [vmem:[#allocation3 + $0xb0] sm:$0xff]  ;;  %v9564_v60 = vld [vmem:[#allocation3 + $0x98] sm:$0xff] }
 0x54f   :  { %2997 = vmatprep.subr.mxu0 %v11345_v61  ;;  %6774 = vmatprep.subr.mxu1 %v11136_v34  ;;  %7401 = vrcp.f32 %v2706_v58  ;;  %v9560_v58 = vld [vmem:[#allocation3 + $0xb8] sm:$0xff]  ;;  %v9568_v5 = vld [vmem:[#allocation3 + $0x90] sm:$0xff]  ;;  %v9570_v61 = vld [vmem:[#allocation3 + $0xa0] sm:$0xff] }
 0x550   :  { %2998 = vmatpush1.msra.mxu0 %v11346_v31  ;;  %6775 = vmatpush3.msra.mxu1 %v11347_v37  ;;  %v9574_v31 = vld [vmem:[#allocation3 + $0x80] sm:$0xff]  ;;  %v9578_v37 = vld [vmem:[#allocation3 + $0x78] sm:$0xff] }
 0x551   :  { %2999 = vmatprep.subr.mxu0 %v11348_v0  ;;  %6776 = vmatprep.subr.mxu1 %v11136_v34  ;;  %v9580_v0 = vld [vmem:[#allocation3 + $0x88] sm:$0xff] }
 0x552   :  { %3000 = vmatpush1.msra.mxu0 %v11349_v21  ;;  %6777 = vmatpush3.msra.mxu1 %v11350_v3  ;;  %v9584_v21 = vld [vmem:[#allocation3 + $0x68] sm:$0xff]  ;;  %v9588_v3 = vld [vmem:[#allocation3 + $0x60] sm:$0xff] }
 0x553   :  { %3001 = vmatprep.subr.mxu0 %v11351_v4  ;;  %6778 = vmatprep.subr.mxu1 %v11136_v34  ;;  %v9590_v4 = vld [vmem:[#allocation3 + $0x70] sm:$0xff] }
 0x554   :  { %3002 = vmatpush1.msra.mxu0 %v11352_v30  ;;  %6779 = vmatpush3.msra.mxu1 %v11353_v2  ;;  %v9594_v30 = vld [vmem:[#allocation3 + $0x50] sm:$0xff]  ;;  %v9598_v2 = vld [vmem:[#allocation3 + $0x48] sm:$0xff] }
 0x555   :  { %3003 = vmatprep.subr.mxu0 %v11354_v42  ;;  %6780 = vmatprep.subr.mxu1 %v11136_v34  ;;  %v9600_v42 = vld [vmem:[#allocation3 + $0x58] sm:$0xff] }
 0x556   :  { %3004 = vmatpush1.msra.mxu0 %v11355_v26  ;;  %6781 = vmatpush3.msra.mxu1 %v11356_v63  ;;  %v9604_v26 = vld [vmem:[#allocation3 + $0x38] sm:$0xff]  ;;  %v9608_v63 = vld [vmem:[#allocation3 + $0x30] sm:$0xff] }
 0x557   :  { %3005 = vmatprep.subr.mxu0 %v11357_v27  ;;  %6782 = vmatprep.subr.mxu1 %v11136_v34  ;;  %11370 = vst [vmem:[#allocation75_spill] sm:$0xff] %v9608_v63  ;;  %v9610_v27 = vld [vmem:[#allocation3 + $0x40] sm:$0xff] }
 0x558   :  { %3006 = vmatpush1.msra.mxu0 %v11358_v6  ;;  %6783 = vmatpush3.msra.mxu1 %v11359_v18  ;;  %11371 = vst [vmem:[#allocation76_spill] sm:$0xff] %v9610_v27  ;;  %v9614_v6 = vld [vmem:[#allocation3 + $0x20] sm:$0xff]  ;;  %v9618_v18 = vld [vmem:[#allocation3 + $0x18] sm:$0xff] }
 0x559   :  { %3007 = vmatprep.subr.mxu0 %v11360_v28  ;;  %6784 = vmatprep.subr.mxu1 %v11136_v34  ;;  %11372 = vst [vmem:[#allocation85_spill] sm:$0xff] %v9614_v6  ;;  %11373 = vst [vmem:[#allocation50_spill] sm:$0xff] %v9618_v18  ;;  %v9620_v28 = vld [vmem:[#allocation3 + $0x28] sm:$0xff] }
 0x55a   :  { %3008 = vmatpush1.msra.mxu0 %v11361_v39  ;;  %6785 = vmatpush3.msra.mxu1 %v11362_v9  ;;  %11374 = vst [vmem:[#allocation51_spill] sm:$0xff] %v9620_v28  ;;  %v9624_v39 = vld [vmem:[#allocation3 + $0x8] sm:$0xff]  ;;  %v9628_v9 = vld [vmem:[#allocation3] sm:$0xff] }
 0x55b   :  { %v7400_v56 = vpop.eup %7399  ;;  %3009 = vmatprep.subr.mxu0 %v11363_v44  ;;  %6786 = vmatprep.subr.mxu1 %v11136_v34  ;;  %11375 = vst [vmem:[#allocation52_spill] sm:$0xff] %v9624_v39  ;;  %11376 = vst [vmem:[#allocation53_spill] sm:$0xff] %v9628_v9  ;;  %v9634_v44 = vld [vmem:[#allocation5 + $0x170] sm:$0xff] }
 0x55c   :  { %3010 = vmatpush1.msra.mxu0 %v11364_v45  ;;  %6787 = vmatpush3.msra.mxu1 %v11365_v52  ;;  %v2713_v62 = vsub.f32 %v9315_v50, %v7400_v56  ;;  %v7402_v16 = vpop.eup %7401  ;;  %v9498_v50 = vld [vmem:[#allocation3 + $0x138] sm:$0xff]  ;;  %11378 = vst [vmem:[#allocation55_spill] sm:$0xff] %v9634_v44 }
 0x55d   :  { %3011 = vmatprep.subr.mxu0 %v11366_v29  ;;  %6788 = vmatprep.subr.mxu1 %v11136_v34 }
 0x55e   :  { %3012 = vmatpush1.msra.mxu0 %v11367_v49  ;;  %6789 = vmatpush3.msra.mxu1 %v11368_v1  ;;  %v2714_v41 = vmul.f32 %v7402_v16, %v2713_v62  ;;  %v11379_v62 = vld [vmem:[#allocation79_spill] sm:$0xff] }
 0x55f   :  { %3013 = vmatprep.subr.mxu0 %v11369_v48  ;;  %6790 = vmatprep.subr.mxu1 %v11136_v34  ;;  %v11380_v48 = vld [vmem:[#allocation80_spill] sm:$0xff] }
 0x560   :  { %3014 = vmatpush1.msra.mxu0 %v9285_v46  ;;  %6791 = vmatpush3.msra.mxu1 %v9287_v19  ;;  %v9464_v46 = vadd.f32 %v7400_v56, %v2714_v41  ;;  %v9484_v19 = vld [vmem:[#allocation3 + $0x158] sm:$0xff]  ;;  %v9630_v56 = vld [vmem:[#allocation3 + $0x10] sm:$0xff] }
 0x561   :  { %3015 = vmatprep.subr.mxu0 %v9291_v17  ;;  %6792 = vmatprep.subr.mxu1 %v11136_v34  ;;  %v9480_v17 = vld [vmem:[#allocation3 + $0x178] sm:$0xff]  ;;  %11377 = vst [vmem:[#allocation54_spill] sm:$0xff] %v9630_v56 }
 0x562   :  { %3016 = vmatpush1.msra.mxu0 %v9295_v53  ;;  %6793 = vmatpush3.msra.mxu1 %v9297_v7  ;;  %v9475_v7 = vld [vmem:[#allocation3 + $0x170] sm:$0xff]  ;;  %v9494_v53 = vld [vmem:[#allocation3 + $0x140] sm:$0xff] }
 0x563   :  { %3017 = vmatprep.subr.mxu0 %v9301_v13  ;;  %6794 = vmatprep.subr.mxu1 %v11136_v34  ;;  %v9478_v13 = vld [vmem:[#allocation3 + $0x168] sm:$0xff] }
 0x564   :  { %3018 = vmatpush1.msra.mxu0 %v9305_v22  ;;  %3051 = vmatprep.mubr.f32.mxu0 %v11136_v34  ;;  %v9488_v22 = vld [vmem:[#allocation3 + $0x150] sm:$0xff] }
 0x565   :  { %6795 = vmatpush3.msra.mxu1 %v9309_v24  ;;  %6796 = vmatprep.mubr.msk.f32.mxu1 %vm7671_vm1, %v11136_v34  ;;  %v9490_v24 = vld [vmem:[#allocation3 + $0x160] sm:$0xff] }
 0x566   :  { %3052 = vmatmul.mubr.f32.vlgmr.msra.gmra.mxu0 %v9464_v46  ;;  %6797 = vmatmul.mubr.f32.vlgmr.msra.gmra.mxu1 %v9464_v46 }
 0x567   :  { %6799 = vmatprep.subr.mxu1 %v11136_v34  ;;  %3267 = vmatprep.mubr.f32.mxu0 %v11136_v34 }
 0x568   :  { %6831 = vmatprep.mubr.msk.f32.mxu1 %vm7671_vm1, %v11136_v34  ;;  %3203 = vmatprep.subr.mxu0 %v9475_v7 }
 0x569   :  { %3204 = vmatpush1.msra.mxu0 %v9478_v13  ;;  %6800 = vmatpush3.msra.mxu1 %v9480_v17 }
 0x56a   :  { %3205 = vmatprep.subr.mxu0 %v9484_v19  ;;  %6801 = vmatprep.subr.mxu1 %v11136_v34 }
 0x56b   :  { %3206 = vmatpush1.msra.mxu0 %v9488_v22  ;;  %6802 = vmatpush3.msra.mxu1 %v9490_v24 }
 0x56c   :  { %3207 = vmatprep.subr.mxu0 %v9494_v53  ;;  %6803 = vmatprep.subr.mxu1 %v11136_v34 }
 0x56d   :  { %3208 = vmatpush1.msra.mxu0 %v9498_v50  ;;  %6804 = vmatpush3.msra.mxu1 %v9500_v32 }
 0x56e   :  { %3209 = vmatprep.subr.mxu0 %v9504_v43  ;;  %6805 = vmatprep.subr.mxu1 %v11136_v34 }
 0x56f   :  { %3210 = vmatpush1.msra.mxu0 %v9508_v55  ;;  %6806 = vmatpush3.msra.mxu1 %v9510_v33 }
 0x570   :  { %3211 = vmatprep.subr.mxu0 %v9514_v35  ;;  %6807 = vmatprep.subr.mxu1 %v11136_v34 }
 0x571   :  { %3212 = vmatpush1.msra.mxu0 %v9518_v36  ;;  %6808 = vmatpush3.msra.mxu1 %v9520_v47 }
 0x572   :  { %3213 = vmatprep.subr.mxu0 %v9524_v59  ;;  %6809 = vmatprep.subr.mxu1 %v11136_v34 }
 0x573   :  { %3214 = vmatpush1.msra.mxu0 %v9528_v54  ;;  %6810 = vmatpush3.msra.mxu1 %v9530_v15 }
 0x574   :  { %3215 = vmatprep.subr.mxu0 %v9534_v20  ;;  %6811 = vmatprep.subr.mxu1 %v11136_v34 }
 0x575   :  { %3216 = vmatpush1.msra.mxu0 %v9538_v40  ;;  %6812 = vmatpush3.msra.mxu1 %v9540_v38 }
 0x576   :  { %3217 = vmatprep.subr.mxu0 %v9544_v8  ;;  %6813 = vmatprep.subr.mxu1 %v11136_v34 }
 0x577   :  { %3218 = vmatpush1.msra.mxu0 %v9548_v10  ;;  %6814 = vmatpush3.msra.mxu1 %v9550_v51 }
 0x578   :  { %3219 = vmatprep.subr.mxu0 %v9554_v11  ;;  %6815 = vmatprep.subr.mxu1 %v11136_v34 }
 0x579   :  { %3220 = vmatpush1.msra.mxu0 %v9558_v23  ;;  %6816 = vmatpush3.msra.mxu1 %v9560_v58 }
 0x57a   :  { %3221 = vmatprep.subr.mxu0 %v9564_v60  ;;  %6817 = vmatprep.subr.mxu1 %v11136_v34 }
 0x57b   :  { %3222 = vmatpush1.msra.mxu0 %v9568_v5  ;;  %6818 = vmatpush3.msra.mxu1 %v9570_v61 }
 0x57c   :  { %3223 = vmatprep.subr.mxu0 %v9574_v31  ;;  %6819 = vmatprep.subr.mxu1 %v11136_v34 }
 0x57d   :  { %3224 = vmatpush1.msra.mxu0 %v9578_v37  ;;  %6820 = vmatpush3.msra.mxu1 %v9580_v0 }
 0x57e   :  { %3225 = vmatprep.subr.mxu0 %v9584_v21  ;;  %6821 = vmatprep.subr.mxu1 %v11136_v34 }
 0x57f   :  { %3226 = vmatpush1.msra.mxu0 %v9588_v3  ;;  %6822 = vmatpush3.msra.mxu1 %v9590_v4 }
 0x580   :  { %3227 = vmatprep.subr.mxu0 %v9594_v30  ;;  %6823 = vmatprep.subr.mxu1 %v11136_v34 }
 0x581   :  { %3228 = vmatpush1.msra.mxu0 %v9598_v2  ;;  %6824 = vmatpush3.msra.mxu1 %v9600_v42 }
 0x582   :  { %3229 = vmatprep.subr.mxu0 %v9604_v26  ;;  %6825 = vmatprep.subr.mxu1 %v11136_v34 }
 0x583   :  { %3230 = vmatpush1.msra.mxu0 %v9608_v63  ;;  %6826 = vmatpush3.msra.mxu1 %v9610_v27 }
 0x584   :  { %3231 = vmatprep.subr.mxu0 %v9614_v6  ;;  %6827 = vmatprep.subr.mxu1 %v11136_v34 }
 0x585   :  { %3232 = vmatpush1.msra.mxu0 %v9618_v18  ;;  %6828 = vmatpush3.msra.mxu1 %v9620_v28 }
 0x586   :  { %3233 = vmatprep.subr.mxu0 %v9624_v39  ;;  %6829 = vmatprep.subr.mxu1 %v11136_v34 }
 0x587   :  { %3234 = vmatpush1.msra.mxu0 %v9628_v9  ;;  %6830 = vmatpush3.msra.mxu1 %v9630_v56 }
 0x588   :  { %3420 = vmatprep.subr.mxu0 %v9634_v44  ;;  %6834 = vmatprep.subr.mxu1 %v11136_v34 }
 0x605   :  { %v2836_v45 = vpop.f32.mrf.mxu0  ;;  %v2907_v52 = vpop.f32.mrf.mxu1 }
 0x606   :  { %v2911_v29 = vadd.f32 %v2836_v45, %v11379_v62  ;;  %v2925_v44 = vadd.f32 %v11335_v57, %v2907_v52  ;;  %v11381_v62 = vld [vmem:[#allocation87_spill] sm:$0xff] }
 0x607   :  { %v6763_v49 = vpop.f32.mrf.mxu1  ;;  %v2838_v16 = vpop.f32.mrf.mxu0 }
 0x608   :  { %v5875_v1 = vmul.f32 -1.442695, %v2911_v29  ;;  %v2918_v41 = vadd.f32 %v2838_v16, %v11380_v48 }
 0x60a   :  { %7403 = vpow2.f32 %v5875_v1  ;;  %v5876_v14 = vmul.f32 -1.442695, %v2918_v41  ;;  %v9659_v41 = vld [vmem:[#allocation5 + $0x140] sm:$0xff] }
 0x60c   :  { %7405 = vpow2.f32 %v5876_v14 }
 0x617   :  { %v7404_v9 = vpop.eup %7403 }
 0x618   :  { %v2915_v39 = vadd.f32 1.0, %v7404_v9 }
 0x619   :  { %v7406_v56 = vpop.eup %7405 }
 0x61a   :  { %7407 = vrcp.f32 %v2915_v39  ;;  %v2922_v49 = vadd.f32 1.0, %v7406_v56  ;;  %v9653_v56 = vld [vmem:[#allocation5 + $0x150] sm:$0xff] }
 0x626   :  { %v3053_v28 = vpop.f32.mrf.mxu0  ;;  %v3124_v18 = vpop.f32.mrf.mxu1 }
 0x627   :  { %v7408_v6 = vpop.eup %7407  ;;  %v5877_v27 = vmul.f32 -1.442695, %v3053_v28 }
 0x628   :  { %v2926_v63 = vmul.f32 %v7408_v6, %v2925_v44  ;;  %v6798_v45 = vpop.f32.mrf.mxu1  ;;  %v3055_v1 = vpop.f32.mrf.mxu0  ;;  %v9645_v6 = vld [vmem:[#allocation5 + $0x168] sm:$0xff]  ;;  %v9655_v44 = vld [vmem:[#allocation5 + $0x160] sm:$0xff] }
 0x629   :  { %7409 = vpow2.f32 %v5877_v27  ;;  %v5878_v16 = vmul.f32 -1.442695, %v3055_v1  ;;  %v9647_v27 = vld [vmem:[#allocation5 + $0x178] sm:$0xff]  ;;  %v9675_v1 = vld [vmem:[#allocation5 + $0x130] sm:$0xff] }
 0x62a   :  { %v2927_v29 = vadd.f32 %v2926_v63, %v11381_v62  ;;  %v9649_v63 = vld [vmem:[#allocation5 + $0x158] sm:$0xff]  ;;  %v9665_v62 = vld [vmem:[#allocation5 + $0x148] sm:$0xff] }
 0x62b   :  { %v9663_v45 = vld [vmem:[#allocation5 + $0x138] sm:$0xff] }
 0x62c   :  { %7411 = vtanh.f32 %v2927_v29  ;;  %v9669_v29 = vld [vmem:[#allocation5 + $0x128] sm:$0xff] }
 0x62d   :  { %7413 = vrcp.f32 %v2922_v49  ;;  %11382 = vst [vmem:[#allocation56_spill] sm:$0xff] %v9669_v29  ;;  %v9673_v49 = vld [vmem:[#allocation5 + $0x120] sm:$0xff] }
 0x62e   :  { %7415 = vpow2.f32 %v5878_v16 }
 0x636   :  { %v7410_v9 = vpop.eup %7409 }
 0x637   :  { %v3132_v14 = vadd.f32 1.0, %v7410_v9  ;;  %v3142_v9 = vadd.f32 %v9185_v25, %v3124_v18  ;;  %v9690_v25 = vld [vmem:[#allocation5 + $0xf8] sm:$0xff]  ;;  %v9694_v18 = vld [vmem:[#allocation5 + $0xf0] sm:$0xff] }
 0x638   :  { %11386 = vst [vmem:[#allocation88_spill] sm:$0xff] %v9690_v25  ;;  %11387 = vst [vmem:[#allocation73_spill] sm:$0xff] %v9694_v18 }
 0x639   :  { %v7412_v39 = vpop.eup %7411  ;;  %7417 = vrcp.f32 %v3132_v14  ;;  %v9680_v14 = vld [vmem:[#allocation5 + $0x110] sm:$0xff] }
 0x63a   :  { %v2929_v57 = vsub.f32 %v9396_v12, %v7412_v39  ;;  %v7414_v52 = vpop.eup %7413  ;;  %11383 = vst [vmem:[#allocation77_spill] sm:$0xff] %v9680_v14  ;;  %v9696_v12 = vld [vmem:[#allocation5 + $0x100] sm:$0xff] }
 0x63b   :  { %v7416_v16 = vpop.eup %7415  ;;  %11388 = vst [vmem:[#allocation74_spill] sm:$0xff] %v9696_v12 }
 0x63c   :  { %v2930_v48 = vmul.f32 %v7414_v52, %v2929_v57  ;;  %v9684_v57 = vld [vmem:[#allocation5 + $0x108] sm:$0xff]  ;;  %v9686_v52 = vld [vmem:[#allocation5 + $0x118] sm:$0xff] }
 0x63d   :  { %11384 = vst [vmem:[#allocation78_spill] sm:$0xff] %v9684_v57  ;;  %11385 = vst [vmem:[#allocation57_spill] sm:$0xff] %v9686_v52 }
 0x63e   :  { %v9643_v28 = vadd.f32 %v7412_v39, %v2930_v48 }
 0x640   :  { %3268 = vmatmul.mubr.f32.vlgmr.msra.gmra.mxu0 %v9643_v28  ;;  %6832 = vmatmul.mubr.f32.vlgmr.msra.gmra.mxu1 %v9643_v28 }
 0x641   :  { %3421 = vmatpush1.msra.mxu0 %v9645_v6  ;;  %6835 = vmatpush3.msra.mxu1 %v9647_v27 }
 0x642   :  { %3422 = vmatprep.subr.mxu0 %v9649_v63  ;;  %6836 = vmatprep.subr.mxu1 %v11136_v34 }
 0x643   :  { %3423 = vmatpush1.msra.mxu0 %v9653_v56  ;;  %6837 = vmatpush3.msra.mxu1 %v9655_v44 }
 0x644   :  { %3424 = vmatprep.subr.mxu0 %v9659_v41  ;;  %6838 = vmatprep.subr.mxu1 %v11136_v34 }
 0x645   :  { %3425 = vmatpush1.msra.mxu0 %v9663_v45  ;;  %6839 = vmatpush3.msra.mxu1 %v9665_v62 }
 0x646   :  { %v7418_v39 = vpop.eup %7417  ;;  %3426 = vmatprep.subr.mxu0 %v9669_v29  ;;  %6840 = vmatprep.subr.mxu1 %v11136_v34  ;;  %v3139_v29 = vadd.f32 1.0, %v7416_v16  ;;  %v9714_v16 = vld [vmem:[#allocation5 + $0xc0] sm:$0xff] }
 0x647   :  { %v3143_v48 = vmul.f32 %v7418_v39, %v3142_v9  ;;  %3427 = vmatpush1.msra.mxu0 %v9673_v49  ;;  %6841 = vmatpush3.msra.mxu1 %v9675_v1  ;;  %v9700_v9 = vld [vmem:[#allocation5 + $0xe0] sm:$0xff]  ;;  %v9704_v39 = vld [vmem:[#allocation5 + $0xd8] sm:$0xff]  ;;  %11393 = vst [vmem:[#allocation63_spill] sm:$0xff] %v9714_v16 }
 0x648   :  { %3428 = vmatprep.subr.mxu0 %v9680_v14  ;;  %6842 = vmatprep.subr.mxu1 %v11136_v34  ;;  %11389 = vst [vmem:[#allocation86_spill] sm:$0xff] %v9700_v9  ;;  %11390 = vst [vmem:[#allocation60_spill] sm:$0xff] %v9704_v39  ;;  %v9706_v14 = vld [vmem:[#allocation5 + $0xe8] sm:$0xff] }
 0x649   :  { %7419 = vtanh.f32 %v3143_v48  ;;  %3429 = vmatpush1.msra.mxu0 %v9684_v57  ;;  %6843 = vmatpush3.msra.mxu1 %v9686_v52  ;;  %11391 = vst [vmem:[#allocation61_spill] sm:$0xff] %v9706_v14  ;;  %v9710_v48 = vld [vmem:[#allocation5 + $0xc8] sm:$0xff]  ;;  %v9716_v52 = vld [vmem:[#allocation5 + $0xd0] sm:$0xff]  ;;  %v9781_v57 = vld [vmem:[#allocation5 + $0x20] sm:$0xff] }
 0x64a   :  { %3430 = vmatprep.subr.mxu0 %v9690_v25  ;;  %6844 = vmatprep.subr.mxu1 %v11136_v34  ;;  %11392 = vst [vmem:[#allocation62_spill] sm:$0xff] %v9710_v48  ;;  %11394 = vst [vmem:[#allocation64_spill] sm:$0xff] %v9716_v52  ;;  %7421 = vrcp.f32 %v3139_v29  ;;  %v9720_v25 = vld [vmem:[#allocation5 + $0xb0] sm:$0xff] }
 0x64b   :  { %3431 = vmatpush1.msra.mxu0 %v9694_v18  ;;  %6845 = vmatpush3.msra.mxu1 %v9696_v12  ;;  %11395 = vst [vmem:[#allocation65_spill] sm:$0xff] %v9720_v25  ;;  %v9724_v12 = vld [vmem:[#allocation5 + $0xa8] sm:$0xff]  ;;  %v9730_v18 = vld [vmem:[#allocation5 + $0x98] sm:$0xff]  ;;  %v9734_v29 = vld [vmem:[#allocation5 + $0x90] sm:$0xff] }
 0x64c   :  { %3432 = vmatprep.subr.mxu0 %v9700_v9  ;;  %6846 = vmatprep.subr.mxu1 %v11136_v34  ;;  %11396 = vst [vmem:[#allocation66_spill] sm:$0xff] %v9724_v12  ;;  %v9726_v9 = vld [vmem:[#allocation5 + $0xb8] sm:$0xff]  ;;  %11398 = vst [vmem:[#allocation68_spill] sm:$0xff] %v9730_v18 }
 0x64d   :  { %3433 = vmatpush1.msra.mxu0 %v9704_v39  ;;  %6847 = vmatpush3.msra.mxu1 %v9706_v14  ;;  %11397 = vst [vmem:[#allocation67_spill] sm:$0xff] %v9726_v9  ;;  %11399 = vst [vmem:[#allocation69_spill] sm:$0xff] %v9734_v29  ;;  %v9736_v14 = vld [vmem:[#allocation5 + $0xa0] sm:$0xff] }
 0x64e   :  { %3434 = vmatprep.subr.mxu0 %v9710_v48  ;;  %6848 = vmatprep.subr.mxu1 %v11136_v34  ;;  %11400 = vst [vmem:[#allocation70_spill] sm:$0xff] %v9736_v14  ;;  %v9740_v48 = vld [vmem:[#allocation5 + $0x80] sm:$0xff] }
 0x64f   :  { %3435 = vmatpush1.msra.mxu0 %v9714_v16  ;;  %6849 = vmatpush3.msra.mxu1 %v9716_v52  ;;  %11401 = vst [vmem:[#allocation71_spill] sm:$0xff] %v9740_v48  ;;  %v9744_v52 = vld [vmem:[#allocation5 + $0x78] sm:$0xff]  ;;  %v9746_v16 = vld [vmem:[#allocation5 + $0x88] sm:$0xff] }
 0x650   :  { %3436 = vmatprep.subr.mxu0 %v9720_v25  ;;  %6850 = vmatprep.subr.mxu1 %v11136_v34  ;;  %11402 = vst [vmem:[#allocation92_spill] sm:$0xff] %v9744_v52  ;;  %11403 = vst [vmem:[#allocation93_spill] sm:$0xff] %v9746_v16  ;;  %v9750_v25 = vld [vmem:[#allocation5 + $0x68] sm:$0xff] }
 0x651   :  { %3437 = vmatpush1.msra.mxu0 %v9724_v12  ;;  %6851 = vmatpush3.msra.mxu1 %v9726_v9  ;;  %11404 = vst [vmem:[#allocation94_spill] sm:$0xff] %v9750_v25  ;;  %v9754_v9 = vld [vmem:[#allocation5 + $0x60] sm:$0xff]  ;;  %v9756_v12 = vld [vmem:[#allocation5 + $0x70] sm:$0xff] }
 0x652   :  { %3438 = vmatprep.subr.mxu0 %v9730_v18  ;;  %6852 = vmatprep.subr.mxu1 %v11136_v34  ;;  %11405 = vst [vmem:[#allocation95_spill] sm:$0xff] %v9754_v9  ;;  %11406 = vst [vmem:[#allocation96_spill] sm:$0xff] %v9756_v12  ;;  %v9760_v18 = vld [vmem:[#allocation5 + $0x50] sm:$0xff] }
 0x653   :  { %3439 = vmatpush1.msra.mxu0 %v9734_v29  ;;  %6853 = vmatpush3.msra.mxu1 %v9736_v14  ;;  %11407 = vst [vmem:[#allocation97_spill] sm:$0xff] %v9760_v18  ;;  %v9764_v14 = vld [vmem:[#allocation5 + $0x48] sm:$0xff]  ;;  %v9770_v29 = vld [vmem:[#allocation5 + $0x38] sm:$0xff] }
 0x654   :  { %3440 = vmatprep.subr.mxu0 %v9740_v48  ;;  %6854 = vmatprep.subr.mxu1 %v11136_v34  ;;  %11408 = vst [vmem:[#allocation98_spill] sm:$0xff] %v9764_v14  ;;  %v9766_v48 = vld [vmem:[#allocation5 + $0x58] sm:$0xff]  ;;  %11410 = vst [vmem:[#allocation100_spill] sm:$0xff] %v9770_v29 }
 0x655   :  { %3441 = vmatpush1.msra.mxu0 %v9744_v52  ;;  %6855 = vmatpush3.msra.mxu1 %v9746_v16  ;;  %11409 = vst [vmem:[#allocation99_spill] sm:$0xff] %v9766_v48  ;;  %v9775_v16 = vld [vmem:[#allocation5 + $0x30] sm:$0xff] }
 0x656   :  { %v7420_v39 = vpop.eup %7419  ;;  %3442 = vmatprep.subr.mxu0 %v9750_v25  ;;  %6856 = vmatprep.subr.mxu1 %v11136_v34  ;;  %v9777_v25 = vld [vmem:[#allocation5 + $0x40] sm:$0xff] }
 0x657   :  { %3443 = vmatpush1.msra.mxu0 %v9754_v9  ;;  %6857 = vmatpush3.msra.mxu1 %v9756_v12  ;;  %v3146_v52 = vsub.f32 %v9464_v46, %v7420_v39  ;;  %v7422_v9 = vpop.eup %7421  ;;  %v9785_v46 = vld [vmem:[#allocation5 + $0x18] sm:$0xff]  ;;  %v9791_v12 = vld [vmem:[#allocation5 + $0x8] sm:$0xff] }
 0x658   :  { %3444 = vmatprep.subr.mxu0 %v9760_v18  ;;  %6858 = vmatprep.subr.mxu1 %v11136_v34  ;;  %v9787_v18 = vld [vmem:[#allocation5 + $0x28] sm:$0xff] }
 0x659   :  { %3445 = vmatpush1.msra.mxu0 %v9764_v14  ;;  %6859 = vmatpush3.msra.mxu1 %v9766_v48  ;;  %v3147_v14 = vmul.f32 %v7422_v9, %v3146_v52  ;;  %v9795_v48 = vld [vmem:[#allocation5] sm:$0xff] }
 0x65a   :  { %3446 = vmatprep.subr.mxu0 %v9770_v29  ;;  %6860 = vmatprep.subr.mxu1 %v11136_v34  ;;  %v9799_v29 = vld [vmem:[#allocation5 + $0x10] sm:$0xff] }
 0x65b   :  { %3447 = vmatpush1.msra.mxu0 %v9775_v16  ;;  %6861 = vmatpush3.msra.mxu1 %v9777_v25  ;;  %v9805_v52 = vadd.f32 %v7420_v39, %v3147_v14 }
 0x65c   :  { %3448 = vmatprep.subr.mxu0 %v9781_v57  ;;  %6862 = vmatprep.subr.mxu1 %v11136_v34 }
 0x65d   :  { %3449 = vmatpush1.msra.mxu0 %v9785_v46  ;;  %6863 = vmatpush3.msra.mxu1 %v9787_v18 }
 0x65e   :  { %3450 = vmatprep.subr.mxu0 %v9791_v12  ;;  %6864 = vmatprep.subr.mxu1 %v11136_v34 }
 0x65f   :  { %3451 = vmatpush1.msra.mxu0 %v9795_v48  ;;  %3484 = vmatprep.mubr.f32.mxu0 %v11136_v34 }
 0x660   :  { %6865 = vmatpush3.msra.mxu1 %v9799_v29  ;;  %6866 = vmatprep.mubr.msk.f32.mxu1 %vm7671_vm1, %v11136_v34 }
 0x661   :  { %3485 = vmatmul.mubr.f32.vlgmr.msra.gmra.mxu0 %v9805_v52  ;;  %6867 = vmatmul.mubr.f32.vlgmr.msra.gmra.mxu1 %v9805_v52 }
 0x662   :  { %3636 = vmatprep.subr.mxu0 %v9475_v7  ;;  %6869 = vmatprep.subr.mxu1 %v11136_v34  ;;  %v11411_v7 = vld [vmem:[#allocation75_spill] sm:$0xff] }
 0x663   :  { %3637 = vmatpush1.msra.mxu0 %v9478_v13  ;;  %6870 = vmatpush3.msra.mxu1 %v9480_v17  ;;  %v11412_v13 = vld [vmem:[#allocation76_spill] sm:$0xff]  ;;  %v11413_v17 = vld [vmem:[#allocation85_spill] sm:$0xff] }
 0x664   :  { %3638 = vmatprep.subr.mxu0 %v9484_v19  ;;  %6871 = vmatprep.subr.mxu1 %v11136_v34  ;;  %v11414_v19 = vld [vmem:[#allocation50_spill] sm:$0xff] }
 0x665   :  { %3639 = vmatpush1.msra.mxu0 %v9488_v22  ;;  %6872 = vmatpush3.msra.mxu1 %v9490_v24  ;;  %v11415_v22 = vld [vmem:[#allocation51_spill] sm:$0xff]  ;;  %v11416_v24 = vld [vmem:[#allocation52_spill] sm:$0xff] }
 0x666   :  { %3640 = vmatprep.subr.mxu0 %v9494_v53  ;;  %6873 = vmatprep.subr.mxu1 %v11136_v34  ;;  %v11417_v53 = vld [vmem:[#allocation53_spill] sm:$0xff] }
 0x667   :  { %3641 = vmatpush1.msra.mxu0 %v9498_v50  ;;  %6874 = vmatpush3.msra.mxu1 %v9500_v32  ;;  %v11418_v50 = vld [vmem:[#allocation54_spill] sm:$0xff]  ;;  %v11419_v32 = vld [vmem:[#allocation55_spill] sm:$0xff] }
 0x668   :  { %3642 = vmatprep.subr.mxu0 %v9504_v43  ;;  %6875 = vmatprep.subr.mxu1 %v11136_v34 }
 0x669   :  { %3643 = vmatpush1.msra.mxu0 %v9508_v55  ;;  %6876 = vmatpush3.msra.mxu1 %v9510_v33  ;;  %v11420_v33 = vld [vmem:[#allocation81_spill] sm:$0xff] }
 0x66a   :  { %3644 = vmatprep.subr.mxu0 %v9514_v35  ;;  %6877 = vmatprep.subr.mxu1 %v11136_v34 }
 0x66b   :  { %3645 = vmatpush1.msra.mxu0 %v9518_v36  ;;  %6878 = vmatpush3.msra.mxu1 %v9520_v47 }
 0x66c   :  { %3646 = vmatprep.subr.mxu0 %v9524_v59  ;;  %6879 = vmatprep.subr.mxu1 %v11136_v34 }
 0x66d   :  { %3647 = vmatpush1.msra.mxu0 %v9528_v54  ;;  %6880 = vmatpush3.msra.mxu1 %v9530_v15  ;;  %v11421_v54 = vld [vmem:[#allocation82_spill] sm:$0xff] }
 0x66e   :  { %3648 = vmatprep.subr.mxu0 %v9534_v20  ;;  %6881 = vmatprep.subr.mxu1 %v11136_v34 }
 0x66f   :  { %3649 = vmatpush1.msra.mxu0 %v9538_v40  ;;  %6882 = vmatpush3.msra.mxu1 %v9540_v38 }
 0x670   :  { %3650 = vmatprep.subr.mxu0 %v9544_v8  ;;  %6883 = vmatprep.subr.mxu1 %v11136_v34 }
 0x671   :  { %3651 = vmatpush1.msra.mxu0 %v9548_v10  ;;  %6884 = vmatpush3.msra.mxu1 %v9550_v51  ;;  %v9886_v10 = vld [vmem:[%s10920_s7] ss:$0 sm:$0xff] }
 0x672   :  { %3652 = vmatprep.subr.mxu0 %v9554_v11  ;;  %6885 = vmatprep.subr.mxu1 %v11136_v34 }
 0x673   :  { %3653 = vmatpush1.msra.mxu0 %v9558_v23  ;;  %6886 = vmatpush3.msra.mxu1 %v9560_v58 }
 0x674   :  { %3654 = vmatprep.subr.mxu0 %v9564_v60  ;;  %6887 = vmatprep.subr.mxu1 %v11136_v34 }
 0x675   :  { %3655 = vmatpush1.msra.mxu0 %v9568_v5  ;;  %6888 = vmatpush3.msra.mxu1 %v9570_v61 }
 0x676   :  { %3656 = vmatprep.subr.mxu0 %v9574_v31  ;;  %6889 = vmatprep.subr.mxu1 %v11136_v34  ;;  %v11422_v31 = vld [vmem:[#allocation90_spill] sm:$0xff] }
 0x677   :  { %3657 = vmatpush1.msra.mxu0 %v9578_v37  ;;  %6890 = vmatpush3.msra.mxu1 %v9580_v0 }
 0x678   :  { %3658 = vmatprep.subr.mxu0 %v9584_v21  ;;  %6891 = vmatprep.subr.mxu1 %v11136_v34 }
 0x679   :  { %3659 = vmatpush1.msra.mxu0 %v9588_v3  ;;  %6892 = vmatpush3.msra.mxu1 %v9590_v4 }
 0x67a   :  { %3660 = vmatprep.subr.mxu0 %v9594_v30  ;;  %6893 = vmatprep.subr.mxu1 %v11136_v34 }
 0x67b   :  { %3661 = vmatpush1.msra.mxu0 %v9598_v2  ;;  %6894 = vmatpush3.msra.mxu1 %v9600_v42 }
 0x67c   :  { %3662 = vmatprep.subr.mxu0 %v9604_v26  ;;  %6895 = vmatprep.subr.mxu1 %v11136_v34 }
 0x67d   :  { %3663 = vmatpush1.msra.mxu0 %v11411_v7  ;;  %6896 = vmatpush3.msra.mxu1 %v11412_v13  ;;  %v9906_v7 = vld [vmem:[%s10922_s9] ss:$0 sm:$0xff]  ;;  %v11425_v13 = vld [vmem:[#allocation78_spill] sm:$0xff] }
 0x67e   :  { %3664 = vmatprep.subr.mxu0 %v11413_v17  ;;  %6897 = vmatprep.subr.mxu1 %v11136_v34  ;;  %v11428_v17 = vld [vmem:[#allocation73_spill] sm:$0xff] }
 0x67f   :  { %3665 = vmatpush1.msra.mxu0 %v11414_v19  ;;  %6898 = vmatpush3.msra.mxu1 %v11415_v22  ;;  %v11429_v19 = vld [vmem:[#allocation74_spill] sm:$0xff]  ;;  %v11432_v22 = vld [vmem:[#allocation61_spill] sm:$0xff] }
 0x680   :  { %3666 = vmatprep.subr.mxu0 %v11416_v24  ;;  %6899 = vmatprep.subr.mxu1 %v11136_v34  ;;  %v11433_v24 = vld [vmem:[#allocation62_spill] sm:$0xff] }
 0x681   :  { %3667 = vmatpush1.msra.mxu0 %v11417_v53  ;;  %6900 = vmatpush3.msra.mxu1 %v11418_v50  ;;  %v11434_v53 = vld [vmem:[#allocation63_spill] sm:$0xff]  ;;  %v11435_v50 = vld [vmem:[#allocation64_spill] sm:$0xff] }
 0x682   :  { %3700 = vmatprep.mubr.f32.mxu0 %v11136_v34  ;;  %6901 = vmatprep.mubr.msk.f32.mxu1 %vm7671_vm1, %v11136_v34 }
 0x683   :  { %3853 = vmatprep.subr.mxu0 %v11419_v32  ;;  %6904 = vmatprep.subr.mxu1 %v11136_v34  ;;  %v11436_v32 = vld [vmem:[#allocation65_spill] sm:$0xff] }
 0x700   :  { %v3269_v43 = vpop.f32.mrf.mxu0  ;;  %v3340_v55 = vpop.f32.mrf.mxu1 }
 0x701   :  { %v3344_v35 = vadd.f32 %v3269_v43, %v11420_v33  ;;  %v3358_v51 = vadd.f32 %v9886_v10, %v3340_v55  ;;  %v11437_v43 = vld [vmem:[#allocation66_spill] sm:$0xff]  ;;  %v11438_v55 = vld [vmem:[#allocation67_spill] sm:$0xff]  ;;  %v11439_v33 = vld [vmem:[#allocation68_spill] sm:$0xff] }
 0x702   :  { %v6833_v36 = vpop.f32.mrf.mxu1  ;;  %v3271_v59 = vpop.f32.mrf.mxu0 }
 0x703   :  { %v5879_v47 = vmul.f32 -1.442695, %v3344_v35  ;;  %v3351_v15 = vadd.f32 %v3271_v59, %v11421_v54  ;;  %v11440_v35 = vld [vmem:[#allocation69_spill] sm:$0xff]  ;;  %v11441_v36 = vld [vmem:[#allocation70_spill] sm:$0xff]  ;;  %v11443_v59 = vld [vmem:[#allocation92_spill] sm:$0xff] }
 0x704   :  { %v11444_v54 = vld [vmem:[#allocation93_spill] sm:$0xff] }
 0x705   :  { %7423 = vpow2.f32 %v5879_v47  ;;  %v5880_v20 = vmul.f32 -1.442695, %v3351_v15  ;;  %v11442_v47 = vld [vmem:[#allocation71_spill] sm:$0xff] }
 0x707   :  { %7425 = vpow2.f32 %v5880_v20  ;;  %v11445_v20 = vld [vmem:[#allocation94_spill] sm:$0xff] }
 0x712   :  { %v7424_v40 = vpop.eup %7423 }
 0x713   :  { %v3348_v38 = vadd.f32 1.0, %v7424_v40  ;;  %v11446_v40 = vld [vmem:[#allocation95_spill] sm:$0xff] }
 0x714   :  { %v7426_v8 = vpop.eup %7425 }
 0x715   :  { %7427 = vrcp.f32 %v3348_v38  ;;  %v3355_v0 = vadd.f32 1.0, %v7426_v8  ;;  %v11447_v38 = vld [vmem:[#allocation96_spill] sm:$0xff] }
 0x721   :  { %v3486_v11 = vpop.f32.mrf.mxu0  ;;  %v3557_v23 = vpop.f32.mrf.mxu1 }
 0x722   :  { %v7428_v58 = vpop.eup %7427  ;;  %v5881_v60 = vmul.f32 -1.442695, %v3486_v11  ;;  %v11449_v11 = vld [vmem:[#allocation98_spill] sm:$0xff] }
 0x723   :  { %v3359_v5 = vmul.f32 %v7428_v58, %v3358_v51  ;;  %v6868_v61 = vpop.f32.mrf.mxu1  ;;  %v3488_v21 = vpop.f32.mrf.mxu0  ;;  %v11448_v51 = vld [vmem:[#allocation97_spill] sm:$0xff] }
 0x724   :  { %7429 = vpow2.f32 %v5881_v60  ;;  %v5882_v3 = vmul.f32 -1.442695, %v3488_v21  ;;  %v11451_v60 = vld [vmem:[#allocation100_spill] sm:$0xff]  ;;  %v4076_v61 = vld [vmem:[#allocation4 + $0x170] sm:$0xff] }
 0x725   :  { %v3360_v37 = vadd.f32 %v3359_v5, %v11422_v31  ;;  %v4075_v31 = vld [vmem:[#allocation4 + $0x168] sm:$0xff]  ;;  %v4070_v21 = vld [vmem:[#allocation4 + $0x140] sm:$0xff] }
 0x727   :  { %7431 = vtanh.f32 %v3360_v37  ;;  %v4074_v37 = vld [vmem:[#allocation4 + $0x160] sm:$0xff] }
 0x728   :  { %7433 = vrcp.f32 %v3355_v0  ;;  %v4072_v0 = vld [vmem:[#allocation4 + $0x150] sm:$0xff] }
 0x729   :  { %7435 = vpow2.f32 %v5882_v3  ;;  %v11452_v3 = vld [vmem:[#allocation91_spill] sm:$0xff] }
 0x731   :  { %v7430_v4 = vpop.eup %7429 }
 0x732   :  { %v3565_v30 = vadd.f32 1.0, %v7430_v4  ;;  %v4071_v4 = vld [vmem:[#allocation4 + $0x148] sm:$0xff] }
 0x734   :  { %v7432_v2 = vpop.eup %7431  ;;  %7437 = vrcp.f32 %v3565_v30  ;;  %v4069_v30 = vld [vmem:[#allocation4 + $0x138] sm:$0xff] }
 0x735   :  { %v3362_v42 = vsub.f32 %v9643_v28, %v7432_v2  ;;  %v7434_v26 = vpop.eup %7433 }
 0x736   :  { %v7436_v39 = vpop.eup %7435 }
 0x737   :  { %v3363_v14 = vmul.f32 %v7434_v26, %v3362_v42  ;;  %v4066_v42 = vld [vmem:[#allocation4 + $0x120] sm:$0xff]  ;;  %v4064_v26 = vld [vmem:[#allocation4 + $0x110] sm:$0xff] }
 0x739   :  { %v9891_v9 = vadd.f32 %v7432_v2, %v3363_v14  ;;  %v4068_v2 = vld [vmem:[#allocation4 + $0x130] sm:$0xff]  ;;  %v4065_v14 = vld [vmem:[#allocation4 + $0x118] sm:$0xff] }
 0x73b   :  { %3701 = vmatmul.mubr.f32.vlgmr.msra.gmra.mxu0 %v9891_v9  ;;  %6902 = vmatmul.mubr.f32.vlgmr.msra.gmra.mxu1 %v9891_v9 }
 0x73c   :  { %3854 = vmatpush1.msra.mxu0 %v9645_v6  ;;  %6905 = vmatpush3.msra.mxu1 %v9647_v27  ;;  %v3575_v6 = vadd.f32 %v9906_v7, %v3557_v23  ;;  %v11450_v23 = vld [vmem:[#allocation99_spill] sm:$0xff] }
 0x73d   :  { %3855 = vmatprep.subr.mxu0 %v9649_v63  ;;  %6906 = vmatprep.subr.mxu1 %v11136_v34  ;;  %v11423_v63 = vld [vmem:[#allocation56_spill] sm:$0xff] }
 0x73e   :  { %3856 = vmatpush1.msra.mxu0 %v9653_v56  ;;  %6907 = vmatpush3.msra.mxu1 %v9655_v44  ;;  %v11424_v44 = vld [vmem:[#allocation77_spill] sm:$0xff] }
 0x73f   :  { %3857 = vmatprep.subr.mxu0 %v9659_v41  ;;  %6908 = vmatprep.subr.mxu1 %v11136_v34  ;;  %v3572_v41 = vadd.f32 1.0, %v7436_v39  ;;  %v4063_v39 = vld [vmem:[#allocation4 + $0x108] sm:$0xff] }
 0x740   :  { %3858 = vmatpush1.msra.mxu0 %v9663_v45  ;;  %6909 = vmatpush3.msra.mxu1 %v9665_v62  ;;  %v11426_v45 = vld [vmem:[#allocation57_spill] sm:$0xff]  ;;  %v11427_v62 = vld [vmem:[#allocation88_spill] sm:$0xff] }
 0x741   :  { %v7438_v27 = vpop.eup %7437  ;;  %3859 = vmatprep.subr.mxu0 %v11423_v63  ;;  %6910 = vmatprep.subr.mxu1 %v11136_v34  ;;  %v4060_v63 = vld [vmem:[#allocation4 + $0xf0] sm:$0xff] }
 0x742   :  { %v3576_v56 = vmul.f32 %v7438_v27, %v3575_v6  ;;  %3860 = vmatpush1.msra.mxu0 %v9673_v49  ;;  %6911 = vmatpush3.msra.mxu1 %v9675_v1  ;;  %v11430_v49 = vld [vmem:[#allocation86_spill] sm:$0xff]  ;;  %v11431_v1 = vld [vmem:[#allocation60_spill] sm:$0xff] }
 0x743   :  { %3861 = vmatprep.subr.mxu0 %v11424_v44  ;;  %6912 = vmatprep.subr.mxu1 %v11136_v34  ;;  %v4061_v6 = vld [vmem:[#allocation4 + $0xf8] sm:$0xff]  ;;  %v4062_v27 = vld [vmem:[#allocation4 + $0x100] sm:$0xff]  ;;  %v4059_v44 = vld [vmem:[#allocation4 + $0xe8] sm:$0xff] }
 0x744   :  { %7439 = vtanh.f32 %v3576_v56  ;;  %3862 = vmatpush1.msra.mxu0 %v11425_v13  ;;  %6913 = vmatpush3.msra.mxu1 %v11426_v45  ;;  %v4058_v56 = vld [vmem:[#allocation4 + $0xe0] sm:$0xff]  ;;  %v4055_v13 = vld [vmem:[#allocation4 + $0xc8] sm:$0xff]  ;;  %v4056_v45 = vld [vmem:[#allocation4 + $0xd0] sm:$0xff] }
 0x745   :  { %3863 = vmatprep.subr.mxu0 %v11427_v62  ;;  %6914 = vmatprep.subr.mxu1 %v11136_v34  ;;  %7441 = vrcp.f32 %v3572_v41  ;;  %v4057_v41 = vld [vmem:[#allocation4 + $0xd8] sm:$0xff]  ;;  %v4054_v62 = vld [vmem:[#allocation4 + $0xc0] sm:$0xff] }
 0x746   :  { %3864 = vmatpush1.msra.mxu0 %v11428_v17  ;;  %6915 = vmatpush3.msra.mxu1 %v11429_v19  ;;  %v4052_v17 = vld [vmem:[#allocation4 + $0xb0] sm:$0xff]  ;;  %v4053_v19 = vld [vmem:[#allocation4 + $0xb8] sm:$0xff] }
 0x747   :  { %3865 = vmatprep.subr.mxu0 %v11430_v49  ;;  %6916 = vmatprep.subr.mxu1 %v11136_v34  ;;  %v4051_v49 = vld [vmem:[#allocation4 + $0xa8] sm:$0xff] }
 0x748   :  { %3866 = vmatpush1.msra.mxu0 %v11431_v1  ;;  %6917 = vmatpush3.msra.mxu1 %v11432_v22  ;;  %v4049_v1 = vld [vmem:[#allocation4 + $0x98] sm:$0xff]  ;;  %v4050_v22 = vld [vmem:[#allocation4 + $0xa0] sm:$0xff] }
 0x749   :  { %3867 = vmatprep.subr.mxu0 %v11433_v24  ;;  %6918 = vmatprep.subr.mxu1 %v11136_v34  ;;  %v4048_v24 = vld [vmem:[#allocation4 + $0x90] sm:$0xff] }
 0x74a   :  { %3868 = vmatpush1.msra.mxu0 %v11434_v53  ;;  %6919 = vmatpush3.msra.mxu1 %v11435_v50  ;;  %v4046_v53 = vld [vmem:[#allocation4 + $0x80] sm:$0xff]  ;;  %v4047_v50 = vld [vmem:[#allocation4 + $0x88] sm:$0xff] }
 0x74b   :  { %3869 = vmatprep.subr.mxu0 %v11436_v32  ;;  %6920 = vmatprep.subr.mxu1 %v11136_v34  ;;  %v4045_v32 = vld [vmem:[#allocation4 + $0x78] sm:$0xff] }
 0x74c   :  { %3870 = vmatpush1.msra.mxu0 %v11437_v43  ;;  %6921 = vmatpush3.msra.mxu1 %v11438_v55  ;;  %v4043_v43 = vld [vmem:[#allocation4 + $0x68] sm:$0xff]  ;;  %v4044_v55 = vld [vmem:[#allocation4 + $0x70] sm:$0xff] }
 0x74d   :  { %3871 = vmatprep.subr.mxu0 %v11439_v33  ;;  %6922 = vmatprep.subr.mxu1 %v11136_v34  ;;  %v4042_v33 = vld [vmem:[#allocation4 + $0x60] sm:$0xff] }
 0x74e   :  { %3872 = vmatpush1.msra.mxu0 %v11440_v35  ;;  %6923 = vmatpush3.msra.mxu1 %v11441_v36  ;;  %v4040_v35 = vld [vmem:[#allocation4 + $0x50] sm:$0xff]  ;;  %v4041_v36 = vld [vmem:[#allocation4 + $0x58] sm:$0xff] }
 0x74f   :  { %3873 = vmatprep.subr.mxu0 %v11442_v47  ;;  %6924 = vmatprep.subr.mxu1 %v11136_v34  ;;  %v4039_v47 = vld [vmem:[#allocation4 + $0x48] sm:$0xff] }
 0x750   :  { %3874 = vmatpush1.msra.mxu0 %v11443_v59  ;;  %6925 = vmatpush3.msra.mxu1 %v11444_v54  ;;  %v4037_v59 = vld [vmem:[#allocation4 + $0x38] sm:$0xff]  ;;  %v4038_v54 = vld [vmem:[#allocation4 + $0x40] sm:$0xff] }
 0x751   :  { %v7440_v15 = vpop.eup %7439  ;;  %3875 = vmatprep.subr.mxu0 %v11445_v20  ;;  %6926 = vmatprep.subr.mxu1 %v11136_v34 }
 0x752   :  { %3876 = vmatpush1.msra.mxu0 %v11446_v40  ;;  %6927 = vmatpush3.msra.mxu1 %v11447_v38  ;;  %v3579_v8 = vsub.f32 %v9805_v52, %v7440_v15  ;;  %v7442_v58 = vpop.eup %7441  ;;  %v4034_v38 = vld [vmem:[#allocation4 + $0x20] sm:$0xff] }
 0x753   :  { %3877 = vmatprep.subr.mxu0 %v11448_v51  ;;  %6928 = vmatprep.subr.mxu1 %v11136_v34 }
 0x754   :  { %3878 = vmatpush1.msra.mxu0 %v11449_v11  ;;  %6929 = vmatpush3.msra.mxu1 %v11450_v23  ;;  %v3580_v5 = vmul.f32 %v7442_v58, %v3579_v8  ;;  %v4035_v8 = vld [vmem:[#allocation4 + $0x28] sm:$0xff]  ;;  %v4033_v23 = vld [vmem:[#allocation4 + $0x18] sm:$0xff] }
 0x755   :  { %3879 = vmatprep.subr.mxu0 %v11451_v60  ;;  %6930 = vmatprep.subr.mxu1 %v11136_v34  ;;  %v4031_v58 = vld [vmem:[#allocation4 + $0x8] sm:$0xff] }
 0x756   :  { %3880 = vmatpush1.msra.mxu0 %v9775_v16  ;;  %6931 = vmatpush3.msra.mxu1 %v9777_v25  ;;  %v3581_v52 = vadd.f32 %v7440_v15, %v3580_v5  ;;  %v4077_v25 = vld [vmem:[#allocation4 + $0x178] sm:$0xff]  ;;  %v4036_v15 = vld [vmem:[#allocation4 + $0x30] sm:$0xff] }
 0x757   :  { %3881 = vmatprep.subr.mxu0 %v9781_v57  ;;  %6932 = vmatprep.subr.mxu1 %v11136_v34  ;;  %v4032_v5 = vld [vmem:[#allocation4 + $0x10] sm:$0xff] }
 0x758   :  { %3882 = vmatpush1.msra.mxu0 %v9785_v46  ;;  %6933 = vmatpush3.msra.mxu1 %v9787_v18  ;;  %v4073_v18 = vld [vmem:[#allocation4 + $0x158] sm:$0xff] }
 0x759   :  { %3883 = vmatprep.subr.mxu0 %v9791_v12  ;;  %6934 = vmatprep.subr.mxu1 %v11136_v34 }
 0x75a   :  { %3884 = vmatpush1.msra.mxu0 %v9795_v48  ;;  %3917 = vmatprep.mubr.f32.mxu0 %v11136_v34 }
 0x75b   :  { %6935 = vmatpush3.msra.mxu1 %v9799_v29  ;;  %6936 = vmatprep.mubr.msk.f32.mxu1 %vm7671_vm1, %v11136_v34  ;;  %v4067_v29 = vld [vmem:[#allocation4 + $0x128] sm:$0xff] }
 0x75c   :  { %3918 = vmatmul.mubr.f32.vlgmr.msra.gmra.mxu0 %v3581_v52  ;;  %6937 = vmatmul.mubr.f32.vlgmr.msra.gmra.mxu1 %v3581_v52  ;;  %v4030_v52 = vld [vmem:[#allocation4] sm:$0xff] }
 0x75d   :  { %4095 = vmatprep.subr.mxu0 %v4076_v61  ;;  %6939 = vmatprep.subr.mxu1 %v4077_v25  ;;  %v11453_v61 = vld [vmem:[#allocation59_spill] sm:$0xff] }
 0x75e   :  { %4096 = vmatpush1.msra.mxu0 %v4075_v31  ;;  %6940 = vmatpush3.msra.mxu1 %v4077_v25  ;;  %v11454_v25 = vld [vmem:[#allocation49_spill] sm:$0xff]  ;;  %v11455_v31 = vld [vmem:[#allocation58_spill] sm:$0xff] }
 0x75f   :  { %6971 = vmatprep.mubr.f32.mxu1 %v11452_v3  ;;  %4097 = vmatprep.subr.mxu0 %v4073_v18  ;;  %v11456_v18 = vld [vmem:[#allocation109_spill] sm:$0xff] }
 0x760   :  { %6941 = vmatprep.subr.mxu1 %v4074_v37  ;;  %4098 = vmatpush1.msra.mxu0 %v4072_v0  ;;  %v9993_v0 = vld [vmem:[#allocation5 + $0x168] sm:$0xff] }
 0x761   :  { %6942 = vmatpush3.msra.mxu1 %v4074_v37  ;;  %4099 = vmatprep.subr.mxu0 %v4070_v21  ;;  %v9990_v37 = vld [vmem:[#allocation5 + $0x170] sm:$0xff]  ;;  %v9996_v21 = vld [vmem:[#allocation5 + $0x158] sm:$0xff] }
 0x762   :  { %6943 = vmatprep.subr.mxu1 %v4071_v4  ;;  %4100 = vmatpush1.msra.mxu0 %v4069_v30  ;;  %11457 = vst [vmem:[#allocation101_spill] sm:$0xff] %v9990_v37  ;;  %v10007_v30 = vld [vmem:[#allocation5 + $0x128] sm:$0xff] }
 0x763   :  { %6944 = vmatpush3.msra.mxu1 %v4071_v4  ;;  %4101 = vmatprep.subr.mxu0 %v4067_v29  ;;  %v10005_v4 = vld [vmem:[#allocation5 + $0x138] sm:$0xff]  ;;  %v10009_v29 = vld [vmem:[#allocation5 + $0x120] sm:$0xff] }
 0x764   :  { %6945 = vmatprep.subr.mxu1 %v4068_v2  ;;  %4102 = vmatpush1.msra.mxu0 %v4066_v42  ;;  %v10015_v42 = vld [vmem:[#allocation5 + $0x108] sm:$0xff] }
 0x765   :  { %6946 = vmatpush3.msra.mxu1 %v4068_v2  ;;  %4103 = vmatprep.subr.mxu0 %v4064_v26  ;;  %v10012_v2 = vld [vmem:[#allocation5 + $0x110] sm:$0xff]  ;;  %v10018_v26 = vld [vmem:[#allocation5 + $0xf8] sm:$0xff] }
 0x766   :  { %6947 = vmatprep.subr.mxu1 %v4065_v14  ;;  %4104 = vmatpush1.msra.mxu0 %v4063_v39  ;;  %v10024_v39 = vld [vmem:[#allocation5 + $0xe0] sm:$0xff] }
 0x767   :  { %6948 = vmatpush3.msra.mxu1 %v4065_v14  ;;  %4105 = vmatprep.subr.mxu0 %v4061_v6  ;;  %v10021_v14 = vld [vmem:[#allocation5 + $0xf0] sm:$0xff]  ;;  %v10027_v6 = vld [vmem:[#allocation5 + $0xd8] sm:$0xff] }
 0x768   :  { %6949 = vmatprep.subr.mxu1 %v4062_v27  ;;  %4106 = vmatpush1.msra.mxu0 %v4060_v63  ;;  %v10033_v63 = vld [vmem:[#allocation5 + $0xc0] sm:$0xff] }
 0x769   :  { %6950 = vmatpush3.msra.mxu1 %v4062_v27  ;;  %4107 = vmatprep.subr.mxu0 %v4058_v56  ;;  %v10030_v27 = vld [vmem:[#allocation5 + $0xc8] sm:$0xff]  ;;  %v10036_v56 = vld [vmem:[#allocation5 + $0xb0] sm:$0xff] }
 0x76a   :  { %6951 = vmatprep.subr.mxu1 %v4059_v44  ;;  %4108 = vmatpush1.msra.mxu0 %v4057_v41  ;;  %v10042_v41 = vld [vmem:[#allocation5 + $0x98] sm:$0xff] }
 0x76b   :  { %6952 = vmatpush3.msra.mxu1 %v4059_v44  ;;  %4109 = vmatprep.subr.mxu0 %v4055_v13  ;;  %v10039_v44 = vld [vmem:[#allocation5 + $0xa8] sm:$0xff]  ;;  %v10045_v13 = vld [vmem:[#allocation5 + $0x90] sm:$0xff] }
 0x76c   :  { %6953 = vmatprep.subr.mxu1 %v4056_v45  ;;  %4110 = vmatpush1.msra.mxu0 %v4054_v62  ;;  %v10051_v62 = vld [vmem:[#allocation5 + $0x78] sm:$0xff] }
 0x76d   :  { %6954 = vmatpush3.msra.mxu1 %v4056_v45  ;;  %4111 = vmatprep.subr.mxu0 %v4052_v17  ;;  %v10048_v45 = vld [vmem:[#allocation5 + $0x80] sm:$0xff]  ;;  %v10065_v17 = vld [vmem:[#allocation5 + $0x178] sm:$0xff] }
 0x76e   :  { %6955 = vmatprep.subr.mxu1 %v4053_v19  ;;  %4112 = vmatpush1.msra.mxu0 %v4051_v49  ;;  %v10115_v49 = vld [vmem:[#allocation5 + $0x58] sm:$0xff] }
 0x76f   :  { %6956 = vmatpush3.msra.mxu1 %v4053_v19  ;;  %4113 = vmatprep.subr.mxu0 %v4049_v1  ;;  %v10111_v19 = vld [vmem:[#allocation5 + $0x70] sm:$0xff]  ;;  %v10119_v1 = vld [vmem:[#allocation5 + $0x40] sm:$0xff] }
 0x770   :  { %6957 = vmatprep.subr.mxu1 %v4050_v22  ;;  %4114 = vmatpush1.msra.mxu0 %v4048_v24  ;;  %v10126_v24 = vld [vmem:[#allocation5 + $0x10] sm:$0xff] }
 0x771   :  { %6958 = vmatpush3.msra.mxu1 %v4050_v22  ;;  %4115 = vmatprep.subr.mxu0 %v4046_v53  ;;  %v10123_v22 = vld [vmem:[#allocation5 + $0x28] sm:$0xff]  ;;  %11459 = vst [vmem:[#allocation103_spill] sm:$0xff] %v10126_v24 }
 0x772   :  { %6959 = vmatprep.subr.mxu1 %v4047_v50  ;;  %4116 = vmatpush1.msra.mxu0 %v4045_v32  ;;  %11458 = vst [vmem:[#allocation102_spill] sm:$0xff] %v10123_v22  ;;  %v11460_v32 = vld [vmem:[#allocation83_spill] sm:$0xff] }
 0x773   :  { %6960 = vmatpush3.msra.mxu1 %v4047_v50  ;;  %4117 = vmatprep.subr.mxu0 %v4043_v43 }
 0x774   :  { %6961 = vmatprep.subr.mxu1 %v4044_v55  ;;  %4118 = vmatpush1.msra.mxu0 %v4042_v33 }
 0x775   :  { %6962 = vmatpush3.msra.mxu1 %v4044_v55  ;;  %4119 = vmatprep.subr.mxu0 %v4040_v35 }
 0x776   :  { %6963 = vmatprep.subr.mxu1 %v4041_v36  ;;  %4120 = vmatpush1.msra.mxu0 %v4039_v47 }
 0x777   :  { %6964 = vmatpush3.msra.mxu1 %v4041_v36  ;;  %4121 = vmatprep.subr.mxu0 %v4037_v59  ;;  %v11461_v36 = vld [vmem:[#allocation84_spill] sm:$0xff] }
 0x778   :  { %6965 = vmatprep.subr.mxu1 %v4038_v54  ;;  %4122 = vmatpush1.msra.mxu0 %v4036_v15 }
 0x779   :  { %6966 = vmatpush3.msra.mxu1 %v4038_v54  ;;  %4123 = vmatprep.subr.mxu0 %v4034_v38 }
 0x77a   :  { %6967 = vmatprep.subr.mxu1 %v4035_v8  ;;  %4124 = vmatpush1.msra.mxu0 %v4033_v23 }
 0x77b   :  { %6968 = vmatpush3.msra.mxu1 %v4035_v8  ;;  %4125 = vmatprep.subr.mxu0 %v4031_v58 }
 0x77c   :  { %6969 = vmatprep.subr.mxu1 %v4032_v5  ;;  %4126 = vmatpush1.msra.mxu0 %v4030_v52 }
 0x77d   :  { %4159 = vmatprep.mubr.f32.mxu0 %v11136_v34  ;;  %6970 = vmatpush3.msra.mxu1 %v4032_v5 }
 0x77e   :  { %4160 = vmatmul.mubr.f32.vlgmr.msra.gmra.mxu0 %v11452_v3  ;;  %6972 = vmatmul.mubr.f32.vlgmr.msra.gmra.mxu1 %v11453_v61  ;;  %v9999_v3 = vld [vmem:[#allocation5 + $0x150] sm:$0xff] }
 0x77f   :  { %6974 = vmatprep.mubr.f32.mxu1 %v11454_v25  ;;  %4165 = vmatprep.mubr.f32.mxu0 %v11136_v34 }
 0x780   :  { %6983 = vmatprep.subr.mxu1 %v11136_v34  ;;  %4391 = vmatprep.subr.mxu0 %v9990_v37 }
 0x781   :  { %4392 = vmatpush1.msra.mxu0 %v9993_v0  ;;  %6984 = vmatpush3.msra.mxu1 %v10065_v17 }
 0x782   :  { %4166 = vmatmul.mubr.f32.gmra.mxu0 %v11453_v61  ;;  %6975 = vmatmul.mubr.f32.gmra.mxu1 %v11455_v31 }
 0x783   :  { %6977 = vmatprep.mubr.f32.mxu1 %v11456_v18  ;;  %4171 = vmatprep.mubr.f32.mxu0 %v11136_v34 }
 0x784   :  { %4393 = vmatprep.subr.mxu0 %v9996_v21  ;;  %6985 = vmatprep.subr.mxu1 %v11136_v34 }
 0x785   :  { %4394 = vmatpush1.msra.mxu0 %v9999_v3 }
 0x786   :  { %4172 = vmatmul.mubr.f32.gmra.mxu0 %v11454_v25  ;;  %6978 = vmatmul.mubr.f32.gmra.mxu1 %v9643_v28 }
 0x787   :  { %6980 = vmatprep.mubr.f32.mxu1 %v9891_v9  ;;  %4177 = vmatprep.mubr.f32.mxu0 %v11136_v34 }
 0x78a   :  { %4178 = vmatmul.mubr.f32.gmra.mxu0 %v11455_v31  ;;  %v11462_v31 = vld [vmem:[#allocation89_spill] sm:$0xff] }
 0x78b   :  { %4183 = vmatprep.mubr.f32.mxu0 %v11136_v34 }
 0x78e   :  { %4184 = vmatmul.mubr.f32.gmra.mxu0 %v11456_v18 }
 0x78f   :  { %4189 = vmatprep.mubr.f32.mxu0 %v11136_v34 }
 0x792   :  { %4190 = vmatmul.mubr.f32.gmra.mxu0 %v9643_v28  ;;  %v10002_v28 = vld [vmem:[#allocation5 + $0x140] sm:$0xff] }
 0x793   :  { %4195 = vmatprep.mubr.f32.mxu0 %v11136_v34  ;;  %4395 = vmatprep.subr.mxu0 %v10002_v28 }
 0x794   :  { %4396 = vmatpush1.msra.mxu0 %v10005_v4 }
 0x795   :  { %4397 = vmatprep.subr.mxu0 %v10007_v30 }
 0x796   :  { %4196 = vmatmul.mubr.f32.gmra.mxu0 %v9891_v9 }
 0x797   :  { %4201 = vmatprep.mubr.f32.mxu0 %v11136_v34  ;;  %4398 = vmatpush1.msra.mxu0 %v10009_v29 }
 0x798   :  { %4399 = vmatprep.subr.mxu0 %v10012_v2 }
 0x799   :  { %4400 = vmatpush1.msra.mxu0 %v10015_v42 }
 0x79a   :  { %4401 = vmatprep.subr.mxu0 %v10018_v26 }
 0x79b   :  { %4402 = vmatpush1.msra.mxu0 %v10021_v14 }
 0x79c   :  { %4403 = vmatprep.subr.mxu0 %v10024_v39 }
 0x79d   :  { %4404 = vmatpush1.msra.mxu0 %v10027_v6 }
 0x79e   :  { %4405 = vmatprep.subr.mxu0 %v10030_v27 }
 0x79f   :  { %4406 = vmatpush1.msra.mxu0 %v10033_v63 }
 0x7a0   :  { %4407 = vmatprep.subr.mxu0 %v10036_v56 }
 0x7a1   :  { %4408 = vmatpush1.msra.mxu0 %v10039_v44 }
 0x7a2   :  { %4409 = vmatprep.subr.mxu0 %v10042_v41 }
 0x7a3   :  { %4410 = vmatpush1.msra.mxu0 %v10045_v13 }
 0x7a4   :  { %4411 = vmatprep.subr.mxu0 %v10048_v45 }
 0x7a5   :  { %4412 = vmatpush1.msra.mxu0 %v10051_v62 }
 0x7a6   :  { %4413 = vmatprep.subr.mxu0 %v11445_v20  ;;  %v10070_v20 = vld [vmem:[#allocation5 + $0x160] sm:$0xff] }
 0x7a7   :  { %4414 = vmatpush1.msra.mxu0 %v11446_v40  ;;  %6986 = vmatpush3.msra.mxu1 %v10070_v20  ;;  %v10095_v40 = vld [vmem:[#allocation5 + $0xd0] sm:$0xff] }
 0x7a8   :  { %4415 = vmatprep.subr.mxu0 %v11448_v51  ;;  %6987 = vmatprep.subr.mxu1 %v11136_v34  ;;  %v10099_v51 = vld [vmem:[#allocation5 + $0xb8] sm:$0xff] }
 0x7a9   :  { %4416 = vmatpush1.msra.mxu0 %v11449_v11  ;;  %v10103_v11 = vld [vmem:[#allocation5 + $0xa0] sm:$0xff] }
 0x7aa   :  { %4417 = vmatprep.subr.mxu0 %v11451_v60  ;;  %v10107_v60 = vld [vmem:[#allocation5 + $0x88] sm:$0xff] }
 0x7ab   :  { %4418 = vmatpush1.msra.mxu0 %v9775_v16  ;;  %v10087_v16 = vld [vmem:[#allocation5 + $0x100] sm:$0xff] }
 0x7ac   :  { %4419 = vmatprep.subr.mxu0 %v9781_v57  ;;  %v10075_v57 = vld [vmem:[#allocation5 + $0x148] sm:$0xff] }
 0x7ad   :  { %4420 = vmatpush1.msra.mxu0 %v9785_v46  ;;  %6988 = vmatpush3.msra.mxu1 %v10075_v57  ;;  %v10091_v46 = vld [vmem:[#allocation5 + $0xe8] sm:$0xff] }
 0x7ae   :  { %4421 = vmatprep.subr.mxu0 %v9791_v12  ;;  %6989 = vmatprep.subr.mxu1 %v11136_v34  ;;  %v10079_v12 = vld [vmem:[#allocation5 + $0x130] sm:$0xff] }
 0x7af   :  { %4422 = vmatpush1.msra.mxu0 %v9795_v48  ;;  %6990 = vmatpush3.msra.mxu1 %v10079_v12  ;;  %v10083_v48 = vld [vmem:[#allocation5 + $0x118] sm:$0xff] }
 0x7b0   :  { %4556 = vmatprep.subr.mxu0 %v9990_v37  ;;  %6991 = vmatprep.subr.mxu1 %v11136_v34 }
 0x7b1   :  { %6992 = vmatpush3.msra.mxu1 %v10083_v48 }
 0x7b2   :  { %6993 = vmatprep.subr.mxu1 %v11136_v34 }
 0x7b3   :  { %6994 = vmatpush3.msra.mxu1 %v10087_v16 }
 0x7b4   :  { %6995 = vmatprep.subr.mxu1 %v11136_v34 }
 0x7b5   :  { %6996 = vmatpush3.msra.mxu1 %v10091_v46 }
 0x7b6   :  { %6997 = vmatprep.subr.mxu1 %v11136_v34 }
 0x7b7   :  { %6998 = vmatpush3.msra.mxu1 %v10095_v40 }
 0x7b8   :  { %6999 = vmatprep.subr.mxu1 %v11136_v34 }
 0x7b9   :  { %7000 = vmatpush3.msra.mxu1 %v10099_v51 }
 0x7ba   :  { %7001 = vmatprep.subr.mxu1 %v11136_v34 }
 0x7bb   :  { %7002 = vmatpush3.msra.mxu1 %v10103_v11 }
 0x7bc   :  { %7003 = vmatprep.subr.mxu1 %v11136_v34 }
 0x7bd   :  { %7004 = vmatpush3.msra.mxu1 %v10107_v60 }
 0x7be   :  { %7005 = vmatprep.subr.mxu1 %v11136_v34 }
 0x7bf   :  { %7006 = vmatpush3.msra.mxu1 %v10111_v19 }
 0x7c0   :  { %7007 = vmatprep.subr.mxu1 %v11136_v34 }
 0x7c1   :  { %7008 = vmatpush3.msra.mxu1 %v10115_v49 }
 0x7c2   :  { %7009 = vmatprep.subr.mxu1 %v11136_v34 }
 0x7c3   :  { %7010 = vmatpush3.msra.mxu1 %v10119_v1 }
 0x7c4   :  { %7011 = vmatprep.subr.mxu1 %v11136_v34 }
 0x7c5   :  { %7012 = vmatpush3.msra.mxu1 %v10123_v22 }
 0x7c6   :  { %7013 = vmatprep.subr.mxu1 %v11136_v34 }
 0x7c7   :  { %7014 = vmatpush3.msra.mxu1 %v10126_v24 }
 0x7c8   :  { %7018 = vmatprep.subr.mxu1 %v11136_v34 }
 0x7fb   :  { %v3702_v53 = vpop.f32.mrf.mxu0  ;;  %v3773_v50 = vpop.f32.mrf.mxu1 }
 0x7fc   :  { %v3777_v43 = vadd.f32 %v3702_v53, %v11460_v32  ;;  %v3791_v8 = vadd.f32 %v9886_v10, %v3773_v50  ;;  %v10183_v10 = vld [vmem:[#allocation5 + $0x68] sm:$0xff]  ;;  %v10191_v50 = vld [vmem:[#allocation5 + $0x50] sm:$0xff] }
 0x7fd   :  { %v6903_v55 = vpop.f32.mrf.mxu1  ;;  %v3704_v35 = vpop.f32.mrf.mxu0 }
 0x7fe   :  { %v5883_v33 = vmul.f32 -1.442695, %v3777_v43  ;;  %v3784_v47 = vadd.f32 %v3704_v35, %v11461_v36  ;;  %v10195_v36 = vld [vmem:[#allocation5 + $0x48] sm:$0xff] }
 0x800   :  { %7443 = vpow2.f32 %v5883_v33  ;;  %v5884_v59 = vmul.f32 -1.442695, %v3784_v47  ;;  %v10199_v47 = vld [vmem:[#allocation5 + $0x38] sm:$0xff] }
 0x802   :  { %7445 = vpow2.f32 %v5884_v59  ;;  %v10203_v59 = vld [vmem:[#allocation5 + $0x30] sm:$0xff] }
 0x80d   :  { %v7444_v54 = vpop.eup %7443 }
 0x80e   :  { %v3781_v15 = vadd.f32 1.0, %v7444_v54  ;;  %v10207_v54 = vld [vmem:[#allocation5 + $0x20] sm:$0xff] }
 0x80f   :  { %v7446_v38 = vpop.eup %7445  ;;  %11463 = vst [vmem:[#allocation104_spill] sm:$0xff] %v10207_v54 }
 0x810   :  { %7447 = vrcp.f32 %v3781_v15  ;;  %v3788_v53 = vadd.f32 1.0, %v7446_v38  ;;  %v10211_v15 = vld [vmem:[#allocation5 + $0x18] sm:$0xff]  ;;  %v10215_v38 = vld [vmem:[#allocation5 + $0x8] sm:$0xff] }
 0x811   :  { %11464 = vst [vmem:[#allocation105_spill] sm:$0xff] %v10211_v15  ;;  %11465 = vst [vmem:[#allocation106_spill] sm:$0xff] %v10215_v38 }
 0x81c   :  { %v3919_v23 = vpop.f32.mrf.mxu0  ;;  %v3990_v58 = vpop.f32.mrf.mxu1 }
 0x81d   :  { %v7448_v5 = vpop.eup %7447 }
 0x81e   :  { %v3792_v52 = vmul.f32 %v7448_v5, %v3791_v8  ;;  %v3921_v61 = vpop.f32.mrf.mxu0  ;;  %v6938_v25 = vpop.f32.mrf.mxu1  ;;  %v10219_v8 = vld [vmem:[#allocation5] sm:$0xff] }
 0x81f   :  { %11466 = vst [vmem:[#allocation107_spill] sm:$0xff] %v10219_v8 }
 0x820   :  { %v3793_v18 = vadd.f32 %v3792_v52, %v11462_v31 }
 0x822   :  { %7449 = vtanh.f32 %v3793_v18 }
 0x823   :  { %7451 = vrcp.f32 %v3788_v53 }
 0x82f   :  { %v7450_v32 = vpop.eup %7449 }
 0x830   :  { %v3795_v43 = vsub.f32 %v9891_v9, %v7450_v32  ;;  %v7452_v55 = vpop.eup %7451  ;;  %v10187_v9 = vld [vmem:[#allocation5 + $0x60] sm:$0xff] }
 0x832   :  { %v3796_v33 = vmul.f32 %v7452_v55, %v3795_v43 }
 0x834   :  { %v3797_v35 = vadd.f32 %v7450_v32, %v3796_v33 }
 0x836   :  { %4202 = vmatmul.mubr.f32.gmra.mxu0 %v3797_v35  ;;  %6981 = vmatmul.mubr.f32.gmra.mxu1 %v3797_v35 }
 0x837   :  { %4455 = vmatprep.mubr.f32.mxu0 %v11136_v34  ;;  %7015 = vmatprep.mubr.msk.f32.mxu1 %vm7671_vm1, %v11136_v34 }
 0x83a   :  { %4456 = vmatmul.mubr.f32.vlgmr.msra.gmra.mxu0 %v11136_v34  ;;  %7016 = vmatmul.mubr.f32.vlgmr.msra.gmra.mxu1 %v11136_v34 }
 0x83b   :  { %4557 = vmatpush1.msra.mxu0 %v9993_v0  ;;  %7019 = vmatpush3.msra.mxu1 %v10065_v17 }
 0x83c   :  { %4558 = vmatprep.subr.mxu0 %v9996_v21  ;;  %7020 = vmatprep.subr.mxu1 %v11136_v34 }
 0x83d   :  { %4559 = vmatpush1.msra.mxu0 %v9999_v3  ;;  %7021 = vmatpush3.msra.mxu1 %v10070_v20 }
 0x83e   :  { %4560 = vmatprep.subr.mxu0 %v10002_v28  ;;  %7022 = vmatprep.subr.mxu1 %v11136_v34  ;;  %v4161_v23 = vpop.f32.mrf.mxu0  ;;  %v10240_v53 = vpop.f32.mrf.mxu1 }
 0x83f   :  { %4561 = vmatpush1.msra.mxu0 %v10005_v4  ;;  %7023 = vmatpush3.msra.mxu1 %v10075_v57  ;;  %11473 = vst [vmem:[#allocation85_spill] sm:$0xff] %v10240_v53 }
 0x840   :  { %4562 = vmatprep.subr.mxu0 %v10007_v30  ;;  %7024 = vmatprep.subr.mxu1 %v11136_v34  ;;  %v4163_v58 = vpop.f32.mrf.mxu0  ;;  %v4274_v43 = vpop.f32.mrf.mxu1 }
 0x841   :  { %4563 = vmatpush1.msra.mxu0 %v10009_v29  ;;  %7025 = vmatpush3.msra.mxu1 %v10079_v12 }
 0x842   :  { %4564 = vmatprep.subr.mxu0 %v10012_v2  ;;  %7026 = vmatprep.subr.mxu1 %v11136_v34  ;;  %v10228_v5 = vpop.f32.mrf.mxu0  ;;  %v10246_v33 = vpop.f32.mrf.mxu1 }
 0x843   :  { %4565 = vmatpush1.msra.mxu0 %v10015_v42  ;;  %7027 = vmatpush3.msra.mxu1 %v10083_v48  ;;  %11467 = vst [vmem:[#allocation108_spill] sm:$0xff] %v10228_v5  ;;  %11476 = vst [vmem:[#allocation52_spill] sm:$0xff] %v10246_v33 }
 0x844   :  { %4566 = vmatprep.subr.mxu0 %v10018_v26  ;;  %7028 = vmatprep.subr.mxu1 %v11136_v34  ;;  %v10230_v52 = vpop.f32.mrf.mxu0 }
 0x845   :  { %4567 = vmatpush1.msra.mxu0 %v10021_v14  ;;  %7029 = vmatpush3.msra.mxu1 %v10087_v16  ;;  %11468 = vst [vmem:[#allocation79_spill] sm:$0xff] %v10230_v52  ;;  %v10250_v52 = vpop.f32.mrf.mxu1 }
 0x846   :  { %4568 = vmatprep.subr.mxu0 %v10024_v39  ;;  %7030 = vmatprep.subr.mxu1 %v11136_v34  ;;  %v10232_v61 = vpop.f32.mrf.mxu0  ;;  %11478 = vst [vmem:[#allocation54_spill] sm:$0xff] %v10250_v52 }
 0x847   :  { %4569 = vmatpush1.msra.mxu0 %v10027_v6  ;;  %7031 = vmatpush3.msra.mxu1 %v10091_v46  ;;  %11469 = vst [vmem:[#allocation80_spill] sm:$0xff] %v10232_v61 }
 0x848   :  { %4570 = vmatprep.subr.mxu0 %v10030_v27  ;;  %7032 = vmatprep.subr.mxu1 %v11136_v34  ;;  %v10234_v25 = vpop.f32.mrf.mxu0 }
 0x849   :  { %4571 = vmatpush1.msra.mxu0 %v10033_v63  ;;  %7033 = vmatpush3.msra.mxu1 %v10095_v40  ;;  %11470 = vst [vmem:[#allocation87_spill] sm:$0xff] %v10234_v25  ;;  %v10254_v25 = vpop.f32.mrf.mxu1 }
 0x84a   :  { %4572 = vmatprep.subr.mxu0 %v10036_v56  ;;  %7034 = vmatprep.subr.mxu1 %v11136_v34  ;;  %v10236_v31 = vpop.f32.mrf.mxu0  ;;  %11480 = vst [vmem:[#allocation81_spill] sm:$0xff] %v10254_v25 }
 0x84b   :  { %4573 = vmatpush1.msra.mxu0 %v10039_v44  ;;  %7035 = vmatpush3.msra.mxu1 %v10099_v51  ;;  %11471 = vst [vmem:[#allocation75_spill] sm:$0xff] %v10236_v31 }
 0x84c   :  { %4574 = vmatprep.subr.mxu0 %v10042_v41  ;;  %7036 = vmatprep.subr.mxu1 %v11136_v34  ;;  %v10238_v18 = vpop.f32.mrf.mxu0 }
 0x84d   :  { %4575 = vmatpush1.msra.mxu0 %v10045_v13  ;;  %7037 = vmatpush3.msra.mxu1 %v10103_v11  ;;  %11472 = vst [vmem:[#allocation76_spill] sm:$0xff] %v10238_v18  ;;  %v4078_v18 = vld [vmem:[%s10921_s8] sm:$0x7] }
 0x84e   :  { %4576 = vmatprep.subr.mxu0 %v10048_v45  ;;  %7038 = vmatprep.subr.mxu1 %v11136_v34  ;;  %v10242_v32 = vpop.f32.mrf.mxu0 }
 0x84f   :  { %4577 = vmatpush1.msra.mxu0 %v10051_v62  ;;  %7039 = vmatpush3.msra.mxu1 %v10107_v60  ;;  %11474 = vst [vmem:[#allocation50_spill] sm:$0xff] %v10242_v32  ;;  %v10261_v32 = vpop.f32.mrf.mxu1 }
 0x850   :  { %4578 = vmatprep.subr.mxu0 %v10183_v10  ;;  %7040 = vmatprep.subr.mxu1 %v11136_v34  ;;  %v10244_v55 = vpop.f32.mrf.mxu0  ;;  %11482 = vst [vmem:[#allocation90_spill] sm:$0xff] %v10261_v32 }
 0x851   :  { %4579 = vmatpush1.msra.mxu0 %v10187_v9  ;;  %7041 = vmatpush3.msra.mxu1 %v10111_v19  ;;  %11475 = vst [vmem:[#allocation51_spill] sm:$0xff] %v10244_v55  ;;  %v11484_v55 = vld [vmem:[#allocation72_spill] sm:$0xff] }
 0x852   :  { %4580 = vmatprep.subr.mxu0 %v10191_v50  ;;  %7042 = vmatprep.subr.mxu1 %v11136_v34  ;;  %v10248_v35 = vpop.f32.mrf.mxu0  ;;  %v11485_v33 = vsub.s32 0, %v11484_v55 }
 0x853   :  { %4581 = vmatpush1.msra.mxu0 %v10195_v36  ;;  %7043 = vmatpush3.msra.mxu1 %v10115_v49  ;;  %11477 = vst [vmem:[#allocation53_spill] sm:$0xff] %v10248_v35 }
 0x854   :  { %4582 = vmatprep.subr.mxu0 %v10199_v47  ;;  %7044 = vmatprep.subr.mxu1 %v11136_v34  ;;  %v10252_v61 = vpop.f32.mrf.mxu0  ;;  %v10267_v5 = vrot.slane %v4078_v18, %v11485_v33 }
 0x855   :  { %4583 = vmatpush1.msra.mxu0 %v10203_v59  ;;  %7045 = vmatpush3.msra.mxu1 %v10119_v1  ;;  %11479 = vst [vmem:[#allocation55_spill] sm:$0xff] %v10252_v61 }
 0x856   :  { %4584 = vmatprep.subr.mxu0 %v10207_v54  ;;  %7046 = vmatprep.subr.mxu1 %v11136_v34  ;;  %v10256_v31 = vpop.f32.mrf.mxu0  ;;  %11486 = vst [vmem:[#allocation77_spill] sm:$0xff] %v10267_v5 }
 0x857   :  { %4585 = vmatpush1.msra.mxu0 %v10211_v15  ;;  %7047 = vmatpush3.msra.mxu1 %v10123_v22  ;;  %11481 = vst [vmem:[#allocation82_spill] sm:$0xff] %v10256_v31  ;;  %v4162_v31 = vadd.f32 %v4161_v23, %v10267_v5 }
 0x858   :  { %4586 = vmatprep.subr.mxu0 %v10215_v38  ;;  %7048 = vmatprep.subr.mxu1 %v11136_v34  ;;  %v10263_v53 = vpop.f32.mrf.mxu0 }
 0x859   :  { %4587 = vmatpush1.msra.mxu0 %v10219_v8  ;;  %4620 = vmatprep.mubr.f32.mxu0 %v11136_v34  ;;  %11483 = vst [vmem:[#allocation56_spill] sm:$0xff] %v10263_v53  ;;  %v11491_v53 = vsub.s32 1, %v11484_v55 }
 0x85a   :  { %7049 = vmatpush3.msra.mxu1 %v10126_v24  ;;  %7050 = vmatprep.mubr.msk.f32.mxu1 %vm7671_vm1, %v11136_v34 }
 0x85b   :  { %4721 = vmatprep.subr.mxu0 %v9990_v37  ;;  %7053 = vmatprep.subr.mxu1 %v11136_v34  ;;  %v10280_v33 = vrot.slane %v4078_v18, %v11491_v53 }
 0x8f6   :  { %v10269_v35 = vpop.f32.mrf.mxu0  ;;  %v10271_v52 = vpop.f32.mrf.mxu1 }
 0x8f7   :  { %11487 = vst [vmem:[#allocation78_spill] sm:$0xff] %v10269_v35  ;;  %11488 = vst [vmem:[#allocation57_spill] sm:$0xff] %v10271_v52  ;;  %v4164_v35 = vadd.f32 %v4163_v58, %v10280_v33 }
 0x8f8   :  { %v10273_v61 = vpop.f32.mrf.mxu0  ;;  %v10275_v25 = vpop.f32.mrf.mxu1 }
 0x8f9   :  { %11489 = vst [vmem:[#allocation88_spill] sm:$0xff] %v10273_v61  ;;  %11490 = vst [vmem:[#allocation73_spill] sm:$0xff] %v10275_v25 }
 0x8fa   :  { %v4457_v37 = vpop.f32.mrf.mxu0  ;;  %v4528_v24 = vpop.f32.mrf.mxu1 }
 0x8fb   :  { %v4532_v8 = vadd.f32 %v4457_v37, %v4162_v31  ;;  %v4546_v23 = vadd.f32 %v9906_v7, %v4528_v24  ;;  %v11492_v37 = vsub.s32 2, %v11484_v55  ;;  %v11493_v7 = vld [vmem:[#allocation104_spill] sm:$0xff]  ;;  %v11494_v24 = vld [vmem:[#allocation105_spill] sm:$0xff] }
 0x8fc   :  { %v7017_v32 = vpop.f32.mrf.mxu1  ;;  %v4459_v22 = vpop.f32.mrf.mxu0  ;;  %v11500_v55 = vld [vmem:[#allocation77_spill] sm:$0xff] }
 0x8fd   :  { %v5887_v38 = vmul.f32 -1.442695, %v4532_v8  ;;  %v4539_v52 = vadd.f32 %v4459_v22, %v4164_v35  ;;  %v10286_v8 = vrot.slane %v4078_v18, %v11492_v37  ;;  %v11498_v18 = vld [vmem:[#allocation103_spill] sm:$0xff]  ;;  %v11501_v35 = vld [vmem:[#allocation108_spill] sm:$0xff] }
 0x8ff   :  { %7453 = vpow2.f32 %v5887_v38  ;;  %v5888_v15 = vmul.f32 -1.442695, %v4539_v52  ;;  %v4275_v31 = vadd.f32 %v4274_v43, %v10286_v8  ;;  %v11499_v43 = vld [vmem:[#allocation101_spill] sm:$0xff] }
 0x901   :  { %7455 = vpow2.f32 %v5888_v15 }
 0x90c   :  { %v7454_v61 = vpop.eup %7453 }
 0x90d   :  { %v4536_v54 = vadd.f32 1.0, %v7454_v61  ;;  %v11496_v61 = vld [vmem:[#allocation106_spill] sm:$0xff] }
 0x90e   :  { %v7456_v25 = vpop.eup %7455 }
 0x90f   :  { %7457 = vrcp.f32 %v4536_v54  ;;  %v4543_v32 = vadd.f32 1.0, %v7456_v25  ;;  %v11497_v25 = vld [vmem:[#allocation107_spill] sm:$0xff] }
 0x91c   :  { %v7458_v38 = vpop.eup %7457 }
 0x91d   :  { %v4547_v53 = vmul.f32 %v7458_v38, %v4546_v23  ;;  %v4168_v23 = vadd.f32 %v11501_v35, %v11500_v55  ;;  %v10367_v35 = vld [vmem:[%s10922_s9] ss:$0 sm:$0xff] }
 0x91f   :  { %v4548_v5 = vadd.f32 %v4547_v53, %v4275_v31 }
 0x921   :  { %7459 = vtanh.f32 %v4548_v5  ;;  %v11495_v5 = vld [vmem:[#allocation102_spill] sm:$0xff] }
 0x922   :  { %7461 = vrcp.f32 %v4543_v32 }
 0x92e   :  { %v7460_v22 = vpop.eup %7459 }
 0x92f   :  { %v4550_v58 = vsub.f32 0.0, %v7460_v22  ;;  %v7462_v52 = vpop.eup %7461 }
 0x931   :  { %v4551_v15 = vmul.f32 %v7462_v52, %v4550_v58  ;;  %v11502_v58 = vld [vmem:[#allocation79_spill] sm:$0xff] }
 0x932   :  { %v4170_v52 = vadd.f32 %v11502_v58, %v10280_v33 }
 0x933   :  { %v10289_v54 = vadd.f32 %v7460_v22, %v4551_v15 }
 0x935   :  { %4621 = vmatmul.mubr.f32.vlgmr.msra.gmra.mxu0 %v10289_v54  ;;  %7051 = vmatmul.mubr.f32.vlgmr.msra.gmra.mxu1 %v10289_v54 }
 0x936   :  { %4722 = vmatpush1.msra.mxu0 %v9993_v0  ;;  %7054 = vmatpush3.msra.mxu1 %v10065_v17 }
 0x937   :  { %4723 = vmatprep.subr.mxu0 %v9996_v21  ;;  %7055 = vmatprep.subr.mxu1 %v11136_v34 }
 0x938   :  { %4724 = vmatpush1.msra.mxu0 %v9999_v3  ;;  %7056 = vmatpush3.msra.mxu1 %v10070_v20 }
 0x939   :  { %4725 = vmatprep.subr.mxu0 %v10002_v28  ;;  %7057 = vmatprep.subr.mxu1 %v11136_v34 }
 0x93a   :  { %4726 = vmatpush1.msra.mxu0 %v10005_v4  ;;  %7058 = vmatpush3.msra.mxu1 %v10075_v57 }
 0x93b   :  { %4727 = vmatprep.subr.mxu0 %v10007_v30  ;;  %7059 = vmatprep.subr.mxu1 %v11136_v34 }
 0x93c   :  { %4728 = vmatpush1.msra.mxu0 %v10009_v29  ;;  %7060 = vmatpush3.msra.mxu1 %v10079_v12 }
 0x93d   :  { %4729 = vmatprep.subr.mxu0 %v10012_v2  ;;  %7061 = vmatprep.subr.mxu1 %v11136_v34 }
 0x93e   :  { %4730 = vmatpush1.msra.mxu0 %v10015_v42  ;;  %7062 = vmatpush3.msra.mxu1 %v10083_v48 }
 0x93f   :  { %4731 = vmatprep.subr.mxu0 %v10018_v26  ;;  %7063 = vmatprep.subr.mxu1 %v11136_v34 }
 0x940   :  { %4732 = vmatpush1.msra.mxu0 %v10021_v14  ;;  %7064 = vmatpush3.msra.mxu1 %v10087_v16 }
 0x941   :  { %4733 = vmatprep.subr.mxu0 %v10024_v39  ;;  %7065 = vmatprep.subr.mxu1 %v11136_v34 }
 0x942   :  { %4734 = vmatpush1.msra.mxu0 %v10027_v6  ;;  %7066 = vmatpush3.msra.mxu1 %v10091_v46 }
 0x943   :  { %4735 = vmatprep.subr.mxu0 %v10030_v27  ;;  %7067 = vmatprep.subr.mxu1 %v11136_v34 }
 0x944   :  { %4736 = vmatpush1.msra.mxu0 %v10033_v63  ;;  %7068 = vmatpush3.msra.mxu1 %v10095_v40 }
 0x945   :  { %4737 = vmatprep.subr.mxu0 %v10036_v56  ;;  %7069 = vmatprep.subr.mxu1 %v11136_v34 }
 0x946   :  { %4738 = vmatpush1.msra.mxu0 %v10039_v44  ;;  %7070 = vmatpush3.msra.mxu1 %v10099_v51 }
 0x947   :  { %4739 = vmatprep.subr.mxu0 %v10042_v41  ;;  %7071 = vmatprep.subr.mxu1 %v11136_v34 }
 0x948   :  { %4740 = vmatpush1.msra.mxu0 %v10045_v13  ;;  %7072 = vmatpush3.msra.mxu1 %v10103_v11 }
 0x949   :  { %4741 = vmatprep.subr.mxu0 %v10048_v45  ;;  %7073 = vmatprep.subr.mxu1 %v11136_v34 }
 0x94a   :  { %4742 = vmatpush1.msra.mxu0 %v10051_v62  ;;  %7074 = vmatpush3.msra.mxu1 %v10107_v60 }
 0x94b   :  { %4743 = vmatprep.subr.mxu0 %v10183_v10  ;;  %7075 = vmatprep.subr.mxu1 %v11136_v34 }
 0x94c   :  { %4744 = vmatpush1.msra.mxu0 %v10187_v9  ;;  %7076 = vmatpush3.msra.mxu1 %v10111_v19 }
 0x94d   :  { %4745 = vmatprep.subr.mxu0 %v10191_v50  ;;  %7077 = vmatprep.subr.mxu1 %v11136_v34 }
 0x94e   :  { %4746 = vmatpush1.msra.mxu0 %v10195_v36  ;;  %7078 = vmatpush3.msra.mxu1 %v10115_v49 }
 0x94f   :  { %4747 = vmatprep.subr.mxu0 %v10199_v47  ;;  %7079 = vmatprep.subr.mxu1 %v11136_v34 }
 0x950   :  { %4748 = vmatpush1.msra.mxu0 %v10203_v59  ;;  %7080 = vmatpush3.msra.mxu1 %v10119_v1 }
 0x951   :  { %4749 = vmatprep.subr.mxu0 %v11493_v7  ;;  %7081 = vmatprep.subr.mxu1 %v11136_v34 }
 0x952   :  { %4750 = vmatpush1.msra.mxu0 %v11494_v24  ;;  %7082 = vmatpush3.msra.mxu1 %v11495_v5 }
 0x953   :  { %4751 = vmatprep.subr.mxu0 %v11496_v61  ;;  %7083 = vmatprep.subr.mxu1 %v11136_v34 }
 0x954   :  { %4752 = vmatpush1.msra.mxu0 %v11497_v25  ;;  %4785 = vmatprep.mubr.f32.mxu0 %v11136_v34 }
 0x955   :  { %7084 = vmatpush3.msra.mxu1 %v11498_v18  ;;  %7085 = vmatprep.mubr.msk.f32.mxu1 %vm7671_vm1, %v11136_v34 }
 0x956   :  { %4886 = vmatprep.subr.mxu0 %v11499_v43  ;;  %7088 = vmatprep.subr.mxu1 %v11136_v34 }
 0x9f5   :  { %v4622_v37 = vpop.f32.mrf.mxu0  ;;  %v4693_v38 = vpop.f32.mrf.mxu1 }
 0x9f6   :  { %v4697_v31 = vadd.f32 %v4622_v37, %v4168_v23  ;;  %v4711_v23 = vadd.f32 %v10367_v35, %v4693_v38  ;;  %v11506_v38 = vld [vmem:[#allocation103_spill] sm:$0xff] }
 0x9f7   :  { %v7052_v53 = vpop.f32.mrf.mxu1  ;;  %v4624_v22 = vpop.f32.mrf.mxu0 }
 0x9f8   :  { %v5889_v32 = vmul.f32 -1.442695, %v4697_v31  ;;  %v4704_v15 = vadd.f32 %v4624_v22, %v4170_v52  ;;  %v11503_v31 = vld [vmem:[#allocation85_spill] sm:$0xff] }
 0x9f9   :  { %v4280_v53 = vadd.f32 %v11503_v31, %v10286_v8 }
 0x9fa   :  { %7463 = vpow2.f32 %v5889_v32  ;;  %v5890_v18 = vmul.f32 -1.442695, %v4704_v15 }
 0x9fc   :  { %7465 = vpow2.f32 %v5890_v18 }
 0xa07   :  { %v7464_v25 = vpop.eup %7463 }
 0xa08   :  { %v4701_v61 = vadd.f32 1.0, %v7464_v25 }
 0xa09   :  { %v7466_v43 = vpop.eup %7465 }
 0xa0a   :  { %7467 = vrcp.f32 %v4701_v61  ;;  %v4708_v22 = vadd.f32 1.0, %v7466_v43  ;;  %v11505_v43 = vld [vmem:[#allocation107_spill] sm:$0xff] }
 0xa17   :  { %v7468_v37 = vpop.eup %7467 }
 0xa18   :  { %v4712_v32 = vmul.f32 %v7468_v37, %v4711_v23  ;;  %v11507_v23 = vld [vmem:[#allocation101_spill] sm:$0xff]  ;;  %v11508_v37 = vld [vmem:[#allocation80_spill] sm:$0xff] }
 0xa19   :  { %v4174_v31 = vadd.f32 %v11508_v37, %v11500_v55  ;;  %v11510_v55 = vld [vmem:[#allocation54_spill] sm:$0xff] }
 0xa1a   :  { %v4713_v58 = vadd.f32 %v4712_v32, %v4280_v53 }
 0xa1c   :  { %7469 = vtanh.f32 %v4713_v58 }
 0xa1d   :  { %7471 = vrcp.f32 %v4708_v22 }
 0xa29   :  { %v7470_v25 = vpop.eup %7469 }
 0xa2a   :  { %v4715_v61 = vsub.f32 %v10289_v54, %v7470_v25  ;;  %v7472_v18 = vpop.eup %7471  ;;  %v11504_v54 = vld [vmem:[#allocation106_spill] sm:$0xff] }
 0xa2c   :  { %v4716_v52 = vmul.f32 %v7472_v18, %v4715_v61  ;;  %v11509_v18 = vld [vmem:[#allocation87_spill] sm:$0xff] }
 0xa2e   :  { %v10373_v15 = vadd.f32 %v7470_v25, %v4716_v52  ;;  %v4176_v52 = vadd.f32 %v11509_v18, %v10280_v33 }
 0xa30   :  { %4786 = vmatmul.mubr.f32.vlgmr.msra.gmra.mxu0 %v10373_v15  ;;  %7086 = vmatmul.mubr.f32.vlgmr.msra.gmra.mxu1 %v10373_v15 }
 0xa31   :  { %4887 = vmatpush1.msra.mxu0 %v9993_v0  ;;  %7089 = vmatpush3.msra.mxu1 %v10065_v17 }
 0xa32   :  { %4888 = vmatprep.subr.mxu0 %v9996_v21  ;;  %7090 = vmatprep.subr.mxu1 %v11136_v34 }
 0xa33   :  { %4889 = vmatpush1.msra.mxu0 %v9999_v3  ;;  %7091 = vmatpush3.msra.mxu1 %v10070_v20 }
 0xa34   :  { %4890 = vmatprep.subr.mxu0 %v10002_v28  ;;  %7092 = vmatprep.subr.mxu1 %v11136_v34 }
 0xa35   :  { %4891 = vmatpush1.msra.mxu0 %v10005_v4  ;;  %7093 = vmatpush3.msra.mxu1 %v10075_v57 }
 0xa36   :  { %4892 = vmatprep.subr.mxu0 %v10007_v30  ;;  %7094 = vmatprep.subr.mxu1 %v11136_v34 }
 0xa37   :  { %4893 = vmatpush1.msra.mxu0 %v10009_v29  ;;  %7095 = vmatpush3.msra.mxu1 %v10079_v12 }
 0xa38   :  { %4894 = vmatprep.subr.mxu0 %v10012_v2  ;;  %7096 = vmatprep.subr.mxu1 %v11136_v34 }
 0xa39   :  { %4895 = vmatpush1.msra.mxu0 %v10015_v42  ;;  %7097 = vmatpush3.msra.mxu1 %v10083_v48 }
 0xa3a   :  { %4896 = vmatprep.subr.mxu0 %v10018_v26  ;;  %7098 = vmatprep.subr.mxu1 %v11136_v34 }
 0xa3b   :  { %4897 = vmatpush1.msra.mxu0 %v10021_v14  ;;  %7099 = vmatpush3.msra.mxu1 %v10087_v16 }
 0xa3c   :  { %4898 = vmatprep.subr.mxu0 %v10024_v39  ;;  %7100 = vmatprep.subr.mxu1 %v11136_v34 }
 0xa3d   :  { %4899 = vmatpush1.msra.mxu0 %v10027_v6  ;;  %7101 = vmatpush3.msra.mxu1 %v10091_v46 }
 0xa3e   :  { %4900 = vmatprep.subr.mxu0 %v10030_v27  ;;  %7102 = vmatprep.subr.mxu1 %v11136_v34 }
 0xa3f   :  { %4901 = vmatpush1.msra.mxu0 %v10033_v63  ;;  %7103 = vmatpush3.msra.mxu1 %v10095_v40 }
 0xa40   :  { %4902 = vmatprep.subr.mxu0 %v10036_v56  ;;  %7104 = vmatprep.subr.mxu1 %v11136_v34 }
 0xa41   :  { %4903 = vmatpush1.msra.mxu0 %v10039_v44  ;;  %7105 = vmatpush3.msra.mxu1 %v10099_v51 }
 0xa42   :  { %4904 = vmatprep.subr.mxu0 %v10042_v41  ;;  %7106 = vmatprep.subr.mxu1 %v11136_v34 }
 0xa43   :  { %4905 = vmatpush1.msra.mxu0 %v10045_v13  ;;  %7107 = vmatpush3.msra.mxu1 %v10103_v11 }
 0xa44   :  { %4906 = vmatprep.subr.mxu0 %v10048_v45  ;;  %7108 = vmatprep.subr.mxu1 %v11136_v34 }
 0xa45   :  { %4907 = vmatpush1.msra.mxu0 %v10051_v62  ;;  %7109 = vmatpush3.msra.mxu1 %v10107_v60 }
 0xa46   :  { %4908 = vmatprep.subr.mxu0 %v10183_v10  ;;  %7110 = vmatprep.subr.mxu1 %v11136_v34 }
 0xa47   :  { %4909 = vmatpush1.msra.mxu0 %v10187_v9  ;;  %7111 = vmatpush3.msra.mxu1 %v10111_v19 }
 0xa48   :  { %4910 = vmatprep.subr.mxu0 %v10191_v50  ;;  %7112 = vmatprep.subr.mxu1 %v11136_v34 }
 0xa49   :  { %4911 = vmatpush1.msra.mxu0 %v10195_v36  ;;  %7113 = vmatpush3.msra.mxu1 %v10115_v49 }
 0xa4a   :  { %4912 = vmatprep.subr.mxu0 %v10199_v47  ;;  %7114 = vmatprep.subr.mxu1 %v11136_v34 }
 0xa4b   :  { %4913 = vmatpush1.msra.mxu0 %v10203_v59  ;;  %7115 = vmatpush3.msra.mxu1 %v10119_v1 }
 0xa4c   :  { %4914 = vmatprep.subr.mxu0 %v11493_v7  ;;  %7116 = vmatprep.subr.mxu1 %v11136_v34 }
 0xa4d   :  { %4915 = vmatpush1.msra.mxu0 %v11494_v24  ;;  %7117 = vmatpush3.msra.mxu1 %v11495_v5 }
 0xa4e   :  { %4916 = vmatprep.subr.mxu0 %v11504_v54  ;;  %7118 = vmatprep.subr.mxu1 %v11136_v34 }
 0xa4f   :  { %4917 = vmatpush1.msra.mxu0 %v11505_v43  ;;  %4950 = vmatprep.mubr.f32.mxu0 %v11136_v34 }
 0xa50   :  { %7119 = vmatpush3.msra.mxu1 %v11506_v38  ;;  %7120 = vmatprep.mubr.msk.f32.mxu1 %vm7671_vm1, %v11136_v34 }
 0xa51   :  { %5051 = vmatprep.subr.mxu0 %v11507_v23  ;;  %7123 = vmatprep.subr.mxu1 %v11136_v34 }
 0xaf0   :  { %v4787_v53 = vpop.f32.mrf.mxu0  ;;  %v4858_v32 = vpop.f32.mrf.mxu1 }
 0xaf1   :  { %v4862_v58 = vadd.f32 %v4787_v53, %v4174_v31  ;;  %v4876_v24 = vadd.f32 %v10367_v35, %v4858_v32  ;;  %v4285_v31 = vadd.f32 %v11510_v55, %v10286_v8 }
 0xaf2   :  { %v7087_v22 = vpop.f32.mrf.mxu1  ;;  %v4789_v61 = vpop.f32.mrf.mxu0 }
 0xaf3   :  { %v5891_v25 = vmul.f32 -1.442695, %v4862_v58  ;;  %v4869_v38 = vadd.f32 %v4789_v61, %v4176_v52 }
 0xaf5   :  { %7473 = vpow2.f32 %v5891_v25  ;;  %v5892_v43 = vmul.f32 -1.442695, %v4869_v38 }
 0xaf7   :  { %7475 = vpow2.f32 %v5892_v43 }
 0xb02   :  { %v7474_v54 = vpop.eup %7473 }
 0xb03   :  { %v4866_v5 = vadd.f32 1.0, %v7474_v54 }
 0xb04   :  { %v7476_v23 = vpop.eup %7475 }
 0xb05   :  { %7477 = vrcp.f32 %v4866_v5  ;;  %v4873_v22 = vadd.f32 1.0, %v7476_v23 }
 0xb12   :  { %v7478_v37 = vpop.eup %7477 }
 0xb13   :  { %v4877_v53 = vmul.f32 %v7478_v37, %v4876_v24  ;;  %v11519_v24 = vld [vmem:[#allocation52_spill] sm:$0xff] }
 0xb14   :  { %v4290_v5 = vadd.f32 %v11519_v24, %v10286_v8 }
 0xb15   :  { %v4878_v58 = vadd.f32 %v4877_v53, %v4285_v31  ;;  %v10537_v53 = vld [vmem:[#allocation5 + $0x168] sm:$0xff] }
 0xb17   :  { %7479 = vtanh.f32 %v4878_v58  ;;  %v10541_v58 = vld [vmem:[#allocation5 + $0x158] sm:$0xff] }
 0xb18   :  { %7481 = vrcp.f32 %v4873_v22  ;;  %v10545_v22 = vld [vmem:[#allocation5 + $0x150] sm:$0xff] }
 0xb24   :  { %v7480_v25 = vpop.eup %7479 }
 0xb25   :  { %v4880_v61 = vsub.f32 %v10373_v15, %v7480_v25  ;;  %v7482_v38 = vpop.eup %7481 }
 0xb27   :  { %v4881_v18 = vmul.f32 %v7482_v38, %v4880_v61  ;;  %v10553_v61 = vld [vmem:[#allocation5 + $0x138] sm:$0xff]  ;;  %v10561_v38 = vld [vmem:[#allocation5 + $0x120] sm:$0xff] }
 0xb29   :  { %v10452_v54 = vadd.f32 %v7480_v25, %v4881_v18  ;;  %v10549_v25 = vld [vmem:[#allocation5 + $0x140] sm:$0xff]  ;;  %v10569_v18 = vld [vmem:[#allocation5 + $0x108] sm:$0xff] }
 0xb2b   :  { %4951 = vmatmul.mubr.f32.vlgmr.msra.gmra.mxu0 %v10452_v54  ;;  %7121 = vmatmul.mubr.f32.vlgmr.msra.gmra.mxu1 %v10452_v54 }
 0xb2c   :  { %5052 = vmatpush1.msra.mxu0 %v9993_v0  ;;  %7124 = vmatpush3.msra.mxu1 %v10065_v17  ;;  %v11511_v0 = vld [vmem:[#allocation105_spill] sm:$0xff] }
 0xb2d   :  { %5053 = vmatprep.subr.mxu0 %v9996_v21  ;;  %7125 = vmatprep.subr.mxu1 %v11136_v34  ;;  %v11512_v21 = vld [vmem:[#allocation102_spill] sm:$0xff] }
 0xb2e   :  { %5054 = vmatpush1.msra.mxu0 %v9999_v3  ;;  %7126 = vmatpush3.msra.mxu1 %v10070_v20  ;;  %v11513_v3 = vld [vmem:[#allocation106_spill] sm:$0xff] }
 0xb2f   :  { %5055 = vmatprep.subr.mxu0 %v10002_v28  ;;  %7127 = vmatprep.subr.mxu1 %v11136_v34  ;;  %v11514_v28 = vld [vmem:[#allocation107_spill] sm:$0xff] }
 0xb30   :  { %5056 = vmatpush1.msra.mxu0 %v10005_v4  ;;  %7128 = vmatpush3.msra.mxu1 %v10075_v57  ;;  %v11515_v4 = vld [vmem:[#allocation103_spill] sm:$0xff] }
 0xb31   :  { %5057 = vmatprep.subr.mxu0 %v10007_v30  ;;  %7129 = vmatprep.subr.mxu1 %v11136_v34  ;;  %v10521_v30 = vld [vmem:[#allocation5 + $0x170] sm:$0xff] }
 0xb32   :  { %5058 = vmatpush1.msra.mxu0 %v10009_v29  ;;  %7130 = vmatpush3.msra.mxu1 %v10079_v12  ;;  %v11516_v29 = vld [vmem:[#allocation77_spill] sm:$0xff] }
 0xb33   :  { %5059 = vmatprep.subr.mxu0 %v10012_v2  ;;  %7131 = vmatprep.subr.mxu1 %v11136_v34  ;;  %v11517_v2 = vld [vmem:[#allocation75_spill] sm:$0xff] }
 0xb34   :  { %5060 = vmatpush1.msra.mxu0 %v10015_v42  ;;  %7132 = vmatpush3.msra.mxu1 %v10083_v48  ;;  %v4180_v42 = vadd.f32 %v11517_v2, %v11516_v29  ;;  %v10601_v2 = vld [vmem:[#allocation5 + $0xa8] sm:$0xff] }
 0xb35   :  { %5061 = vmatprep.subr.mxu0 %v10018_v26  ;;  %7133 = vmatprep.subr.mxu1 %v11136_v34 }
 0xb36   :  { %5062 = vmatpush1.msra.mxu0 %v10021_v14  ;;  %7134 = vmatpush3.msra.mxu1 %v10087_v16 }
 0xb37   :  { %5063 = vmatprep.subr.mxu0 %v10024_v39  ;;  %7135 = vmatprep.subr.mxu1 %v11136_v34 }
 0xb38   :  { %5064 = vmatpush1.msra.mxu0 %v10027_v6  ;;  %7136 = vmatpush3.msra.mxu1 %v10091_v46 }
 0xb39   :  { %5065 = vmatprep.subr.mxu0 %v10030_v27  ;;  %7137 = vmatprep.subr.mxu1 %v11136_v34 }
 0xb3a   :  { %5066 = vmatpush1.msra.mxu0 %v10033_v63  ;;  %7138 = vmatpush3.msra.mxu1 %v10095_v40 }
 0xb3b   :  { %5067 = vmatprep.subr.mxu0 %v10036_v56  ;;  %7139 = vmatprep.subr.mxu1 %v11136_v34  ;;  %v11518_v56 = vld [vmem:[#allocation76_spill] sm:$0xff] }
 0xb3c   :  { %5068 = vmatpush1.msra.mxu0 %v10039_v44  ;;  %7140 = vmatpush3.msra.mxu1 %v10099_v51  ;;  %v4182_v44 = vadd.f32 %v11518_v56, %v10280_v33 }
 0xb3d   :  { %5069 = vmatprep.subr.mxu0 %v10042_v41  ;;  %7141 = vmatprep.subr.mxu1 %v11136_v34 }
 0xb3e   :  { %5070 = vmatpush1.msra.mxu0 %v10045_v13  ;;  %7142 = vmatpush3.msra.mxu1 %v10103_v11 }
 0xb3f   :  { %5071 = vmatprep.subr.mxu0 %v10048_v45  ;;  %7143 = vmatprep.subr.mxu1 %v11136_v34 }
 0xb40   :  { %5072 = vmatpush1.msra.mxu0 %v10051_v62  ;;  %7144 = vmatpush3.msra.mxu1 %v10107_v60 }
 0xb41   :  { %5073 = vmatprep.subr.mxu0 %v10183_v10  ;;  %7145 = vmatprep.subr.mxu1 %v11136_v34 }
 0xb42   :  { %5074 = vmatpush1.msra.mxu0 %v10187_v9  ;;  %7146 = vmatpush3.msra.mxu1 %v10111_v19 }
 0xb43   :  { %5075 = vmatprep.subr.mxu0 %v10191_v50  ;;  %7147 = vmatprep.subr.mxu1 %v11136_v34 }
 0xb44   :  { %5076 = vmatpush1.msra.mxu0 %v10195_v36  ;;  %7148 = vmatpush3.msra.mxu1 %v10115_v49 }
 0xb45   :  { %5077 = vmatprep.subr.mxu0 %v10199_v47  ;;  %7149 = vmatprep.subr.mxu1 %v11136_v34 }
 0xb46   :  { %5078 = vmatpush1.msra.mxu0 %v10203_v59  ;;  %7150 = vmatpush3.msra.mxu1 %v10119_v1 }
 0xb47   :  { %5079 = vmatprep.subr.mxu0 %v11493_v7  ;;  %7151 = vmatprep.subr.mxu1 %v11136_v34 }
 0xb48   :  { %5080 = vmatpush1.msra.mxu0 %v11511_v0  ;;  %7152 = vmatpush3.msra.mxu1 %v11512_v21  ;;  %v10585_v21 = vld [vmem:[#allocation5 + $0xd8] sm:$0xff] }
 0xb49   :  { %5081 = vmatprep.subr.mxu0 %v11513_v3  ;;  %7153 = vmatprep.subr.mxu1 %v11136_v34 }
 0xb4a   :  { %5082 = vmatpush1.msra.mxu0 %v11514_v28  ;;  %5115 = vmatprep.mubr.f32.mxu0 %v11136_v34 }
 0xb4b   :  { %7154 = vmatpush3.msra.mxu1 %v11515_v4  ;;  %7155 = vmatprep.mubr.msk.f32.mxu1 %vm7671_vm1, %v11136_v34  ;;  %v10593_v4 = vld [vmem:[#allocation5 + $0xc0] sm:$0xff] }
 0xb4c   :  { %5216 = vmatprep.subr.mxu0 %v10521_v30  ;;  %7158 = vmatprep.subr.mxu1 %v11136_v34 }
 0xbeb   :  { %v4952_v26 = vpop.f32.mrf.mxu0  ;;  %v5023_v14 = vpop.f32.mrf.mxu1 }
 0xbec   :  { %v5027_v39 = vadd.f32 %v4952_v26, %v4180_v42  ;;  %v5041_v49 = vadd.f32 %v10367_v35, %v5023_v14  ;;  %v10609_v42 = vld [vmem:[#allocation5 + $0x90] sm:$0xff]  ;;  %v10617_v26 = vld [vmem:[#allocation5 + $0x78] sm:$0xff] }
 0xbed   :  { %v7122_v6 = vpop.f32.mrf.mxu1  ;;  %v4954_v63 = vpop.f32.mrf.mxu0  ;;  %v11523_v14 = vld [vmem:[#allocation51_spill] sm:$0xff] }
 0xbee   :  { %v5893_v27 = vmul.f32 -1.442695, %v5027_v39  ;;  %v5034_v41 = vadd.f32 %v4954_v63, %v4182_v44  ;;  %v4188_v39 = vadd.f32 %v11523_v14, %v10280_v33  ;;  %v10740_v14 = vld [vmem:[#allocation5 + $0x50] sm:$0xff] }
 0xbf0   :  { %7483 = vpow2.f32 %v5893_v27  ;;  %v5894_v13 = vmul.f32 -1.442695, %v5034_v41 }
 0xbf2   :  { %7485 = vpow2.f32 %v5894_v13 }
 0xbfd   :  { %v7484_v45 = vpop.eup %7483 }
 0xbfe   :  { %v5031_v62 = vadd.f32 1.0, %v7484_v45  ;;  %v11524_v45 = vld [vmem:[#allocation90_spill] sm:$0xff] }
 0xbff   :  { %v7486_v19 = vpop.eup %7485 }
 0xc00   :  { %7487 = vrcp.f32 %v5031_v62  ;;  %v5038_v43 = vadd.f32 1.0, %v7486_v19  ;;  %v4295_v62 = vadd.f32 %v11524_v45, %v10286_v8 }
 0xc0d   :  { %v7488_v1 = vpop.eup %7487 }
 0xc0e   :  { %v5042_v55 = vmul.f32 %v7488_v1, %v5041_v49 }
 0xc10   :  { %v5043_v15 = vadd.f32 %v5042_v55, %v4290_v5 }
 0xc12   :  { %7489 = vtanh.f32 %v5043_v15 }
 0xc13   :  { %7491 = vrcp.f32 %v5038_v43 }
 0xc1f   :  { %v7490_v32 = vpop.eup %7489 }
 0xc20   :  { %v5045_v52 = vsub.f32 %v10452_v54, %v7490_v32  ;;  %v7492_v23 = vpop.eup %7491  ;;  %v10577_v54 = vld [vmem:[#allocation5 + $0xf0] sm:$0xff] }
 0xc22   :  { %v5046_v37 = vmul.f32 %v7492_v23, %v5045_v52  ;;  %v10675_v52 = vld [vmem:[#allocation5 + $0x160] sm:$0xff]  ;;  %v10681_v23 = vld [vmem:[#allocation5 + $0x148] sm:$0xff] }
 0xc24   :  { %v10533_v31 = vadd.f32 %v7490_v32, %v5046_v37  ;;  %v10669_v32 = vld [vmem:[#allocation5 + $0x178] sm:$0xff]  ;;  %v10687_v37 = vld [vmem:[#allocation5 + $0x130] sm:$0xff] }
 0xc26   :  { %5116 = vmatmul.mubr.f32.vlgmr.msra.gmra.mxu0 %v10533_v31  ;;  %7156 = vmatmul.mubr.f32.vlgmr.msra.gmra.mxu1 %v10533_v31 }
 0xc27   :  { %5217 = vmatpush1.msra.mxu0 %v10537_v53  ;;  %7159 = vmatpush3.msra.mxu1 %v10065_v17  ;;  %v10557_v17 = vld [vmem:[#allocation5 + $0x128] sm:$0xff] }
 0xc28   :  { %5218 = vmatprep.subr.mxu0 %v10541_v58  ;;  %7160 = vmatprep.subr.mxu1 %v11136_v34 }
 0xc29   :  { %5219 = vmatpush1.msra.mxu0 %v10545_v22  ;;  %7161 = vmatpush3.msra.mxu1 %v10070_v20  ;;  %v10565_v20 = vld [vmem:[#allocation5 + $0x110] sm:$0xff] }
 0xc2a   :  { %5220 = vmatprep.subr.mxu0 %v10549_v25  ;;  %7162 = vmatprep.subr.mxu1 %v11136_v34 }
 0xc2b   :  { %5221 = vmatpush1.msra.mxu0 %v10553_v61  ;;  %7163 = vmatpush3.msra.mxu1 %v10075_v57  ;;  %v10573_v57 = vld [vmem:[#allocation5 + $0xf8] sm:$0xff] }
 0xc2c   :  { %5222 = vmatprep.subr.mxu0 %v10557_v17  ;;  %7164 = vmatprep.subr.mxu1 %v11136_v34 }
 0xc2d   :  { %5223 = vmatpush1.msra.mxu0 %v10561_v38  ;;  %7165 = vmatpush3.msra.mxu1 %v10079_v12  ;;  %v10581_v12 = vld [vmem:[#allocation5 + $0xe0] sm:$0xff] }
 0xc2e   :  { %5224 = vmatprep.subr.mxu0 %v10565_v20  ;;  %7166 = vmatprep.subr.mxu1 %v11136_v34 }
 0xc2f   :  { %5225 = vmatpush1.msra.mxu0 %v10569_v18  ;;  %7167 = vmatpush3.msra.mxu1 %v10083_v48  ;;  %v10589_v48 = vld [vmem:[#allocation5 + $0xc8] sm:$0xff] }
 0xc30   :  { %5226 = vmatprep.subr.mxu0 %v10573_v57  ;;  %7168 = vmatprep.subr.mxu1 %v11136_v34 }
 0xc31   :  { %5227 = vmatpush1.msra.mxu0 %v10577_v54  ;;  %7169 = vmatpush3.msra.mxu1 %v10087_v16  ;;  %v10597_v16 = vld [vmem:[#allocation5 + $0xb0] sm:$0xff] }
 0xc32   :  { %5228 = vmatprep.subr.mxu0 %v10581_v12  ;;  %7170 = vmatprep.subr.mxu1 %v11136_v34 }
 0xc33   :  { %5229 = vmatpush1.msra.mxu0 %v10585_v21  ;;  %7171 = vmatpush3.msra.mxu1 %v10091_v46  ;;  %v10605_v46 = vld [vmem:[#allocation5 + $0x98] sm:$0xff] }
 0xc34   :  { %5230 = vmatprep.subr.mxu0 %v10589_v48  ;;  %7172 = vmatprep.subr.mxu1 %v11136_v34 }
 0xc35   :  { %5231 = vmatpush1.msra.mxu0 %v10593_v4  ;;  %7173 = vmatpush3.msra.mxu1 %v10095_v40  ;;  %v10613_v40 = vld [vmem:[#allocation5 + $0x80] sm:$0xff] }
 0xc36   :  { %5232 = vmatprep.subr.mxu0 %v10597_v16  ;;  %7174 = vmatprep.subr.mxu1 %v11136_v34 }
 0xc37   :  { %5233 = vmatpush1.msra.mxu0 %v10601_v2  ;;  %7175 = vmatpush3.msra.mxu1 %v10099_v51  ;;  %v10624_v51 = vld [vmem:[#allocation5 + $0x70] sm:$0xff] }
 0xc38   :  { %5234 = vmatprep.subr.mxu0 %v10605_v46  ;;  %7176 = vmatprep.subr.mxu1 %v11136_v34 }
 0xc39   :  { %5235 = vmatpush1.msra.mxu0 %v10609_v42  ;;  %7177 = vmatpush3.msra.mxu1 %v10103_v11  ;;  %v10630_v11 = vld [vmem:[#allocation5 + $0x58] sm:$0xff] }
 0xc3a   :  { %5236 = vmatprep.subr.mxu0 %v10613_v40  ;;  %7178 = vmatprep.subr.mxu1 %v11136_v34 }
 0xc3b   :  { %5237 = vmatpush1.msra.mxu0 %v10617_v26  ;;  %7179 = vmatpush3.msra.mxu1 %v10107_v60  ;;  %v10636_v60 = vld [vmem:[#allocation5 + $0x40] sm:$0xff] }
 0xc3c   :  { %5238 = vmatprep.subr.mxu0 %v10183_v10  ;;  %7180 = vmatprep.subr.mxu1 %v11136_v34  ;;  %v10642_v10 = vld [vmem:[#allocation5 + $0x28] sm:$0xff] }
 0xc3d   :  { %5239 = vmatpush1.msra.mxu0 %v10187_v9  ;;  %7181 = vmatpush3.msra.mxu1 %v10624_v51  ;;  %11520 = vst [vmem:[#allocation74_spill] sm:$0xff] %v10642_v10  ;;  %v10649_v9 = vld [vmem:[#allocation5 + $0x10] sm:$0xff] }
 0xc3e   :  { %5240 = vmatprep.subr.mxu0 %v10191_v50  ;;  %7182 = vmatprep.subr.mxu1 %v11136_v34  ;;  %11521 = vst [vmem:[#allocation86_spill] sm:$0xff] %v10649_v9  ;;  %v11522_v50 = vld [vmem:[#allocation50_spill] sm:$0xff] }
 0xc3f   :  { %5241 = vmatpush1.msra.mxu0 %v10195_v36  ;;  %7183 = vmatpush3.msra.mxu1 %v10630_v11  ;;  %v4186_v36 = vadd.f32 %v11522_v50, %v11516_v29  ;;  %v10699_v50 = vld [vmem:[#allocation5 + $0x100] sm:$0xff] }
 0xc40   :  { %5242 = vmatprep.subr.mxu0 %v10199_v47  ;;  %7184 = vmatprep.subr.mxu1 %v11136_v34 }
 0xc41   :  { %5243 = vmatpush1.msra.mxu0 %v10203_v59  ;;  %7185 = vmatpush3.msra.mxu1 %v10636_v60 }
 0xc42   :  { %5244 = vmatprep.subr.mxu0 %v11493_v7  ;;  %7186 = vmatprep.subr.mxu1 %v11136_v34 }
 0xc43   :  { %5245 = vmatpush1.msra.mxu0 %v11511_v0  ;;  %7187 = vmatpush3.msra.mxu1 %v10642_v10 }
 0xc44   :  { %5246 = vmatprep.subr.mxu0 %v11513_v3  ;;  %7188 = vmatprep.subr.mxu1 %v11136_v34 }
 0xc45   :  { %5247 = vmatpush1.msra.mxu0 %v11514_v28  ;;  %5280 = vmatprep.mubr.f32.mxu0 %v11136_v34 }
 0xc46   :  { %7189 = vmatpush3.msra.mxu1 %v10649_v9  ;;  %7190 = vmatprep.mubr.msk.f32.mxu1 %vm7671_vm1, %v11136_v34 }
 0xc47   :  { %5381 = vmatprep.subr.mxu0 %v10521_v30  ;;  %7193 = vmatprep.subr.mxu1 %v11136_v34 }
 0xce6   :  { %v5117_v47 = vpop.f32.mrf.mxu0  ;;  %v5188_v59 = vpop.f32.mrf.mxu1 }
 0xce7   :  { %v5192_v7 = vadd.f32 %v5117_v47, %v4186_v36  ;;  %v5206_v41 = vadd.f32 %v10367_v35, %v5188_v59  ;;  %v10705_v36 = vld [vmem:[#allocation5 + $0xe8] sm:$0xff]  ;;  %v10711_v47 = vld [vmem:[#allocation5 + $0xd0] sm:$0xff]  ;;  %v10717_v59 = vld [vmem:[#allocation5 + $0xb8] sm:$0xff] }
 0xce8   :  { %v7157_v0 = vpop.f32.mrf.mxu1  ;;  %v5119_v28 = vpop.f32.mrf.mxu0 }
 0xce9   :  { %v5895_v3 = vmul.f32 -1.442695, %v5192_v7  ;;  %v5199_v6 = vadd.f32 %v5119_v28, %v4188_v39  ;;  %v10723_v7 = vld [vmem:[#allocation5 + $0xa0] sm:$0xff]  ;;  %v10729_v0 = vld [vmem:[#allocation5 + $0x88] sm:$0xff] }
 0xcea   :  { %v10736_v28 = vld [vmem:[#allocation5 + $0x60] sm:$0xff]  ;;  %v10744_v39 = vld [vmem:[#allocation5 + $0x48] sm:$0xff] }
 0xceb   :  { %7493 = vpow2.f32 %v5895_v3  ;;  %v5896_v27 = vmul.f32 -1.442695, %v5199_v6  ;;  %v10732_v3 = vld [vmem:[#allocation5 + $0x68] sm:$0xff]  ;;  %v10748_v6 = vld [vmem:[#allocation5 + $0x38] sm:$0xff] }
 0xced   :  { %7495 = vpow2.f32 %v5896_v27  ;;  %v10752_v27 = vld [vmem:[#allocation5 + $0x30] sm:$0xff] }
 0xcf8   :  { %v7494_v63 = vpop.eup %7493 }
 0xcf9   :  { %v5196_v56 = vadd.f32 1.0, %v7494_v63  ;;  %v10756_v63 = vld [vmem:[#allocation5 + $0x20] sm:$0xff] }
 0xcfa   :  { %v7496_v44 = vpop.eup %7495 }
 0xcfb   :  { %7497 = vrcp.f32 %v5196_v56  ;;  %v5203_v1 = vadd.f32 1.0, %v7496_v44  ;;  %v10760_v56 = vld [vmem:[#allocation5 + $0x18] sm:$0xff]  ;;  %v10764_v44 = vld [vmem:[#allocation5 + $0x8] sm:$0xff] }
 0xcfc   :  { %11525 = vst [vmem:[#allocation60_spill] sm:$0xff] %v10760_v56  ;;  %11526 = vst [vmem:[#allocation61_spill] sm:$0xff] %v10764_v44 }
 0xd08   :  { %v7498_v13 = vpop.eup %7497 }
 0xd09   :  { %v5207_v19 = vmul.f32 %v7498_v13, %v5206_v41  ;;  %v10768_v41 = vld [vmem:[#allocation5] sm:$0xff] }
 0xd0a   :  { %11527 = vst [vmem:[#allocation62_spill] sm:$0xff] %v10768_v41  ;;  %v11528_v13 = vld [vmem:[#allocation53_spill] sm:$0xff] }
 0xd0b   :  { %v5208_v49 = vadd.f32 %v5207_v19, %v4295_v62  ;;  %v4192_v45 = vadd.f32 %v11528_v13, %v11516_v29  ;;  %v11530_v29 = vld [vmem:[#allocation81_spill] sm:$0xff] }
 0xd0d   :  { %7499 = vtanh.f32 %v5208_v49 }
 0xd0e   :  { %7501 = vrcp.f32 %v5203_v1 }
 0xd1a   :  { %v7500_v24 = vpop.eup %7499 }
 0xd1b   :  { %v5210_v5 = vsub.f32 %v10533_v31, %v7500_v24  ;;  %v7502_v55 = vpop.eup %7501  ;;  %v10693_v31 = vld [vmem:[#allocation5 + $0x118] sm:$0xff] }
 0xd1d   :  { %v5211_v15 = vmul.f32 %v7502_v55, %v5210_v5  ;;  %v11529_v55 = vld [vmem:[#allocation55_spill] sm:$0xff] }
 0xd1f   :  { %v10664_v43 = vadd.f32 %v7500_v24, %v5211_v15  ;;  %v4194_v15 = vadd.f32 %v11529_v55, %v10280_v33 }
 0xd21   :  { %5281 = vmatmul.mubr.f32.vlgmr.msra.gmra.mxu0 %v10664_v43  ;;  %7191 = vmatmul.mubr.f32.vlgmr.msra.gmra.mxu1 %v10664_v43 }
 0xd22   :  { %5382 = vmatpush1.msra.mxu0 %v10537_v53  ;;  %7194 = vmatpush3.msra.mxu1 %v10669_v32 }
 0xd23   :  { %5383 = vmatprep.subr.mxu0 %v10541_v58  ;;  %7195 = vmatprep.subr.mxu1 %v11136_v34 }
 0xd24   :  { %5384 = vmatpush1.msra.mxu0 %v10545_v22  ;;  %7196 = vmatpush3.msra.mxu1 %v10675_v52 }
 0xd25   :  { %5385 = vmatprep.subr.mxu0 %v10549_v25  ;;  %7197 = vmatprep.subr.mxu1 %v11136_v34 }
 0xd26   :  { %5386 = vmatpush1.msra.mxu0 %v10553_v61  ;;  %7198 = vmatpush3.msra.mxu1 %v10681_v23 }
 0xd27   :  { %5387 = vmatprep.subr.mxu0 %v10557_v17  ;;  %7199 = vmatprep.subr.mxu1 %v11136_v34 }
 0xd28   :  { %5388 = vmatpush1.msra.mxu0 %v10561_v38  ;;  %7200 = vmatpush3.msra.mxu1 %v10687_v37 }
 0xd29   :  { %5389 = vmatprep.subr.mxu0 %v10565_v20  ;;  %7201 = vmatprep.subr.mxu1 %v11136_v34 }
 0xd2a   :  { %5390 = vmatpush1.msra.mxu0 %v10569_v18  ;;  %7202 = vmatpush3.msra.mxu1 %v10693_v31 }
 0xd2b   :  { %5391 = vmatprep.subr.mxu0 %v10573_v57  ;;  %7203 = vmatprep.subr.mxu1 %v11136_v34 }
 0xd2c   :  { %5392 = vmatpush1.msra.mxu0 %v10577_v54  ;;  %7204 = vmatpush3.msra.mxu1 %v10699_v50 }
 0xd2d   :  { %5393 = vmatprep.subr.mxu0 %v10581_v12  ;;  %7205 = vmatprep.subr.mxu1 %v11136_v34 }
 0xd2e   :  { %5394 = vmatpush1.msra.mxu0 %v10585_v21  ;;  %7206 = vmatpush3.msra.mxu1 %v10705_v36 }
 0xd2f   :  { %5395 = vmatprep.subr.mxu0 %v10589_v48  ;;  %7207 = vmatprep.subr.mxu1 %v11136_v34 }
 0xd30   :  { %5396 = vmatpush1.msra.mxu0 %v10593_v4  ;;  %7208 = vmatpush3.msra.mxu1 %v10711_v47 }
 0xd31   :  { %5397 = vmatprep.subr.mxu0 %v10597_v16  ;;  %7209 = vmatprep.subr.mxu1 %v11136_v34 }
 0xd32   :  { %5398 = vmatpush1.msra.mxu0 %v10601_v2  ;;  %7210 = vmatpush3.msra.mxu1 %v10717_v59 }
 0xd33   :  { %5399 = vmatprep.subr.mxu0 %v10605_v46  ;;  %7211 = vmatprep.subr.mxu1 %v11136_v34 }
 0xd34   :  { %5400 = vmatpush1.msra.mxu0 %v10609_v42  ;;  %7212 = vmatpush3.msra.mxu1 %v10723_v7 }
 0xd35   :  { %5401 = vmatprep.subr.mxu0 %v10613_v40  ;;  %7213 = vmatprep.subr.mxu1 %v11136_v34 }
 0xd36   :  { %5402 = vmatpush1.msra.mxu0 %v10617_v26  ;;  %7214 = vmatpush3.msra.mxu1 %v10729_v0 }
 0xd37   :  { %5403 = vmatprep.subr.mxu0 %v10732_v3  ;;  %7215 = vmatprep.subr.mxu1 %v11136_v34 }
 0xd38   :  { %5404 = vmatpush1.msra.mxu0 %v10736_v28  ;;  %7216 = vmatpush3.msra.mxu1 %v10624_v51 }
 0xd39   :  { %5405 = vmatprep.subr.mxu0 %v10740_v14  ;;  %7217 = vmatprep.subr.mxu1 %v11136_v34 }
 0xd3a   :  { %5406 = vmatpush1.msra.mxu0 %v10744_v39  ;;  %7218 = vmatpush3.msra.mxu1 %v10630_v11 }
 0xd3b   :  { %5407 = vmatprep.subr.mxu0 %v10748_v6  ;;  %7219 = vmatprep.subr.mxu1 %v11136_v34 }
 0xd3c   :  { %5408 = vmatpush1.msra.mxu0 %v10752_v27  ;;  %7220 = vmatpush3.msra.mxu1 %v10636_v60 }
 0xd3d   :  { %5409 = vmatprep.subr.mxu0 %v10756_v63  ;;  %7221 = vmatprep.subr.mxu1 %v11136_v34 }
 0xd3e   :  { %5410 = vmatpush1.msra.mxu0 %v10760_v56  ;;  %7222 = vmatpush3.msra.mxu1 %v10642_v10 }
 0xd3f   :  { %5411 = vmatprep.subr.mxu0 %v10764_v44  ;;  %7223 = vmatprep.subr.mxu1 %v11136_v34 }
 0xd40   :  { %5412 = vmatpush1.msra.mxu0 %v10768_v41  ;;  %5445 = vmatprep.mubr.f32.mxu0 %v11136_v34 }
 0xd41   :  { %7224 = vmatpush3.msra.mxu1 %v10649_v9  ;;  %7225 = vmatprep.mubr.msk.f32.mxu1 %vm7671_vm1, %v11136_v34 }
 0xd42   :  { %5546 = vmatprep.subr.mxu0 %v10521_v30  ;;  %7228 = vmatprep.subr.mxu1 %v11136_v34 }
 0xde1   :  { %v5282_v62 = vpop.f32.mrf.mxu0  ;;  %v5353_v19 = vpop.f32.mrf.mxu1 }
 0xde2   :  { %v5357_v49 = vadd.f32 %v5282_v62, %v4192_v45  ;;  %v5371_v56 = vadd.f32 %v10367_v35, %v5353_v19  ;;  %v4300_v45 = vadd.f32 %v11530_v29, %v10286_v8  ;;  %v11531_v29 = vld [vmem:[#allocation60_spill] sm:$0xff]  ;;  %v11555_v19 = vld [vmem:[#allocation33_spill] sm:$0xff] }
 0xde3   :  { %v7192_v1 = vpop.f32.mrf.mxu1  ;;  %v5284_v5 = vpop.f32.mrf.mxu0 }
 0xde4   :  { %v5897_v24 = vmul.f32 -1.442695, %v5357_v49  ;;  %v5364_v9 = vadd.f32 %v5284_v5, %v4194_v15  ;;  %v11556_v15 = vld [vmem:[#allocation78_spill] sm:$0xff] }
 0xde6   :  { %7503 = vpow2.f32 %v5897_v24  ;;  %v5898_v41 = vmul.f32 -1.442695, %v5364_v9 }
 0xde8   :  { %7505 = vpow2.f32 %v5898_v41  ;;  %v11554_v41 = vld [vmem:[#allocation34_spill] sm:$0xff] }
 0xdf3   :  { %v7504_v44 = vpop.eup %7503 }
 0xdf4   :  { %v5361_v10 = vadd.f32 1.0, %v7504_v44 }
 0xdf5   :  { %v7506_v30 = vpop.eup %7505 }
 0xdf6   :  { %7507 = vrcp.f32 %v5361_v10  ;;  %v5368_v1 = vadd.f32 1.0, %v7506_v30 }
 0xe03   :  { %v7508_v13 = vpop.eup %7507 }
 0xe04   :  { %v5372_v62 = vmul.f32 %v7508_v13, %v5371_v56  ;;  %v11553_v56 = vld [vmem:[#allocation35_spill] sm:$0xff] }
 0xe06   :  { %v5373_v49 = vadd.f32 %v5372_v62, %v4300_v45 }
 0xe08   :  { %7509 = vtanh.f32 %v5373_v49 }
 0xe09   :  { %7511 = vrcp.f32 %v5368_v1 }
 0xe15   :  { %v7510_v24 = vpop.eup %7509 }
 0xe16   :  { %v5375_v5 = vsub.f32 %v10664_v43, %v7510_v24  ;;  %v7512_v9 = vpop.eup %7511 }
 0xe18   :  { %v5376_v55 = vmul.f32 %v7512_v9, %v5375_v5  ;;  %v11557_v5 = vld [vmem:[#allocation88_spill] sm:$0xff] }
 0xe19   :  { %v4206_v9 = vadd.f32 %v11557_v5, %v10280_v33 }
 0xe1a   :  { %v10785_v44 = vadd.f32 %v7510_v24, %v5376_v55 }
 0xe1c   :  { %5446 = vmatmul.mubr.f32.vlgmr.msra.gmra.mxu0 %v10785_v44  ;;  %7226 = vmatmul.mubr.f32.vlgmr.msra.gmra.mxu1 %v10785_v44 }
 0xe1d   :  { %5547 = vmatpush1.msra.mxu0 %v10537_v53  ;;  %7229 = vmatpush3.msra.mxu1 %v10669_v32  ;;  %v11532_v53 = vld [vmem:[#allocation74_spill] sm:$0xff] }
 0xe1e   :  { %5548 = vmatprep.subr.mxu0 %v10541_v58  ;;  %7230 = vmatprep.subr.mxu1 %v11136_v34  ;;  %v11533_v58 = vld [vmem:[#allocation61_spill] sm:$0xff] }
 0xe1f   :  { %5549 = vmatpush1.msra.mxu0 %v10545_v22  ;;  %7231 = vmatpush3.msra.mxu1 %v10675_v52  ;;  %v11534_v22 = vld [vmem:[#allocation62_spill] sm:$0xff] }
 0xe20   :  { %5550 = vmatprep.subr.mxu0 %v10549_v25  ;;  %7232 = vmatprep.subr.mxu1 %v11136_v34  ;;  %v11535_v25 = vld [vmem:[#allocation86_spill] sm:$0xff] }
 0xe21   :  { %5551 = vmatpush1.msra.mxu0 %v10553_v61  ;;  %7233 = vmatpush3.msra.mxu1 %v10681_v23  ;;  %v11536_v61 = vld [vmem:[#allocation77_spill] sm:$0xff] }
 0xe22   :  { %5552 = vmatprep.subr.mxu0 %v10557_v17  ;;  %7234 = vmatprep.subr.mxu1 %v11136_v34  ;;  %v11537_v17 = vld [vmem:[#allocation82_spill] sm:$0xff]  ;;  %v4204_v30 = vadd.f32 %v11556_v15, %v11536_v61 }
 0xe23   :  { %5553 = vmatpush1.msra.mxu0 %v10561_v38  ;;  %7235 = vmatpush3.msra.mxu1 %v10687_v37  ;;  %v4198_v38 = vadd.f32 %v11537_v17, %v11536_v61  ;;  %v11558_v61 = vld [vmem:[#allocation57_spill] sm:$0xff] }
 0xe24   :  { %5554 = vmatprep.subr.mxu0 %v10565_v20  ;;  %7236 = vmatprep.subr.mxu1 %v11136_v34  ;;  %v4310_v17 = vadd.f32 %v11558_v61, %v10286_v8 }
 0xe25   :  { %5555 = vmatpush1.msra.mxu0 %v10569_v18  ;;  %7237 = vmatpush3.msra.mxu1 %v10693_v31 }
 0xe26   :  { %5556 = vmatprep.subr.mxu0 %v10573_v57  ;;  %7238 = vmatprep.subr.mxu1 %v11136_v34 }
 0xe27   :  { %5557 = vmatpush1.msra.mxu0 %v10577_v54  ;;  %7239 = vmatpush3.msra.mxu1 %v10699_v50 }
 0xe28   :  { %5558 = vmatprep.subr.mxu0 %v10581_v12  ;;  %7240 = vmatprep.subr.mxu1 %v11136_v34 }
 0xe29   :  { %5559 = vmatpush1.msra.mxu0 %v10585_v21  ;;  %7241 = vmatpush3.msra.mxu1 %v10705_v36  ;;  %v11541_v36 = vld [vmem:[#allocation47_spill] sm:$0xff] }
 0xe2a   :  { %5560 = vmatprep.subr.mxu0 %v10589_v48  ;;  %7242 = vmatprep.subr.mxu1 %v11136_v34  ;;  %v11538_v48 = vld [vmem:[#allocation56_spill] sm:$0xff] }
 0xe2b   :  { %5561 = vmatpush1.msra.mxu0 %v10593_v4  ;;  %7243 = vmatpush3.msra.mxu1 %v10711_v47  ;;  %v4200_v4 = vadd.f32 %v11538_v48, %v10280_v33  ;;  %v11542_v47 = vld [vmem:[#allocation46_spill] sm:$0xff]  ;;  %v5903_v48 = vld [vmem:[#allocation12] ss:$0 sm:$0xff] }
 0xe2c   :  { %5562 = vmatprep.subr.mxu0 %v10597_v16  ;;  %7244 = vmatprep.subr.mxu1 %v11136_v34 }
 0xe2d   :  { %5563 = vmatpush1.msra.mxu0 %v10601_v2  ;;  %7245 = vmatpush3.msra.mxu1 %v10717_v59  ;;  %v11543_v59 = vld [vmem:[#allocation45_spill] sm:$0xff] }
 0xe2e   :  { %5564 = vmatprep.subr.mxu0 %v10605_v46  ;;  %7246 = vmatprep.subr.mxu1 %v11136_v34 }
 0xe2f   :  { %5565 = vmatpush1.msra.mxu0 %v10609_v42  ;;  %7247 = vmatpush3.msra.mxu1 %v10723_v7  ;;  %v11544_v7 = vld [vmem:[#allocation44_spill] sm:$0xff] }
 0xe30   :  { %5566 = vmatprep.subr.mxu0 %v10613_v40  ;;  %7248 = vmatprep.subr.mxu1 %v11136_v34 }
 0xe31   :  { %5567 = vmatpush1.msra.mxu0 %v10617_v26  ;;  %7249 = vmatpush3.msra.mxu1 %v10729_v0  ;;  %v11545_v0 = vld [vmem:[#allocation43_spill] sm:$0xff] }
 0xe32   :  { %5568 = vmatprep.subr.mxu0 %v10732_v3  ;;  %7250 = vmatprep.subr.mxu1 %v11136_v34  ;;  %v11546_v3 = vld [vmem:[#allocation42_spill] sm:$0xff] }
 0xe33   :  { %5569 = vmatpush1.msra.mxu0 %v10736_v28  ;;  %7251 = vmatpush3.msra.mxu1 %v10624_v51  ;;  %v11547_v28 = vld [vmem:[#allocation41_spill] sm:$0xff] }
 0xe34   :  { %5570 = vmatprep.subr.mxu0 %v10740_v14  ;;  %7252 = vmatprep.subr.mxu1 %v11136_v34  ;;  %v11548_v14 = vld [vmem:[#allocation40_spill] sm:$0xff] }
 0xe35   :  { %5571 = vmatpush1.msra.mxu0 %v10744_v39  ;;  %7253 = vmatpush3.msra.mxu1 %v10630_v11  ;;  %v11539_v11 = vld [vmem:[#allocation73_spill] sm:$0xff]  ;;  %v11549_v39 = vld [vmem:[#allocation39_spill] sm:$0xff] }
 0xe36   :  { %5572 = vmatprep.subr.mxu0 %v10748_v6  ;;  %7254 = vmatprep.subr.mxu1 %v11136_v34  ;;  %v11550_v6 = vld [vmem:[#allocation38_spill] sm:$0xff] }
 0xe37   :  { %5573 = vmatpush1.msra.mxu0 %v10752_v27  ;;  %7255 = vmatpush3.msra.mxu1 %v10636_v60  ;;  %v4305_v60 = vadd.f32 %v11539_v11, %v10286_v8  ;;  %v11551_v27 = vld [vmem:[#allocation37_spill] sm:$0xff] }
 0xe38   :  { %5574 = vmatprep.subr.mxu0 %v10756_v63  ;;  %7256 = vmatprep.subr.mxu1 %v11136_v34  ;;  %v11552_v63 = vld [vmem:[#allocation36_spill] sm:$0xff] }
 0xe39   :  { %5575 = vmatpush1.msra.mxu0 %v11531_v29  ;;  %7257 = vmatpush3.msra.mxu1 %v11532_v53 }
 0xe3a   :  { %5576 = vmatprep.subr.mxu0 %v11533_v58  ;;  %7258 = vmatprep.subr.mxu1 %v11136_v34  ;;  %v7596_v58 = vld [vmem:[%s10922_s9] ss:$0 sm:$0xff] }
 0xe3b   :  { %5577 = vmatpush1.msra.mxu0 %v11534_v22  ;;  %5610 = vmatprep.mubr.f32.mxu0 %v11136_v34 }
 0xe3c   :  { %7259 = vmatpush3.msra.mxu1 %v11535_v25  ;;  %7260 = vmatprep.mubr.msk.f32.mxu1 %vm7671_vm1, %v11136_v34 }
 0xe3d   :  { %7263 = vmatprep.subr.mxu0 %v11136_v34 }
 0xedc   :  { %v5447_v20 = vpop.f32.mrf.mxu0  ;;  %v5518_v18 = vpop.f32.mrf.mxu1 }
 0xedd   :  { %v5522_v57 = vadd.f32 %v5447_v20, %v4198_v38  ;;  %v5536_v26 = vadd.f32 %v10367_v35, %v5518_v18  ;;  %v11540_v35 = vld [vmem:[#allocation48_spill] sm:$0xff] }
 0xede   :  { %v7227_v54 = vpop.f32.mrf.mxu1  ;;  %v5449_v21 = vpop.f32.mrf.mxu0 }
 0xedf   :  { %v5899_v12 = vmul.f32 -1.442695, %v5522_v57  ;;  %v5529_v16 = vadd.f32 %v5449_v21, %v4200_v4 }
 0xee1   :  { %7513 = vpow2.f32 %v5899_v12  ;;  %v5900_v2 = vmul.f32 -1.442695, %v5529_v16 }
 0xee3   :  { %7515 = vpow2.f32 %v5900_v2 }
 0xeee   :  { %v7514_v46 = vpop.eup %7513 }
 0xeef   :  { %v5526_v42 = vadd.f32 1.0, %v7514_v46 }
 0xef0   :  { %v7516_v40 = vpop.eup %7515 }
 0xef1   :  { %7517 = vrcp.f32 %v5526_v42  ;;  %v5533_v32 = vadd.f32 1.0, %v7516_v40 }
 0xefe   :  { %v7518_v51 = vpop.eup %7517 }
 0xeff   :  { %v5537_v10 = vmul.f32 %v7518_v51, %v5536_v26 }
 0xf01   :  { %v5538_v43 = vadd.f32 %v5537_v10, %v4305_v60 }
 0xf03   :  { %7519 = vtanh.f32 %v5538_v43 }
 0xf04   :  { %7521 = vrcp.f32 %v5533_v32 }
 0xf10   :  { %v7520_v52 = vpop.eup %7519 }
 0xf11   :  { %v5540_v23 = vsub.f32 %v10785_v44, %v7520_v52  ;;  %v7522_v37 = vpop.eup %7521 }
 0xf13   :  { %v5541_v31 = vmul.f32 %v7522_v37, %v5540_v23 }
 0xf15   :  { %v10863_v50 = vadd.f32 %v7520_v52, %v5541_v31 }
 0xf17   :  { %5611 = vmatmul.mubr.f32.vlgmr.msra.gmra.mxu0 %v10863_v50  ;;  %7261 = vmatmul.mubr.f32.vlgmr.msra.gmra.mxu1 %v10863_v50 }
 0xf18   :  { %7264 = vmatpush3.msra.mxu0 %v11540_v35  ;;  %7295 = vmatprep.mubr.msk.f32.mxu0 %vm7671_vm1, %v11136_v34 }
 0xf19   :  { %7265 = vmatprep.subr.mxu0 %v11136_v34 }
 0xf1a   :  { %7266 = vmatpush3.msra.mxu0 %v11541_v36 }
 0xf1b   :  { %7267 = vmatprep.subr.mxu0 %v11136_v34 }
 0xf1c   :  { %7268 = vmatpush3.msra.mxu0 %v11542_v47 }
 0xf1d   :  { %7269 = vmatprep.subr.mxu0 %v11136_v34 }
 0xf1e   :  { %7270 = vmatpush3.msra.mxu0 %v11543_v59 }
 0xf1f   :  { %7271 = vmatprep.subr.mxu0 %v11136_v34 }
 0xf20   :  { %7272 = vmatpush3.msra.mxu0 %v11544_v7 }
 0xf21   :  { %7273 = vmatprep.subr.mxu0 %v11136_v34 }
 0xf22   :  { %7274 = vmatpush3.msra.mxu0 %v11545_v0 }
 0xf23   :  { %7275 = vmatprep.subr.mxu0 %v11136_v34 }
 0xf24   :  { %7276 = vmatpush3.msra.mxu0 %v11546_v3 }
 0xf25   :  { %7277 = vmatprep.subr.mxu0 %v11136_v34 }
 0xf26   :  { %7278 = vmatpush3.msra.mxu0 %v11547_v28 }
 0xf27   :  { %7279 = vmatprep.subr.mxu0 %v11136_v34 }
 0xf28   :  { %7280 = vmatpush3.msra.mxu0 %v11548_v14 }
 0xf29   :  { %7281 = vmatprep.subr.mxu0 %v11136_v34 }
 0xf2a   :  { %7282 = vmatpush3.msra.mxu0 %v11549_v39 }
 0xf2b   :  { %7283 = vmatprep.subr.mxu0 %v11136_v34 }
 0xf2c   :  { %7284 = vmatpush3.msra.mxu0 %v11550_v6 }
 0xf2d   :  { %7285 = vmatprep.subr.mxu0 %v11136_v34 }
 0xf2e   :  { %7286 = vmatpush3.msra.mxu0 %v11551_v27 }
 0xf2f   :  { %7287 = vmatprep.subr.mxu0 %v11136_v34 }
 0xf30   :  { %7288 = vmatpush3.msra.mxu0 %v11552_v63 }
 0xf31   :  { %7289 = vmatprep.subr.mxu0 %v11136_v34 }
 0xf32   :  { %7290 = vmatpush3.msra.mxu0 %v11553_v56 }
 0xf33   :  { %7291 = vmatprep.subr.mxu0 %v11136_v34 }
 0xf34   :  { %7292 = vmatpush3.msra.mxu0 %v11554_v41 }
 0xf35   :  { %7293 = vmatprep.subr.mxu0 %v11136_v34 }
 0xf36   :  { %7294 = vmatpush3.msra.mxu0 %v11555_v19 }
 0xfd7   :  { %v5612_v13 = vpop.f32.mrf.mxu0  ;;  %v5683_v45 = vpop.f32.mrf.mxu1 }
 0xfd8   :  { %v5687_v62 = vadd.f32 %v5612_v13, %v4204_v30  ;;  %v5701_v22 = vadd.f32 %v7596_v58, %v5683_v45 }
 0xfd9   :  { %v7262_v49 = vpop.f32.mrf.mxu1  ;;  %v5614_v24 = vpop.f32.mrf.mxu0 }
 0xfda   :  { %v5901_v1 = vmul.f32 -1.442695, %v5687_v62  ;;  %v5694_v55 = vadd.f32 %v5614_v24, %v4206_v9 }
 0xfdc   :  { %7523 = vpow2.f32 %v5901_v1  ;;  %v5902_v44 = vmul.f32 -1.442695, %v5694_v55 }
 0xfde   :  { %7525 = vpow2.f32 %v5902_v44 }
 0xfe9   :  { %v7524_v29 = vpop.eup %7523 }
 0xfea   :  { %v5691_v53 = vadd.f32 1.0, %v7524_v29 }
 0xfeb   :  { %v7526_v34 = vpop.eup %7525 }
 0xfec   :  { %7527 = vrcp.f32 %v5691_v53  ;;  %v5698_v18 = vadd.f32 1.0, %v7526_v34 }
 0xff9   :  { %v7528_v25 = vpop.eup %7527 }
 0xffa   :  { %v5702_v38 = vmul.f32 %v7528_v25, %v5701_v22 }
 0xffc   :  { %v5703_v20 = vadd.f32 %v5702_v38, %v4310_v17 }
 0xffe   :  { %7529 = vtanh.f32 %v5703_v20 }
 0xfff   :  { %7531 = vrcp.f32 %v5698_v18 }
0x100b   :  { %v7530_v33 = vpop.eup %7529 }
0x100c   :  { %v5705_v57 = vsub.f32 %v10863_v50, %v7530_v33  ;;  %v7532_v54 = vpop.eup %7531 }
0x100e   :  { %v5706_v12 = vmul.f32 %v7532_v54, %v5705_v57 }
0x1010   :  { %v5707_v21 = vadd.f32 %v7530_v33, %v5706_v12 }
0x1012   :  { %7296 = vmatmul.mubr.f32.vlgmr.msra.gmra.mxu0 %v5707_v21 }
0x10d2   :  { %v5797_v4 = vpop.f32.mrf.mxu0 }
0x10d3   :  { %v5798_v16 = vadd.f32 %v5903_v48, %v5797_v4 }
0x10d4   :  { %v7297_v2 = vpop.f32.mrf.mxu0 }
0x10d5   :  { %5802 = vst.msk [vmem:[%s10924_s11] sm:$0xff] %vm5801_vm2, %v5798_v16 }

</bundles_post_ra>
